<compile_context>
chip_gen: v7x
topology: tpu7x:2x2x1
jax: 0.10.0
libtpu: 0.0.40
codegen_flags: <defaults>
</compile_context>

<pallas_src>
import functools

import jax
import jax.numpy as jnp
from jax.experimental import pallas as pl
from jax.experimental.pallas import tpu as pltpu

# Layer widths of the autoencoder (encoder then decoder).
DIMS = (28 * 28, 128, 64, 12, 3, 12, 64, 128, 28 * 28)
# Activation after each Linear: ReLU for hidden layers, nothing after the
# bottleneck Linear(12, 3), Sigmoid after the final Linear.
ACTS = ("relu", "relu", "relu", "none", "relu", "relu", "relu", "sigmoid")
N_LAYERS = len(DIMS) - 1
TOTAL_W = sum(DIMS[l] * DIMS[l + 1] for l in range(N_LAYERS))
TOTAL_B = sum(DIMS[1:])


def autoencoder_kernel(x_ref, *refs):
    """Full forward pass for one batch tile, entirely in VMEM.

    refs = (w1, b1, ..., w8, b8, out_ref).  Weights are bf16 (in, out); biases are
    f32 (1, out).  Matmuls use bf16 operands with f32 accumulation on the MXU.
    The tiny bottleneck matmuls (64->12->3->12->64) stay fused in this grid step
    (MXU-latency, negligible FLOPs) rather than getting extra grid structure.
    """
    out_ref = refs[-1]
    params = refs[:-1]

    h = x_ref[...].astype(jnp.bfloat16)              # (TB, 784)
    for l in range(N_LAYERS):
        w = params[2 * l][...]                       # (in_l, out_l) bf16
        b = params[2 * l + 1][...]                   # (1, out_l) f32, broadcasts over batch
        acc = jnp.dot(h, w, preferred_element_type=jnp.float32) + b
        if ACTS[l] == "relu":
            acc = jnp.maximum(acc, 0.0)
        elif ACTS[l] == "sigmoid":
            # sigmoid(x) = 1 / (1 + exp(-x)); approx reciprocal runs on the EUP slot.
            acc = pl.reciprocal(1.0 + jnp.exp(-acc), approx=True)
        # ACTS[l] == "none": bottleneck output, no nonlinearity
        h = acc.astype(jnp.bfloat16)
    out_ref[...] = h.astype(out_ref.dtype)


def _choose_tb(batch):
    """Largest tile (<=1024) dividing the batch while keeping >= 4 grid steps
    (>= 2 per v7x TensorCore) whenever the batch allows it."""
    candidates = (1024, 512, 256, 128, 64, 32, 16, 8)
    for tb in candidates:
        if batch % tb == 0 and batch // tb >= 4:
            return tb
    for tb in candidates:
        if batch % tb == 0:
            return tb
    return 256  # ragged batch: wrapper pads to a multiple of this


def _vmem_limit_bytes(tb, x_itemsize):
    """Actual footprint + headroom instead of a fixed constant."""
    x_tiles = 2 * tb * DIMS[0] * x_itemsize      # double-buffered input tiles
    out_tiles = 2 * tb * DIMS[-1] * 2            # double-buffered bf16 output tiles
    weights = TOTAL_W * 2 + TOTAL_B * 4          # single-buffered resident params
    live = 2 * tb * DIMS[0] * 4                  # f32 accumulators / live intermediates
    est = x_tiles + out_tiles + weights + live
    return min(2 * est + (8 << 20), 32 << 20)


@functools.partial(jax.jit, static_argnames=("tb",))
def _forward_tiles(x, params, *, tb):
    """x: (Bp, 784) with Bp % tb == 0; params: (w1_bf16, b1_f32, ..., w8_bf16, b8_f32)."""
    bp = x.shape[0]

    # x / out are tiled over the batch; weights & biases are full blocks with a
    # constant index_map, single-buffered so they are DMA'd once and stay resident.
    in_specs = [pl.BlockSpec((tb, DIMS[0]), lambda i: (i, 0))]
    for l in range(N_LAYERS):
        in_specs.append(pl.BlockSpec((DIMS[l], DIMS[l + 1]), lambda i: (0, 0),
                                     pipeline_mode=pl.Buffered(1)))
        in_specs.append(pl.BlockSpec((1, DIMS[l + 1]), lambda i: (0, 0),
                                     pipeline_mode=pl.Buffered(1)))
    out_spec = pl.BlockSpec((tb, DIMS[-1]), lambda i: (i, 0))

    cost = pl.CostEstimate(
        flops=2 * bp * TOTAL_W,
        transcendentals=2 * bp * DIMS[-1],                 # exp + reciprocal per output elem
        bytes_accessed=(bp * DIMS[0] * x.dtype.itemsize    # input
                        + bp * DIMS[-1] * 2                # bf16 output
                        + TOTAL_W * 2 + TOTAL_B * 4),      # resident params
    )

    return pl.pallas_call(
        autoencoder_kernel,
        out_shape=jax.ShapeDtypeStruct((bp, DIMS[-1]), jnp.bfloat16),
        grid=(bp // tb,),
        in_specs=in_specs,
        out_specs=out_spec,
        compiler_params=pltpu.CompilerParams(
            dimension_semantics=("parallel",),
            vmem_limit_bytes=_vmem_limit_bytes(tb, x.dtype.itemsize),
        ),
        cost_estimate=cost,
    )(x, *params)


def autoencoder_forward(x, params, tb=None):
    """Forward pass. x: (B, 784) f32/bf16; params from prepare_params(). Returns bf16."""
    batch = x.shape[0]
    assert x.shape[1] == DIMS[0]
    if tb is None:
        tb = _choose_tb(batch)
    pad = (-batch) % tb
    if pad:  # ragged-batch fallback; avoided whenever tb | B
        x = jnp.pad(x, ((0, pad), (0, 0)))
    out = _forward_tiles(x, params, tb=tb)
    if pad:
        out = out[:batch]
    return out


def init_params(key):
    """PyTorch nn.Linear default init (U[-1/sqrt(in), 1/sqrt(in)]), f32."""
    flat = []
    for l in range(N_LAYERS):
        fan_in, fan_out = DIMS[l], DIMS[l + 1]
        key, kw, kb = jax.random.split(key, 3)
        bound = 1.0 / (fan_in ** 0.5)
        w = jax.random.uniform(kw, (fan_in, fan_out), jnp.float32, -bound, bound)
        b = jax.random.uniform(kb, (fan_out,), jnp.float32, -bound, bound)
        flat += [w, b]
    return flat


def prepare_params(flat_f32):
    """One-time prep OUTSIDE the jit: weights -> bf16, biases -> f32 (1, out)."""
    prepped = []
    for l in range(N_LAYERS):
        prepped.append(flat_f32[2 * l].astype(jnp.bfloat16))
        prepped.append(flat_f32[2 * l + 1].reshape(1, DIMS[l + 1]).astype(jnp.float32))
    return tuple(prepped)


def reference_forward_f32(x, flat_f32):
    h = x
    for l in range(N_LAYERS):
        w, b = flat_f32[2 * l], flat_f32[2 * l + 1]
        h = h @ w + b
        if ACTS[l] == "relu":
            h = jnp.maximum(h, 0.0)
        elif ACTS[l] == "sigmoid":
            h = jax.nn.sigmoid(h)
    return h


def reference_forward_bf16(x, flat_f32):
    """Same bf16-operand / f32-accumulate casting scheme as the kernel."""
    h = x.astype(jnp.bfloat16)
    for l in range(N_LAYERS):
        w = flat_f32[2 * l].astype(jnp.bfloat16)
        b = flat_f32[2 * l + 1]
        h = jnp.dot(h, w, preferred_element_type=jnp.float32) + b
        if ACTS[l] == "relu":
            h = jnp.maximum(h, 0.0)
        elif ACTS[l] == "sigmoid":
            h = jax.nn.sigmoid(h)
        h = h.astype(jnp.bfloat16)
    return h.astype(jnp.float32)


if __name__ == "__main__":
    key = jax.random.PRNGKey(0)
    key, kx = jax.random.split(key)

    B = 1024                      # tb=256 -> 4 grid steps -> 2 per v7x TensorCore
    x = jax.random.uniform(kx, (B, DIMS[0]), jnp.float32)

    flat_f32 = init_params(key)
    kernel_params = prepare_params(flat_f32)   # one-time bf16 cast, outside the jit

    out = autoencoder_forward(x, kernel_params)
    out = jax.block_until_ready(out)
    assert out.shape == (B, DIMS[0])
    assert out.dtype == jnp.bfloat16

    out_f32 = out.astype(jnp.float32)

    # Tight check vs a reference using the same bf16/f32 casting scheme.
    ref_bf16 = reference_forward_bf16(x, flat_f32)
    err_bf16 = float(jnp.max(jnp.abs(out_f32 - ref_bf16)))
    assert err_bf16 < 3e-2, err_bf16

    # Looser sanity check vs the pure-f32 reference (bf16 rounding tolerance).
    ref_f32 = reference_forward_f32(x, flat_f32)
    err_f32 = float(jnp.max(jnp.abs(out_f32 - ref_f32)))
    assert err_f32 < 1e-1, err_f32

    print("KERNEL_OK")
</pallas_src>

<mosaic_0001>
module attributes {stable_mosaic.version = 11 : i64} {
  func.func @autoencoder_kernel(%arg0: i32, %arg1: memref<256x784xf32, #tpu.memory_space<vmem>>, %arg2: memref<784x128xbf16, #tpu.memory_space<vmem>>, %arg3: memref<1x128xf32, #tpu.memory_space<vmem>>, %arg4: memref<128x64xbf16, #tpu.memory_space<vmem>>, %arg5: memref<1x64xf32, #tpu.memory_space<vmem>>, %arg6: memref<64x12xbf16, #tpu.memory_space<vmem>>, %arg7: memref<1x12xf32, #tpu.memory_space<vmem>>, %arg8: memref<12x3xbf16, #tpu.memory_space<vmem>>, %arg9: memref<1x3xf32, #tpu.memory_space<vmem>>, %arg10: memref<3x12xbf16, #tpu.memory_space<vmem>>, %arg11: memref<1x12xf32, #tpu.memory_space<vmem>>, %arg12: memref<12x64xbf16, #tpu.memory_space<vmem>>, %arg13: memref<1x64xf32, #tpu.memory_space<vmem>>, %arg14: memref<64x128xbf16, #tpu.memory_space<vmem>>, %arg15: memref<1x128xf32, #tpu.memory_space<vmem>>, %arg16: memref<128x784xbf16, #tpu.memory_space<vmem>>, %arg17: memref<1x784xf32, #tpu.memory_space<vmem>>, %arg18: memref<256x784xbf16, #tpu.memory_space<vmem>>) attributes {dimension_semantics = [#tpu.dimension_semantics<parallel>], iteration_bounds = array<i64: 4>, scalar_prefetch = 0 : i64, scratch_operands = 0 : i64, tpu.core_type = #tpu.core_type<tc>, window_params = [{transform_indices = @transform_0, window_bounds = array<i64: 256, 784>}, {pipeline_mode = #tpu.pipeline_mode<synchronous>, transform_indices = @transform_1, window_bounds = array<i64: 784, 128>}, {pipeline_mode = #tpu.pipeline_mode<synchronous>, transform_indices = @transform_2, window_bounds = array<i64: 1, 128>}, {pipeline_mode = #tpu.pipeline_mode<synchronous>, transform_indices = @transform_3, window_bounds = array<i64: 128, 64>}, {pipeline_mode = #tpu.pipeline_mode<synchronous>, transform_indices = @transform_4, window_bounds = array<i64: 1, 64>}, {pipeline_mode = #tpu.pipeline_mode<synchronous>, transform_indices = @transform_5, window_bounds = array<i64: 64, 12>}, {pipeline_mode = #tpu.pipeline_mode<synchronous>, transform_indices = @transform_6, window_bounds = array<i64: 1, 12>}, {pipeline_mode = #tpu.pipeline_mode<synchronous>, transform_indices = @transform_7, window_bounds = array<i64: 12, 3>}, {pipeline_mode = #tpu.pipeline_mode<synchronous>, transform_indices = @transform_8, window_bounds = array<i64: 1, 3>}, {pipeline_mode = #tpu.pipeline_mode<synchronous>, transform_indices = @transform_9, window_bounds = array<i64: 3, 12>}, {pipeline_mode = #tpu.pipeline_mode<synchronous>, transform_indices = @transform_10, window_bounds = array<i64: 1, 12>}, {pipeline_mode = #tpu.pipeline_mode<synchronous>, transform_indices = @transform_11, window_bounds = array<i64: 12, 64>}, {pipeline_mode = #tpu.pipeline_mode<synchronous>, transform_indices = @transform_12, window_bounds = array<i64: 1, 64>}, {pipeline_mode = #tpu.pipeline_mode<synchronous>, transform_indices = @transform_13, window_bounds = array<i64: 64, 128>}, {pipeline_mode = #tpu.pipeline_mode<synchronous>, transform_indices = @transform_14, window_bounds = array<i64: 1, 128>}, {pipeline_mode = #tpu.pipeline_mode<synchronous>, transform_indices = @transform_15, window_bounds = array<i64: 128, 784>}, {pipeline_mode = #tpu.pipeline_mode<synchronous>, transform_indices = @transform_16, window_bounds = array<i64: 1, 784>}, {transform_indices = @transform_17, window_bounds = array<i64: 256, 784>}]} {
    %c0 = arith.constant 0 : index
    %c0_0 = arith.constant 0 : index
    %0 = vector.load %arg1[%c0, %c0_0] : memref<256x784xf32, #tpu.memory_space<vmem>>, vector<256x784xf32>
    %1 = arith.truncf %0 : vector<256x784xf32> to vector<256x784xbf16>
    %c0_1 = arith.constant 0 : index
    %c0_2 = arith.constant 0 : index
    %2 = vector.load %arg2[%c0_1, %c0_2] : memref<784x128xbf16, #tpu.memory_space<vmem>>, vector<784x128xbf16>
    %c0_3 = arith.constant 0 : index
    %c0_4 = arith.constant 0 : index
    %3 = vector.load %arg3[%c0_3, %c0_4] : memref<1x128xf32, #tpu.memory_space<vmem>>, vector<1x128xf32>
    %cst = arith.constant dense<0.000000e+00> : vector<256x128xf32>
    %4 = tpu.matmul %1, %2, %cst {dimension_numbers = #tpu.dot_dimension_numbers<[1], [0], [0], [1], [0, 0, 1, 1], [], []>} : vector<256x784xbf16>, vector<784x128xbf16>, vector<256x128xf32> -> vector<256x128xf32>
    %5 = vector.broadcast %3 : vector<1x128xf32> to vector<256x128xf32>
    %6 = arith.addf %4, %5 : vector<256x128xf32>
    %cst_5 = arith.constant 0.000000e+00 : f32
    %7 = vector.broadcast %cst_5 : f32 to vector<256x128xf32>
    %8 = arith.maximumf %6, %7 : vector<256x128xf32>
    %9 = arith.truncf %8 : vector<256x128xf32> to vector<256x128xbf16>
    %c0_6 = arith.constant 0 : index
    %c0_7 = arith.constant 0 : index
    %10 = vector.load %arg4[%c0_6, %c0_7] : memref<128x64xbf16, #tpu.memory_space<vmem>>, vector<128x64xbf16>
    %c0_8 = arith.constant 0 : index
    %c0_9 = arith.constant 0 : index
    %11 = vector.load %arg5[%c0_8, %c0_9] : memref<1x64xf32, #tpu.memory_space<vmem>>, vector<1x64xf32>
    %cst_10 = arith.constant dense<0.000000e+00> : vector<256x64xf32>
    %12 = tpu.matmul %9, %10, %cst_10 {dimension_numbers = #tpu.dot_dimension_numbers<[1], [0], [0], [1], [0, 0, 1, 1], [], []>} : vector<256x128xbf16>, vector<128x64xbf16>, vector<256x64xf32> -> vector<256x64xf32>
    %13 = vector.broadcast %11 : vector<1x64xf32> to vector<256x64xf32>
    %14 = arith.addf %12, %13 : vector<256x64xf32>
    %cst_11 = arith.constant 0.000000e+00 : f32
    %15 = vector.broadcast %cst_11 : f32 to vector<256x64xf32>
    %16 = arith.maximumf %14, %15 : vector<256x64xf32>
    %17 = arith.truncf %16 : vector<256x64xf32> to vector<256x64xbf16>
    %c0_12 = arith.constant 0 : index
    %c0_13 = arith.constant 0 : index
    %18 = vector.load %arg6[%c0_12, %c0_13] : memref<64x12xbf16, #tpu.memory_space<vmem>>, vector<64x12xbf16>
    %c0_14 = arith.constant 0 : index
    %c0_15 = arith.constant 0 : index
    %19 = vector.load %arg7[%c0_14, %c0_15] : memref<1x12xf32, #tpu.memory_space<vmem>>, vector<1x12xf32>
    %cst_16 = arith.constant dense<0.000000e+00> : vector<256x12xf32>
    %20 = tpu.matmul %17, %18, %cst_16 {dimension_numbers = #tpu.dot_dimension_numbers<[1], [0], [0], [1], [0, 0, 1, 1], [], []>} : vector<256x64xbf16>, vector<64x12xbf16>, vector<256x12xf32> -> vector<256x12xf32>
    %21 = vector.broadcast %19 : vector<1x12xf32> to vector<256x12xf32>
    %22 = arith.addf %20, %21 : vector<256x12xf32>
    %cst_17 = arith.constant 0.000000e+00 : f32
    %23 = vector.broadcast %cst_17 : f32 to vector<256x12xf32>
    %24 = arith.maximumf %22, %23 : vector<256x12xf32>
    %25 = arith.truncf %24 : vector<256x12xf32> to vector<256x12xbf16>
    %c0_18 = arith.constant 0 : index
    %c0_19 = arith.constant 0 : index
    %26 = vector.load %arg8[%c0_18, %c0_19] : memref<12x3xbf16, #tpu.memory_space<vmem>>, vector<12x3xbf16>
    %c0_20 = arith.constant 0 : index
    %c0_21 = arith.constant 0 : index
    %27 = vector.load %arg9[%c0_20, %c0_21] : memref<1x3xf32, #tpu.memory_space<vmem>>, vector<1x3xf32>
    %cst_22 = arith.constant dense<0.000000e+00> : vector<256x3xf32>
    %28 = tpu.matmul %25, %26, %cst_22 {dimension_numbers = #tpu.dot_dimension_numbers<[1], [0], [0], [1], [0, 0, 1, 1], [], []>} : vector<256x12xbf16>, vector<12x3xbf16>, vector<256x3xf32> -> vector<256x3xf32>
    %29 = vector.broadcast %27 : vector<1x3xf32> to vector<256x3xf32>
    %30 = arith.addf %28, %29 : vector<256x3xf32>
    %31 = arith.truncf %30 : vector<256x3xf32> to vector<256x3xbf16>
    %c0_23 = arith.constant 0 : index
    %c0_24 = arith.constant 0 : index
    %32 = vector.load %arg10[%c0_23, %c0_24] : memref<3x12xbf16, #tpu.memory_space<vmem>>, vector<3x12xbf16>
    %c0_25 = arith.constant 0 : index
    %c0_26 = arith.constant 0 : index
    %33 = vector.load %arg11[%c0_25, %c0_26] : memref<1x12xf32, #tpu.memory_space<vmem>>, vector<1x12xf32>
    %cst_27 = arith.constant dense<0.000000e+00> : vector<256x12xf32>
    %34 = tpu.matmul %31, %32, %cst_27 {dimension_numbers = #tpu.dot_dimension_numbers<[1], [0], [0], [1], [0, 0, 1, 1], [], []>} : vector<256x3xbf16>, vector<3x12xbf16>, vector<256x12xf32> -> vector<256x12xf32>
    %35 = vector.broadcast %33 : vector<1x12xf32> to vector<256x12xf32>
    %36 = arith.addf %34, %35 : vector<256x12xf32>
    %cst_28 = arith.constant 0.000000e+00 : f32
    %37 = vector.broadcast %cst_28 : f32 to vector<256x12xf32>
    %38 = arith.maximumf %36, %37 : vector<256x12xf32>
    %39 = arith.truncf %38 : vector<256x12xf32> to vector<256x12xbf16>
    %c0_29 = arith.constant 0 : index
    %c0_30 = arith.constant 0 : index
    %40 = vector.load %arg12[%c0_29, %c0_30] : memref<12x64xbf16, #tpu.memory_space<vmem>>, vector<12x64xbf16>
    %c0_31 = arith.constant 0 : index
    %c0_32 = arith.constant 0 : index
    %41 = vector.load %arg13[%c0_31, %c0_32] : memref<1x64xf32, #tpu.memory_space<vmem>>, vector<1x64xf32>
    %cst_33 = arith.constant dense<0.000000e+00> : vector<256x64xf32>
    %42 = tpu.matmul %39, %40, %cst_33 {dimension_numbers = #tpu.dot_dimension_numbers<[1], [0], [0], [1], [0, 0, 1, 1], [], []>} : vector<256x12xbf16>, vector<12x64xbf16>, vector<256x64xf32> -> vector<256x64xf32>
    %43 = vector.broadcast %41 : vector<1x64xf32> to vector<256x64xf32>
    %44 = arith.addf %42, %43 : vector<256x64xf32>
    %cst_34 = arith.constant 0.000000e+00 : f32
    %45 = vector.broadcast %cst_34 : f32 to vector<256x64xf32>
    %46 = arith.maximumf %44, %45 : vector<256x64xf32>
    %47 = arith.truncf %46 : vector<256x64xf32> to vector<256x64xbf16>
    %c0_35 = arith.constant 0 : index
    %c0_36 = arith.constant 0 : index
    %48 = vector.load %arg14[%c0_35, %c0_36] : memref<64x128xbf16, #tpu.memory_space<vmem>>, vector<64x128xbf16>
    %c0_37 = arith.constant 0 : index
    %c0_38 = arith.constant 0 : index
    %49 = vector.load %arg15[%c0_37, %c0_38] : memref<1x128xf32, #tpu.memory_space<vmem>>, vector<1x128xf32>
    %cst_39 = arith.constant dense<0.000000e+00> : vector<256x128xf32>
    %50 = tpu.matmul %47, %48, %cst_39 {dimension_numbers = #tpu.dot_dimension_numbers<[1], [0], [0], [1], [0, 0, 1, 1], [], []>} : vector<256x64xbf16>, vector<64x128xbf16>, vector<256x128xf32> -> vector<256x128xf32>
    %51 = vector.broadcast %49 : vector<1x128xf32> to vector<256x128xf32>
    %52 = arith.addf %50, %51 : vector<256x128xf32>
    %cst_40 = arith.constant 0.000000e+00 : f32
    %53 = vector.broadcast %cst_40 : f32 to vector<256x128xf32>
    %54 = arith.maximumf %52, %53 : vector<256x128xf32>
    %55 = arith.truncf %54 : vector<256x128xf32> to vector<256x128xbf16>
    %c0_41 = arith.constant 0 : index
    %c0_42 = arith.constant 0 : index
    %56 = vector.load %arg16[%c0_41, %c0_42] : memref<128x784xbf16, #tpu.memory_space<vmem>>, vector<128x784xbf16>
    %c0_43 = arith.constant 0 : index
    %c0_44 = arith.constant 0 : index
    %57 = vector.load %arg17[%c0_43, %c0_44] : memref<1x784xf32, #tpu.memory_space<vmem>>, vector<1x784xf32>
    %cst_45 = arith.constant dense<0.000000e+00> : vector<256x784xf32>
    %58 = tpu.matmul %55, %56, %cst_45 {dimension_numbers = #tpu.dot_dimension_numbers<[1], [0], [0], [1], [0, 0, 1, 1], [], []>} : vector<256x128xbf16>, vector<128x784xbf16>, vector<256x784xf32> -> vector<256x784xf32>
    %59 = vector.broadcast %57 : vector<1x784xf32> to vector<256x784xf32>
    %60 = arith.addf %58, %59 : vector<256x784xf32>
    %cst_46 = arith.constant 0.000000e+00 : f32
    %61 = vector.broadcast %cst_46 : f32 to vector<256x784xf32>
    %62 = arith.subf %61, %60 : vector<256x784xf32>
    %63 = math.exp %62 : vector<256x784xf32>
    %cst_47 = arith.constant 1.000000e+00 : f32
    %64 = vector.broadcast %cst_47 : f32 to vector<256x784xf32>
    %65 = arith.addf %64, %63 : vector<256x784xf32>
    %66 = tpu.reciprocal %65 {approx = true} : vector<256x784xf32> -> vector<256x784xf32>
    %67 = arith.truncf %66 : vector<256x784xf32> to vector<256x784xbf16>
    %c0_48 = arith.constant 0 : index
    %c0_49 = arith.constant 0 : index
    %68 = vector.load %arg18[%c0_48, %c0_49] : memref<256x784xbf16, #tpu.memory_space<vmem>>, vector<256x784xbf16>
    tpu.vector_store %arg18[%c0_48, %c0_49], %67 {strides = array<i32>} : memref<256x784xbf16, #tpu.memory_space<vmem>>, vector<256x784xbf16>,
    return
  }
  func.func @transform_0(%arg0: i32) -> (i32, i32) {
    %c0_i32 = arith.constant 0 : i32
    %c0_i32_0 = arith.constant 0 : i32
    return %arg0, %c0_i32 : i32, i32
  }
  func.func @transform_1(%arg0: i32) -> (i32, i32) {
    %c0_i32 = arith.constant 0 : i32
    %c0_i32_0 = arith.constant 0 : i32
    %c0_i32_1 = arith.constant 0 : i32
    return %c0_i32, %c0_i32_0 : i32, i32
  }
  func.func @transform_2(%arg0: i32) -> (i32, i32) {
    %c0_i32 = arith.constant 0 : i32
    %c0_i32_0 = arith.constant 0 : i32
    %c0_i32_1 = arith.constant 0 : i32
    return %c0_i32, %c0_i32_0 : i32, i32
  }
  func.func @transform_3(%arg0: i32) -> (i32, i32) {
    %c0_i32 = arith.constant 0 : i32
    %c0_i32_0 = arith.constant 0 : i32
    %c0_i32_1 = arith.constant 0 : i32
    return %c0_i32, %c0_i32_0 : i32, i32
  }
  func.func @transform_4(%arg0: i32) -> (i32, i32) {
    %c0_i32 = arith.constant 0 : i32
    %c0_i32_0 = arith.constant 0 : i32
    %c0_i32_1 = arith.constant 0 : i32
    return %c0_i32, %c0_i32_0 : i32, i32
  }
  func.func @transform_5(%arg0: i32) -> (i32, i32) {
    %c0_i32 = arith.constant 0 : i32
    %c0_i32_0 = arith.constant 0 : i32
    %c0_i32_1 = arith.constant 0 : i32
    return %c0_i32, %c0_i32_0 : i32, i32
  }
  func.func @transform_6(%arg0: i32) -> (i32, i32) {
    %c0_i32 = arith.constant 0 : i32
    %c0_i32_0 = arith.constant 0 : i32
    %c0_i32_1 = arith.constant 0 : i32
    return %c0_i32, %c0_i32_0 : i32, i32
  }
  func.func @transform_7(%arg0: i32) -> (i32, i32) {
    %c0_i32 = arith.constant 0 : i32
    %c0_i32_0 = arith.constant 0 : i32
    %c0_i32_1 = arith.constant 0 : i32
    return %c0_i32, %c0_i32_0 : i32, i32
  }
  func.func @transform_8(%arg0: i32) -> (i32, i32) {
    %c0_i32 = arith.constant 0 : i32
    %c0_i32_0 = arith.constant 0 : i32
    %c0_i32_1 = arith.constant 0 : i32
    return %c0_i32, %c0_i32_0 : i32, i32
  }
  func.func @transform_9(%arg0: i32) -> (i32, i32) {
    %c0_i32 = arith.constant 0 : i32
    %c0_i32_0 = arith.constant 0 : i32
    %c0_i32_1 = arith.constant 0 : i32
    return %c0_i32, %c0_i32_0 : i32, i32
  }
  func.func @transform_10(%arg0: i32) -> (i32, i32) {
    %c0_i32 = arith.constant 0 : i32
    %c0_i32_0 = arith.constant 0 : i32
    %c0_i32_1 = arith.constant 0 : i32
    return %c0_i32, %c0_i32_0 : i32, i32
  }
  func.func @transform_11(%arg0: i32) -> (i32, i32) {
    %c0_i32 = arith.constant 0 : i32
    %c0_i32_0 = arith.constant 0 : i32
    %c0_i32_1 = arith.constant 0 : i32
    return %c0_i32, %c0_i32_0 : i32, i32
  }
  func.func @transform_12(%arg0: i32) -> (i32, i32) {
    %c0_i32 = arith.constant 0 : i32
    %c0_i32_0 = arith.constant 0 : i32
    %c0_i32_1 = arith.constant 0 : i32
    return %c0_i32, %c0_i32_0 : i32, i32
  }
  func.func @transform_13(%arg0: i32) -> (i32, i32) {
    %c0_i32 = arith.constant 0 : i32
    %c0_i32_0 = arith.constant 0 : i32
    %c0_i32_1 = arith.constant 0 : i32
    return %c0_i32, %c0_i32_0 : i32, i32
  }
  func.func @transform_14(%arg0: i32) -> (i32, i32) {
    %c0_i32 = arith.constant 0 : i32
    %c0_i32_0 = arith.constant 0 : i32
    %c0_i32_1 = arith.constant 0 : i32
    return %c0_i32, %c0_i32_0 : i32, i32
  }
  func.func @transform_15(%arg0: i32) -> (i32, i32) {
    %c0_i32 = arith.constant 0 : i32
    %c0_i32_0 = arith.constant 0 : i32
    %c0_i32_1 = arith.constant 0 : i32
    return %c0_i32, %c0_i32_0 : i32, i32
  }
  func.func @transform_16(%arg0: i32) -> (i32, i32) {
    %c0_i32 = arith.constant 0 : i32
    %c0_i32_0 = arith.constant 0 : i32
    %c0_i32_1 = arith.constant 0 : i32
    return %c0_i32, %c0_i32_0 : i32, i32
  }
  func.func @transform_17(%arg0: i32) -> (i32, i32) {
    %c0_i32 = arith.constant 0 : i32
    %c0_i32_0 = arith.constant 0 : i32
    return %arg0, %c0_i32 : i32, i32
  }
}

</mosaic_0001>

<bundles_post_ra>
// kernel: _forward_tiles.1
= control target key start
LH: loop header
LB: loop body
LE: loop exit
PB: predicated region body
PF: predicated region fallthrough
CT: control target
= control target key end

     0   :  { %s9293_s24 = smov 0   ;;  %s11626_s0 = inlined_call_operand.vmem [shape: f32[1024,784], index: 0, kind: input, shape index: {}]   ;;  %s11627_s1 = inlined_call_operand.vmem [shape: bf16[784,128], index: 1, kind: input, shape index: {}]   ;;  %s11628_s2 = inlined_call_operand.vmem [shape: f32[1,128], index: 2, kind: input, shape index: {}]   ;;  %s11629_s3 = inlined_call_operand.vmem [shape: bf16[128,64], index: 3, kind: input, shape index: {}]   ;;  %s11630_s4 = inlined_call_operand.vmem [shape: f32[1,64], index: 4, kind: input, shape index: {}]   ;;  %s11631_s5 = inlined_call_operand.vmem [shape: bf16[64,12], index: 5, kind: input, shape index: {}]   ;;  %s11632_s6 = inlined_call_operand.vmem [shape: f32[1,12], index: 6, kind: input, shape index: {}]   ;;  %s11633_s7 = inlined_call_operand.vmem [shape: bf16[12,3], index: 7, kind: input, shape index: {}]   ;;  %s11634_s8 = inlined_call_operand.vmem [shape: f32[1,3], index: 8, kind: input, shape index: {}]   ;;  %s11635_s9 = inlined_call_operand.vmem [shape: bf16[3,12], index: 9, kind: input, shape index: {}]   ;;  %s11636_s10 = inlined_call_operand.vmem [shape: f32[1,12], index: 10, kind: input, shape index: {}]   ;;  %s11637_s11 = inlined_call_operand.vmem [shape: bf16[12,64], index: 11, kind: input, shape index: {}]   ;;  %s11638_s12 = inlined_call_operand.vmem [shape: f32[1,64], index: 12, kind: input, shape index: {}]   ;;  %s11639_s13 = inlined_call_operand.vmem [shape: bf16[64,128], index: 13, kind: input, shape index: {}]   ;;  %s11640_s14 = inlined_call_operand.vmem [shape: f32[1,128], index: 14, kind: input, shape index: {}]   ;;  %s11641_s15 = inlined_call_operand.vmem [shape: bf16[128,784], index: 15, kind: input, shape index: {}]   ;;  %s11642_s16 = inlined_call_operand.vmem [shape: f32[1,784], index: 16, kind: input, shape index: {}]   ;;  %s11643_s17 = inlined_call_operand.vmem [shape: bf16[1024,784], index: 17, kind: output, shape index: {}]  }
   0x1   :  { %11647 = sst [smem:[#allocation31_spill]] %s11626_s0 }
   0x2   :  { %11648 = sst [smem:[#allocation32_spill]] %s11627_s1 }
   0x3 LB: > { %s6838_s25 = sadd.s32 4294967295, %s9199_s24   ;;  %p6842_p0 = scmp.ge.s32.totalorder %s9199_s24, 1  ;;  %s9199_s24 = sphi %s9293_s24, %s27_s24  }
   0x4   : > { %p489_p1 = scmp.lt.s32.totalorder %s9199_s24, 5 }
   0x6   : > { %p490_p2 = pnand %p6842_p0, %p489_p1 }
   0x8   : > { %493 = sbr.rel (%p490_p2) target bundleno = 2436 (0x984), region = 88 }
   0xf   : > { %s11649_s28 = sld [smem:[#allocation32_spill]]  ;;  %s6843_s30 = sshll.u32 %s6838_s25, 5  ;;  %vm1293_vm0 = vcmask 130048   ;;  %vm2674_vm1 = vcmask 1045504   ;;  %vm2353_vm2 = vcmask 523264   ;;  %vm2912_vm3 = vcmask 1040384  }
  0x10   : > { %p544_p3 = scmp.lt.s32.totalorder %s6843_s30, 127  ;;  %s11650_s27 = sld [smem:[#allocation31_spill]]  ;;  %vm2913_vm4 = vcmask 1041408   ;;  %vm2625_vm5 = vcmask 97280   ;;  %vm2863_vm6 = vcmask 23552   ;;  %vm6654_vm7 = vcmask 125952  }
  0x12   : > { %s11770_s30 = smov (!%p544_p3, %s6843_s30), 127 }
  0x13   : > { %s8137_s29 = smul.u32 56, %s11770_s30 }
  0x14   : > { %s8138_s22 = smul.u32 28, %s11770_s30 }
  0x15   : > { %v8149_v0 = vld [vmem:[%s11649_s28 + $0x40] sm:$0xff]   ;;  %v8153_v4 = vld [vmem:[%s11649_s28 + $0x48] sm:$0xff]   ;;  %v8157_v8 = vld [vmem:[%s11649_s28 + $0x50] sm:$0xff]  }
  0x16   : > { %v8150_v1 = vld [vmem:[%s11649_s28] sm:$0xff]   ;;  %7331 = vmatprep.subr.bf16.mxu0 %v8149_v0  ;;  %v8154_v5 = vld [vmem:[%s11649_s28 + $0x8] sm:$0xff]   ;;  %v8158_v9 = vld [vmem:[%s11649_s28 + $0x10] sm:$0xff]   ;;  %s9396_s0 = scalar_lea.vmem %s11650_s27, %s8137_s29  ;;  %s10622_s26 = scalar_lea.vmem %s11643_s17, %s8138_s22 }
  0x17   : > { %v8151_v2 = vld [vmem:[%s11649_s28 + $0xc0] sm:$0xff]   ;;  %7332 = vmatpush3.bf16.msra.mxu0 %v8150_v1  ;;  %v8155_v6 = vld [vmem:[%s11649_s28 + $0xc8] sm:$0xff]   ;;  %v8159_v10 = vld [vmem:[%s11649_s28 + $0xd0] sm:$0xff]  }
  0x18   : > { %v8152_v3 = vld [vmem:[%s11649_s28 + $0x80] sm:$0xff]   ;;  %7443 = vmatprep.subr.bf16.mxu1 %v8151_v2  ;;  %7333 = vmatprep.subr.bf16.mxu0 %v8153_v4  ;;  %v8156_v7 = vld [vmem:[%s11649_s28 + $0x88] sm:$0xff]   ;;  %v8160_v11 = vld [vmem:[%s11649_s28 + $0x90] sm:$0xff]  }
  0x19   : > { %7444 = vmatpush3.bf16.msra.mxu1 %v8152_v3  ;;  %v8161_v12 = vld [vmem:[%s11649_s28 + $0x58] sm:$0xff]   ;;  %v8165_v16 = vld [vmem:[%s11649_s28 + $0x60] sm:$0xff]   ;;  %v8169_v20 = vld [vmem:[%s11649_s28 + $0x68] sm:$0xff]  }
  0x1a   : > { %7445 = vmatprep.subr.bf16.mxu1 %v8155_v6  ;;  %v8162_v13 = vld [vmem:[%s11649_s28 + $0x18] sm:$0xff]   ;;  %v8166_v17 = vld [vmem:[%s11649_s28 + $0x20] sm:$0xff]   ;;  %v8170_v21 = vld [vmem:[%s11649_s28 + $0x28] sm:$0xff]  }
  0x1b   : > { %7334 = vmatpush3.bf16.msra.mxu0 %v8154_v5  ;;  %v8163_v14 = vld [vmem:[%s11649_s28 + $0xd8] sm:$0xff]   ;;  %v8167_v18 = vld [vmem:[%s11649_s28 + $0xe0] sm:$0xff]   ;;  %v8171_v22 = vld [vmem:[%s11649_s28 + $0xe8] sm:$0xff]  }
  0x1c   : > { %7335 = vmatprep.subr.bf16.mxu0 %v8157_v8  ;;  %v8164_v15 = vld [vmem:[%s11649_s28 + $0x98] sm:$0xff]   ;;  %v8168_v19 = vld [vmem:[%s11649_s28 + $0xa0] sm:$0xff]   ;;  %v8172_v23 = vld [vmem:[%s11649_s28 + $0xa8] sm:$0xff]  }
  0x1d   : > { %7446 = vmatpush3.bf16.msra.mxu1 %v8156_v7  ;;  %v8173_v24 = vld [vmem:[%s11649_s28 + $0x70] sm:$0xff]   ;;  %v8177_v28 = vld [vmem:[%s11649_s28 + $0x78] sm:$0xff]   ;;  %v559_v31 = vld [vmem:[%s9396_s0 + $0x8] sm:$0xff] }
  0x1e   : > { %7447 = vmatprep.subr.bf16.mxu1 %v8159_v10  ;;  %v8174_v25 = vld [vmem:[%s11649_s28 + $0x30] sm:$0xff]   ;;  %v8178_v29 = vld [vmem:[%s11649_s28 + $0x38] sm:$0xff]   ;;  %v566_v32 = vld [vmem:[%s9396_s0 + $0x40] sm:$0xff] }
  0x1f   : > { %7336 = vmatpush3.bf16.msra.mxu0 %v8158_v9  ;;  %v8175_v26 = vld [vmem:[%s11649_s28 + $0xf0] sm:$0xff]   ;;  %v8179_v30 = vld [vmem:[%s11649_s28 + $0xf8] sm:$0xff]   ;;  %v783_v33 = vpack.c.bf16 %v566_v32, %v559_v31  ;;  %v558_v35 = vld [vmem:[%s9396_s0] sm:$0xff] }
  0x20   : > { %7337 = vmatprep.subr.bf16.mxu0 %v8161_v12  ;;  %v8176_v27 = vld [vmem:[%s11649_s28 + $0xb0] sm:$0xff]   ;;  %v8180_v34 = vld [vmem:[%s11649_s28 + $0xb8] sm:$0xff]   ;;  %v8181_v38 = vld [vmem:[%s11649_s28 + $0x140] sm:$0xff]  }
  0x21   : > { %7448 = vmatpush3.bf16.msra.mxu1 %v8160_v11  ;;  %v565_v36 = vld [vmem:[%s9396_s0 + $0x38] sm:$0xff]  ;;  %1374 = vmatprep.mubr.bf16.mxu0 %v783_v33  ;;  %v568_v40 = vld [vmem:[%s9396_s0 + $0x50] sm:$0xff]  ;;  %v8182_v42 = vld [vmem:[%s11649_s28 + $0x100] sm:$0xff]  }
  0x22   : > { %7449 = vmatprep.subr.bf16.mxu1 %v8163_v14  ;;  %v782_v37 = vpack.c.bf16 %v565_v36, %v558_v35  ;;  %v561_v39 = vld [vmem:[%s9396_s0 + $0x18] sm:$0xff]  ;;  %v560_v43 = vld [vmem:[%s9396_s0 + $0x10] sm:$0xff]  ;;  %v567_v44 = vld [vmem:[%s9396_s0 + $0x48] sm:$0xff] }
  0x23   : > { %7338 = vmatpush3.bf16.msra.mxu0 %v8162_v13  ;;  %v785_v41 = vpack.c.bf16 %v568_v40, %v561_v39  ;;  %v573_v45 = vld [vmem:[%s9396_s0 + $0x78] sm:$0xff]  ;;  %v784_v46 = vpack.c.bf16 %v567_v44, %v560_v43  ;;  %v580_v47 = vld [vmem:[%s9396_s0 + $0xb0] sm:$0xff]  ;;  %v579_v49 = vld [vmem:[%s9396_s0 + $0xa8] sm:$0xff] }
  0x24   : > { %7339 = vmatprep.subr.bf16.mxu0 %v8165_v16  ;;  %v572_v48 = vld [vmem:[%s9396_s0 + $0x70] sm:$0xff]  ;;  %v790_v50 = vpack.c.bf16 %v580_v47, %v573_v45  ;;  %v575_v51 = vld [vmem:[%s9396_s0 + $0x88] sm:$0xff]  ;;  %v582_v52 = vld [vmem:[%s9396_s0 + $0xc0] sm:$0xff] }
  0x25   : > { %7450 = vmatpush3.bf16.msra.mxu1 %v8164_v15  ;;  %1535 = vmatprep.mubr.bf16.mxu1 %v785_v41  ;;  %v574_v53 = vld [vmem:[%s9396_s0 + $0x80] sm:$0xff]  ;;  %v792_v54 = vpack.c.bf16 %v582_v52, %v575_v51  ;;  %v581_v55 = vld [vmem:[%s9396_s0 + $0xb8] sm:$0xff]  ;;  %v789_v56 = vpack.c.bf16 %v579_v49, %v572_v48  ;;  %v587_v58 = vld [vmem:[%s9396_s0 + $0xe8] sm:$0xff] }
  0x26   : > { %7451 = vmatprep.subr.bf16.mxu1 %v8167_v18  ;;  %v8183_v57 = vld [vmem:[%s11649_s28 + $0x180] sm:$0xff]   ;;  %v8184_v61 = vld [vmem:[%s11649_s28 + $0x148] sm:$0xff]   ;;  %v589_v62 = vld [vmem:[%s9396_s0 + $0xf8] sm:$0xff]  ;;  %v791_v63 = vpack.c.bf16 %v581_v55, %v574_v53 }
  0x27   : > { %7340 = vmatpush3.bf16.msra.mxu0 %v8166_v17  ;;  %v594_v59 = vld [vmem:[%s9396_s0 + $0x120] sm:$0xff]  ;;  %v596_v0 = vld [vmem:[%s9396_s0 + $0x130] sm:$0xff]  ;;  %v8185_v2 = vld [vmem:[%s11649_s28 + $0x108] sm:$0xff]  }
  0x28   : > { %7341 = vmatprep.subr.bf16.mxu0 %v8169_v20  ;;  %v797_v60 = vpack.c.bf16 %v594_v59, %v587_v58  ;;  %v799_v1 = vpack.c.bf16 %v596_v0, %v589_v62  ;;  %v586_v3 = vld [vmem:[%s9396_s0 + $0xe0] sm:$0xff]  ;;  %v593_v4 = vld [vmem:[%s9396_s0 + $0x118] sm:$0xff]  ;;  %v608_v6 = vld [vmem:[%s9396_s0 + $0x190] sm:$0xff] }
  0x29   : > { %7452 = vmatpush3.bf16.msra.mxu1 %v8168_v19  ;;  %v601_v5 = vld [vmem:[%s9396_s0 + $0x158] sm:$0xff]  ;;  %v588_v7 = vld [vmem:[%s9396_s0 + $0xf0] sm:$0xff]  ;;  %v796_v8 = vpack.c.bf16 %v593_v4, %v586_v3  ;;  %v595_v9 = vld [vmem:[%s9396_s0 + $0x128] sm:$0xff] }
  0x2a   : > { %7453 = vmatprep.subr.bf16.mxu1 %v8171_v22  ;;  %v603_v10 = vld [vmem:[%s9396_s0 + $0x168] sm:$0xff]  ;;  %v610_v11 = vld [vmem:[%s9396_s0 + $0x1a0] sm:$0xff]  ;;  %v804_v12 = vpack.c.bf16 %v608_v6, %v601_v5  ;;  %v8186_v13 = vld [vmem:[%s11649_s28 + $0x150] sm:$0xff]   ;;  %v798_v14 = vpack.c.bf16 %v595_v9, %v588_v7 }
  0x2b   : > { %7342 = vmatpush3.bf16.msra.mxu0 %v8170_v21  ;;  %v8187_v15 = vld [vmem:[%s11649_s28 + $0x110] sm:$0xff]   ;;  %v806_v16 = vpack.c.bf16 %v610_v11, %v603_v10  ;;  %v607_v18 = vld [vmem:[%s9396_s0 + $0x188] sm:$0xff]  ;;  %v622_v20 = vld [vmem:[%s9396_s0 + $0x200] sm:$0xff] }
  0x2c   : > { %7343 = vmatprep.subr.bf16.mxu0 %v8173_v24  ;;  %v600_v17 = vld [vmem:[%s9396_s0 + $0x150] sm:$0xff]  ;;  %v615_v19 = vld [vmem:[%s9396_s0 + $0x1c8] sm:$0xff]  ;;  %v602_v21 = vld [vmem:[%s9396_s0 + $0x160] sm:$0xff] }
  0x2d   : > { %7454 = vmatpush3.bf16.msra.mxu1 %v8172_v23  ;;  %v803_v22 = vpack.c.bf16 %v607_v18, %v600_v17  ;;  %v609_v23 = vld [vmem:[%s9396_s0 + $0x198] sm:$0xff]  ;;  %v811_v24 = vpack.c.bf16 %v622_v20, %v615_v19  ;;  %v614_v31 = vld [vmem:[%s9396_s0 + $0x1c0] sm:$0xff]  ;;  %v616_v35 = vld [vmem:[%s9396_s0 + $0x1d0] sm:$0xff] }
  0x2e   : > { %7455 = vmatprep.subr.bf16.mxu1 %v8175_v26  ;;  %v624_v26 = vld [vmem:[%s9396_s0 + $0x210] sm:$0xff]  ;;  %v621_v32 = vld [vmem:[%s9396_s0 + $0x1f8] sm:$0xff]  ;;  %v623_v36 = vld [vmem:[%s9396_s0 + $0x208] sm:$0xff] }
  0x2f   : > { %7344 = vmatpush3.bf16.msra.mxu0 %v8174_v25  ;;  %v617_v25 = vld [vmem:[%s9396_s0 + $0x1d8] sm:$0xff]  ;;  %v8190_v39 = vld [vmem:[%s11649_s28 + $0x160] sm:$0xff]   ;;  %v812_v43 = vpack.c.bf16 %v623_v36, %v616_v35  ;;  %v628_v45 = vld [vmem:[%s9396_s0 + $0x230] sm:$0xff] }
  0x30   : > { %7345 = vmatprep.subr.bf16.mxu0 %v8177_v28  ;;  %v8189_v28 = vld [vmem:[%s11649_s28 + $0x118] sm:$0xff]   ;;  %v638_v41 = vld [vmem:[%s9396_s0 + $0x280] sm:$0xff]  ;;  %v643_v48 = vld [vmem:[%s9396_s0 + $0x2a8] sm:$0xff] }
  0x31   : > { %7456 = vmatpush3.bf16.msra.mxu1 %v8176_v27  ;;  %v8188_v27 = vld [vmem:[%s11649_s28 + $0x158] sm:$0xff]   ;;  %v630_v47 = vld [vmem:[%s9396_s0 + $0x240] sm:$0xff]  ;;  %v652_v55 = vld [vmem:[%s9396_s0 + $0x2f0] sm:$0xff] }
  0x32   : > { %7457 = vmatprep.subr.bf16.mxu1 %v8179_v30  ;;  %v813_v30 = vpack.c.bf16 %v624_v26, %v617_v25  ;;  %v629_v33 = vld [vmem:[%s9396_s0 + $0x238] sm:$0xff]  ;;  %v650_v49 = vld [vmem:[%s9396_s0 + $0x2e0] sm:$0xff]  ;;  %v664_v62 = vld [vmem:[%s9396_s0 + $0x350] sm:$0xff] }
  0x33   : > { %7346 = vmatpush3.bf16.msra.mxu0 %v8178_v29  ;;  %v805_v29 = vpack.c.bf16 %v609_v23, %v602_v21  ;;  %v637_v52 = vld [vmem:[%s9396_s0 + $0x278] sm:$0xff]  ;;  %v642_v59 = vld [vmem:[%s9396_s0 + $0x2a0] sm:$0xff]  ;;  %v651_v0 = vld [vmem:[%s9396_s0 + $0x2e8] sm:$0xff] }
  0x34   : > { %7555 = vmatprep.subr.bf16.mxu0 %v8181_v38  ;;  %v631_v38 = vld [vmem:[%s9396_s0 + $0x248] sm:$0xff]  ;;  %v645_v53 = vld [vmem:[%s9396_s0 + $0x2b8] sm:$0xff]  ;;  %v8195_v3 = vld [vmem:[%s11649_s28 + $0x130] sm:$0xff]  }
  0x35   : > { %7458 = vmatpush3.bf16.msra.mxu1 %v8180_v34  ;;  %v636_v34 = vld [vmem:[%s9396_s0 + $0x270] sm:$0xff]  ;;  %v820_v44 = vpack.c.bf16 %v638_v41, %v631_v38  ;;  %v827_v58 = vpack.c.bf16 %v652_v55, %v645_v53  ;;  %v659_v5 = vld [vmem:[%s9396_s0 + $0x328] sm:$0xff]  ;;  %v666_v6 = vld [vmem:[%s9396_s0 + $0x360] sm:$0xff] }
  0x36   : > { %1375 = vmatmul.mubr.bf16.vlgmr.msra.gmra.mrb[0].mxu0 %v782_v37  ;;  %7823 = vmatprep.subr.bf16.mxu1 %v8183_v57  ;;  %v810_v37 = vpack.c.bf16 %v621_v32, %v614_v31  ;;  %v818_v40 = vpack.c.bf16 %v636_v34, %v629_v33  ;;  %v834_v9 = vpack.c.bf16 %v666_v6, %v659_v5  ;;  %v663_v10 = vld [vmem:[%s9396_s0 + $0x348] sm:$0xff]  ;;  %v8197_v17 = vld [vmem:[%s11649_s28 + $0x138] sm:$0xff]   ;;  %v680_v20 = vld [vmem:[%s9396_s0 + $0x3d0] sm:$0xff] }
  0x37   : > { %7556 = vmatpush3.bf16.msra.mxu0 %v8182_v42  ;;  %1382 = vmatprep.mubr.bf16.mxu0 %v790_v50  ;;  %v8191_v42 = vld [vmem:[%s11649_s28 + $0x120] sm:$0xff]   ;;  %v8192_v50 = vld [vmem:[%s11649_s28 + $0x168] sm:$0xff]   ;;  %v673_v19 = vld [vmem:[%s9396_s0 + $0x398] sm:$0xff] }
  0x38   : > { %1536 = vmatmul.mubr.bf16.vlgmr.msra.gmra.mrb[0].mxu1 %v784_v46  ;;  %7557 = vmatprep.subr.bf16.mxu0 %v8184_v61  ;;  %v635_v46 = vld [vmem:[%s9396_s0 + $0x268] sm:$0xff]  ;;  %v657_v61 = vld [vmem:[%s9396_s0 + $0x318] sm:$0xff]  ;;  %v670_v23 = vld [vmem:[%s9396_s0 + $0x380] sm:$0xff] }
  0x39   : > { %1543 = vmatprep.mubr.bf16.mxu1 %v792_v54  ;;  %7824 = vmatpush3.bf16.msra.mxu1 %v8183_v57  ;;  %v817_v51 = vpack.c.bf16 %v635_v46, %v628_v45  ;;  %v825_v54 = vpack.c.bf16 %v650_v49, %v643_v48  ;;  %v819_v57 = vpack.c.bf16 %v637_v52, %v630_v47  ;;  %v671_v11 = vld [vmem:[%s9396_s0 + $0x388] sm:$0xff]  ;;  %v685_v25 = vld [vmem:[%s9396_s0 + $0x3f8] sm:$0xff]  ;;  %v692_v26 = vld [vmem:[%s9396_s0 + $0x430] sm:$0xff] }
  0x3a   : > { %v832_v4 = vpack.c.bf16 %v664_v62, %v657_v61  ;;  %v687_v31 = vld [vmem:[%s9396_s0 + $0x408] sm:$0xff]  ;;  %v694_v32 = vld [vmem:[%s9396_s0 + $0x440] sm:$0xff]  ;;  %v684_v35 = vld [vmem:[%s9396_s0 + $0x3f0] sm:$0xff] }
  0x3b   : > { %7558 = vmatpush3.bf16.msra.mxu0 %v8185_v2  ;;  %v848_v34 = vpack.c.bf16 %v694_v32, %v687_v31  ;;  %v691_v36 = vld [vmem:[%s9396_s0 + $0x428] sm:$0xff]  ;;  %v706_v38 = vld [vmem:[%s9396_s0 + $0x4a0] sm:$0xff]  ;;  %v693_v41 = vld [vmem:[%s9396_s0 + $0x438] sm:$0xff] }
  0x3c   : > { %7559 = vmatprep.subr.bf16.mxu0 %v8186_v13  ;;  %v8196_v13 = vld [vmem:[%s11649_s28 + $0x178] sm:$0xff]   ;;  %v698_v47 = vld [vmem:[%s9396_s0 + $0x460] sm:$0xff]  ;;  %v707_v53 = vld [vmem:[%s9396_s0 + $0x4a8] sm:$0xff] }
  0x3d   : > { %v705_v48 = vld [vmem:[%s9396_s0 + $0x498] sm:$0xff]  ;;  %v722_v55 = vld [vmem:[%s9396_s0 + $0x520] sm:$0xff]  ;;  %v727_v62 = vld [vmem:[%s9396_s0 + $0x548] sm:$0xff] }
  0x3e   : > { %1383 = vmatmul.mubr.bf16.gmra.mrb[4].mxu0 %v789_v56  ;;  %v8193_v56 = vld [vmem:[%s11649_s28 + $0x128] sm:$0xff]   ;;  %v713_v49 = vld [vmem:[%s9396_s0 + $0x4d8] sm:$0xff]  ;;  %v852_v52 = vpack.c.bf16 %v705_v48, %v698_v47  ;;  %v714_v61 = vld [vmem:[%s9396_s0 + $0x4e0] sm:$0xff] }
  0x3f   : > { %1390 = vmatprep.mubr.bf16.mxu0 %v797_v60  ;;  %7560 = vmatpush3.bf16.msra.mxu0 %v8187_v15  ;;  %v649_v60 = vld [vmem:[%s9396_s0 + $0x2d8] sm:$0xff]  ;;  %v658_v15 = vld [vmem:[%s9396_s0 + $0x320] sm:$0xff]  ;;  %v563_v47 = vld [vmem:[%s9396_s0 + $0x28] sm:$0xff] }
  0x40   : > { %1544 = vmatmul.mubr.bf16.gmra.mrb[4].mxu1 %v791_v63  ;;  %7561 = vmatprep.subr.bf16.mxu0 %v8188_v27  ;;  %v644_v63 = vld [vmem:[%s9396_s0 + $0x2b0] sm:$0xff]  ;;  %v824_v2 = vpack.c.bf16 %v649_v60, %v642_v59  ;;  %v719_v60 = vld [vmem:[%s9396_s0 + $0x508] sm:$0xff]  ;;  %v726_v6 = vld [vmem:[%s9396_s0 + $0x540] sm:$0xff] }
  0x41   : > { %1551 = vmatprep.mubr.bf16.mxu1 %v799_v1  ;;  %v8194_v1 = vld [vmem:[%s11649_s28 + $0x170] sm:$0xff]   ;;  %v826_v7 = vpack.c.bf16 %v651_v0, %v644_v63  ;;  %v734_v63 = vld [vmem:[%s9396_s0 + $0x580] sm:$0xff]  ;;  %v721_v0 = vld [vmem:[%s9396_s0 + $0x518] sm:$0xff] }
  0x42   : > { %v712_v59 = vld [vmem:[%s9396_s0 + $0x4d0] sm:$0xff]  ;;  %v861_v5 = vpack.c.bf16 %v721_v0, %v714_v61  ;;  %v761_v31 = vld [vmem:[%s9396_s0 + $0x658] sm:$0xff]  ;;  %v570_v48 = vld [vmem:[%s9396_s0 + $0x60] sm:$0xff] }
  0x43   : > { %7562 = vmatpush3.bf16.msra.mxu0 %v8189_v28  ;;  %v672_v28 = vld [vmem:[%s9396_s0 + $0x390] sm:$0xff]  ;;  %v585_v61 = vld [vmem:[%s9396_s0 + $0xd8] sm:$0xff]  ;;  %v599_v0 = vld [vmem:[%s9396_s0 + $0x148] sm:$0xff] }
  0x44   : > { %7563 = vmatprep.subr.bf16.mxu0 %v8190_v39  ;;  %v845_v39 = vpack.c.bf16 %v691_v36, %v684_v35  ;;  %v756_v35 = vld [vmem:[%s9396_s0 + $0x630] sm:$0xff]  ;;  %v763_v36 = vld [vmem:[%s9396_s0 + $0x668] sm:$0xff] }
  0x46   : > { %1391 = vmatmul.mubr.bf16.gmra.mrb[8].mxu0 %v796_v8  ;;  %v656_v8 = vld [vmem:[%s9396_s0 + $0x310] sm:$0xff] }
  0x47   : > { %1398 = vmatprep.mubr.bf16.mxu0 %v804_v12  ;;  %7564 = vmatpush3.bf16.msra.mxu0 %v8191_v42  ;;  %v678_v12 = vld [vmem:[%s9396_s0 + $0x3c0] sm:$0xff] }
  0x48   : > { %1552 = vmatmul.mubr.bf16.gmra.mrb[8].mxu1 %v798_v14  ;;  %7565 = vmatprep.subr.bf16.mxu0 %v8192_v50  ;;  %v831_v14 = vpack.c.bf16 %v663_v10, %v656_v8  ;;  %v839_v18 = vpack.c.bf16 %v678_v12, %v671_v11  ;;  %v720_v50 = vld [vmem:[%s9396_s0 + $0x510] sm:$0xff]  ;;  %v735_v12 = vld [vmem:[%s9396_s0 + $0x588] sm:$0xff] }
  0x49   : > { %1559 = vmatprep.mubr.bf16.mxu1 %v806_v16  ;;  %v665_v16 = vld [vmem:[%s9396_s0 + $0x358] sm:$0xff]  ;;  %v748_v10 = vld [vmem:[%s9396_s0 + $0x5f0] sm:$0xff] }
  0x4a   : > { %v833_v21 = vpack.c.bf16 %v665_v16, %v658_v15  ;;  %v728_v11 = vld [vmem:[%s9396_s0 + $0x550] sm:$0xff]  ;;  %v743_v15 = vld [vmem:[%s9396_s0 + $0x5c8] sm:$0xff]  ;;  %v750_v16 = vld [vmem:[%s9396_s0 + $0x600] sm:$0xff] }
  0x4b   : > { %7566 = vmatpush3.bf16.msra.mxu0 %v8193_v56  ;;  %v860_v56 = vpack.c.bf16 %v720_v50, %v713_v49  ;;  %v787_v50 = vpack.c.bf16 %v570_v48, %v563_v47  ;;  %v704_v47 = vld [vmem:[%s9396_s0 + $0x490] sm:$0xff]  ;;  %v711_v48 = vld [vmem:[%s9396_s0 + $0x4c8] sm:$0xff] }
  0x4c   : > { %7567 = vmatprep.subr.bf16.mxu0 %v8194_v1  ;;  %v859_v1 = vpack.c.bf16 %v719_v60, %v712_v59  ;;  %v578_v60 = vld [vmem:[%s9396_s0 + $0xa0] sm:$0xff] }
  0x4e   : > { %1399 = vmatmul.mubr.bf16.gmra.mrb[12].mxu0 %v803_v22  ;;  %v841_v22 = vpack.c.bf16 %v680_v20, %v673_v19  ;;  %v740_v19 = vld [vmem:[%s9396_s0 + $0x5b0] sm:$0xff]  ;;  %v747_v20 = vld [vmem:[%s9396_s0 + $0x5e8] sm:$0xff] }
  0x4f   : > { %1406 = vmatprep.mubr.bf16.mxu0 %v811_v24  ;;  %7568 = vmatpush3.bf16.msra.mxu0 %v8195_v3  ;;  %v677_v24 = vld [vmem:[%s9396_s0 + $0x3b8] sm:$0xff] }
  0x50   : > { %1560 = vmatmul.mubr.bf16.gmra.mrb[12].mxu1 %v805_v29  ;;  %7569 = vmatprep.subr.bf16.mxu0 %v8196_v13  ;;  %v838_v27 = vpack.c.bf16 %v677_v24, %v670_v23  ;;  %v679_v29 = vld [vmem:[%s9396_s0 + $0x3c8] sm:$0xff]  ;;  %v729_v3 = vld [vmem:[%s9396_s0 + $0x558] sm:$0xff]  ;;  %v762_v24 = vld [vmem:[%s9396_s0 + $0x660] sm:$0xff] }
  0x51   : > { %1567 = vmatprep.mubr.bf16.mxu1 %v813_v30  ;;  %v846_v30 = vpack.c.bf16 %v692_v26, %v685_v25  ;;  %v840_v33 = vpack.c.bf16 %v679_v29, %v672_v28  ;;  %v755_v23 = vld [vmem:[%s9396_s0 + $0x628] sm:$0xff]  ;;  %v873_v25 = vpack.c.bf16 %v747_v20, %v740_v19  ;;  %v764_v28 = vld [vmem:[%s9396_s0 + $0x670] sm:$0xff]  ;;  %v634_v20 = vld [vmem:[%s9396_s0 + $0x260] sm:$0xff] }
  0x52   : > { %v881_v26 = vpack.c.bf16 %v762_v24, %v755_v23  ;;  %v648_v23 = vld [vmem:[%s9396_s0 + $0x2d0] sm:$0xff]  ;;  %v655_v24 = vld [vmem:[%s9396_s0 + $0x308] sm:$0xff] }
  0x53   : > { %7570 = vmatpush3.bf16.msra.mxu0 %v8197_v17  ;;  %v868_v17 = vpack.c.bf16 %v735_v12, %v728_v11  ;;  %v620_v11 = vld [vmem:[%s9396_s0 + $0x1f0] sm:$0xff]  ;;  %v627_v12 = vld [vmem:[%s9396_s0 + $0x228] sm:$0xff] }
  0x56   : > { %1407 = vmatmul.mubr.bf16.gmra.mrb[16].mxu0 %v810_v37  ;;  %v699_v37 = vld [vmem:[%s9396_s0 + $0x468] sm:$0xff] }
  0x57   : > { %1414 = vmatprep.mubr.bf16.mxu0 %v818_v40  ;;  %v686_v40 = vld [vmem:[%s9396_s0 + $0x400] sm:$0xff]  ;;  %v853_v42 = vpack.c.bf16 %v706_v38, %v699_v37 }
  0x58   : > { %1568 = vmatmul.mubr.bf16.gmra.mrb[16].mxu1 %v812_v43  ;;  %v701_v43 = vld [vmem:[%s9396_s0 + $0x478] sm:$0xff]  ;;  %v847_v45 = vpack.c.bf16 %v693_v41, %v686_v40  ;;  %v778_v40 = vld [vmem:[%s9396_s0 + $0x6e0] sm:$0xff]  ;;  %v882_v41 = vpack.c.bf16 %v763_v36, %v756_v35  ;;  %v676_v35 = vld [vmem:[%s9396_s0 + $0x3b0] sm:$0xff] }
  0x59   : > { %1575 = vmatprep.mubr.bf16.mxu1 %v820_v44  ;;  %v708_v44 = vld [vmem:[%s9396_s0 + $0x4b0] sm:$0xff]  ;;  %v683_v36 = vld [vmem:[%s9396_s0 + $0x3e8] sm:$0xff] }
  0x5a   : > { %v855_v46 = vpack.c.bf16 %v708_v44, %v701_v43  ;;  %v768_v43 = vld [vmem:[%s9396_s0 + $0x690] sm:$0xff]  ;;  %v775_v44 = vld [vmem:[%s9396_s0 + $0x6c8] sm:$0xff] }
  0x5b   : > { %v887_v49 = vpack.c.bf16 %v775_v44, %v768_v43  ;;  %v690_v44 = vld [vmem:[%s9396_s0 + $0x420] sm:$0xff] }
  0x5e   : > { %1415 = vmatmul.mubr.bf16.gmra.mrb[20].mxu0 %v817_v51  ;;  %v700_v51 = vld [vmem:[%s9396_s0 + $0x470] sm:$0xff] }
  0x5f   : > { %1422 = vmatprep.mubr.bf16.mxu0 %v825_v54  ;;  %v715_v54 = vld [vmem:[%s9396_s0 + $0x4e8] sm:$0xff] }
  0x60   : > { %1576 = vmatmul.mubr.bf16.gmra.mrb[20].mxu1 %v819_v57  ;;  %v854_v57 = vpack.c.bf16 %v707_v53, %v700_v51  ;;  %v564_v51 = vld [vmem:[%s9396_s0 + $0x30] sm:$0xff] }
  0x61   : > { %1583 = vmatprep.mubr.bf16.mxu1 %v827_v58  ;;  %v862_v58 = vpack.c.bf16 %v722_v55, %v715_v54  ;;  %v562_v55 = vld [vmem:[%s9396_s0 + $0x20] sm:$0xff] }
  0x66   : > { %1423 = vmatmul.mubr.bf16.gmra.mrb[24].mxu0 %v824_v2  ;;  %v867_v2 = vpack.c.bf16 %v734_v63, %v727_v62  ;;  %v592_v63 = vld [vmem:[%s9396_s0 + $0x110] sm:$0xff] }
  0x67   : > { %1430 = vmatprep.mubr.bf16.mxu0 %v832_v4  ;;  %v736_v4 = vld [vmem:[%s9396_s0 + $0x590] sm:$0xff] }
  0x68   : > { %1584 = vmatmul.mubr.bf16.gmra.mrb[24].mxu1 %v826_v7  ;;  %v733_v7 = vld [vmem:[%s9396_s0 + $0x578] sm:$0xff]  ;;  %v869_v8 = vpack.c.bf16 %v736_v4, %v729_v3  ;;  %v576_v3 = vld [vmem:[%s9396_s0 + $0x90] sm:$0xff]  ;;  %v583_v4 = vld [vmem:[%s9396_s0 + $0xc8] sm:$0xff] }
  0x69   : > { %1591 = vmatprep.mubr.bf16.mxu1 %v834_v9  ;;  %v741_v9 = vld [vmem:[%s9396_s0 + $0x5b8] sm:$0xff]  ;;  %v866_v13 = vpack.c.bf16 %v733_v7, %v726_v6  ;;  %v598_v6 = vld [vmem:[%s9396_s0 + $0x140] sm:$0xff]  ;;  %v793_v7 = vpack.c.bf16 %v583_v4, %v576_v3 }
  0x6a   : > { %v8198_v3 = vld [vmem:[%s11629_s3] sm:$0xff]  }
  0x6b   : > { %7857 = vmatprep.subr.bf16.mxu1 %v8198_v3 }
  0x6e   : > { %1431 = vmatmul.mubr.bf16.gmra.mrb[28].mxu0 %v831_v14  ;;  %v874_v14 = vpack.c.bf16 %v748_v10, %v741_v9  ;;  %v613_v9 = vld [vmem:[%s9396_s0 + $0x1b8] sm:$0xff] }
  0x6f   : > { %1438 = vmatprep.mubr.bf16.mxu0 %v839_v18  ;;  %v876_v18 = vpack.c.bf16 %v750_v16, %v743_v15  ;;  %v590_v15 = vld [vmem:[%s9396_s0 + $0x100] sm:$0xff]  ;;  %v597_v16 = vld [vmem:[%s9396_s0 + $0x138] sm:$0xff] }
  0x70   : > { %1592 = vmatmul.mubr.bf16.gmra.mrb[28].mxu1 %v833_v21  ;;  %v742_v21 = vld [vmem:[%s9396_s0 + $0x5c0] sm:$0xff]  ;;  %v800_v19 = vpack.c.bf16 %v597_v16, %v590_v15  ;;  %v8199_v16 = vld [vmem:[%s11629_s3 + $0x8] sm:$0xff]  }
  0x71   : > { %1599 = vmatprep.mubr.bf16.mxu1 %v841_v22  ;;  %v749_v22 = vld [vmem:[%s9396_s0 + $0x5f8] sm:$0xff]  ;;  %v682_v15 = vld [vmem:[%s9396_s0 + $0x3e0] sm:$0xff] }
  0x72   : > { %v875_v29 = vpack.c.bf16 %v749_v22, %v742_v21  ;;  %v641_v21 = vld [vmem:[%s9396_s0 + $0x298] sm:$0xff] }
  0x76   : > { %1439 = vmatmul.mubr.bf16.gmra.mrb[32].mxu0 %v838_v27  ;;  %v757_v27 = vld [vmem:[%s9396_s0 + $0x638] sm:$0xff] }
  0x77   : > { %1446 = vmatprep.mubr.bf16.mxu0 %v846_v30  ;;  %v754_v30 = vld [vmem:[%s9396_s0 + $0x620] sm:$0xff]  ;;  %v883_v32 = vpack.c.bf16 %v764_v28, %v757_v27  ;;  %v604_v27 = vld [vmem:[%s9396_s0 + $0x170] sm:$0xff]  ;;  %v611_v28 = vld [vmem:[%s9396_s0 + $0x1a8] sm:$0xff] }
  0x78   : > { %1600 = vmatmul.mubr.bf16.gmra.mrb[32].mxu1 %v840_v33  ;;  %v769_v33 = vld [vmem:[%s9396_s0 + $0x698] sm:$0xff]  ;;  %v880_v37 = vpack.c.bf16 %v761_v31, %v754_v30  ;;  %v626_v30 = vld [vmem:[%s9396_s0 + $0x220] sm:$0xff]  ;;  %v807_v31 = vpack.c.bf16 %v611_v28, %v604_v27 }
  0x79   : > { %1607 = vmatprep.mubr.bf16.mxu1 %v848_v34  ;;  %v776_v34 = vld [vmem:[%s9396_s0 + $0x6d0] sm:$0xff] }
  0x7a   : > { %v888_v38 = vpack.c.bf16 %v776_v34, %v769_v33  ;;  %v669_v33 = vld [vmem:[%s9396_s0 + $0x378] sm:$0xff] }
  0x7e   : > { %1447 = vmatmul.mubr.bf16.gmra.mrb[36].mxu0 %v845_v39  ;;  %v771_v39 = vld [vmem:[%s9396_s0 + $0x6a8] sm:$0xff] }
  0x7f   : > { %1454 = vmatprep.mubr.bf16.mxu0 %v853_v42  ;;  %v890_v42 = vpack.c.bf16 %v778_v40, %v771_v39  ;;  %v618_v39 = vld [vmem:[%s9396_s0 + $0x1e0] sm:$0xff]  ;;  %v625_v40 = vld [vmem:[%s9396_s0 + $0x218] sm:$0xff] }
  0x80   : > { %1608 = vmatmul.mubr.bf16.gmra.mrb[36].mxu1 %v847_v45  ;;  %v770_v45 = vld [vmem:[%s9396_s0 + $0x6a0] sm:$0xff]  ;;  %v814_v43 = vpack.c.bf16 %v625_v40, %v618_v39  ;;  %v724_v39 = vld [vmem:[%s9396_s0 + $0x530] sm:$0xff] }
  0x81   : > { %1615 = vmatprep.mubr.bf16.mxu1 %v855_v46  ;;  %v777_v46 = vld [vmem:[%s9396_s0 + $0x6d8] sm:$0xff]  ;;  %v8202_v40 = vld [vmem:[%s11629_s3 + $0x20] sm:$0xff]  }
  0x82   : > { %v889_v53 = vpack.c.bf16 %v777_v46, %v770_v45  ;;  %v697_v45 = vld [vmem:[%s9396_s0 + $0x458] sm:$0xff] }
  0x86   : > { %1455 = vmatmul.mubr.bf16.gmra.mrb[40].mxu0 %v852_v52  ;;  %v571_v52 = vld [vmem:[%s9396_s0 + $0x68] sm:$0xff] }
  0x87   : > { %1462 = vmatprep.mubr.bf16.mxu0 %v860_v56  ;;  %v788_v54 = vpack.c.bf16 %v571_v52, %v564_v51  ;;  %v569_v56 = vld [vmem:[%s9396_s0 + $0x58] sm:$0xff]  ;;  %v632_v51 = vld [vmem:[%s9396_s0 + $0x250] sm:$0xff]  ;;  %v639_v52 = vld [vmem:[%s9396_s0 + $0x288] sm:$0xff] }
  0x88   : > { %1616 = vmatmul.mubr.bf16.gmra.mrb[40].mxu1 %v854_v57  ;;  %v577_v57 = vld [vmem:[%s9396_s0 + $0x98] sm:$0xff]  ;;  %v786_v59 = vpack.c.bf16 %v569_v56, %v562_v55  ;;  %v821_v55 = vpack.c.bf16 %v639_v52, %v632_v51  ;;  %v718_v56 = vld [vmem:[%s9396_s0 + $0x500] sm:$0xff] }
  0x89   : > { %1623 = vmatprep.mubr.bf16.mxu1 %v862_v58  ;;  %v584_v58 = vld [vmem:[%s9396_s0 + $0xd0] sm:$0xff] }
  0x8a   : > { %v794_v62 = vpack.c.bf16 %v584_v58, %v577_v57  ;;  %v725_v57 = vld [vmem:[%s9396_s0 + $0x538] sm:$0xff] }
  0x8e   : > { %1463 = vmatmul.mubr.bf16.gmra.mrb[44].mxu0 %v859_v1  ;;  %v795_v1 = vpack.c.bf16 %v585_v61, %v578_v60  ;;  %v739_v60 = vld [vmem:[%s9396_s0 + $0x5a8] sm:$0xff]  ;;  %v865_v61 = vpack.c.bf16 %v725_v57, %v718_v56 }
  0x8f   : > { %1470 = vmatprep.mubr.bf16.mxu0 %v867_v2  ;;  %v802_v2 = vpack.c.bf16 %v599_v0, %v592_v63  ;;  %v646_v63 = vld [vmem:[%s9396_s0 + $0x2c0] sm:$0xff]  ;;  %v653_v0 = vld [vmem:[%s9396_s0 + $0x2f8] sm:$0xff] }
  0x90   : > { %1624 = vmatmul.mubr.bf16.gmra.mrb[44].mxu1 %v861_v5  ;;  %v591_v5 = vld [vmem:[%s9396_s0 + $0x108] sm:$0xff]  ;;  %v828_v4 = vpack.c.bf16 %v653_v0, %v646_v63  ;;  %v730_v0 = vld [vmem:[%s9396_s0 + $0x560] sm:$0xff] }
  0x91   : > { %1631 = vmatprep.mubr.bf16.mxu1 %v869_v8  ;;  %v606_v8 = vld [vmem:[%s9396_s0 + $0x180] sm:$0xff]  ;;  %v801_v10 = vpack.c.bf16 %v598_v6, %v591_v5  ;;  %v753_v6 = vld [vmem:[%s9396_s0 + $0x618] sm:$0xff] }
  0x92   : > { %v746_v5 = vld [vmem:[%s9396_s0 + $0x5e0] sm:$0xff] }
  0x96   : > { %1471 = vmatmul.mubr.bf16.gmra.mrb[48].mxu0 %v866_v13  ;;  %v809_v13 = vpack.c.bf16 %v613_v9, %v606_v8  ;;  %v760_v8 = vld [vmem:[%s9396_s0 + $0x650] sm:$0xff]  ;;  %v767_v9 = vld [vmem:[%s9396_s0 + $0x688] sm:$0xff] }
  0x97   : > { %1478 = vmatprep.mubr.bf16.mxu0 %v874_v14  ;;  %v816_v14 = vpack.c.bf16 %v627_v12, %v620_v11  ;;  %v886_v11 = vpack.c.bf16 %v767_v9, %v760_v8  ;;  %v660_v12 = vld [vmem:[%s9396_s0 + $0x330] sm:$0xff] }
  0x98   : > { %1632 = vmatmul.mubr.bf16.gmra.mrb[48].mxu1 %v868_v17  ;;  %v605_v17 = vld [vmem:[%s9396_s0 + $0x178] sm:$0xff] }
  0x99   : > { %1639 = vmatprep.mubr.bf16.mxu1 %v876_v18  ;;  %v612_v18 = vld [vmem:[%s9396_s0 + $0x1b0] sm:$0xff] }
  0x9a   : > { %v808_v22 = vpack.c.bf16 %v612_v18, %v605_v17  ;;  %v774_v18 = vld [vmem:[%s9396_s0 + $0x6c0] sm:$0xff] }
  0x9e   : > { %1479 = vmatmul.mubr.bf16.gmra.mrb[52].mxu0 %v873_v25  ;;  %v823_v25 = vpack.c.bf16 %v641_v21, %v634_v20 }
  0x9f   : > { %1486 = vmatprep.mubr.bf16.mxu0 %v881_v26  ;;  %v830_v26 = vpack.c.bf16 %v655_v24, %v648_v23  ;;  %v681_v23 = vld [vmem:[%s9396_s0 + $0x3d8] sm:$0xff] }
  0xa0   : > { %1640 = vmatmul.mubr.bf16.gmra.mrb[52].mxu1 %v875_v29  ;;  %v619_v29 = vld [vmem:[%s9396_s0 + $0x1e8] sm:$0xff]  ;;  %v689_v24 = vld [vmem:[%s9396_s0 + $0x418] sm:$0xff] }
  0xa1   : > { %1647 = vmatprep.mubr.bf16.mxu1 %v883_v32  ;;  %v662_v32 = vld [vmem:[%s9396_s0 + $0x340] sm:$0xff]  ;;  %v815_v34 = vpack.c.bf16 %v626_v30, %v619_v29  ;;  %v688_v29 = vld [vmem:[%s9396_s0 + $0x410] sm:$0xff]  ;;  %v695_v30 = vld [vmem:[%s9396_s0 + $0x448] sm:$0xff] }
  0xa6   : > { %1487 = vmatmul.mubr.bf16.gmra.mrb[56].mxu0 %v880_v37  ;;  %v837_v37 = vpack.c.bf16 %v669_v33, %v662_v32  ;;  %v710_v32 = vld [vmem:[%s9396_s0 + $0x4c0] sm:$0xff]  ;;  %v8201_v33 = vld [vmem:[%s11629_s3 + $0x18] sm:$0xff]  }
  0xa7   : > { %1494 = vmatprep.mubr.bf16.mxu0 %v888_v38  ;;  %v844_v38 = vpack.c.bf16 %v683_v36, %v676_v35  ;;  %v702_v36 = vld [vmem:[%s9396_s0 + $0x480] sm:$0xff] }
  0xa8   : > { %1648 = vmatmul.mubr.bf16.gmra.mrb[56].mxu1 %v882_v41  ;;  %v633_v41 = vld [vmem:[%s9396_s0 + $0x258] sm:$0xff] }
  0xa9   : > { %1655 = vmatprep.mubr.bf16.mxu1 %v890_v42  ;;  %v640_v42 = vld [vmem:[%s9396_s0 + $0x290] sm:$0xff] }
  0xaa   : > { %v822_v46 = vpack.c.bf16 %v640_v42, %v633_v41 }
  0xae   : > { %1495 = vmatmul.mubr.bf16.gmra.mrb[60].mxu0 %v887_v49  ;;  %v851_v49 = vpack.c.bf16 %v697_v45, %v690_v44  ;;  %v723_v44 = vld [vmem:[%s9396_s0 + $0x528] sm:$0xff] }
  0xaf   : > { %1696 = vmatprep.mubr.bf16.mxu0 %v787_v50  ;;  %v858_v50 = vpack.c.bf16 %v711_v48, %v704_v47  ;;  %v731_v45 = vld [vmem:[%s9396_s0 + $0x568] sm:$0xff] }
  0xb0   : > { %1656 = vmatmul.mubr.bf16.gmra.mrb[60].mxu1 %v889_v53  ;;  %v647_v53 = vld [vmem:[%s9396_s0 + $0x2c8] sm:$0xff] }
  0xb1   : > { %7825 = vmatprep.mubr.msk.bf16.mxu1 %vm1293_vm0, %v788_v54  ;;  %v654_v54 = vld [vmem:[%s9396_s0 + $0x300] sm:$0xff]  ;;  %v8203_v47 = vld [vmem:[%s11629_s3 + $0x28] sm:$0xff]  }
  0xb2   : > { %v829_v58 = vpack.c.bf16 %v654_v54, %v647_v53 }
  0xb6   : > { %1697 = vmatmul.mubr.bf16.vlgmr.msra.gmra.mrb[64].mxu0 %v786_v59  ;;  %v732_v59 = vld [vmem:[%s9396_s0 + $0x570] sm:$0xff] }
  0xb7   : > { %1704 = vmatprep.mubr.bf16.mxu0 %v794_v62  ;;  %v872_v62 = vpack.c.bf16 %v739_v60, %v732_v59 }
  0xb8   : > { %7826 = vmatmul.mubr.msk.bf16.vlgmr.msra.gmra.mrb[64].mxu1 %vm1293_vm0, %v795_v1  ;;  %v661_v1 = vld [vmem:[%s9396_s0 + $0x338] sm:$0xff] }
  0xb9   : > { %7829 = vmatprep.mubr.msk.bf16.mxu1 %vm1293_vm0, %v802_v2  ;;  %v668_v2 = vld [vmem:[%s9396_s0 + $0x370] sm:$0xff]  ;;  %7858 = vmatpush3.bf16.msra.mxu1 %v8198_v3  ;;  %v745_v3 = vld [vmem:[%s9396_s0 + $0x5d8] sm:$0xff] }
  0xba   : > { %7859 = vmatprep.subr.bf16.mxu1 %v8199_v16 }
  0xbd   : > { %7860 = vmatpush3.bf16.msra.mxu1 %v8199_v16 }
  0xbe   : > { %1705 = vmatmul.mubr.bf16.gmra.mrb[68].mxu0 %v793_v7  ;;  %v836_v7 = vpack.c.bf16 %v668_v2, %v661_v1  ;;  %v737_v1 = vld [vmem:[%s9396_s0 + $0x598] sm:$0xff] }
  0xbf   : > { %1712 = vmatprep.mubr.bf16.mxu0 %v801_v10  ;;  %v879_v10 = vpack.c.bf16 %v753_v6, %v746_v5  ;;  %v870_v9 = vpack.c.bf16 %v737_v1, %v730_v0 }
  0xc0   : > { %7830 = vmatmul.mubr.msk.bf16.gmra.mrb[68].mxu1 %vm1293_vm0, %v809_v13  ;;  %v667_v13 = vld [vmem:[%s9396_s0 + $0x368] sm:$0xff] }
  0xc1   : > { %7833 = vmatprep.mubr.msk.bf16.mxu1 %vm1293_vm0, %v816_v14  ;;  %v675_v14 = vld [vmem:[%s9396_s0 + $0x3a8] sm:$0xff]  ;;  %v835_v17 = vpack.c.bf16 %v667_v13, %v660_v12 }
  0xc2   : > { %v843_v20 = vpack.c.bf16 %v682_v15, %v675_v14 }
  0xc6   : > { %1713 = vmatmul.mubr.bf16.gmra.mrb[72].mxu0 %v800_v19  ;;  %v781_v19 = vld [vmem:[%s9396_s0 + $0x6f8] sm:$0xff] }
  0xc7   : > { %1720 = vmatprep.mubr.bf16.mxu0 %v808_v22  ;;  %v893_v21 = vpack.c.bf16 %v781_v19, %v774_v18  ;;  %v674_v22 = vld [vmem:[%s9396_s0 + $0x3a0] sm:$0xff] }
  0xc8   : > { %7834 = vmatmul.mubr.msk.bf16.gmra.mrb[72].mxu1 %vm1293_vm0, %v823_v25  ;;  %v696_v25 = vld [vmem:[%s9396_s0 + $0x450] sm:$0xff]  ;;  %v842_v27 = vpack.c.bf16 %v681_v23, %v674_v22 }
  0xc9   : > { %7837 = vmatprep.mubr.msk.bf16.mxu1 %vm1293_vm0, %v830_v26  ;;  %v8200_v26 = vld [vmem:[%s11629_s3 + $0x10] sm:$0xff]   ;;  %v850_v28 = vpack.c.bf16 %v696_v25, %v689_v24  ;;  %v751_v24 = vld [vmem:[%s9396_s0 + $0x608] sm:$0xff] }
  0xca   : > { %7861 = vmatprep.subr.bf16.mxu1 %v8200_v26  ;;  %v744_v23 = vld [vmem:[%s9396_s0 + $0x5d0] sm:$0xff] }
  0xcb   : > { %7862 = vmatpush3.bf16.msra.mxu1 %v8200_v26  ;;  %v759_v26 = vld [vmem:[%s9396_s0 + $0x648] sm:$0xff] }
  0xcc   : > { %7863 = vmatprep.subr.bf16.mxu1 %v8201_v33 }
  0xce   : > { %1721 = vmatmul.mubr.bf16.gmra.mrb[76].mxu0 %v807_v31  ;;  %v703_v31 = vld [vmem:[%s9396_s0 + $0x488] sm:$0xff] }
  0xcf   : > { %1728 = vmatprep.mubr.bf16.mxu0 %v815_v34  ;;  %v849_v34 = vpack.c.bf16 %v695_v30, %v688_v29  ;;  %v857_v35 = vpack.c.bf16 %v710_v32, %v703_v31  ;;  %7864 = vmatpush3.bf16.msra.mxu1 %v8201_v33  ;;  %v877_v31 = vpack.c.bf16 %v751_v24, %v744_v23  ;;  %v8205_v33 = vld [vmem:[%s11629_s3 + $0x38] sm:$0xff]  }
  0xd0   : > { %7838 = vmatmul.mubr.msk.bf16.gmra.mrb[76].mxu1 %vm1293_vm0, %v837_v37  ;;  %v709_v37 = vld [vmem:[%s9396_s0 + $0x4b8] sm:$0xff]  ;;  %7865 = vmatprep.subr.bf16.mxu1 %v8202_v40 }
  0xd1   : > { %7841 = vmatprep.mubr.msk.bf16.mxu1 %vm1293_vm0, %v844_v38  ;;  %v717_v38 = vld [vmem:[%s9396_s0 + $0x4f8] sm:$0xff]  ;;  %v856_v41 = vpack.c.bf16 %v709_v37, %v702_v36 }
  0xd2   : > { %v864_v42 = vpack.c.bf16 %v724_v39, %v717_v38 }
  0xd3   : > { %7866 = vmatpush3.bf16.msra.mxu1 %v8202_v40 }
  0xd4   : > { %7867 = vmatprep.subr.bf16.mxu1 %v8203_v47 }
  0xd6   : > { %1729 = vmatmul.mubr.bf16.gmra.mrb[80].mxu0 %v814_v43  ;;  %v716_v43 = vld [vmem:[%s9396_s0 + $0x4f0] sm:$0xff] }
  0xd7   : > { %1736 = vmatprep.mubr.bf16.mxu0 %v822_v46  ;;  %v738_v46 = vld [vmem:[%s9396_s0 + $0x5a0] sm:$0xff]  ;;  %v863_v51 = vpack.c.bf16 %v723_v44, %v716_v43  ;;  %7868 = vmatpush3.bf16.msra.mxu1 %v8203_v47  ;;  %v765_v47 = vld [vmem:[%s9396_s0 + $0x678] sm:$0xff] }
  0xd8   : > { %7842 = vmatmul.mubr.msk.bf16.gmra.mrb[80].mxu1 %vm1293_vm0, %v851_v49  ;;  %v9705_v49 = vld [vmem:[%s11628_s2] ss:$0 sm:$0xff]  ;;  %v871_v54 = vpack.c.bf16 %v738_v46, %v731_v45 }
  0xd9   : > { %7845 = vmatprep.mubr.msk.bf16.mxu1 %vm1293_vm0, %v858_v50  ;;  %v758_v46 = vld [vmem:[%s9396_s0 + $0x640] sm:$0xff] }
  0xde   : > { %1737 = vmatmul.mubr.bf16.gmra.mrb[84].mxu0 %v821_v55 }
  0xdf   : > { %1744 = vmatprep.mubr.bf16.mxu0 %v829_v58 }
  0xe0   : > { %7846 = vmatmul.mubr.msk.bf16.gmra.mrb[84].mxu1 %vm1293_vm0, %v865_v61 }
  0xe1   : > { %7849 = vmatprep.mubr.msk.bf16.mxu1 %vm1293_vm0, %v872_v62 }
  0xe6   : > { %1745 = vmatmul.mubr.bf16.gmra.mrb[88].mxu0 %v828_v4  ;;  %v752_v4 = vld [vmem:[%s9396_s0 + $0x610] sm:$0xff] }
  0xe7   : > { %1752 = vmatprep.mubr.bf16.mxu0 %v836_v7  ;;  %v8204_v7 = vld [vmem:[%s11629_s3 + $0x30] sm:$0xff]   ;;  %v878_v13 = vpack.c.bf16 %v752_v4, %v745_v3 }
  0xe8   : > { %7850 = vmatmul.mubr.msk.bf16.gmra.mrb[88].mxu1 %vm1293_vm0, %v879_v10  ;;  %7869 = vmatprep.subr.bf16.mxu1 %v8204_v7 }
  0xe9   : > { %7853 = vmatprep.mubr.msk.bf16.mxu1 %vm1293_vm0, %v886_v11  ;;  %7870 = vmatpush3.bf16.msra.mxu1 %v8204_v7  ;;  %v779_v7 = vld [vmem:[%s9396_s0 + $0x6e8] sm:$0xff] }
  0xea   : > { %7871 = vmatprep.subr.bf16.mxu1 %v8205_v33 }
  0xed   : > { %7872 = vmatpush3.bf16.msra.mxu1 %v8205_v33 }
  0xee   : > { %1753 = vmatmul.mubr.bf16.gmra.mrb[92].mxu0 %v835_v17 }
  0xef   : > { %1760 = vmatprep.mubr.bf16.mxu0 %v843_v20 }
  0xf0   : > { %7854 = vmatmul.mubr.msk.bf16.gmra.mrb[92].mxu1 %vm1293_vm0, %v893_v21 }
  0xf6   : > { %1761 = vmatmul.mubr.bf16.gmra.mrb[96].mxu0 %v842_v27  ;;  %v766_v27 = vld [vmem:[%s9396_s0 + $0x680] sm:$0xff] }
  0xf7   : > { %1768 = vmatprep.mubr.bf16.mxu0 %v850_v28  ;;  %v885_v36 = vpack.c.bf16 %v766_v27, %v759_v26 }
  0xfe   : > { %1769 = vmatmul.mubr.bf16.gmra.mrb[100].mxu0 %v849_v34 }
  0xff   : > { %1776 = vmatprep.mubr.bf16.mxu0 %v857_v35 }
 0x106   : > { %1777 = vmatmul.mubr.bf16.gmra.mrb[104].mxu0 %v856_v41 }
 0x107   : > { %1784 = vmatprep.mubr.bf16.mxu0 %v864_v42 }
 0x109   : > { %v7347_v48 = vpop.f32.mrb[0].mxu0 }
 0x10a   : > { %v7348_v50 = vpop.f32.mrb[1].mxu0 }
 0x10b   : > { %v7349_v52 = vadd.f32 %v7348_v50, %v7347_v48  ;;  %v7350_v53 = vpop.f32.mrb[2].mxu0  ;;  %v7459_v55 = vpop.f32.mrb[0].mxu1  ;;  %v773_v50 = vld [vmem:[%s9396_s0 + $0x6b8] sm:$0xff] }
 0x10c   : > { %v7351_v56 = vpop.f32.mrb[3].mxu0  ;;  %v7460_v59 = vpop.f32.mrb[1].mxu1 }
 0x10d   : > { %v1377_v57 = vadd.f32 %v7349_v52, %v9705_v49  ;;  %v7352_v58 = vadd.f32 %v7351_v56, %v7350_v53  ;;  %v7461_v60 = vadd.f32 %v7460_v59, %v7459_v55  ;;  %v7462_v61 = vpop.f32.mrb[2].mxu1  ;;  %v884_v55 = vpack.c.bf16 %v765_v47, %v758_v46 }
 0x10e   : > { %1785 = vmatmul.mubr.bf16.gmra.mrb[108].mxu0 %v863_v51  ;;  %v7463_v63 = vpop.f32.mrb[3].mxu1  ;;  %v780_v51 = vld [vmem:[%s9396_s0 + $0x6f0] sm:$0xff] }
 0x10f   : > { %v1380_v62 = vadd.f32 %v7352_v58, %v9705_v49  ;;  %1792 = vmatprep.mubr.bf16.mxu0 %v871_v54  ;;  %v7464_v2 = vadd.f32 %v7463_v63, %v7462_v61  ;;  %v9713_v5 = vadd.f32 %v7461_v60, %v1377_v57  ;;  %v892_v59 = vpack.c.bf16 %v780_v51, %v773_v50 }
 0x111   : > { %v7353_v6 = vpop.f32.mrb[4].mxu0  ;;  %v9718_v10 = vadd.f32 %v7464_v2, %v1380_v62 }
 0x112   : > { %v7354_v8 = vpop.f32.mrb[5].mxu0 }
 0x113   : > { %v7355_v11 = vadd.f32 %v7354_v8, %v7353_v6  ;;  %v7356_v12 = vpop.f32.mrb[6].mxu0  ;;  %v7465_v14 = vpop.f32.mrb[4].mxu1  ;;  %v772_v6 = vld [vmem:[%s9396_s0 + $0x6b0] sm:$0xff] }
 0x114   : > { %v7357_v15 = vpop.f32.mrb[7].mxu0  ;;  %v7466_v18 = vpop.f32.mrb[5].mxu1 }
 0x115   : > { %v1385_v16 = vadd.f32 %v7355_v11, %v9705_v49  ;;  %v7358_v17 = vadd.f32 %v7357_v15, %v7356_v12  ;;  %v7467_v19 = vadd.f32 %v7466_v18, %v7465_v14  ;;  %v7468_v20 = vpop.f32.mrb[6].mxu1 }
 0x116   : > { %1793 = vmatmul.mubr.bf16.gmra.mrb[112].mxu0 %v870_v9  ;;  %v7469_v22 = vpop.f32.mrb[7].mxu1 }
 0x117   : > { %v1388_v21 = vadd.f32 %v7358_v17, %v9705_v49  ;;  %1800 = vmatprep.mubr.bf16.mxu0 %v878_v13  ;;  %v7470_v25 = vadd.f32 %v7469_v22, %v7468_v20  ;;  %v9726_v28 = vadd.f32 %v7467_v19, %v1385_v16  ;;  %v891_v13 = vpack.c.bf16 %v779_v7, %v772_v6 }
 0x119   : > { %v7359_v29 = vpop.f32.mrb[8].mxu0  ;;  %v9728_v32 = vadd.f32 %v7470_v25, %v1388_v21 }
 0x11a   : > { %v7360_v30 = vpop.f32.mrb[9].mxu0 }
 0x11b   : > { %v7361_v34 = vadd.f32 %v7360_v30, %v7359_v29  ;;  %v7362_v35 = vpop.f32.mrb[10].mxu0  ;;  %v7471_v37 = vpop.f32.mrb[8].mxu1 }
 0x11c   : > { %v7363_v38 = vpop.f32.mrb[11].mxu0  ;;  %v7472_v41 = vpop.f32.mrb[9].mxu1 }
 0x11d   : > { %v1393_v39 = vadd.f32 %v7361_v34, %v9705_v49  ;;  %v7364_v40 = vadd.f32 %v7363_v38, %v7362_v35  ;;  %v7473_v42 = vadd.f32 %v7472_v41, %v7471_v37  ;;  %v7474_v43 = vpop.f32.mrb[10].mxu1 }
 0x11e   : > { %1801 = vmatmul.mubr.bf16.gmra.mrb[116].mxu0 %v877_v31  ;;  %v7475_v45 = vpop.f32.mrb[11].mxu1 }
 0x11f   : > { %v1396_v44 = vadd.f32 %v7364_v40, %v9705_v49  ;;  %1808 = vmatprep.mubr.bf16.mxu0 %v885_v36  ;;  %v7476_v48 = vadd.f32 %v7475_v45, %v7474_v43  ;;  %v9739_v52 = vadd.f32 %v7473_v42, %v1393_v39 }
 0x121   : > { %v7365_v53 = vpop.f32.mrb[12].mxu0  ;;  %v9741_v56 = vadd.f32 %v7476_v48, %v1396_v44 }
 0x122   : > { %v7366_v54 = vpop.f32.mrb[13].mxu0 }
 0x123   : > { %v7367_v57 = vadd.f32 %v7366_v54, %v7365_v53  ;;  %v7368_v58 = vpop.f32.mrb[14].mxu0  ;;  %v7477_v60 = vpop.f32.mrb[12].mxu1 }
 0x124   : > { %v7369_v61 = vpop.f32.mrb[15].mxu0  ;;  %v7478_v0 = vpop.f32.mrb[13].mxu1 }
 0x125   : > { %v1401_v62 = vadd.f32 %v7367_v57, %v9705_v49  ;;  %v7370_v63 = vadd.f32 %v7369_v61, %v7368_v58  ;;  %v7479_v1 = vadd.f32 %v7478_v0, %v7477_v60  ;;  %v7480_v2 = vpop.f32.mrb[14].mxu1 }
 0x126   : > { %1809 = vmatmul.mubr.bf16.gmra.mrb[120].mxu0 %v884_v55  ;;  %v7481_v4 = vpop.f32.mrb[15].mxu1 }
 0x127   : > { %v1404_v3 = vadd.f32 %v7370_v63, %v9705_v49  ;;  %1816 = vmatprep.mubr.bf16.mxu0 %v892_v59  ;;  %v7482_v8 = vadd.f32 %v7481_v4, %v7480_v2  ;;  %v9747_v9 = vadd.f32 %v7479_v1, %v1401_v62 }
 0x129   : > { %v7371_v11 = vpop.f32.mrb[16].mxu0  ;;  %v9749_v14 = vadd.f32 %v7482_v8, %v1404_v3 }
 0x12a   : > { %v7372_v12 = vpop.f32.mrb[17].mxu0 }
 0x12b   : > { %v7373_v15 = vadd.f32 %v7372_v12, %v7371_v11  ;;  %v7374_v16 = vpop.f32.mrb[18].mxu0  ;;  %v7483_v17 = vpop.f32.mrb[16].mxu1 }
 0x12c   : > { %v7375_v18 = vpop.f32.mrb[19].mxu0  ;;  %v7484_v21 = vpop.f32.mrb[17].mxu1 }
 0x12d   : > { %v1409_v19 = vadd.f32 %v7373_v15, %v9705_v49  ;;  %v7376_v20 = vadd.f32 %v7375_v18, %v7374_v16  ;;  %v7485_v22 = vadd.f32 %v7484_v21, %v7483_v17  ;;  %v7486_v23 = vpop.f32.mrb[18].mxu1 }
 0x12e   : > { %1817 = vmatmul.mubr.bf16.gmra.mrb[124].mxu0 %v891_v13  ;;  %v7487_v25 = vpop.f32.mrb[19].mxu1 }
 0x12f   : > { %v1412_v24 = vadd.f32 %v7376_v20, %v9705_v49  ;;  %v7488_v26 = vadd.f32 %v7487_v25, %v7486_v23  ;;  %v9753_v27 = vadd.f32 %v7485_v22, %v1409_v19 }
 0x131   : > { %v7377_v29 = vpop.f32.mrb[20].mxu0  ;;  %v9755_v31 = vadd.f32 %v7488_v26, %v1412_v24 }
 0x132   : > { %v7378_v30 = vpop.f32.mrb[21].mxu0 }
 0x133   : > { %v7379_v33 = vadd.f32 %v7378_v30, %v7377_v29  ;;  %v7380_v34 = vpop.f32.mrb[22].mxu0  ;;  %v7489_v35 = vpop.f32.mrb[20].mxu1 }
 0x134   : > { %v7381_v36 = vpop.f32.mrb[23].mxu0  ;;  %v7490_v39 = vpop.f32.mrb[21].mxu1 }
 0x135   : > { %v1417_v37 = vadd.f32 %v7379_v33, %v9705_v49  ;;  %v7382_v38 = vadd.f32 %v7381_v36, %v7380_v34  ;;  %v7491_v40 = vadd.f32 %v7490_v39, %v7489_v35  ;;  %v7492_v41 = vpop.f32.mrb[22].mxu1 }
 0x136   : > { %v7493_v43 = vpop.f32.mrb[23].mxu1 }
 0x137   : > { %v1420_v42 = vadd.f32 %v7382_v38, %v9705_v49  ;;  %v7494_v44 = vadd.f32 %v7493_v43, %v7492_v41  ;;  %v9759_v45 = vadd.f32 %v7491_v40, %v1417_v37 }
 0x139   : > { %v7383_v46 = vpop.f32.mrb[24].mxu0  ;;  %v9761_v48 = vadd.f32 %v7494_v44, %v1420_v42 }
 0x13a   : > { %v7384_v47 = vpop.f32.mrb[25].mxu0 }
 0x13b   : > { %v7385_v50 = vadd.f32 %v7384_v47, %v7383_v46  ;;  %v7386_v51 = vpop.f32.mrb[26].mxu0  ;;  %v7495_v53 = vpop.f32.mrb[24].mxu1 }
 0x13c   : > { %v7387_v54 = vpop.f32.mrb[27].mxu0  ;;  %v7496_v58 = vpop.f32.mrb[25].mxu1 }
 0x13d   : > { %v1425_v55 = vadd.f32 %v7385_v50, %v9705_v49  ;;  %v7388_v57 = vadd.f32 %v7387_v54, %v7386_v51  ;;  %v7497_v59 = vadd.f32 %v7496_v58, %v7495_v53  ;;  %v7498_v60 = vpop.f32.mrb[26].mxu1 }
 0x13e   : > { %v7499_v62 = vpop.f32.mrb[27].mxu1 }
 0x13f   : > { %v1428_v61 = vadd.f32 %v7388_v57, %v9705_v49  ;;  %v7500_v63 = vadd.f32 %v7499_v62, %v7498_v60  ;;  %v9765_v0 = vadd.f32 %v7497_v59, %v1425_v55 }
 0x141   : > { %v7389_v1 = vpop.f32.mrb[28].mxu0  ;;  %v9767_v3 = vadd.f32 %v7500_v63, %v1428_v61 }
 0x142   : > { %v7390_v2 = vpop.f32.mrb[29].mxu0 }
 0x143   : > { %v7391_v4 = vadd.f32 %v7390_v2, %v7389_v1  ;;  %v7392_v6 = vpop.f32.mrb[30].mxu0  ;;  %v7501_v7 = vpop.f32.mrb[28].mxu1 }
 0x144   : > { %v7393_v8 = vpop.f32.mrb[31].mxu0  ;;  %v7502_v13 = vpop.f32.mrb[29].mxu1 }
 0x145   : > { %v1433_v11 = vadd.f32 %v7391_v4, %v9705_v49  ;;  %v7394_v12 = vadd.f32 %v7393_v8, %v7392_v6  ;;  %v7503_v15 = vadd.f32 %v7502_v13, %v7501_v7  ;;  %v7504_v16 = vpop.f32.mrb[30].mxu1 }
 0x146   : > { %v7505_v18 = vpop.f32.mrb[31].mxu1 }
 0x147   : > { %v1436_v17 = vadd.f32 %v7394_v12, %v9705_v49  ;;  %v7506_v19 = vadd.f32 %v7505_v18, %v7504_v16  ;;  %v9771_v20 = vadd.f32 %v7503_v15, %v1433_v11 }
 0x149   : > { %v7395_v21 = vpop.f32.mrb[32].mxu0  ;;  %v9773_v23 = vadd.f32 %v7506_v19, %v1436_v17 }
 0x14a   : > { %v7396_v22 = vpop.f32.mrb[33].mxu0 }
 0x14b   : > { %v7397_v24 = vadd.f32 %v7396_v22, %v7395_v21  ;;  %v7398_v25 = vpop.f32.mrb[34].mxu0  ;;  %v7507_v26 = vpop.f32.mrb[32].mxu1 }
 0x14c   : > { %v7399_v29 = vpop.f32.mrb[35].mxu0  ;;  %v7508_v34 = vpop.f32.mrb[33].mxu1 }
 0x14d   : > { %v1441_v30 = vadd.f32 %v7397_v24, %v9705_v49  ;;  %v7400_v33 = vadd.f32 %v7399_v29, %v7398_v25  ;;  %v7509_v35 = vadd.f32 %v7508_v34, %v7507_v26  ;;  %v7510_v36 = vpop.f32.mrb[34].mxu1 }
 0x14e   : > { %v7511_v38 = vpop.f32.mrb[35].mxu1 }
 0x14f   : > { %v1444_v37 = vadd.f32 %v7400_v33, %v9705_v49  ;;  %v7512_v39 = vadd.f32 %v7511_v38, %v7510_v36  ;;  %v9777_v40 = vadd.f32 %v7509_v35, %v1441_v30 }
 0x151   : > { %v7401_v41 = vpop.f32.mrb[36].mxu0  ;;  %v9779_v43 = vadd.f32 %v7512_v39, %v1444_v37 }
 0x152   : > { %v7402_v42 = vpop.f32.mrb[37].mxu0 }
 0x153   : > { %v7403_v44 = vadd.f32 %v7402_v42, %v7401_v41  ;;  %v7404_v46 = vpop.f32.mrb[38].mxu0  ;;  %v7513_v47 = vpop.f32.mrb[36].mxu1 }
 0x154   : > { %v7405_v50 = vpop.f32.mrb[39].mxu0  ;;  %v7514_v54 = vpop.f32.mrb[37].mxu1 }
 0x155   : > { %v1449_v51 = vadd.f32 %v7403_v44, %v9705_v49  ;;  %v7406_v53 = vadd.f32 %v7405_v50, %v7404_v46  ;;  %v7515_v55 = vadd.f32 %v7514_v54, %v7513_v47  ;;  %v7516_v57 = vpop.f32.mrb[38].mxu1 }
 0x156   : > { %v7517_v59 = vpop.f32.mrb[39].mxu1 }
 0x157   : > { %v1452_v58 = vadd.f32 %v7406_v53, %v9705_v49  ;;  %v7518_v60 = vadd.f32 %v7517_v59, %v7516_v57  ;;  %v9783_v61 = vadd.f32 %v7515_v55, %v1449_v51 }
 0x159   : > { %v7407_v62 = vpop.f32.mrb[40].mxu0  ;;  %v9785_v1 = vadd.f32 %v7518_v60, %v1452_v58 }
 0x15a   : > { %v7408_v63 = vpop.f32.mrb[41].mxu0 }
 0x15b   : > { %v7409_v2 = vadd.f32 %v7408_v63, %v7407_v62  ;;  %v7410_v4 = vpop.f32.mrb[42].mxu0  ;;  %v7519_v6 = vpop.f32.mrb[40].mxu1 }
 0x15c   : > { %v7411_v7 = vpop.f32.mrb[43].mxu0  ;;  %v7520_v12 = vpop.f32.mrb[41].mxu1 }
 0x15d   : > { %v1457_v8 = vadd.f32 %v7409_v2, %v9705_v49  ;;  %v7412_v11 = vadd.f32 %v7411_v7, %v7410_v4  ;;  %v7521_v13 = vadd.f32 %v7520_v12, %v7519_v6  ;;  %v7522_v15 = vpop.f32.mrb[42].mxu1 }
 0x15e   : > { %v7523_v17 = vpop.f32.mrb[43].mxu1 }
 0x15f   : > { %v1460_v16 = vadd.f32 %v7412_v11, %v9705_v49  ;;  %v7524_v18 = vadd.f32 %v7523_v17, %v7522_v15  ;;  %v9789_v19 = vadd.f32 %v7521_v13, %v1457_v8 }
 0x161   : > { %v7413_v21 = vpop.f32.mrb[44].mxu0  ;;  %v9791_v24 = vadd.f32 %v7524_v18, %v1460_v16 }
 0x162   : > { %v7414_v22 = vpop.f32.mrb[45].mxu0 }
 0x163   : > { %v7415_v25 = vadd.f32 %v7414_v22, %v7413_v21  ;;  %v7416_v26 = vpop.f32.mrb[46].mxu0  ;;  %v7525_v29 = vpop.f32.mrb[44].mxu1 }
 0x164   : > { %v7417_v30 = vpop.f32.mrb[47].mxu0  ;;  %v7526_v35 = vpop.f32.mrb[45].mxu1 }
 0x165   : > { %v1465_v33 = vadd.f32 %v7415_v25, %v9705_v49  ;;  %v7418_v34 = vadd.f32 %v7417_v30, %v7416_v26  ;;  %v7527_v36 = vadd.f32 %v7526_v35, %v7525_v29  ;;  %v7528_v37 = vpop.f32.mrb[46].mxu1 }
 0x166   : > { %v7529_v39 = vpop.f32.mrb[47].mxu1 }
 0x167   : > { %v1468_v38 = vadd.f32 %v7418_v34, %v9705_v49  ;;  %v7530_v41 = vadd.f32 %v7529_v39, %v7528_v37  ;;  %v9795_v42 = vadd.f32 %v7527_v36, %v1465_v33 }
 0x169   : > { %v7419_v44 = vpop.f32.mrb[48].mxu0  ;;  %v9797_v47 = vadd.f32 %v7530_v41, %v1468_v38 }
 0x16a   : > { %v7420_v46 = vpop.f32.mrb[49].mxu0 }
 0x16b   : > { %v7421_v50 = vadd.f32 %v7420_v46, %v7419_v44  ;;  %v7422_v51 = vpop.f32.mrb[50].mxu0  ;;  %v7531_v53 = vpop.f32.mrb[48].mxu1 }
 0x16c   : > { %v7423_v54 = vpop.f32.mrb[51].mxu0  ;;  %v7532_v58 = vpop.f32.mrb[49].mxu1 }
 0x16d   : > { %v1473_v55 = vadd.f32 %v7421_v50, %v9705_v49  ;;  %v7424_v57 = vadd.f32 %v7423_v54, %v7422_v51  ;;  %v7533_v59 = vadd.f32 %v7532_v58, %v7531_v53  ;;  %v7534_v60 = vpop.f32.mrb[50].mxu1  ;;  %v8206_v50 = vld [vmem:[%s11631_s5] sm:$0xff]  }
 0x16e   : > { %v7535_v63 = vpop.f32.mrb[51].mxu1  ;;  %7905 = vmatprep.subr.bf16.mxu0 %v8206_v50 }
 0x16f   : > { %v1476_v62 = vadd.f32 %v7424_v57, %v9705_v49  ;;  %v7536_v2 = vadd.f32 %v7535_v63, %v7534_v60  ;;  %v9801_v4 = vadd.f32 %v7533_v59, %v1473_v55  ;;  %7906 = vmatpush3.bf16.msra.mxu0 %v8206_v50 }
 0x171   : > { %v7425_v6 = vpop.f32.mrb[52].mxu0  ;;  %v9803_v8 = vadd.f32 %v7536_v2, %v1476_v62 }
 0x172   : > { %v7426_v7 = vpop.f32.mrb[53].mxu0 }
 0x173   : > { %v7427_v11 = vadd.f32 %v7426_v7, %v7425_v6  ;;  %v7428_v12 = vpop.f32.mrb[54].mxu0  ;;  %v7537_v13 = vpop.f32.mrb[52].mxu1 }
 0x174   : > { %v7429_v15 = vpop.f32.mrb[55].mxu0  ;;  %v7538_v18 = vpop.f32.mrb[53].mxu1 }
 0x175   : > { %v1481_v16 = vadd.f32 %v7427_v11, %v9705_v49  ;;  %v7430_v17 = vadd.f32 %v7429_v15, %v7428_v12  ;;  %v7539_v21 = vadd.f32 %v7538_v18, %v7537_v13  ;;  %v7540_v22 = vpop.f32.mrb[54].mxu1 }
 0x176   : > { %v7541_v26 = vpop.f32.mrb[55].mxu1 }
 0x177   : > { %v1484_v25 = vadd.f32 %v7430_v17, %v9705_v49  ;;  %v7542_v29 = vadd.f32 %v7541_v26, %v7540_v22  ;;  %v9807_v30 = vadd.f32 %v7539_v21, %v1481_v16 }
 0x179   : > { %v7431_v33 = vpop.f32.mrb[56].mxu0  ;;  %v9809_v35 = vadd.f32 %v7542_v29, %v1484_v25 }
 0x17a   : > { %v7432_v34 = vpop.f32.mrb[57].mxu0 }
 0x17b   : > { %v7433_v36 = vadd.f32 %v7432_v34, %v7431_v33  ;;  %v7434_v37 = vpop.f32.mrb[58].mxu0  ;;  %v7543_v38 = vpop.f32.mrb[56].mxu1 }
 0x17c   : > { %v7435_v39 = vpop.f32.mrb[59].mxu0  ;;  %v7544_v46 = vpop.f32.mrb[57].mxu1 }
 0x17d   : > { %v1489_v41 = vadd.f32 %v7433_v36, %v9705_v49  ;;  %v7436_v44 = vadd.f32 %v7435_v39, %v7434_v37  ;;  %v7545_v51 = vadd.f32 %v7544_v46, %v7543_v38  ;;  %v7546_v53 = vpop.f32.mrb[58].mxu1 }
 0x17e   : > { %v7547_v55 = vpop.f32.mrb[59].mxu1 }
 0x17f   : > { %v1492_v54 = vadd.f32 %v7436_v44, %v9705_v49  ;;  %v7548_v57 = vadd.f32 %v7547_v55, %v7546_v53  ;;  %v9816_v58 = vadd.f32 %v7545_v51, %v1489_v41  ;;  %v8207_v51 = vld [vmem:[%s11631_s5 + $0x8] sm:$0xff]   ;;  %v8208_v53 = vld [vmem:[%s11631_s5 + $0x10] sm:$0xff]  }
 0x180   : > { %7907 = vmatprep.subr.bf16.mxu0 %v8207_v51 }
 0x181   : > { %v7437_v59 = vpop.f32.mrb[60].mxu0  ;;  %v9818_v62 = vadd.f32 %v7548_v57, %v1492_v54  ;;  %7908 = vmatpush3.bf16.msra.mxu0 %v8207_v51 }
 0x182   : > { %v7438_v60 = vpop.f32.mrb[61].mxu0  ;;  %7909 = vmatprep.subr.bf16.mxu0 %v8208_v53 }
 0x183   : > { %v7439_v63 = vadd.f32 %v7438_v60, %v7437_v59  ;;  %v7440_v2 = vpop.f32.mrb[62].mxu0  ;;  %v7549_v6 = vpop.f32.mrb[60].mxu1 }
 0x184   : > { %v7441_v7 = vpop.f32.mrb[63].mxu0  ;;  %v7550_v13 = vpop.f32.mrb[61].mxu1 }
 0x185   : > { %v1497_v11 = vadd.f32 %v7439_v63, %v9705_v49  ;;  %v7442_v12 = vadd.f32 %v7441_v7, %v7440_v2  ;;  %v7551_v15 = vadd.f32 %v7550_v13, %v7549_v6  ;;  %v7552_v16 = vpop.f32.mrb[62].mxu1  ;;  %7910 = vmatpush3.bf16.msra.mxu0 %v8208_v53 }
 0x186   : > { %v7553_v18 = vpop.f32.mrb[63].mxu1 }
 0x187   : > { %v1500_v17 = vadd.f32 %v7442_v12, %v9705_v49  ;;  %v7554_v21 = vadd.f32 %v7553_v18, %v7552_v16  ;;  %v9822_v22 = vadd.f32 %v7551_v15, %v1497_v11 }
 0x189   : > { %v7571_v25 = vpop.f32.mrb[64].mxu0  ;;  %v9824_v29 = vadd.f32 %v7554_v21, %v1500_v17 }
 0x18a   : > { %v7572_v26 = vpop.f32.mrb[65].mxu0 }
 0x18b   : > { %v7573_v33 = vadd.f32 %v7572_v26, %v7571_v25  ;;  %v7574_v34 = vpop.f32.mrb[66].mxu0  ;;  %v7827_v37 = vpop.f32.mrb[64].mxu1 }
 0x18c   : > { %v7575_v36 = vpop.f32.mrb[67].mxu0  ;;  %v1859_v41 = vpop.f32.mrb[65].mxu1 }
 0x18d   : > { %v7576_v38 = vadd.f32 %v7575_v36, %v7574_v34  ;;  %v1699_v39 = vadd.f32 %v7573_v33, %v9713_v5  ;;  %v7828_v44 = vpop.f32.mrb[66].mxu1 }
 0x18e   : > { %v1862_v50 = vpop.f32.mrb[67].mxu1 }
 0x18f   : > { %v1860_v46 = vadd.f32 %v1859_v41, %v1699_v39  ;;  %v1702_v49 = vadd.f32 %v7576_v38, %v9718_v10  ;;  %v8209_v10 = vld [vmem:[%s11631_s5 + $0x18] sm:$0xff]  }
 0x190   : > { %7911 = vmatprep.subr.bf16.mxu0 %v8209_v10 }
 0x191   : > { %v1863_v54 = vadd.f32 %v1862_v50, %v1702_v49  ;;  %v7577_v55 = vpop.f32.mrb[68].mxu0  ;;  %v1986_v5 = vmax.f32 %v1860_v46, 0.0  ;;  %7912 = vmatpush3.bf16.msra.mxu0 %v8209_v10 }
 0x192   : > { %v7578_v57 = vpop.f32.mrb[69].mxu0 }
 0x193   : > { %v1987_v59 = vmax.f32 %v1863_v54, 0.0  ;;  %v7579_v60 = vadd.f32 %v7578_v57, %v7577_v55  ;;  %v7580_v63 = vpop.f32.mrb[70].mxu0  ;;  %v7831_v6 = vpop.f32.mrb[68].mxu1 }
 0x194   : > { %v7581_v2 = vpop.f32.mrb[71].mxu0  ;;  %v1875_v13 = vpop.f32.mrb[69].mxu1 }
 0x195   : > { %v2018_v7 = vpack.c.bf16 %v1987_v59, %v1986_v5  ;;  %v1707_v11 = vadd.f32 %v7579_v60, %v9726_v28  ;;  %v7582_v12 = vadd.f32 %v7581_v2, %v7580_v63  ;;  %v7832_v15 = vpop.f32.mrb[70].mxu1 }
 0x196   : > { %v1878_v18 = vpop.f32.mrb[71].mxu1 }
 0x197   : > { %v1868_v16 = vadd.f32 %v7827_v37, %v1707_v11  ;;  %v1710_v17 = vadd.f32 %v7582_v12, %v9728_v32  ;;  %7873 = vmatprep.mubr.bf16.mxu1 %v2018_v7 }
 0x199   : > { %v1871_v21 = vadd.f32 %v7828_v44, %v1710_v17  ;;  %v7583_v25 = vpop.f32.mrb[72].mxu0  ;;  %v1988_v33 = vmax.f32 %v1868_v16, 0.0 }
 0x19a   : > { %v7584_v26 = vpop.f32.mrb[73].mxu0 }
 0x19b   : > { %v1989_v34 = vmax.f32 %v1871_v21, 0.0  ;;  %v7585_v36 = vadd.f32 %v7584_v26, %v7583_v25  ;;  %v7586_v38 = vpop.f32.mrb[74].mxu0  ;;  %v7835_v28 = vpop.f32.mrb[72].mxu1 }
 0x19c   : > { %v7587_v39 = vpop.f32.mrb[75].mxu0  ;;  %v1891_v37 = vpop.f32.mrb[73].mxu1 }
 0x19d   : > { %v2019_v41 = vpack.c.bf16 %v1989_v34, %v1988_v33  ;;  %v7588_v46 = vadd.f32 %v7587_v39, %v7586_v38  ;;  %v1715_v49 = vadd.f32 %v7585_v36, %v9739_v52  ;;  %v7836_v50 = vpop.f32.mrb[74].mxu1 }
 0x19e   : > { %v1894_v44 = vpop.f32.mrb[75].mxu1 }
 0x19f   : > { %v1876_v32 = vadd.f32 %v1875_v13, %v1715_v49  ;;  %7874 = vmatmul.mubr.bf16.vlgmr.msra.gmra.mrb[96].mxu1 %v2019_v41  ;;  %v1718_v51 = vadd.f32 %v7588_v46, %v9741_v56 }
 0x1a1   : > { %v1879_v53 = vadd.f32 %v1878_v18, %v1718_v51  ;;  %v7589_v54 = vpop.f32.mrb[76].mxu0  ;;  %v1990_v57 = vmax.f32 %v1876_v32, 0.0 }
 0x1a2   : > { %v7590_v55 = vpop.f32.mrb[77].mxu0 }
 0x1a3   : > { %v1991_v5 = vmax.f32 %v1879_v53, 0.0  ;;  %v7591_v59 = vadd.f32 %v7590_v55, %v7589_v54  ;;  %v7592_v60 = vpop.f32.mrb[78].mxu0  ;;  %v9841_v10 = vpop.f32.mrb[76].mxu1 }
 0x1a4   : > { %v7593_v63 = vpop.f32.mrb[79].mxu0  ;;  %v1907_v11 = vpop.f32.mrb[77].mxu1 }
 0x1a5   : > { %v2020_v2 = vpack.c.bf16 %v1991_v5, %v1990_v57  ;;  %v1723_v52 = vadd.f32 %v7591_v59, %v9747_v9  ;;  %v7594_v7 = vadd.f32 %v7593_v63, %v7592_v60  ;;  %v9844_v12 = vpop.f32.mrb[78].mxu1 }
 0x1a6   : > { %v1910_v16 = vpop.f32.mrb[79].mxu1 }
 0x1a7   : > { %v1884_v13 = vadd.f32 %v7831_v6, %v1723_v52  ;;  %v1726_v56 = vadd.f32 %v7594_v7, %v9749_v14  ;;  %7877 = vmatprep.mubr.bf16.mxu1 %v2020_v2 }
 0x1a9   : > { %v1887_v17 = vadd.f32 %v7832_v15, %v1726_v56  ;;  %v7595_v18 = vpop.f32.mrb[80].mxu0  ;;  %v1992_v25 = vmax.f32 %v1884_v13, 0.0 }
 0x1aa   : > { %v7596_v21 = vpop.f32.mrb[81].mxu0 }
 0x1ab   : > { %v1993_v26 = vmax.f32 %v1887_v17, 0.0  ;;  %v7597_v33 = vadd.f32 %v7596_v21, %v7595_v18  ;;  %v7598_v34 = vpop.f32.mrb[82].mxu0  ;;  %v9847_v38 = vpop.f32.mrb[80].mxu1 }
 0x1ac   : > { %v7599_v36 = vpop.f32.mrb[83].mxu0  ;;  %v9850_v46 = vpop.f32.mrb[81].mxu1 }
 0x1ad   : > { %v7600_v9 = vadd.f32 %v7599_v36, %v7598_v34  ;;  %v1731_v39 = vadd.f32 %v7597_v33, %v9753_v27  ;;  %v2021_v41 = vpack.c.bf16 %v1993_v26, %v1992_v25  ;;  %v9852_v6 = vpop.f32.mrb[82].mxu1 }
 0x1ae   : > { %v9855_v49 = vpop.f32.mrb[83].mxu1 }
 0x1af   : > { %v1892_v14 = vadd.f32 %v1891_v37, %v1731_v39  ;;  %7878 = vmatmul.mubr.bf16.gmra.mrb[100].mxu1 %v2021_v41  ;;  %v1734_v15 = vadd.f32 %v7600_v9, %v9755_v31 }
 0x1b1   : > { %v1895_v32 = vadd.f32 %v1894_v44, %v1734_v15  ;;  %v7601_v51 = vpop.f32.mrb[84].mxu0  ;;  %v1994_v54 = vmax.f32 %v1892_v14, 0.0 }
 0x1b2   : > { %v7602_v53 = vpop.f32.mrb[85].mxu0 }
 0x1b3   : > { %v1995_v55 = vmax.f32 %v1895_v32, 0.0  ;;  %v7603_v57 = vadd.f32 %v7602_v53, %v7601_v51  ;;  %v7604_v5 = vpop.f32.mrb[86].mxu0  ;;  %v9857_v27 = vpop.f32.mrb[84].mxu1 }
 0x1b4   : > { %v7605_v59 = vpop.f32.mrb[87].mxu0  ;;  %v9860_v37 = vpop.f32.mrb[85].mxu1 }
 0x1b5   : > { %v2022_v60 = vpack.c.bf16 %v1995_v55, %v1994_v54  ;;  %v1739_v63 = vadd.f32 %v7603_v57, %v9759_v45  ;;  %v7606_v2 = vadd.f32 %v7605_v59, %v7604_v5  ;;  %v9862_v52 = vpop.f32.mrb[86].mxu1 }
 0x1b6   : > { %v9865_v7 = vpop.f32.mrb[87].mxu1 }
 0x1b7   : > { %v1900_v31 = vadd.f32 %v7835_v28, %v1739_v63  ;;  %v1742_v44 = vadd.f32 %v7606_v2, %v9761_v48  ;;  %7881 = vmatprep.mubr.bf16.mxu1 %v2022_v60 }
 0x1b9   : > { %v1903_v13 = vadd.f32 %v7836_v50, %v1742_v44  ;;  %v7607_v56 = vpop.f32.mrb[88].mxu0  ;;  %v1996_v18 = vmax.f32 %v1900_v31, 0.0 }
 0x1ba   : > { %v7608_v17 = vpop.f32.mrb[89].mxu0 }
 0x1bb   : > { %v1997_v21 = vmax.f32 %v1903_v13, 0.0  ;;  %v7609_v25 = vadd.f32 %v7608_v17, %v7607_v56  ;;  %v7610_v26 = vpop.f32.mrb[90].mxu0  ;;  %v9867_v45 = vpop.f32.mrb[88].mxu1 }
 0x1bc   : > { %v7611_v33 = vpop.f32.mrb[91].mxu0  ;;  %v9870_v28 = vpop.f32.mrb[89].mxu1 }
 0x1bd   : > { %v7612_v34 = vadd.f32 %v7611_v33, %v7610_v26  ;;  %v1747_v36 = vadd.f32 %v7609_v25, %v9765_v0  ;;  %v2023_v9 = vpack.c.bf16 %v1997_v21, %v1996_v18  ;;  %v9872_v48 = vpop.f32.mrb[90].mxu1 }
 0x1be   : > { %v9875_v41 = vpop.f32.mrb[91].mxu1 }
 0x1bf   : > { %v1908_v39 = vadd.f32 %v1907_v11, %v1747_v36  ;;  %7882 = vmatmul.mubr.bf16.gmra.mrb[104].mxu1 %v2023_v9  ;;  %v1750_v50 = vadd.f32 %v7612_v34, %v9767_v3 }
 0x1c1   : > { %v1911_v14 = vadd.f32 %v1910_v16, %v1750_v50  ;;  %v7613_v15 = vpop.f32.mrb[92].mxu0  ;;  %v1998_v51 = vmax.f32 %v1908_v39, 0.0 }
 0x1c2   : > { %v7614_v32 = vpop.f32.mrb[93].mxu0 }
 0x1c3   : > { %v1999_v53 = vmax.f32 %v1911_v14, 0.0  ;;  %v7615_v54 = vadd.f32 %v7614_v32, %v7613_v15  ;;  %v7616_v55 = vpop.f32.mrb[94].mxu0  ;;  %v9877_v0 = vpop.f32.mrb[92].mxu1 }
 0x1c4   : > { %v7617_v57 = vpop.f32.mrb[95].mxu0  ;;  %v9880_v11 = vpop.f32.mrb[93].mxu1 }
 0x1c5   : > { %v2024_v5 = vpack.c.bf16 %v1999_v53, %v1998_v51  ;;  %v1755_v59 = vadd.f32 %v7615_v54, %v9771_v20  ;;  %v7618_v60 = vadd.f32 %v7617_v57, %v7616_v55  ;;  %v9882_v63 = vpop.f32.mrb[94].mxu1 }
 0x1c6   : > { %v9886_v2 = vpop.f32.mrb[95].mxu1 }
 0x1c7   : > { %v1916_v3 = vadd.f32 %v9841_v10, %v1755_v59  ;;  %v1758_v16 = vadd.f32 %v7618_v60, %v9773_v23  ;;  %7885 = vmatprep.mubr.bf16.mxu1 %v2024_v5 }
 0x1c9   : > { %v1919_v31 = vadd.f32 %v9844_v12, %v1758_v16  ;;  %v7619_v44 = vpop.f32.mrb[96].mxu0  ;;  %v2000_v56 = vmax.f32 %v1916_v3, 0.0 }
 0x1ca   : > { %v7620_v13 = vpop.f32.mrb[97].mxu0 }
 0x1cb   : > { %v2001_v17 = vmax.f32 %v1919_v31, 0.0  ;;  %v7621_v18 = vadd.f32 %v7620_v13, %v7619_v44  ;;  %v7622_v20 = vpop.f32.mrb[98].mxu0 }
 0x1cc   : > { %v7623_v21 = vpop.f32.mrb[99].mxu0 }
 0x1cd   : > { %v7624_v25 = vadd.f32 %v7623_v21, %v7622_v20  ;;  %v1763_v26 = vadd.f32 %v7621_v18, %v9777_v40  ;;  %v2025_v33 = vpack.c.bf16 %v2001_v17, %v2000_v56 }
 0x1cf   : > { %v1924_v10 = vadd.f32 %v9850_v46, %v1763_v26  ;;  %7886 = vmatmul.mubr.bf16.gmra.mrb[108].mxu1 %v2025_v33  ;;  %v1766_v23 = vadd.f32 %v7624_v25, %v9779_v43 }
 0x1d1   : > { %v1927_v34 = vadd.f32 %v9855_v49, %v1766_v23  ;;  %v7625_v36 = vpop.f32.mrb[100].mxu0  ;;  %v2002_v9 = vmax.f32 %v1924_v10, 0.0 }
 0x1d2   : > { %v7626_v12 = vpop.f32.mrb[101].mxu0 }
 0x1d3   : > { %v2003_v39 = vmax.f32 %v1927_v34, 0.0  ;;  %v7627_v50 = vadd.f32 %v7626_v12, %v7625_v36  ;;  %v7628_v14 = vpop.f32.mrb[102].mxu0 }
 0x1d4   : > { %v7629_v15 = vpop.f32.mrb[103].mxu0 }
 0x1d5   : > { %v2026_v32 = vpack.c.bf16 %v2003_v39, %v2002_v9  ;;  %v1771_v51 = vadd.f32 %v7627_v50, %v9783_v61  ;;  %v7630_v53 = vadd.f32 %v7629_v15, %v7628_v14 }
 0x1d7   : > { %v1932_v40 = vadd.f32 %v9847_v38, %v1771_v51  ;;  %v1774_v46 = vadd.f32 %v7630_v53, %v9785_v1  ;;  %7889 = vmatprep.mubr.bf16.mxu1 %v2026_v32 }
 0x1d9   : > { %v1935_v43 = vadd.f32 %v9852_v6, %v1774_v46  ;;  %v7631_v54 = vpop.f32.mrb[104].mxu0  ;;  %v2004_v55 = vmax.f32 %v1932_v40, 0.0 }
 0x1da   : > { %v7632_v49 = vpop.f32.mrb[105].mxu0 }
 0x1db   : > { %v2005_v57 = vmax.f32 %v1935_v43, 0.0  ;;  %v7633_v5 = vadd.f32 %v7632_v49, %v7631_v54  ;;  %v7634_v59 = vpop.f32.mrb[106].mxu0 }
 0x1dc   : > { %v7635_v60 = vpop.f32.mrb[107].mxu0 }
 0x1dd   : > { %v7636_v3 = vadd.f32 %v7635_v60, %v7634_v59  ;;  %v1779_v16 = vadd.f32 %v7633_v5, %v9789_v19  ;;  %v2027_v31 = vpack.c.bf16 %v2005_v57, %v2004_v55 }
 0x1df   : > { %v1940_v61 = vadd.f32 %v9860_v37, %v1779_v16  ;;  %7890 = vmatmul.mubr.bf16.gmra.mrb[112].mxu1 %v2027_v31  ;;  %v1782_v38 = vadd.f32 %v7636_v3, %v9791_v24 }
 0x1e1   : > { %v1943_v1 = vadd.f32 %v9865_v7, %v1782_v38  ;;  %v7637_v44 = vpop.f32.mrb[108].mxu0  ;;  %v2006_v13 = vmax.f32 %v1940_v61, 0.0 }
 0x1e2   : > { %v7638_v6 = vpop.f32.mrb[109].mxu0 }
 0x1e3   : > { %v2007_v56 = vmax.f32 %v1943_v1, 0.0  ;;  %v7639_v17 = vadd.f32 %v7638_v6, %v7637_v44  ;;  %v7640_v18 = vpop.f32.mrb[110].mxu0 }
 0x1e4   : > { %v7641_v20 = vpop.f32.mrb[111].mxu0 }
 0x1e5   : > { %v2028_v21 = vpack.c.bf16 %v2007_v56, %v2006_v13  ;;  %v1787_v25 = vadd.f32 %v7639_v17, %v9795_v42  ;;  %v7642_v26 = vadd.f32 %v7641_v20, %v7640_v18 }
 0x1e7   : > { %v1948_v19 = vadd.f32 %v9857_v27, %v1787_v25  ;;  %v1790_v37 = vadd.f32 %v7642_v26, %v9797_v47  ;;  %7893 = vmatprep.mubr.bf16.mxu1 %v2028_v21  ;;  %v8210_v25 = vld [vmem:[%s11633_s7] sm:$0x3f]  }
 0x1e8   : > { %8135 = vmatprep.subr.msk.bf16.mxu1 %vm2674_vm1, %v8210_v25 }
 0x1e9   : > { %v1951_v24 = vadd.f32 %v9862_v52, %v1790_v37  ;;  %v7643_v33 = vpop.f32.mrb[112].mxu0  ;;  %v2008_v10 = vmax.f32 %v1948_v19, 0.0 }
 0x1ea   : > { %v7644_v7 = vpop.f32.mrb[113].mxu0 }
 0x1eb   : > { %v2009_v23 = vmax.f32 %v1951_v24, 0.0  ;;  %v7645_v34 = vadd.f32 %v7644_v7, %v7643_v33  ;;  %v7646_v36 = vpop.f32.mrb[114].mxu0 }
 0x1ec   : > { %v7647_v12 = vpop.f32.mrb[115].mxu0 }
 0x1ed   : > { %v7648_v9 = vadd.f32 %v7647_v12, %v7646_v36  ;;  %v1795_v39 = vadd.f32 %v7645_v34, %v9801_v4  ;;  %v2029_v50 = vpack.c.bf16 %v2009_v23, %v2008_v10 }
 0x1ef   : > { %v1956_v42 = vadd.f32 %v9870_v28, %v1795_v39  ;;  %7894 = vmatmul.mubr.bf16.gmra.mrb[116].mxu1 %v2029_v50  ;;  %v1798_v27 = vadd.f32 %v7648_v9, %v9803_v8 }
 0x1f1   : > { %v1959_v47 = vadd.f32 %v9875_v41, %v1798_v27  ;;  %v7649_v14 = vpop.f32.mrb[116].mxu0  ;;  %v2010_v15 = vmax.f32 %v1956_v42, 0.0 }
 0x1f2   : > { %v7650_v52 = vpop.f32.mrb[117].mxu0 }
 0x1f3   : > { %v2011_v32 = vmax.f32 %v1959_v47, 0.0  ;;  %v7651_v51 = vadd.f32 %v7650_v52, %v7649_v14  ;;  %v7652_v53 = vpop.f32.mrb[118].mxu0 }
 0x1f4   : > { %v7653_v40 = vpop.f32.mrb[119].mxu0 }
 0x1f5   : > { %v2030_v46 = vpack.c.bf16 %v2011_v32, %v2010_v15  ;;  %v1803_v43 = vadd.f32 %v7651_v51, %v9807_v30  ;;  %v7654_v54 = vadd.f32 %v7653_v40, %v7652_v53 }
 0x1f7   : > { %v1964_v4 = vadd.f32 %v9867_v45, %v1803_v43  ;;  %v1806_v28 = vadd.f32 %v7654_v54, %v9809_v35  ;;  %7897 = vmatprep.mubr.bf16.mxu1 %v2030_v46 }
 0x1f9   : > { %v1967_v8 = vadd.f32 %v9872_v48, %v1806_v28  ;;  %v7655_v49 = vpop.f32.mrb[120].mxu0  ;;  %v2012_v55 = vmax.f32 %v1964_v4, 0.0 }
 0x1fa   : > { %v7656_v41 = vpop.f32.mrb[121].mxu0 }
 0x1fb   : > { %v2013_v57 = vmax.f32 %v1967_v8, 0.0  ;;  %v7657_v5 = vadd.f32 %v7656_v41, %v7655_v49  ;;  %v7658_v59 = vpop.f32.mrb[122].mxu0 }
 0x1fc   : > { %v7659_v60 = vpop.f32.mrb[123].mxu0 }
 0x1fd   : > { %v7660_v3 = vadd.f32 %v7659_v60, %v7658_v59  ;;  %v1811_v16 = vadd.f32 %v7657_v5, %v9816_v58  ;;  %v2031_v31 = vpack.c.bf16 %v2013_v57, %v2012_v55 }
 0x1ff   : > { %v1972_v30 = vadd.f32 %v9880_v11, %v1811_v16  ;;  %7898 = vmatmul.mubr.bf16.gmra.mrb[120].mxu1 %v2031_v31  ;;  %v1814_v45 = vadd.f32 %v7660_v3, %v9818_v62 }
 0x201   : > { %v1975_v35 = vadd.f32 %v9886_v2, %v1814_v45  ;;  %v7661_v61 = vpop.f32.mrb[124].mxu0  ;;  %v2014_v38 = vmax.f32 %v1972_v30, 0.0 }
 0x202   : > { %v7662_v48 = vpop.f32.mrb[125].mxu0 }
 0x203   : > { %v2015_v1 = vmax.f32 %v1975_v35, 0.0  ;;  %v7663_v44 = vadd.f32 %v7662_v48, %v7661_v61  ;;  %v7664_v6 = vpop.f32.mrb[126].mxu0 }
 0x204   : > { %v7665_v13 = vpop.f32.mrb[127].mxu0 }
 0x205   : > { %v2032_v56 = vpack.c.bf16 %v2015_v1, %v2014_v38  ;;  %v1819_v17 = vadd.f32 %v7663_v44, %v9822_v22  ;;  %v7666_v18 = vadd.f32 %v7665_v13, %v7664_v6  ;;  %v2676_v22 = vsel %vm2674_vm1, %v8210_v25, 0 }
 0x206   : > { %7946 = vmatpush3.bf16.msra.mxu1 %v2676_v22 }
 0x207   : > { %v1980_v58 = vadd.f32 %v9877_v0, %v1819_v17  ;;  %v1822_v11 = vadd.f32 %v7666_v18, %v9824_v29  ;;  %7901 = vmatprep.mubr.bf16.mxu1 %v2032_v56  ;;  %v9929_v29 = vld [vmem:[%s11630_s4] ss:$0 sm:$0xff] }
 0x209   : > { %v1983_v62 = vadd.f32 %v9882_v63, %v1822_v11  ;;  %v2016_v20 = vmax.f32 %v1980_v58, 0.0 }
 0x20b   : > { %v2017_v2 = vmax.f32 %v1983_v62, 0.0 }
 0x20d   : > { %v2033_v21 = vpack.c.bf16 %v2017_v2, %v2016_v20 }
 0x20f   : > { %7902 = vmatmul.mubr.bf16.gmra.mrb[124].mxu1 %v2033_v21 }
 0x272   : > { %v7875_v0 = vpop.f32.mrb[96].mxu1 }
 0x273   : > { %v2148_v63 = vadd.f32 %v7875_v0, %v9929_v29  ;;  %v2139_v26 = vpop.f32.mrb[97].mxu1 }
 0x274   : > { %v2140_v19 = vadd.f32 %v9929_v29, %v2139_v26  ;;  %v7876_v37 = vpop.f32.mrb[98].mxu1 }
 0x275   : > { %v2151_v24 = vadd.f32 %v7876_v37, %v9929_v29  ;;  %v2142_v33 = vpop.f32.mrb[99].mxu1  ;;  %v2268_v10 = vmax.f32 %v2148_v63, 0.0 }
 0x276   : > { %v2143_v7 = vadd.f32 %v9929_v29, %v2142_v33  ;;  %v2266_v34 = vmax.f32 %v2140_v19, 0.0 }
 0x277   : > { %v2269_v23 = vmax.f32 %v2151_v24, 0.0 }
 0x278   : > { %v2267_v36 = vmax.f32 %v2143_v7, 0.0 }
 0x279   : > { %v2299_v12 = vpack.c.bf16 %v2269_v23, %v2268_v10 }
 0x27a   : > { %v2298_v9 = vpack.c.bf16 %v2267_v36, %v2266_v34 }
 0x27c   : > { %7913 = vmatprep.mubr.msk.bf16.mxu0 %vm2353_vm2, %v2298_v9 }
 0x27d   : > { %7914 = vmatmul.mubr.msk.bf16.vlgmr.msra.gmra.mrb[128].mxu0 %vm2353_vm2, %v2299_v12 }
 0x282   : > { %v7879_v39 = vpop.f32.mrb[100].mxu1 }
 0x283   : > { %v2164_v50 = vadd.f32 %v7879_v39, %v9929_v29  ;;  %v2155_v42 = vpop.f32.mrb[101].mxu1 }
 0x284   : > { %v2156_v27 = vadd.f32 %v9929_v29, %v2155_v42  ;;  %v7880_v47 = vpop.f32.mrb[102].mxu1 }
 0x285   : > { %v2167_v14 = vadd.f32 %v7880_v47, %v9929_v29  ;;  %v2158_v52 = vpop.f32.mrb[103].mxu1  ;;  %v2272_v32 = vmax.f32 %v2164_v50, 0.0 }
 0x286   : > { %v2159_v15 = vadd.f32 %v9929_v29, %v2158_v52  ;;  %v2270_v53 = vmax.f32 %v2156_v27, 0.0 }
 0x287   : > { %v2273_v51 = vmax.f32 %v2167_v14, 0.0 }
 0x288   : > { %v2271_v40 = vmax.f32 %v2159_v15, 0.0 }
 0x289   : > { %v2301_v46 = vpack.c.bf16 %v2273_v51, %v2272_v32 }
 0x28a   : > { %v2300_v43 = vpack.c.bf16 %v2271_v40, %v2270_v53 }
 0x28c   : > { %7917 = vmatprep.mubr.msk.bf16.mxu0 %vm2353_vm2, %v2300_v43 }
 0x28d   : > { %7918 = vmatmul.mubr.msk.bf16.gmra.mrb[132].mxu0 %vm2353_vm2, %v2301_v46 }
 0x292   : > { %v7883_v54 = vpop.f32.mrb[104].mxu1 }
 0x293   : > { %v2180_v4 = vadd.f32 %v7883_v54, %v9929_v29  ;;  %v2171_v28 = vpop.f32.mrb[105].mxu1 }
 0x294   : > { %v2172_v8 = vadd.f32 %v9929_v29, %v2171_v28  ;;  %v7884_v49 = vpop.f32.mrb[106].mxu1 }
 0x295   : > { %v2183_v41 = vadd.f32 %v7884_v49, %v9929_v29  ;;  %v2174_v55 = vpop.f32.mrb[107].mxu1  ;;  %v2276_v5 = vmax.f32 %v2180_v4, 0.0 }
 0x296   : > { %v2175_v57 = vadd.f32 %v9929_v29, %v2174_v55  ;;  %v2274_v60 = vmax.f32 %v2172_v8, 0.0 }
 0x297   : > { %v2277_v59 = vmax.f32 %v2183_v41, 0.0 }
 0x298   : > { %v2275_v3 = vmax.f32 %v2175_v57, 0.0 }
 0x299   : > { %v2303_v16 = vpack.c.bf16 %v2277_v59, %v2276_v5 }
 0x29a   : > { %v2302_v31 = vpack.c.bf16 %v2275_v3, %v2274_v60 }
 0x29c   : > { %7921 = vmatprep.mubr.msk.bf16.mxu0 %vm2353_vm2, %v2302_v31 }
 0x29d   : > { %7922 = vmatmul.mubr.msk.bf16.gmra.mrb[136].mxu0 %vm2353_vm2, %v2303_v16 }
 0x2a2   : > { %v7887_v30 = vpop.f32.mrb[108].mxu1 }
 0x2a3   : > { %v2196_v45 = vadd.f32 %v7887_v30, %v9929_v29  ;;  %v2187_v35 = vpop.f32.mrb[109].mxu1 }
 0x2a4   : > { %v2188_v61 = vadd.f32 %v9929_v29, %v2187_v35  ;;  %v7888_v48 = vpop.f32.mrb[110].mxu1 }
 0x2a5   : > { %v2199_v38 = vadd.f32 %v7888_v48, %v9929_v29  ;;  %v2190_v1 = vpop.f32.mrb[111].mxu1  ;;  %v2280_v6 = vmax.f32 %v2196_v45, 0.0 }
 0x2a6   : > { %v2191_v44 = vadd.f32 %v9929_v29, %v2190_v1  ;;  %v2278_v56 = vmax.f32 %v2188_v61, 0.0 }
 0x2a7   : > { %v2281_v13 = vmax.f32 %v2199_v38, 0.0 }
 0x2a8   : > { %v2279_v17 = vmax.f32 %v2191_v44, 0.0  ;;  %v2855_v44 = vld [vmem:[%s11635_s9] sm:$0x3] }
 0x2a9   : > { %v2305_v18 = vpack.c.bf16 %v2281_v13, %v2280_v6  ;;  %v9201_v6 = vmov 65535  }
 0x2aa   : > { %v2304_v58 = vpack.c.bf16 %v2279_v17, %v2278_v56  ;;  %v2914_v13 = vsel %vm2912_vm3, 4294967295, %v9201_v6 }
 0x2ab   : > { %v2915_v56 = vsel %vm2913_vm4, %v2914_v13, 0 }
 0x2ac   : > { %7925 = vmatprep.mubr.msk.bf16.mxu0 %vm2353_vm2, %v2304_v58  ;;  %v2917_v17 = vand.u32 %v2915_v56, %v2855_v44 }
 0x2ad   : > { %7926 = vmatmul.mubr.msk.bf16.gmra.mrb[140].mxu0 %vm2353_vm2, %v2305_v18 }
 0x2ae   : > { %7979 = vmatprep.subr.bf16.mxu0 %v2917_v17 }
 0x2af   : > { %7980 = vmatpush3.bf16.msra.mxu0 %v2917_v17 }
 0x2b2   : > { %v7891_v11 = vpop.f32.mrb[112].mxu1 }
 0x2b3   : > { %v2212_v62 = vadd.f32 %v7891_v11, %v9929_v29  ;;  %v2203_v20 = vpop.f32.mrb[113].mxu1 }
 0x2b4   : > { %v2204_v2 = vadd.f32 %v9929_v29, %v2203_v20  ;;  %v7892_v21 = vpop.f32.mrb[114].mxu1 }
 0x2b5   : > { %v2215_v25 = vadd.f32 %v7892_v21, %v9929_v29  ;;  %v2206_v22 = vpop.f32.mrb[115].mxu1  ;;  %v2284_v63 = vmax.f32 %v2212_v62, 0.0 }
 0x2b6   : > { %v2207_v0 = vadd.f32 %v9929_v29, %v2206_v22  ;;  %v2282_v19 = vmax.f32 %v2204_v2, 0.0 }
 0x2b7   : > { %v2285_v26 = vmax.f32 %v2215_v25, 0.0 }
 0x2b8   : > { %v2283_v37 = vmax.f32 %v2207_v0, 0.0 }
 0x2b9   : > { %v2307_v24 = vpack.c.bf16 %v2285_v26, %v2284_v63 }
 0x2ba   : > { %v2306_v33 = vpack.c.bf16 %v2283_v37, %v2282_v19 }
 0x2bc   : > { %7929 = vmatprep.mubr.msk.bf16.mxu0 %vm2353_vm2, %v2306_v33 }
 0x2bd   : > { %7930 = vmatmul.mubr.msk.bf16.gmra.mrb[144].mxu0 %vm2353_vm2, %v2307_v24 }
 0x2c2   : > { %v7895_v7 = vpop.f32.mrb[116].mxu1 }
 0x2c3   : > { %v2228_v10 = vadd.f32 %v7895_v7, %v9929_v29  ;;  %v2219_v23 = vpop.f32.mrb[117].mxu1 }
 0x2c4   : > { %v2220_v34 = vadd.f32 %v9929_v29, %v2219_v23  ;;  %v7896_v36 = vpop.f32.mrb[118].mxu1 }
 0x2c5   : > { %v2231_v12 = vadd.f32 %v7896_v36, %v9929_v29  ;;  %v2222_v9 = vpop.f32.mrb[119].mxu1  ;;  %v2288_v50 = vmax.f32 %v2228_v10, 0.0 }
 0x2c6   : > { %v2223_v39 = vadd.f32 %v9929_v29, %v2222_v9  ;;  %v2286_v27 = vmax.f32 %v2220_v34, 0.0 }
 0x2c7   : > { %v2289_v42 = vmax.f32 %v2231_v12, 0.0 }
 0x2c8   : > { %v2287_v47 = vmax.f32 %v2223_v39, 0.0 }
 0x2c9   : > { %v2309_v14 = vpack.c.bf16 %v2289_v42, %v2288_v50 }
 0x2ca   : > { %v2308_v52 = vpack.c.bf16 %v2287_v47, %v2286_v27 }
 0x2cc   : > { %7933 = vmatprep.mubr.msk.bf16.mxu0 %vm2353_vm2, %v2308_v52 }
 0x2cd   : > { %7934 = vmatmul.mubr.msk.bf16.gmra.mrb[148].mxu0 %vm2353_vm2, %v2309_v14 }
 0x2d2   : > { %v7899_v15 = vpop.f32.mrb[120].mxu1 }
 0x2d3   : > { %v2244_v32 = vadd.f32 %v7899_v15, %v9929_v29  ;;  %v2235_v51 = vpop.f32.mrb[121].mxu1 }
 0x2d4   : > { %v2236_v53 = vadd.f32 %v9929_v29, %v2235_v51  ;;  %v7900_v40 = vpop.f32.mrb[122].mxu1 }
 0x2d5   : > { %v2247_v46 = vadd.f32 %v7900_v40, %v9929_v29  ;;  %v2238_v43 = vpop.f32.mrb[123].mxu1  ;;  %v2292_v4 = vmax.f32 %v2244_v32, 0.0 }
 0x2d6   : > { %v2239_v54 = vadd.f32 %v9929_v29, %v2238_v43  ;;  %v2290_v8 = vmax.f32 %v2236_v53, 0.0 }
 0x2d7   : > { %v2293_v28 = vmax.f32 %v2247_v46, 0.0 }
 0x2d8   : > { %v2291_v49 = vmax.f32 %v2239_v54, 0.0 }
 0x2d9   : > { %v2311_v41 = vpack.c.bf16 %v2293_v28, %v2292_v4 }
 0x2da   : > { %v2310_v55 = vpack.c.bf16 %v2291_v49, %v2290_v8 }
 0x2dc   : > { %7937 = vmatprep.mubr.msk.bf16.mxu0 %vm2353_vm2, %v2310_v55 }
 0x2dd   : > { %7938 = vmatmul.mubr.msk.bf16.gmra.mrb[152].mxu0 %vm2353_vm2, %v2311_v41 }
 0x2e2   : > { %v7903_v57 = vpop.f32.mrb[124].mxu1 }
 0x2e3   : > { %v2260_v5 = vadd.f32 %v7903_v57, %v9929_v29  ;;  %v2251_v59 = vpop.f32.mrb[125].mxu1 }
 0x2e4   : > { %v2252_v60 = vadd.f32 %v9929_v29, %v2251_v59  ;;  %v7904_v3 = vpop.f32.mrb[126].mxu1 }
 0x2e5   : > { %v2263_v16 = vadd.f32 %v7904_v3, %v9929_v29  ;;  %v2254_v31 = vpop.f32.mrb[127].mxu1  ;;  %v2296_v45 = vmax.f32 %v2260_v5, 0.0 }
 0x2e6   : > { %v2255_v30 = vadd.f32 %v9929_v29, %v2254_v31  ;;  %v2294_v61 = vmax.f32 %v2252_v60, 0.0  ;;  %v9985_v29 = vld [vmem:[%s11632_s6] ss:$0 sm:$0xff] }
 0x2e7   : > { %v2297_v35 = vmax.f32 %v2263_v16, 0.0 }
 0x2e8   : > { %v2295_v48 = vmax.f32 %v2255_v30, 0.0 }
 0x2e9   : > { %v2313_v38 = vpack.c.bf16 %v2297_v35, %v2296_v45 }
 0x2ea   : > { %v2312_v1 = vpack.c.bf16 %v2295_v48, %v2294_v61 }
 0x2ec   : > { %7941 = vmatprep.mubr.msk.bf16.mxu0 %vm2353_vm2, %v2312_v1 }
 0x2ed   : > { %7942 = vmatmul.mubr.msk.bf16.gmra.mrb[156].mxu0 %vm2353_vm2, %v2313_v38 }
 0x350   : > { %v7915_v18 = vpop.f32.mrb[128].mxu0 }
 0x351   : > { %v2445_v58 = vadd.f32 %v7915_v18, %v9985_v29  ;;  %v2436_v11 = vpop.f32.mrb[129].mxu0 }
 0x352   : > { %v2437_v62 = vadd.f32 %v9985_v29, %v2436_v11  ;;  %v7916_v20 = vpop.f32.mrb[130].mxu0 }
 0x353   : > { %v2448_v2 = vadd.f32 %v7916_v20, %v9985_v29  ;;  %v2439_v21 = vpop.f32.mrb[131].mxu0  ;;  %v2565_v22 = vmax.f32 %v2445_v58, 0.0 }
 0x354   : > { %v2440_v25 = vadd.f32 %v9985_v29, %v2439_v21  ;;  %v2563_v63 = vmax.f32 %v2437_v62, 0.0 }
 0x355   : > { %v2566_v0 = vmax.f32 %v2448_v2, 0.0 }
 0x356   : > { %v2564_v26 = vmax.f32 %v2440_v25, 0.0 }
 0x357   : > { %v2596_v19 = vpack.c.bf16 %v2566_v0, %v2565_v22 }
 0x358   : > { %v2595_v37 = vpack.c.bf16 %v2564_v26, %v2563_v63 }
 0x35a   : > { %7947 = vmatprep.mubr.msk.bf16.mxu1 %vm2625_vm5, %v2595_v37 }
 0x35b   : > { %7948 = vmatmul.mubr.msk.bf16.vlgmr.msra.gmra.mrb[128].mxu1 %vm2625_vm5, %v2596_v19 }
 0x360   : > { %v7919_v24 = vpop.f32.mrb[132].mxu0 }
 0x361   : > { %v2461_v33 = vadd.f32 %v7919_v24, %v9985_v29  ;;  %v2452_v7 = vpop.f32.mrb[133].mxu0 }
 0x362   : > { %v2453_v10 = vadd.f32 %v9985_v29, %v2452_v7  ;;  %v7920_v23 = vpop.f32.mrb[134].mxu0 }
 0x363   : > { %v2464_v34 = vadd.f32 %v7920_v23, %v9985_v29  ;;  %v2455_v36 = vpop.f32.mrb[135].mxu0  ;;  %v2569_v9 = vmax.f32 %v2461_v33, 0.0 }
 0x364   : > { %v2456_v12 = vadd.f32 %v9985_v29, %v2455_v36  ;;  %v2567_v50 = vmax.f32 %v2453_v10, 0.0 }
 0x365   : > { %v2570_v39 = vmax.f32 %v2464_v34, 0.0 }
 0x366   : > { %v2568_v42 = vmax.f32 %v2456_v12, 0.0 }
 0x367   : > { %v2598_v27 = vpack.c.bf16 %v2570_v39, %v2569_v9 }
 0x368   : > { %v2597_v47 = vpack.c.bf16 %v2568_v42, %v2567_v50 }
 0x36a   : > { %7951 = vmatprep.mubr.msk.bf16.mxu1 %vm2625_vm5, %v2597_v47 }
 0x36b   : > { %7952 = vmatmul.mubr.msk.bf16.gmra.mrb[132].mxu1 %vm2625_vm5, %v2598_v27 }
 0x370   : > { %v7923_v14 = vpop.f32.mrb[136].mxu0 }
 0x371   : > { %v2477_v52 = vadd.f32 %v7923_v14, %v9985_v29  ;;  %v2468_v15 = vpop.f32.mrb[137].mxu0 }
 0x372   : > { %v2469_v32 = vadd.f32 %v9985_v29, %v2468_v15  ;;  %v7924_v51 = vpop.f32.mrb[138].mxu0 }
 0x373   : > { %v2480_v53 = vadd.f32 %v7924_v51, %v9985_v29  ;;  %v2471_v40 = vpop.f32.mrb[139].mxu0  ;;  %v2573_v43 = vmax.f32 %v2477_v52, 0.0 }
 0x374   : > { %v2472_v46 = vadd.f32 %v9985_v29, %v2471_v40  ;;  %v2571_v4 = vmax.f32 %v2469_v32, 0.0 }
 0x375   : > { %v2574_v54 = vmax.f32 %v2480_v53, 0.0 }
 0x376   : > { %v2572_v28 = vmax.f32 %v2472_v46, 0.0 }
 0x377   : > { %v2600_v8 = vpack.c.bf16 %v2574_v54, %v2573_v43 }
 0x378   : > { %v2599_v49 = vpack.c.bf16 %v2572_v28, %v2571_v4 }
 0x37a   : > { %7955 = vmatprep.mubr.msk.bf16.mxu1 %vm2625_vm5, %v2599_v49 }
 0x37b   : > { %7956 = vmatmul.mubr.msk.bf16.gmra.mrb[136].mxu1 %vm2625_vm5, %v2600_v8 }
 0x380   : > { %v7927_v41 = vpop.f32.mrb[140].mxu0 }
 0x381   : > { %v2493_v55 = vadd.f32 %v7927_v41, %v9985_v29  ;;  %v2484_v57 = vpop.f32.mrb[141].mxu0 }
 0x382   : > { %v2485_v5 = vadd.f32 %v9985_v29, %v2484_v57  ;;  %v7928_v59 = vpop.f32.mrb[142].mxu0 }
 0x383   : > { %v2496_v60 = vadd.f32 %v7928_v59, %v9985_v29  ;;  %v2487_v3 = vpop.f32.mrb[143].mxu0  ;;  %v2577_v31 = vmax.f32 %v2493_v55, 0.0 }
 0x384   : > { %v2488_v16 = vadd.f32 %v9985_v29, %v2487_v3  ;;  %v2575_v45 = vmax.f32 %v2485_v5, 0.0 }
 0x385   : > { %v2578_v30 = vmax.f32 %v2496_v60, 0.0 }
 0x386   : > { %v2576_v35 = vmax.f32 %v2488_v16, 0.0  ;;  %v8211_v16 = vld [vmem:[%s11637_s11] sm:$0x3f]  }
 0x387   : > { %v2602_v61 = vpack.c.bf16 %v2578_v30, %v2577_v31  ;;  %8136 = vmatprep.subr.msk.bf16.mxu1 %vm2674_vm1, %v8211_v16  ;;  %v3191_v31 = vsel %vm2674_vm1, %v8211_v16, 0  ;;  %v10043_v30 = vld [vmem:[%s11634_s8] ss:$0 sm:$0xff] }
 0x388   : > { %v2601_v48 = vpack.c.bf16 %v2576_v35, %v2575_v45  ;;  %8014 = vmatpush3.bf16.msra.mxu1 %v3191_v31 }
 0x38a   : > { %7959 = vmatprep.mubr.msk.bf16.mxu1 %vm2625_vm5, %v2601_v48 }
 0x38b   : > { %7960 = vmatmul.mubr.msk.bf16.gmra.mrb[140].mxu1 %vm2625_vm5, %v2602_v61 }
 0x390   : > { %v7931_v38 = vpop.f32.mrb[144].mxu0 }
 0x391   : > { %v2509_v1 = vadd.f32 %v7931_v38, %v9985_v29  ;;  %v2500_v44 = vpop.f32.mrb[145].mxu0 }
 0x392   : > { %v2501_v6 = vadd.f32 %v9985_v29, %v2500_v44  ;;  %v7932_v13 = vpop.f32.mrb[146].mxu0 }
 0x393   : > { %v2512_v56 = vadd.f32 %v7932_v13, %v9985_v29  ;;  %v2503_v17 = vpop.f32.mrb[147].mxu0  ;;  %v2581_v58 = vmax.f32 %v2509_v1, 0.0 }
 0x394   : > { %v2504_v18 = vadd.f32 %v9985_v29, %v2503_v17  ;;  %v2579_v62 = vmax.f32 %v2501_v6, 0.0 }
 0x395   : > { %v2582_v11 = vmax.f32 %v2512_v56, 0.0 }
 0x396   : > { %v2580_v20 = vmax.f32 %v2504_v18, 0.0 }
 0x397   : > { %v2604_v2 = vpack.c.bf16 %v2582_v11, %v2581_v58 }
 0x398   : > { %v2603_v21 = vpack.c.bf16 %v2580_v20, %v2579_v62 }
 0x39a   : > { %7963 = vmatprep.mubr.msk.bf16.mxu1 %vm2625_vm5, %v2603_v21 }
 0x39b   : > { %7964 = vmatmul.mubr.msk.bf16.gmra.mrb[144].mxu1 %vm2625_vm5, %v2604_v2 }
 0x3a0   : > { %v7935_v25 = vpop.f32.mrb[148].mxu0 }
 0x3a1   : > { %v2525_v22 = vadd.f32 %v7935_v25, %v9985_v29  ;;  %v2516_v0 = vpop.f32.mrb[149].mxu0 }
 0x3a2   : > { %v2517_v63 = vadd.f32 %v9985_v29, %v2516_v0  ;;  %v7936_v26 = vpop.f32.mrb[150].mxu0 }
 0x3a3   : > { %v2528_v19 = vadd.f32 %v7936_v26, %v9985_v29  ;;  %v2519_v37 = vpop.f32.mrb[151].mxu0  ;;  %v2585_v33 = vmax.f32 %v2525_v22, 0.0 }
 0x3a4   : > { %v2520_v24 = vadd.f32 %v9985_v29, %v2519_v37  ;;  %v2583_v10 = vmax.f32 %v2517_v63, 0.0 }
 0x3a5   : > { %v2586_v7 = vmax.f32 %v2528_v19, 0.0 }
 0x3a6   : > { %v2584_v23 = vmax.f32 %v2520_v24, 0.0 }
 0x3a7   : > { %v2606_v34 = vpack.c.bf16 %v2586_v7, %v2585_v33 }
 0x3a8   : > { %v2605_v36 = vpack.c.bf16 %v2584_v23, %v2583_v10 }
 0x3aa   : > { %7967 = vmatprep.mubr.msk.bf16.mxu1 %vm2625_vm5, %v2605_v36 }
 0x3ab   : > { %7968 = vmatmul.mubr.msk.bf16.gmra.mrb[148].mxu1 %vm2625_vm5, %v2606_v34 }
 0x3b0   : > { %v7939_v12 = vpop.f32.mrb[152].mxu0 }
 0x3b1   : > { %v2541_v9 = vadd.f32 %v7939_v12, %v9985_v29  ;;  %v2532_v39 = vpop.f32.mrb[153].mxu0 }
 0x3b2   : > { %v2533_v50 = vadd.f32 %v9985_v29, %v2532_v39  ;;  %v7940_v42 = vpop.f32.mrb[154].mxu0 }
 0x3b3   : > { %v2544_v27 = vadd.f32 %v7940_v42, %v9985_v29  ;;  %v2535_v47 = vpop.f32.mrb[155].mxu0  ;;  %v2589_v52 = vmax.f32 %v2541_v9, 0.0 }
 0x3b4   : > { %v2536_v14 = vadd.f32 %v9985_v29, %v2535_v47  ;;  %v2587_v32 = vmax.f32 %v2533_v50, 0.0 }
 0x3b5   : > { %v2590_v15 = vmax.f32 %v2544_v27, 0.0 }
 0x3b6   : > { %v2588_v51 = vmax.f32 %v2536_v14, 0.0 }
 0x3b7   : > { %v2608_v53 = vpack.c.bf16 %v2590_v15, %v2589_v52 }
 0x3b8   : > { %v2607_v40 = vpack.c.bf16 %v2588_v51, %v2587_v32 }
 0x3ba   : > { %7971 = vmatprep.mubr.msk.bf16.mxu1 %vm2625_vm5, %v2607_v40 }
 0x3bb   : > { %7972 = vmatmul.mubr.msk.bf16.gmra.mrb[152].mxu1 %vm2625_vm5, %v2608_v53 }
 0x3c0   : > { %v7943_v46 = vpop.f32.mrb[156].mxu0 }
 0x3c1   : > { %v2557_v43 = vadd.f32 %v7943_v46, %v9985_v29  ;;  %v2548_v54 = vpop.f32.mrb[157].mxu0 }
 0x3c2   : > { %v2549_v4 = vadd.f32 %v9985_v29, %v2548_v54  ;;  %v7944_v28 = vpop.f32.mrb[158].mxu0 }
 0x3c3   : > { %v2560_v8 = vadd.f32 %v7944_v28, %v9985_v29  ;;  %v2551_v49 = vpop.f32.mrb[159].mxu0  ;;  %v2593_v55 = vmax.f32 %v2557_v43, 0.0 }
 0x3c4   : > { %v2552_v41 = vadd.f32 %v9985_v29, %v2551_v49  ;;  %v2591_v5 = vmax.f32 %v2549_v4, 0.0 }
 0x3c5   : > { %v2594_v57 = vmax.f32 %v2560_v8, 0.0 }
 0x3c6   : > { %v2592_v59 = vmax.f32 %v2552_v41, 0.0 }
 0x3c7   : > { %v2610_v60 = vpack.c.bf16 %v2594_v57, %v2593_v55 }
 0x3c8   : > { %v2609_v3 = vpack.c.bf16 %v2592_v59, %v2591_v5 }
 0x3ca   : > { %7975 = vmatprep.mubr.msk.bf16.mxu1 %vm2625_vm5, %v2609_v3 }
 0x3cb   : > { %7976 = vmatmul.mubr.msk.bf16.gmra.mrb[156].mxu1 %vm2625_vm5, %v2610_v60 }
 0x42e   : > { %v7949_v29 = vpop.f32.mrb[128].mxu1 }
 0x42f   : > { %v2712_v45 = vpop.f32.mrb[129].mxu1  ;;  %v2721_v61 = vadd.f32 %v7949_v29, %v10043_v30 }
 0x430   : > { %v7950_v35 = vpop.f32.mrb[130].mxu1  ;;  %v2713_v1 = vadd.f32 %v10043_v30, %v2712_v45 }
 0x431   : > { %v2724_v48 = vadd.f32 %v7950_v35, %v10043_v30  ;;  %v2715_v38 = vpop.f32.mrb[131].mxu1 }
 0x432   : > { %v2716_v44 = vadd.f32 %v10043_v30, %v2715_v38 }
 0x433   : > { %v2840_v6 = vpack.c.bf16 %v2724_v48, %v2721_v61 }
 0x434   : > { %v2839_v13 = vpack.c.bf16 %v2716_v44, %v2713_v1 }
 0x436   : > { %7981 = vmatprep.mubr.msk.bf16.mxu0 %vm2863_vm6, %v2839_v13 }
 0x437   : > { %7982 = vmatmul.mubr.msk.bf16.vlgmr.msra.gmra.mrb[160].mxu0 %vm2863_vm6, %v2840_v6 }
 0x43e   : > { %v7953_v56 = vpop.f32.mrb[132].mxu1 }
 0x43f   : > { %v2728_v17 = vpop.f32.mrb[133].mxu1  ;;  %v2737_v58 = vadd.f32 %v7953_v56, %v10043_v30 }
 0x440   : > { %v7954_v18 = vpop.f32.mrb[134].mxu1  ;;  %v2729_v20 = vadd.f32 %v10043_v30, %v2728_v17 }
 0x441   : > { %v2740_v11 = vadd.f32 %v7954_v18, %v10043_v30  ;;  %v2731_v62 = vpop.f32.mrb[135].mxu1 }
 0x442   : > { %v2732_v2 = vadd.f32 %v10043_v30, %v2731_v62 }
 0x443   : > { %v2842_v21 = vpack.c.bf16 %v2740_v11, %v2737_v58 }
 0x444   : > { %v2841_v25 = vpack.c.bf16 %v2732_v2, %v2729_v20  ;;  %v8212_v2 = vld [vmem:[%s11639_s13] sm:$0xff]  }
 0x445   : > { %8047 = vmatprep.subr.bf16.mxu0 %v8212_v2 }
 0x446   : > { %7985 = vmatprep.mubr.msk.bf16.mxu0 %vm2863_vm6, %v2841_v25  ;;  %v10102_v25 = vld [vmem:[%s11636_s10] ss:$0 sm:$0xff]  ;;  %8048 = vmatpush3.bf16.msra.mxu0 %v8212_v2 }
 0x447   : > { %7986 = vmatmul.mubr.msk.bf16.gmra.mrb[164].mxu0 %vm2863_vm6, %v2842_v21  ;;  %v8213_v21 = vld [vmem:[%s11639_s13 + $0x8] sm:$0xff]  }
 0x448   : > { %8049 = vmatprep.subr.bf16.mxu0 %v8213_v21 }
 0x44a   : > { %8050 = vmatpush3.bf16.msra.mxu0 %v8213_v21 }
 0x44e   : > { %v7957_v22 = vpop.f32.mrb[136].mxu1 }
 0x44f   : > { %v2744_v0 = vpop.f32.mrb[137].mxu1  ;;  %v2753_v26 = vadd.f32 %v7957_v22, %v10043_v30 }
 0x450   : > { %v7958_v63 = vpop.f32.mrb[138].mxu1  ;;  %v2745_v24 = vadd.f32 %v10043_v30, %v2744_v0 }
 0x451   : > { %v2756_v19 = vadd.f32 %v7958_v63, %v10043_v30  ;;  %v2747_v37 = vpop.f32.mrb[139].mxu1 }
 0x452   : > { %v2748_v33 = vadd.f32 %v10043_v30, %v2747_v37 }
 0x453   : > { %v2844_v7 = vpack.c.bf16 %v2756_v19, %v2753_v26 }
 0x454   : > { %v2843_v10 = vpack.c.bf16 %v2748_v33, %v2745_v24  ;;  %v8215_v33 = vld [vmem:[%s11639_s13 + $0x18] sm:$0xff]  }
 0x456   : > { %7989 = vmatprep.mubr.msk.bf16.mxu0 %vm2863_vm6, %v2843_v10 }
 0x457   : > { %7990 = vmatmul.mubr.msk.bf16.gmra.mrb[168].mxu0 %vm2863_vm6, %v2844_v7 }
 0x45e   : > { %v7961_v23 = vpop.f32.mrb[140].mxu1 }
 0x45f   : > { %v2760_v34 = vpop.f32.mrb[141].mxu1  ;;  %v2769_v12 = vadd.f32 %v7961_v23, %v10043_v30 }
 0x460   : > { %v7962_v36 = vpop.f32.mrb[142].mxu1  ;;  %v2761_v50 = vadd.f32 %v10043_v30, %v2760_v34 }
 0x461   : > { %v2772_v9 = vadd.f32 %v7962_v36, %v10043_v30  ;;  %v2763_v39 = vpop.f32.mrb[143].mxu1 }
 0x462   : > { %v2764_v42 = vadd.f32 %v10043_v30, %v2763_v39 }
 0x463   : > { %v2846_v27 = vpack.c.bf16 %v2772_v9, %v2769_v12 }
 0x464   : > { %v2845_v47 = vpack.c.bf16 %v2764_v42, %v2761_v50 }
 0x466   : > { %7993 = vmatprep.mubr.msk.bf16.mxu0 %vm2863_vm6, %v2845_v47 }
 0x467   : > { %7994 = vmatmul.mubr.msk.bf16.gmra.mrb[172].mxu0 %vm2863_vm6, %v2846_v27 }
 0x46e   : > { %v7965_v14 = vpop.f32.mrb[144].mxu1 }
 0x46f   : > { %v2776_v52 = vpop.f32.mrb[145].mxu1  ;;  %v2785_v32 = vadd.f32 %v7965_v14, %v10043_v30 }
 0x470   : > { %v7966_v15 = vpop.f32.mrb[146].mxu1  ;;  %v2777_v40 = vadd.f32 %v10043_v30, %v2776_v52 }
 0x471   : > { %v2788_v51 = vadd.f32 %v7966_v15, %v10043_v30  ;;  %v2779_v53 = vpop.f32.mrb[147].mxu1 }
 0x472   : > { %v2780_v46 = vadd.f32 %v10043_v30, %v2779_v53 }
 0x473   : > { %v2848_v43 = vpack.c.bf16 %v2788_v51, %v2785_v32 }
 0x474   : > { %v2847_v54 = vpack.c.bf16 %v2780_v46, %v2777_v40 }
 0x476   : > { %7997 = vmatprep.mubr.msk.bf16.mxu0 %vm2863_vm6, %v2847_v54 }
 0x477   : > { %7998 = vmatmul.mubr.msk.bf16.gmra.mrb[176].mxu0 %vm2863_vm6, %v2848_v43 }
 0x47e   : > { %v7969_v4 = vpop.f32.mrb[148].mxu1 }
 0x47f   : > { %v2792_v28 = vpop.f32.mrb[149].mxu1  ;;  %v2801_v49 = vadd.f32 %v7969_v4, %v10043_v30 }
 0x480   : > { %v7970_v8 = vpop.f32.mrb[150].mxu1  ;;  %v2793_v57 = vadd.f32 %v10043_v30, %v2792_v28 }
 0x481   : > { %v2804_v41 = vadd.f32 %v7970_v8, %v10043_v30  ;;  %v2795_v55 = vpop.f32.mrb[151].mxu1 }
 0x482   : > { %v2796_v5 = vadd.f32 %v10043_v30, %v2795_v55 }
 0x483   : > { %v2850_v59 = vpack.c.bf16 %v2804_v41, %v2801_v49 }
 0x484   : > { %v2849_v60 = vpack.c.bf16 %v2796_v5, %v2793_v57 }
 0x486   : > { %8001 = vmatprep.mubr.msk.bf16.mxu0 %vm2863_vm6, %v2849_v60 }
 0x487   : > { %8002 = vmatmul.mubr.msk.bf16.gmra.mrb[180].mxu0 %vm2863_vm6, %v2850_v59 }
 0x48e   : > { %v7973_v3 = vpop.f32.mrb[152].mxu1 }
 0x48f   : > { %v2808_v16 = vpop.f32.mrb[153].mxu1  ;;  %v2817_v29 = vadd.f32 %v7973_v3, %v10043_v30 }
 0x490   : > { %v7974_v31 = vpop.f32.mrb[154].mxu1  ;;  %v2809_v61 = vadd.f32 %v10043_v30, %v2808_v16 }
 0x491   : > { %v2820_v45 = vadd.f32 %v7974_v31, %v10043_v30  ;;  %v2811_v35 = vpop.f32.mrb[155].mxu1 }
 0x492   : > { %v2812_v48 = vadd.f32 %v10043_v30, %v2811_v35 }
 0x493   : > { %v2852_v38 = vpack.c.bf16 %v2820_v45, %v2817_v29 }
 0x494   : > { %v2851_v1 = vpack.c.bf16 %v2812_v48, %v2809_v61 }
 0x496   : > { %8005 = vmatprep.mubr.msk.bf16.mxu0 %vm2863_vm6, %v2851_v1 }
 0x497   : > { %8006 = vmatmul.mubr.msk.bf16.gmra.mrb[184].mxu0 %vm2863_vm6, %v2852_v38 }
 0x49e   : > { %v7977_v44 = vpop.f32.mrb[156].mxu1 }
 0x49f   : > { %v2824_v6 = vpop.f32.mrb[157].mxu1  ;;  %v2833_v56 = vadd.f32 %v7977_v44, %v10043_v30 }
 0x4a0   : > { %v7978_v13 = vpop.f32.mrb[158].mxu1  ;;  %v2825_v58 = vadd.f32 %v10043_v30, %v2824_v6 }
 0x4a1   : > { %v2836_v17 = vadd.f32 %v7978_v13, %v10043_v30  ;;  %v2827_v18 = vpop.f32.mrb[159].mxu1 }
 0x4a2   : > { %v2828_v11 = vadd.f32 %v10043_v30, %v2827_v18  ;;  %v8214_v30 = vld [vmem:[%s11639_s13 + $0x10] sm:$0xff]  }
 0x4a3   : > { %v2854_v62 = vpack.c.bf16 %v2836_v17, %v2833_v56  ;;  %8051 = vmatprep.subr.bf16.mxu0 %v8214_v30 }
 0x4a4   : > { %v2853_v20 = vpack.c.bf16 %v2828_v11, %v2825_v58  ;;  %8052 = vmatpush3.bf16.msra.mxu0 %v8214_v30 }
 0x4a5   : > { %8053 = vmatprep.subr.bf16.mxu0 %v8215_v33 }
 0x4a6   : > { %8009 = vmatprep.mubr.msk.bf16.mxu0 %vm2863_vm6, %v2853_v20 }
 0x4a7   : > { %8010 = vmatmul.mubr.msk.bf16.gmra.mrb[188].mxu0 %vm2863_vm6, %v2854_v62 }
 0x4a8   : > { %8054 = vmatpush3.bf16.msra.mxu0 %v8215_v33 }
 0x50a   : > { %v7983_v22 = vpop.f32.mrb[160].mxu0 }
 0x50b   : > { %v2962_v0 = vadd.f32 %v7983_v22, %v10102_v25  ;;  %v2953_v63 = vpop.f32.mrb[161].mxu0 }
 0x50c   : > { %v2954_v26 = vadd.f32 %v10102_v25, %v2953_v63  ;;  %v7984_v19 = vpop.f32.mrb[162].mxu0 }
 0x50d   : > { %v2965_v37 = vadd.f32 %v7984_v19, %v10102_v25  ;;  %v2956_v24 = vpop.f32.mrb[163].mxu0  ;;  %v3082_v10 = vmax.f32 %v2962_v0, 0.0 }
 0x50e   : > { %v2957_v7 = vadd.f32 %v10102_v25, %v2956_v24  ;;  %v3080_v34 = vmax.f32 %v2954_v26, 0.0 }
 0x50f   : > { %v3083_v23 = vmax.f32 %v2965_v37, 0.0 }
 0x510   : > { %v3081_v36 = vmax.f32 %v2957_v7, 0.0 }
 0x511   : > { %v3113_v12 = vpack.c.bf16 %v3083_v23, %v3082_v10 }
 0x512   : > { %v3112_v9 = vpack.c.bf16 %v3081_v36, %v3080_v34 }
 0x514   : > { %8015 = vmatprep.mubr.msk.bf16.mxu1 %vm2625_vm5, %v3112_v9 }
 0x515   : > { %8016 = vmatmul.mubr.msk.bf16.vlgmr.msra.gmra.mrb[160].mxu1 %vm2625_vm5, %v3113_v12 }
 0x51a   : > { %v7987_v39 = vpop.f32.mrb[164].mxu0 }
 0x51b   : > { %v2978_v50 = vadd.f32 %v7987_v39, %v10102_v25  ;;  %v2969_v42 = vpop.f32.mrb[165].mxu0 }
 0x51c   : > { %v2970_v27 = vadd.f32 %v10102_v25, %v2969_v42  ;;  %v7988_v47 = vpop.f32.mrb[166].mxu0 }
 0x51d   : > { %v2981_v14 = vadd.f32 %v7988_v47, %v10102_v25  ;;  %v2972_v52 = vpop.f32.mrb[167].mxu0  ;;  %v3086_v32 = vmax.f32 %v2978_v50, 0.0 }
 0x51e   : > { %v2973_v15 = vadd.f32 %v10102_v25, %v2972_v52  ;;  %v3084_v53 = vmax.f32 %v2970_v27, 0.0 }
 0x51f   : > { %v3087_v51 = vmax.f32 %v2981_v14, 0.0 }
 0x520   : > { %v3085_v40 = vmax.f32 %v2973_v15, 0.0 }
 0x521   : > { %v3115_v46 = vpack.c.bf16 %v3087_v51, %v3086_v32 }
 0x522   : > { %v3114_v43 = vpack.c.bf16 %v3085_v40, %v3084_v53 }
 0x524   : > { %8019 = vmatprep.mubr.msk.bf16.mxu1 %vm2625_vm5, %v3114_v43 }
 0x525   : > { %8020 = vmatmul.mubr.msk.bf16.gmra.mrb[164].mxu1 %vm2625_vm5, %v3115_v46 }
 0x52a   : > { %v7991_v54 = vpop.f32.mrb[168].mxu0 }
 0x52b   : > { %v2994_v4 = vadd.f32 %v7991_v54, %v10102_v25  ;;  %v2985_v28 = vpop.f32.mrb[169].mxu0 }
 0x52c   : > { %v2986_v8 = vadd.f32 %v10102_v25, %v2985_v28  ;;  %v7992_v49 = vpop.f32.mrb[170].mxu0 }
 0x52d   : > { %v2997_v41 = vadd.f32 %v7992_v49, %v10102_v25  ;;  %v2988_v55 = vpop.f32.mrb[171].mxu0  ;;  %v3090_v5 = vmax.f32 %v2994_v4, 0.0 }
 0x52e   : > { %v2989_v57 = vadd.f32 %v10102_v25, %v2988_v55  ;;  %v3088_v60 = vmax.f32 %v2986_v8, 0.0 }
 0x52f   : > { %v3091_v59 = vmax.f32 %v2997_v41, 0.0 }
 0x530   : > { %v3089_v3 = vmax.f32 %v2989_v57, 0.0 }
 0x531   : > { %v3117_v16 = vpack.c.bf16 %v3091_v59, %v3090_v5 }
 0x532   : > { %v3116_v31 = vpack.c.bf16 %v3089_v3, %v3088_v60 }
 0x534   : > { %8023 = vmatprep.mubr.msk.bf16.mxu1 %vm2625_vm5, %v3116_v31 }
 0x535   : > { %8024 = vmatmul.mubr.msk.bf16.gmra.mrb[168].mxu1 %vm2625_vm5, %v3117_v16 }
 0x53a   : > { %v7995_v29 = vpop.f32.mrb[172].mxu0 }
 0x53b   : > { %v3010_v45 = vadd.f32 %v7995_v29, %v10102_v25  ;;  %v3001_v35 = vpop.f32.mrb[173].mxu0 }
 0x53c   : > { %v3002_v61 = vadd.f32 %v10102_v25, %v3001_v35  ;;  %v7996_v48 = vpop.f32.mrb[174].mxu0 }
 0x53d   : > { %v3013_v38 = vadd.f32 %v7996_v48, %v10102_v25  ;;  %v3004_v1 = vpop.f32.mrb[175].mxu0  ;;  %v3094_v6 = vmax.f32 %v3010_v45, 0.0 }
 0x53e   : > { %v3005_v44 = vadd.f32 %v10102_v25, %v3004_v1  ;;  %v3092_v56 = vmax.f32 %v3002_v61, 0.0 }
 0x53f   : > { %v3095_v13 = vmax.f32 %v3013_v38, 0.0 }
 0x540   : > { %v3093_v17 = vmax.f32 %v3005_v44, 0.0  ;;  %v8216_v44 = vld [vmem:[%s11641_s15] ss:$28 sps:$4 sm:$0xff]  }
 0x541   : > { %v3119_v18 = vpack.c.bf16 %v3095_v13, %v3094_v6  ;;  %v8218_v6 = vld [vmem:[%s11641_s15 + $0x4] ss:$28 sps:$4 sm:$0xff]  }
 0x542   : > { %v3118_v58 = vpack.c.bf16 %v3093_v17, %v3092_v56  ;;  %4087 = vmatprep.subr.bf16.mxu1 %v8218_v6  ;;  %v10170_v13 = vld [vmem:[%s11638_s12] ss:$0 sm:$0xff]  ;;  %v8219_v56 = vld [vmem:[%s11641_s15 + $0x38] ss:$28 sps:$4 sm:$0xff]   ;;  %v8233_v17 = vld [vmem:[%s11641_s15 + $0xc] ss:$28 sps:$4 sm:$0xff]  }
 0x543   : > { %4088 = vmatpush1.bf16.msra.mxu1 %v8216_v44  ;;  %4280 = vmatprep.subr.bf16.mxu0 %v8233_v17 }
 0x544   : > { %8027 = vmatprep.mubr.msk.bf16.mxu1 %vm2625_vm5, %v3118_v58 }
 0x545   : > { %8028 = vmatmul.mubr.msk.bf16.gmra.mrb[172].mxu1 %vm2625_vm5, %v3119_v18  ;;  %v8224_v18 = vld [vmem:[%s11641_s15 + $0x74] ss:$28 sps:$4 sm:$0xff]  }
 0x54a   : > { %v7999_v11 = vpop.f32.mrb[176].mxu0 }
 0x54b   : > { %v3026_v62 = vadd.f32 %v7999_v11, %v10102_v25  ;;  %v3017_v20 = vpop.f32.mrb[177].mxu0 }
 0x54c   : > { %v3018_v2 = vadd.f32 %v10102_v25, %v3017_v20  ;;  %v8000_v21 = vpop.f32.mrb[178].mxu0 }
 0x54d   : > { %v3029_v30 = vadd.f32 %v8000_v21, %v10102_v25  ;;  %v3020_v22 = vpop.f32.mrb[179].mxu0  ;;  %v3098_v63 = vmax.f32 %v3026_v62, 0.0  ;;  %v8222_v21 = vld [vmem:[%s11641_s15 + $0x70] ss:$28 sps:$4 sm:$0xff]  }
 0x54e   : > { %v3021_v0 = vadd.f32 %v10102_v25, %v3020_v22  ;;  %v3096_v19 = vmax.f32 %v3018_v2, 0.0 }
 0x54f   : > { %v3099_v26 = vmax.f32 %v3029_v30, 0.0 }
 0x550   : > { %v3097_v37 = vmax.f32 %v3021_v0, 0.0  ;;  %v8227_v0 = vld [vmem:[%s11641_s15 + $0xac] ss:$28 sps:$4 sm:$0xff]  }
 0x551   : > { %v3121_v24 = vpack.c.bf16 %v3099_v26, %v3098_v63 }
 0x552   : > { %v3120_v33 = vpack.c.bf16 %v3097_v37, %v3096_v19 }
 0x554   : > { %8031 = vmatprep.mubr.msk.bf16.mxu1 %vm2625_vm5, %v3120_v33  ;;  %v8225_v33 = vld [vmem:[%s11641_s15 + $0xa8] ss:$28 sps:$4 sm:$0xff]  }
 0x555   : > { %8032 = vmatmul.mubr.msk.bf16.gmra.mrb[176].mxu1 %vm2625_vm5, %v3121_v24 }
 0x55a   : > { %v8003_v7 = vpop.f32.mrb[180].mxu0 }
 0x55b   : > { %v3042_v10 = vadd.f32 %v8003_v7, %v10102_v25  ;;  %v3033_v23 = vpop.f32.mrb[181].mxu0 }
 0x55c   : > { %v3034_v34 = vadd.f32 %v10102_v25, %v3033_v23  ;;  %v8004_v36 = vpop.f32.mrb[182].mxu0 }
 0x55d   : > { %v3045_v12 = vadd.f32 %v8004_v36, %v10102_v25  ;;  %v3036_v9 = vpop.f32.mrb[183].mxu0  ;;  %v3102_v50 = vmax.f32 %v3042_v10, 0.0  ;;  %v8230_v10 = vld [vmem:[%s11641_s15 + $0xe4] ss:$28 sps:$4 sm:$0xff]  }
 0x55e   : > { %v3037_v39 = vadd.f32 %v10102_v25, %v3036_v9  ;;  %v3100_v27 = vmax.f32 %v3034_v34, 0.0  ;;  %v8231_v34 = vld [vmem:[%s11641_s15 + $0x8] ss:$28 sps:$4 sm:$0xff]   ;;  %v8239_v9 = vld [vmem:[%s11641_s15 + $0x11c] ss:$28 sps:$4 sm:$0xff]  }
 0x55f   : > { %v3103_v42 = vmax.f32 %v3045_v12, 0.0  ;;  %v8236_v36 = vld [vmem:[%s11641_s15 + $0x44] ss:$28 sps:$4 sm:$0xff]  }
 0x560   : > { %v3101_v47 = vmax.f32 %v3037_v39, 0.0  ;;  %v8228_v12 = vld [vmem:[%s11641_s15 + $0xe0] ss:$28 sps:$4 sm:$0xff]  }
 0x561   : > { %v3123_v14 = vpack.c.bf16 %v3103_v42, %v3102_v50  ;;  %v8234_v39 = vld [vmem:[%s11641_s15 + $0x40] ss:$28 sps:$4 sm:$0xff]   ;;  %v8237_v42 = vld [vmem:[%s11641_s15 + $0x118] ss:$28 sps:$4 sm:$0xff]  }
 0x562   : > { %v3122_v52 = vpack.c.bf16 %v3101_v47, %v3100_v27  ;;  %v8242_v50 = vld [vmem:[%s11641_s15 + $0x7c] ss:$28 sps:$4 sm:$0xff]   ;;  %v8248_v27 = vld [vmem:[%s11641_s15 + $0x154] ss:$28 sps:$4 sm:$0xff]  }
 0x564   : > { %8035 = vmatprep.mubr.msk.bf16.mxu1 %vm2625_vm5, %v3122_v52 }
 0x565   : > { %8036 = vmatmul.mubr.msk.bf16.gmra.mrb[180].mxu1 %vm2625_vm5, %v3123_v14  ;;  %v8240_v14 = vld [vmem:[%s11641_s15 + $0x78] ss:$28 sps:$4 sm:$0xff]  }
 0x56a   : > { %v8007_v15 = vpop.f32.mrb[184].mxu0 }
 0x56b   : > { %v3058_v32 = vadd.f32 %v8007_v15, %v10102_v25  ;;  %v3049_v51 = vpop.f32.mrb[185].mxu0 }
 0x56c   : > { %v3050_v53 = vadd.f32 %v10102_v25, %v3049_v51  ;;  %v8008_v40 = vpop.f32.mrb[186].mxu0 }
 0x56d   : > { %v3061_v46 = vadd.f32 %v8008_v40, %v10102_v25  ;;  %v3052_v43 = vpop.f32.mrb[187].mxu0  ;;  %v3106_v4 = vmax.f32 %v3058_v32, 0.0  ;;  %v8245_v32 = vld [vmem:[%s11641_s15 + $0xb4] ss:$28 sps:$4 sm:$0xff]  }
 0x56e   : > { %v3053_v54 = vadd.f32 %v10102_v25, %v3052_v43  ;;  %v3104_v8 = vmax.f32 %v3050_v53, 0.0  ;;  %v8246_v40 = vld [vmem:[%s11641_s15 + $0x150] ss:$28 sps:$4 sm:$0xff]  }
 0x56f   : > { %v3107_v28 = vmax.f32 %v3061_v46, 0.0 }
 0x570   : > { %v3105_v49 = vmax.f32 %v3053_v54, 0.0 }
 0x571   : > { %v3125_v41 = vpack.c.bf16 %v3107_v28, %v3106_v4  ;;  %v8243_v4 = vld [vmem:[%s11641_s15 + $0xb0] ss:$28 sps:$4 sm:$0xff]  }
 0x572   : > { %v3124_v55 = vpack.c.bf16 %v3105_v49, %v3104_v8  ;;  %v8251_v49 = vld [vmem:[%s11641_s15 + $0xec] ss:$28 sps:$4 sm:$0xff]  }
 0x574   : > { %8039 = vmatprep.mubr.msk.bf16.mxu1 %vm2625_vm5, %v3124_v55 }
 0x575   : > { %8040 = vmatmul.mubr.msk.bf16.gmra.mrb[184].mxu1 %vm2625_vm5, %v3125_v41 }
 0x57a   : > { %v8011_v57 = vpop.f32.mrb[188].mxu0 }
 0x57b   : > { %v3074_v5 = vadd.f32 %v8011_v57, %v10102_v25  ;;  %v3065_v59 = vpop.f32.mrb[189].mxu0 }
 0x57c   : > { %v3066_v60 = vadd.f32 %v10102_v25, %v3065_v59  ;;  %v8012_v3 = vpop.f32.mrb[190].mxu0  ;;  %v8249_v59 = vld [vmem:[%s11641_s15 + $0xe8] ss:$28 sps:$4 sm:$0xff]  }
 0x57d   : > { %v3077_v16 = vadd.f32 %v8012_v3, %v10102_v25  ;;  %v3068_v31 = vpop.f32.mrb[191].mxu0  ;;  %v3110_v45 = vmax.f32 %v3074_v5, 0.0  ;;  %v8252_v3 = vld [vmem:[%s11641_s15 + $0x120] ss:$28 sps:$4 sm:$0xff]  }
 0x57e   : > { %v3069_v29 = vadd.f32 %v10102_v25, %v3068_v31  ;;  %v3108_v61 = vmax.f32 %v3066_v60, 0.0  ;;  %v8221_v25 = vld [vmem:[%s11641_s15 + $0x3c] ss:$28 sps:$4 sm:$0xff]   ;;  %v8254_v60 = vld [vmem:[%s11641_s15 + $0x124] ss:$28 sps:$4 sm:$0xff]  }
 0x57f   : > { %v3111_v35 = vmax.f32 %v3077_v16, 0.0  ;;  %4089 = vmatprep.subr.bf16.mxu1 %v8221_v25 }
 0x580   : > { %v3109_v48 = vmax.f32 %v3069_v29, 0.0  ;;  %4090 = vmatpush1.bf16.msra.mxu1 %v8219_v56 }
 0x581   : > { %v3127_v38 = vpack.c.bf16 %v3111_v35, %v3110_v45  ;;  %4091 = vmatprep.subr.bf16.mxu1 %v8224_v18 }
 0x582   : > { %v3126_v1 = vpack.c.bf16 %v3109_v48, %v3108_v61 }
 0x584   : > { %8043 = vmatprep.mubr.msk.bf16.mxu1 %vm2625_vm5, %v3126_v1  ;;  %4092 = vmatpush1.bf16.msra.mxu1 %v8222_v21 }
 0x585   : > { %8044 = vmatmul.mubr.msk.bf16.gmra.mrb[188].mxu1 %vm2625_vm5, %v3127_v38  ;;  %4093 = vmatprep.subr.bf16.mxu1 %v8227_v0 }
 0x588   : > { %4094 = vmatpush1.bf16.msra.mxu1 %v8225_v33 }
 0x589   : > { %4095 = vmatprep.subr.bf16.mxu1 %v8230_v10 }
 0x58c   : > { %4096 = vmatpush1.bf16.msra.mxu1 %v8228_v12 }
 0x58d   : > { %4097 = vmatprep.subr.bf16.mxu1 %v8239_v9 }
 0x590   : > { %4098 = vmatpush1.bf16.msra.mxu1 %v8237_v42 }
 0x591   : > { %4099 = vmatprep.subr.bf16.mxu1 %v8248_v27 }
 0x594   : > { %4100 = vmatpush1.bf16.msra.mxu1 %v8246_v40 }
 0x5e8   : > { %v8017_v58 = vpop.f32.mrb[160].mxu1 }
 0x5e9   : > { %v3236_v11 = vadd.f32 %v8017_v58, %v10170_v13  ;;  %v3227_v62 = vpop.f32.mrb[161].mxu1 }
 0x5ea   : > { %v3228_v20 = vadd.f32 %v10170_v13, %v3227_v62  ;;  %v8018_v2 = vpop.f32.mrb[162].mxu1 }
 0x5eb   : > { %v3239_v30 = vadd.f32 %v8018_v2, %v10170_v13  ;;  %v3230_v22 = vpop.f32.mrb[163].mxu1  ;;  %v3356_v26 = vmax.f32 %v3236_v11, 0.0 }
 0x5ec   : > { %v3231_v63 = vadd.f32 %v10170_v13, %v3230_v22  ;;  %v3354_v37 = vmax.f32 %v3228_v20, 0.0 }
 0x5ed   : > { %v3357_v19 = vmax.f32 %v3239_v30, 0.0 }
 0x5ee   : > { %v3355_v24 = vmax.f32 %v3231_v63, 0.0 }
 0x5ef   : > { %v3387_v7 = vpack.c.bf16 %v3357_v19, %v3356_v26 }
 0x5f0   : > { %v3386_v23 = vpack.c.bf16 %v3355_v24, %v3354_v37 }
 0x5f2   : > { %8055 = vmatprep.mubr.msk.bf16.mxu0 %vm2353_vm2, %v3386_v23 }
 0x5f3   : > { %8056 = vmatmul.mubr.msk.bf16.vlgmr.msra.gmra.mrb[192].mxu0 %vm2353_vm2, %v3387_v7 }
 0x5f4   : > { %4281 = vmatpush1.bf16.msra.mxu0 %v8231_v34 }
 0x5f5   : > { %4282 = vmatprep.subr.bf16.mxu0 %v8236_v36 }
 0x5f8   : > { %v8021_v47 = vpop.f32.mrb[164].mxu1  ;;  %4283 = vmatpush1.bf16.msra.mxu0 %v8234_v39 }
 0x5f9   : > { %v3252_v52 = vadd.f32 %v8021_v47, %v10170_v13  ;;  %v3243_v15 = vpop.f32.mrb[165].mxu1  ;;  %4284 = vmatprep.subr.bf16.mxu0 %v8242_v50 }
 0x5fa   : > { %v3244_v51 = vadd.f32 %v10170_v13, %v3243_v15  ;;  %v8022_v53 = vpop.f32.mrb[166].mxu1 }
 0x5fb   : > { %v3255_v46 = vadd.f32 %v8022_v53, %v10170_v13  ;;  %v3246_v43 = vpop.f32.mrb[167].mxu1  ;;  %v3360_v28 = vmax.f32 %v3252_v52, 0.0 }
 0x5fc   : > { %v3247_v54 = vadd.f32 %v10170_v13, %v3246_v43  ;;  %4285 = vmatpush1.bf16.msra.mxu0 %v8240_v14  ;;  %v3358_v41 = vmax.f32 %v3244_v51, 0.0 }
 0x5fd   : > { %v3361_v8 = vmax.f32 %v3255_v46, 0.0  ;;  %4286 = vmatprep.subr.bf16.mxu0 %v8245_v32 }
 0x5fe   : > { %v3359_v55 = vmax.f32 %v3247_v54, 0.0 }
 0x5ff   : > { %v3389_v57 = vpack.c.bf16 %v3361_v8, %v3360_v28 }
 0x600   : > { %v3388_v5 = vpack.c.bf16 %v3359_v55, %v3358_v41  ;;  %4287 = vmatpush1.bf16.msra.mxu0 %v8243_v4  ;;  %v8260_v41 = vld [vmem:[%s11641_s15 + $0x15c] ss:$28 sps:$4 sm:$0xff]  }
 0x601   : > { %4288 = vmatprep.subr.bf16.mxu0 %v8251_v49 }
 0x602   : > { %8059 = vmatprep.mubr.msk.bf16.mxu0 %vm2353_vm2, %v3388_v5 }
 0x603   : > { %8060 = vmatmul.mubr.msk.bf16.gmra.mrb[196].mxu0 %vm2353_vm2, %v3389_v57  ;;  %v8258_v57 = vld [vmem:[%s11641_s15 + $0x158] ss:$28 sps:$4 sm:$0xff]  }
 0x604   : > { %4289 = vmatpush1.bf16.msra.mxu0 %v8249_v59 }
 0x605   : > { %4290 = vmatprep.subr.bf16.mxu0 %v8254_v60 }
 0x608   : > { %v8025_v16 = vpop.f32.mrb[168].mxu1  ;;  %4291 = vmatpush1.bf16.msra.mxu0 %v8252_v3 }
 0x609   : > { %v3268_v31 = vadd.f32 %v8025_v16, %v10170_v13  ;;  %v3259_v29 = vpop.f32.mrb[169].mxu1  ;;  %4292 = vmatprep.subr.bf16.mxu0 %v8260_v41 }
 0x60a   : > { %v3260_v45 = vadd.f32 %v10170_v13, %v3259_v29  ;;  %v8026_v35 = vpop.f32.mrb[170].mxu1  ;;  %v8257_v29 = vld [vmem:[%s11641_s15 + $0x18c] ss:$28 sps:$4 sm:$0xff]  }
 0x60b   : > { %v3271_v61 = vadd.f32 %v8026_v35, %v10170_v13  ;;  %v3262_v48 = vpop.f32.mrb[171].mxu1  ;;  %v3364_v1 = vmax.f32 %v3268_v31, 0.0  ;;  %4101 = vmatprep.subr.bf16.mxu1 %v8257_v29 }
 0x60c   : > { %v3263_v38 = vadd.f32 %v10170_v13, %v3262_v48  ;;  %v3362_v6 = vmax.f32 %v3260_v45, 0.0  ;;  %4293 = vmatpush1.bf16.msra.mxu0 %v8258_v57  ;;  %v8263_v45 = vld [vmem:[%s11641_s15 + $0x194] ss:$28 sps:$4 sm:$0xff]  }
 0x60d   : > { %v3365_v44 = vmax.f32 %v3271_v61, 0.0  ;;  %v8255_v61 = vld [vmem:[%s11641_s15 + $0x188] ss:$28 sps:$4 sm:$0xff]   ;;  %v8261_v48 = vld [vmem:[%s11641_s15 + $0x190] ss:$28 sps:$4 sm:$0xff]   ;;  %4294 = vmatprep.subr.bf16.mxu0 %v8263_v45 }
 0x60e   : > { %v3363_v25 = vmax.f32 %v3263_v38, 0.0  ;;  %4102 = vmatpush1.bf16.msra.mxu1 %v8255_v61 }
 0x60f   : > { %v3391_v56 = vpack.c.bf16 %v3365_v44, %v3364_v1 }
 0x610   : > { %v3390_v17 = vpack.c.bf16 %v3363_v25, %v3362_v6  ;;  %4295 = vmatpush1.bf16.msra.mxu0 %v8261_v48  ;;  %v8276_v48 = vld [vmem:[%s11641_s15 + $0xf0] ss:$28 sps:$4 sm:$0xff]  }
 0x612   : > { %8063 = vmatprep.mubr.msk.bf16.mxu0 %vm2353_vm2, %v3390_v17 }
 0x613   : > { %8064 = vmatmul.mubr.msk.bf16.gmra.mrb[200].mxu0 %vm2353_vm2, %v3391_v56  ;;  %v9202_v56 = vmov 0  }
 0x614   : > { %4119 = vmatprep.mubr.bf16.mxu1 %v9202_v56 }
 0x618   : > { %v8029_v18 = vpop.f32.mrb[172].mxu1 }
 0x619   : > { %v3284_v58 = vadd.f32 %v8029_v18, %v10170_v13  ;;  %v3275_v11 = vpop.f32.mrb[173].mxu1  ;;  %v8266_v18 = vld [vmem:[%s11641_s15 + $0x14] ss:$28 sps:$4 sm:$0xff]  }
 0x61a   : > { %v3276_v62 = vadd.f32 %v10170_v13, %v3275_v11  ;;  %v8030_v20 = vpop.f32.mrb[174].mxu1  ;;  %4473 = vmatprep.subr.bf16.mxu1 %v8266_v18  ;;  %v8284_v18 = vld [vmem:[%s11641_s15 + $0x160] ss:$28 sps:$4 sm:$0xff]  }
 0x61b   : > { %v3287_v2 = vadd.f32 %v8030_v20, %v10170_v13  ;;  %v3278_v21 = vpop.f32.mrb[175].mxu1  ;;  %v3368_v22 = vmax.f32 %v3284_v58, 0.0 }
 0x61c   : > { %v3279_v30 = vadd.f32 %v10170_v13, %v3278_v21  ;;  %v3366_v63 = vmax.f32 %v3276_v62, 0.0 }
 0x61d   : > { %v3369_v0 = vmax.f32 %v3287_v2, 0.0 }
 0x61e   : > { %v3367_v26 = vmax.f32 %v3279_v30, 0.0 }
 0x61f   : > { %v3393_v19 = vpack.c.bf16 %v3369_v0, %v3368_v22 }
 0x620   : > { %v3392_v37 = vpack.c.bf16 %v3367_v26, %v3366_v63 }
 0x622   : > { %8067 = vmatprep.mubr.msk.bf16.mxu0 %vm2353_vm2, %v3392_v37 }
 0x623   : > { %8068 = vmatmul.mubr.msk.bf16.gmra.mrb[204].mxu0 %vm2353_vm2, %v3393_v19 }
 0x628   : > { %v8033_v24 = vpop.f32.mrb[176].mxu1 }
 0x629   : > { %v3300_v33 = vadd.f32 %v8033_v24, %v10170_v13  ;;  %v3291_v7 = vpop.f32.mrb[177].mxu1 }
 0x62a   : > { %v3292_v10 = vadd.f32 %v10170_v13, %v3291_v7  ;;  %v8034_v23 = vpop.f32.mrb[178].mxu1 }
 0x62b   : > { %v3303_v34 = vadd.f32 %v8034_v23, %v10170_v13  ;;  %v3294_v36 = vpop.f32.mrb[179].mxu1  ;;  %v3372_v9 = vmax.f32 %v3300_v33, 0.0  ;;  %v8279_v33 = vld [vmem:[%s11641_s15 + $0x18] ss:$28 sps:$4 sm:$0xff]  }
 0x62c   : > { %v3295_v12 = vadd.f32 %v10170_v13, %v3294_v36  ;;  %v3370_v50 = vmax.f32 %v3292_v10, 0.0  ;;  %8087 = vmatprep.subr.bf16.mxu0 %v8279_v33 }
 0x62d   : > { %v3373_v39 = vmax.f32 %v3303_v34, 0.0 }
 0x62e   : > { %v3371_v42 = vmax.f32 %v3295_v12, 0.0 }
 0x62f   : > { %v3395_v27 = vpack.c.bf16 %v3373_v39, %v3372_v9 }
 0x630   : > { %v3394_v47 = vpack.c.bf16 %v3371_v42, %v3370_v50 }
 0x632   : > { %8071 = vmatprep.mubr.msk.bf16.mxu0 %vm2353_vm2, %v3394_v47 }
 0x633   : > { %8072 = vmatmul.mubr.msk.bf16.gmra.mrb[208].mxu0 %vm2353_vm2, %v3395_v27 }
 0x638   : > { %v8037_v14 = vpop.f32.mrb[180].mxu1 }
 0x639   : > { %v3316_v52 = vadd.f32 %v8037_v14, %v10170_v13  ;;  %v3307_v15 = vpop.f32.mrb[181].mxu1 }
 0x63a   : > { %v3308_v32 = vadd.f32 %v10170_v13, %v3307_v15  ;;  %v8038_v51 = vpop.f32.mrb[182].mxu1 }
 0x63b   : > { %v3319_v53 = vadd.f32 %v8038_v51, %v10170_v13  ;;  %v3310_v40 = vpop.f32.mrb[183].mxu1  ;;  %v3376_v43 = vmax.f32 %v3316_v52, 0.0  ;;  %v8264_v52 = vld [vmem:[%s11641_s15 + $0x10] ss:$28 sps:$4 sm:$0xff]  }
 0x63c   : > { %v3311_v46 = vadd.f32 %v10170_v13, %v3310_v40  ;;  %v3374_v4 = vmax.f32 %v3308_v32, 0.0  ;;  %v8269_v32 = vld [vmem:[%s11641_s15 + $0x4c] ss:$28 sps:$4 sm:$0xff]   ;;  %v8272_v40 = vld [vmem:[%s11641_s15 + $0x84] ss:$28 sps:$4 sm:$0xff]  }
 0x63d   : > { %v3377_v54 = vmax.f32 %v3319_v53, 0.0  ;;  %v8283_v51 = vld [vmem:[%s11641_s15 + $0x50] ss:$28 sps:$4 sm:$0xff]   ;;  %v8267_v53 = vld [vmem:[%s11641_s15 + $0x48] ss:$28 sps:$4 sm:$0xff]  }
 0x63e   : > { %v3375_v28 = vmax.f32 %v3311_v46, 0.0 }
 0x63f   : > { %v3397_v8 = vpack.c.bf16 %v3377_v54, %v3376_v43  ;;  %v8270_v43 = vld [vmem:[%s11641_s15 + $0x80] ss:$28 sps:$4 sm:$0xff]   ;;  %v8287_v54 = vld [vmem:[%s11641_s15 + $0x88] ss:$28 sps:$4 sm:$0xff]  }
 0x640   : > { %v3396_v49 = vpack.c.bf16 %v3375_v28, %v3374_v4 }
 0x642   : > { %8075 = vmatprep.mubr.msk.bf16.mxu0 %vm2353_vm2, %v3396_v49 }
 0x643   : > { %8076 = vmatmul.mubr.msk.bf16.gmra.mrb[212].mxu0 %vm2353_vm2, %v3397_v8  ;;  %v8275_v8 = vld [vmem:[%s11641_s15 + $0xbc] ss:$28 sps:$4 sm:$0xff]  }
 0x648   : > { %v8041_v55 = vpop.f32.mrb[184].mxu1 }
 0x649   : > { %v3332_v5 = vadd.f32 %v8041_v55, %v10170_v13  ;;  %v3323_v59 = vpop.f32.mrb[185].mxu1  ;;  %v8288_v55 = vld [vmem:[%s11641_s15 + $0xc0] ss:$28 sps:$4 sm:$0xff]  }
 0x64a   : > { %v3324_v60 = vadd.f32 %v10170_v13, %v3323_v59  ;;  %v8042_v3 = vpop.f32.mrb[186].mxu1 }
 0x64b   : > { %v3335_v16 = vadd.f32 %v8042_v3, %v10170_v13  ;;  %v3326_v31 = vpop.f32.mrb[187].mxu1  ;;  %v3380_v38 = vmax.f32 %v3332_v5, 0.0 }
 0x64c   : > { %v3327_v35 = vadd.f32 %v10170_v13, %v3326_v31  ;;  %v3378_v44 = vmax.f32 %v3324_v60, 0.0  ;;  %v8273_v60 = vld [vmem:[%s11641_s15 + $0xb8] ss:$28 sps:$4 sm:$0xff]  }
 0x64d   : > { %v3381_v1 = vmax.f32 %v3335_v16, 0.0  ;;  %v8278_v31 = vld [vmem:[%s11641_s15 + $0xf4] ss:$28 sps:$4 sm:$0xff]  }
 0x64e   : > { %v3379_v6 = vmax.f32 %v3327_v35, 0.0 }
 0x64f   : > { %v3399_v25 = vpack.c.bf16 %v3381_v1, %v3380_v38  ;;  %v8292_v38 = vld [vmem:[%s11641_s15 + $0xf8] ss:$28 sps:$4 sm:$0xff]   ;;  %v8282_v1 = vld [vmem:[%s11641_s15 + $0x12c] ss:$28 sps:$4 sm:$0xff]  }
 0x650   : > { %v3398_v17 = vpack.c.bf16 %v3379_v6, %v3378_v44  ;;  %v8293_v44 = vld [vmem:[%s11641_s15 + $0x130] ss:$28 sps:$4 sm:$0xff]   ;;  %v8280_v6 = vld [vmem:[%s11641_s15 + $0x128] ss:$28 sps:$4 sm:$0xff]  }
 0x652   : > { %8079 = vmatprep.mubr.msk.bf16.mxu0 %vm2353_vm2, %v3398_v17 }
 0x653   : > { %8080 = vmatmul.mubr.msk.bf16.gmra.mrb[216].mxu0 %vm2353_vm2, %v3399_v25  ;;  %v8286_v25 = vld [vmem:[%s11641_s15 + $0x164] ss:$28 sps:$4 sm:$0xff]  }
 0x658   : > { %v8045_v58 = vpop.f32.mrb[188].mxu1 }
 0x659   : > { %v3348_v11 = vadd.f32 %v8045_v58, %v10170_v13  ;;  %v3339_v62 = vpop.f32.mrb[189].mxu1  ;;  %v8294_v58 = vld [vmem:[%s11641_s15 + $0x168] ss:$28 sps:$4 sm:$0xff]  }
 0x65a   : > { %v3340_v20 = vadd.f32 %v10170_v13, %v3339_v62  ;;  %v8046_v2 = vpop.f32.mrb[190].mxu1 }
 0x65b   : > { %v3351_v21 = vadd.f32 %v8046_v2, %v10170_v13  ;;  %v3342_v30 = vpop.f32.mrb[191].mxu1  ;;  %v3384_v0 = vmax.f32 %v3348_v11, 0.0 }
 0x65c   : > { %v3343_v22 = vadd.f32 %v10170_v13, %v3342_v30  ;;  %v3382_v26 = vmax.f32 %v3340_v20, 0.0  ;;  %v10318_v13 = vld [vmem:[%s11640_s14] ss:$0 sm:$0xff]  ;;  %v8291_v20 = vld [vmem:[%s11641_s15 + $0x19c] ss:$28 sps:$4 sm:$0xff]  }
 0x65d   : > { %v3385_v63 = vmax.f32 %v3351_v21, 0.0  ;;  %v8295_v30 = vld [vmem:[%s11641_s15 + $0x1a0] ss:$28 sps:$4 sm:$0xff]  }
 0x65e   : > { %v3383_v19 = vmax.f32 %v3343_v22, 0.0 }
 0x65f   : > { %v3401_v37 = vpack.c.bf16 %v3385_v63, %v3384_v0 }
 0x660   : > { %v3400_v24 = vpack.c.bf16 %v3383_v19, %v3382_v26  ;;  %v8289_v26 = vld [vmem:[%s11641_s15 + $0x198] ss:$28 sps:$4 sm:$0xff]  }
 0x662   : > { %8083 = vmatprep.mubr.msk.bf16.mxu0 %vm2353_vm2, %v3400_v24 }
 0x663   : > { %8084 = vmatmul.mubr.msk.bf16.gmra.mrb[220].mxu0 %vm2353_vm2, %v3401_v37 }
 0x664   : > { %4312 = vmatprep.mubr.bf16.mxu0 %v9202_v56 }
 0x6c6   : > { %v8057_v7 = vpop.f32.mrb[192].mxu0 }
 0x6c7   : > { %v3532_v10 = vadd.f32 %v8057_v7, %v10318_v13  ;;  %v3523_v23 = vpop.f32.mrb[193].mxu0 }
 0x6c8   : > { %v3524_v34 = vadd.f32 %v10318_v13, %v3523_v23  ;;  %v8058_v36 = vpop.f32.mrb[194].mxu0 }
 0x6c9   : > { %v3535_v12 = vadd.f32 %v8058_v36, %v10318_v13  ;;  %v3526_v9 = vpop.f32.mrb[195].mxu0  ;;  %v3652_v50 = vmax.f32 %v3532_v10, 0.0 }
 0x6ca   : > { %v3527_v39 = vadd.f32 %v10318_v13, %v3526_v9  ;;  %v3650_v27 = vmax.f32 %v3524_v34, 0.0 }
 0x6cb   : > { %v3653_v42 = vmax.f32 %v3535_v12, 0.0 }
 0x6cc   : > { %v3651_v47 = vmax.f32 %v3527_v39, 0.0 }
 0x6cd   : > { %v10324_v14 = vpack.c.bf16 %v3653_v42, %v3652_v50 }
 0x6ce   : > { %v10329_v15 = vpack.c.bf16 %v3651_v47, %v3650_v27 }
 0x6d0   : > { %4120 = vmatmul.mubr.bf16.vlgmr.msra.gmra.mrb[192].mxu1 %v10329_v15  ;;  %4313 = vmatmul.mubr.bf16.vlgmr.msra.gmra.mrb[224].mxu0 %v10329_v15 }
 0x6d1   : > { %4474 = vmatpush1.bf16.msra.mxu1 %v8264_v52  ;;  %4129 = vmatprep.mubr.bf16.mxu1 %v9202_v56 }
 0x6d2   : > { %4322 = vmatprep.mubr.bf16.mxu0 %v9202_v56  ;;  %4475 = vmatprep.subr.bf16.mxu1 %v8269_v32 }
 0x6d3   : > { %8088 = vmatpush3.bf16.msra.mxu0 %v8279_v33 }
 0x6d4   : > { %8089 = vmatprep.subr.bf16.mxu0 %v8283_v51 }
 0x6d5   : > { %4476 = vmatpush1.bf16.msra.mxu1 %v8267_v53 }
 0x6d6   : > { %v8061_v46 = vpop.f32.mrb[196].mxu0  ;;  %4477 = vmatprep.subr.bf16.mxu1 %v8272_v40 }
 0x6d7   : > { %v3548_v4 = vadd.f32 %v8061_v46, %v10318_v13  ;;  %v3539_v28 = vpop.f32.mrb[197].mxu0  ;;  %8090 = vmatpush3.bf16.msra.mxu0 %v8283_v51 }
 0x6d8   : > { %v3540_v49 = vadd.f32 %v10318_v13, %v3539_v28  ;;  %v8062_v41 = vpop.f32.mrb[198].mxu0  ;;  %4130 = vmatmul.mubr.bf16.gmra.mrb[196].mxu1 %v10324_v14  ;;  %4323 = vmatmul.mubr.bf16.gmra.mrb[228].mxu0 %v10324_v14 }
 0x6d9   : > { %v3551_v57 = vadd.f32 %v8062_v41, %v10318_v13  ;;  %v3542_v5 = vpop.f32.mrb[199].mxu0  ;;  %4139 = vmatprep.mubr.bf16.mxu1 %v9202_v56  ;;  %4332 = vmatprep.mubr.bf16.mxu0 %v9202_v56  ;;  %v3656_v3 = vmax.f32 %v3548_v4, 0.0 }
 0x6da   : > { %v3543_v59 = vadd.f32 %v10318_v13, %v3542_v5  ;;  %4478 = vmatpush1.bf16.msra.mxu1 %v8270_v43  ;;  %8091 = vmatprep.subr.bf16.mxu0 %v8287_v54  ;;  %v3654_v29 = vmax.f32 %v3540_v49, 0.0 }
 0x6db   : > { %v3657_v16 = vmax.f32 %v3551_v57, 0.0  ;;  %4479 = vmatprep.subr.bf16.mxu1 %v8275_v8  ;;  %8092 = vmatpush3.bf16.msra.mxu0 %v8287_v54 }
 0x6dc   : > { %v3655_v45 = vmax.f32 %v3543_v59, 0.0  ;;  %8093 = vmatprep.subr.bf16.mxu0 %v8288_v55 }
 0x6dd   : > { %v10373_v35 = vpack.c.bf16 %v3657_v16, %v3656_v3 }
 0x6de   : > { %v10375_v61 = vpack.c.bf16 %v3655_v45, %v3654_v29  ;;  %4480 = vmatpush1.bf16.msra.mxu1 %v8273_v60 }
 0x6df   : > { %4481 = vmatprep.subr.bf16.mxu1 %v8278_v31  ;;  %8094 = vmatpush3.bf16.msra.mxu0 %v8288_v55 }
 0x6e0   : > { %4140 = vmatmul.mubr.bf16.gmra.mrb[200].mxu1 %v10375_v61  ;;  %4333 = vmatmul.mubr.bf16.gmra.mrb[232].mxu0 %v10375_v61 }
 0x6e1   : > { %4149 = vmatprep.mubr.bf16.mxu1 %v9202_v56  ;;  %4342 = vmatprep.mubr.bf16.mxu0 %v9202_v56 }
 0x6e2   : > { %4482 = vmatpush1.bf16.msra.mxu1 %v8276_v48  ;;  %8095 = vmatprep.subr.bf16.mxu0 %v8292_v38 }
 0x6e3   : > { %4483 = vmatprep.subr.bf16.mxu1 %v8282_v1  ;;  %8096 = vmatpush3.bf16.msra.mxu0 %v8292_v38 }
 0x6e4   : > { %8097 = vmatprep.subr.bf16.mxu0 %v8293_v44 }
 0x6e6   : > { %v8065_v17 = vpop.f32.mrb[200].mxu0  ;;  %4484 = vmatpush1.bf16.msra.mxu1 %v8280_v6 }
 0x6e7   : > { %v3564_v11 = vadd.f32 %v8065_v17, %v10318_v13  ;;  %v3555_v62 = vpop.f32.mrb[201].mxu0  ;;  %4485 = vmatprep.subr.bf16.mxu1 %v8286_v25  ;;  %8098 = vmatpush3.bf16.msra.mxu0 %v8293_v44 }
 0x6e8   : > { %v3556_v2 = vadd.f32 %v10318_v13, %v3555_v62  ;;  %v8066_v21 = vpop.f32.mrb[202].mxu0  ;;  %4150 = vmatmul.mubr.bf16.gmra.mrb[204].mxu1 %v10373_v35  ;;  %4343 = vmatmul.mubr.bf16.gmra.mrb[236].mxu0 %v10373_v35 }
 0x6e9   : > { %v3567_v22 = vadd.f32 %v8066_v21, %v10318_v13  ;;  %v3558_v0 = vpop.f32.mrb[203].mxu0  ;;  %4159 = vmatprep.mubr.bf16.mxu1 %v9202_v56  ;;  %4352 = vmatprep.mubr.bf16.mxu0 %v9202_v56  ;;  %v3660_v19 = vmax.f32 %v3564_v11, 0.0 }
 0x6ea   : > { %v3559_v63 = vadd.f32 %v10318_v13, %v3558_v0  ;;  %4486 = vmatpush1.bf16.msra.mxu1 %v8284_v18  ;;  %8099 = vmatprep.subr.bf16.mxu0 %v8294_v58  ;;  %v3658_v24 = vmax.f32 %v3556_v2, 0.0 }
 0x6eb   : > { %v3661_v37 = vmax.f32 %v3567_v22, 0.0  ;;  %4487 = vmatprep.subr.bf16.mxu1 %v8291_v20  ;;  %8100 = vmatpush3.bf16.msra.mxu0 %v8294_v58 }
 0x6ec   : > { %v3659_v33 = vmax.f32 %v3559_v63, 0.0  ;;  %8101 = vmatprep.subr.bf16.mxu0 %v8295_v30 }
 0x6ed   : > { %v10422_v7 = vpack.c.bf16 %v3661_v37, %v3660_v19 }
 0x6ee   : > { %v10424_v10 = vpack.c.bf16 %v3659_v33, %v3658_v24  ;;  %4488 = vmatpush1.bf16.msra.mxu1 %v8289_v26 }
 0x6ef   : > { %8102 = vmatpush3.bf16.msra.mxu0 %v8295_v30 }
 0x6f0   : > { %4160 = vmatmul.mubr.bf16.gmra.mrb[208].mxu1 %v10424_v10  ;;  %4353 = vmatmul.mubr.bf16.gmra.mrb[240].mxu0 %v10424_v10 }
 0x6f1   : > { %4169 = vmatprep.mubr.bf16.mxu1 %v9202_v56  ;;  %4362 = vmatprep.mubr.bf16.mxu0 %v9202_v56 }
 0x6f6   : > { %v8069_v23 = vpop.f32.mrb[204].mxu0 }
 0x6f7   : > { %v3580_v34 = vadd.f32 %v8069_v23, %v10318_v13  ;;  %v3571_v36 = vpop.f32.mrb[205].mxu0 }
 0x6f8   : > { %v3572_v12 = vadd.f32 %v10318_v13, %v3571_v36  ;;  %v8070_v9 = vpop.f32.mrb[206].mxu0  ;;  %4170 = vmatmul.mubr.bf16.gmra.mrb[212].mxu1 %v10422_v7  ;;  %4363 = vmatmul.mubr.bf16.gmra.mrb[244].mxu0 %v10422_v7 }
 0x6f9   : > { %v3583_v39 = vadd.f32 %v8070_v9, %v10318_v13  ;;  %v3574_v50 = vpop.f32.mrb[207].mxu0  ;;  %4179 = vmatprep.mubr.bf16.mxu1 %v9202_v56  ;;  %4372 = vmatprep.mubr.bf16.mxu0 %v9202_v56  ;;  %v3664_v27 = vmax.f32 %v3580_v34, 0.0 }
 0x6fa   : > { %v3575_v42 = vadd.f32 %v10318_v13, %v3574_v50  ;;  %v3662_v52 = vmax.f32 %v3572_v12, 0.0 }
 0x6fb   : > { %v3665_v47 = vmax.f32 %v3583_v39, 0.0 }
 0x6fc   : > { %v3663_v32 = vmax.f32 %v3575_v42, 0.0 }
 0x6fd   : > { %v10438_v51 = vpack.c.bf16 %v3665_v47, %v3664_v27 }
 0x6fe   : > { %v10440_v53 = vpack.c.bf16 %v3663_v32, %v3662_v52 }
 0x700   : > { %4180 = vmatmul.mubr.bf16.gmra.mrb[216].mxu1 %v10440_v53  ;;  %4373 = vmatmul.mubr.bf16.gmra.mrb[248].mxu0 %v10440_v53 }
 0x701   : > { %4189 = vmatprep.mubr.bf16.mxu1 %v9202_v56  ;;  %4382 = vmatprep.mubr.bf16.mxu0 %v9202_v56 }
 0x706   : > { %v8073_v40 = vpop.f32.mrb[208].mxu0 }
 0x707   : > { %v3596_v46 = vadd.f32 %v8073_v40, %v10318_v13  ;;  %v3587_v43 = vpop.f32.mrb[209].mxu0 }
 0x708   : > { %v3588_v54 = vadd.f32 %v10318_v13, %v3587_v43  ;;  %v8074_v4 = vpop.f32.mrb[210].mxu0  ;;  %4190 = vmatmul.mubr.bf16.gmra.mrb[220].mxu1 %v10438_v51  ;;  %4383 = vmatmul.mubr.bf16.gmra.mrb[252].mxu0 %v10438_v51 }
 0x709   : > { %v3599_v28 = vadd.f32 %v8074_v4, %v10318_v13  ;;  %v3590_v8 = vpop.f32.mrb[211].mxu0  ;;  %4199 = vmatprep.mubr.bf16.mxu1 %v9202_v56  ;;  %4392 = vmatprep.mubr.bf16.mxu0 %v9202_v56  ;;  %v3668_v41 = vmax.f32 %v3596_v46, 0.0 }
 0x70a   : > { %v3591_v49 = vadd.f32 %v10318_v13, %v3590_v8  ;;  %v3666_v57 = vmax.f32 %v3588_v54, 0.0 }
 0x70b   : > { %v3669_v55 = vmax.f32 %v3599_v28, 0.0 }
 0x70c   : > { %v3667_v5 = vmax.f32 %v3591_v49, 0.0 }
 0x70d   : > { %v10454_v59 = vpack.c.bf16 %v3669_v55, %v3668_v41 }
 0x70e   : > { %v10456_v60 = vpack.c.bf16 %v3667_v5, %v3666_v57 }
 0x710   : > { %4200 = vmatmul.mubr.bf16.gmra.mrb[224].mxu1 %v10456_v60  ;;  %4393 = vmatmul.mubr.bf16.gmra.mrb[0].mxu0 %v10456_v60 }
 0x711   : > { %4209 = vmatprep.mubr.bf16.mxu1 %v9202_v56  ;;  %4402 = vmatprep.mubr.bf16.mxu0 %v9202_v56 }
 0x716   : > { %v8077_v3 = vpop.f32.mrb[212].mxu0 }
 0x717   : > { %v3612_v16 = vadd.f32 %v8077_v3, %v10318_v13  ;;  %v3603_v31 = vpop.f32.mrb[213].mxu0 }
 0x718   : > { %v3604_v29 = vadd.f32 %v10318_v13, %v3603_v31  ;;  %v8078_v45 = vpop.f32.mrb[214].mxu0  ;;  %4210 = vmatmul.mubr.bf16.gmra.mrb[228].mxu1 %v10454_v59  ;;  %4403 = vmatmul.mubr.bf16.gmra.mrb[4].mxu0 %v10454_v59 }
 0x719   : > { %v3615_v48 = vadd.f32 %v8078_v45, %v10318_v13  ;;  %v3606_v38 = vpop.f32.mrb[215].mxu0  ;;  %4219 = vmatprep.mubr.bf16.mxu1 %v9202_v56  ;;  %4412 = vmatprep.mubr.bf16.mxu0 %v9202_v56  ;;  %v3672_v44 = vmax.f32 %v3612_v16, 0.0 }
 0x71a   : > { %v3607_v1 = vadd.f32 %v10318_v13, %v3606_v38  ;;  %v3670_v25 = vmax.f32 %v3604_v29, 0.0 }
 0x71b   : > { %v3673_v6 = vmax.f32 %v3615_v48, 0.0 }
 0x71c   : > { %v3671_v17 = vmax.f32 %v3607_v1, 0.0 }
 0x71d   : > { %v10470_v18 = vpack.c.bf16 %v3673_v6, %v3672_v44 }
 0x71e   : > { %v10472_v58 = vpack.c.bf16 %v3671_v17, %v3670_v25 }
 0x720   : > { %4220 = vmatmul.mubr.bf16.gmra.mrb[232].mxu1 %v10472_v58  ;;  %4413 = vmatmul.mubr.bf16.gmra.mrb[8].mxu0 %v10472_v58 }
 0x721   : > { %4229 = vmatprep.mubr.bf16.mxu1 %v9202_v56  ;;  %4422 = vmatprep.mubr.bf16.mxu0 %v9202_v56 }
 0x726   : > { %v8081_v11 = vpop.f32.mrb[216].mxu0 }
 0x727   : > { %v3628_v62 = vadd.f32 %v8081_v11, %v10318_v13  ;;  %v3619_v20 = vpop.f32.mrb[217].mxu0 }
 0x728   : > { %v3620_v2 = vadd.f32 %v10318_v13, %v3619_v20  ;;  %v8082_v21 = vpop.f32.mrb[218].mxu0  ;;  %4230 = vmatmul.mubr.bf16.gmra.mrb[236].mxu1 %v10470_v18  ;;  %4423 = vmatmul.mubr.bf16.gmra.mrb[12].mxu0 %v10470_v18 }
 0x729   : > { %v3631_v30 = vadd.f32 %v8082_v21, %v10318_v13  ;;  %v3622_v22 = vpop.f32.mrb[219].mxu0  ;;  %4239 = vmatprep.mubr.bf16.mxu1 %v9202_v56  ;;  %4432 = vmatprep.mubr.bf16.mxu0 %v9202_v56  ;;  %v3676_v63 = vmax.f32 %v3628_v62, 0.0 }
 0x72a   : > { %v3623_v0 = vadd.f32 %v10318_v13, %v3622_v22  ;;  %v3674_v19 = vmax.f32 %v3620_v2, 0.0 }
 0x72b   : > { %v3677_v26 = vmax.f32 %v3631_v30, 0.0 }
 0x72c   : > { %v3675_v37 = vmax.f32 %v3623_v0, 0.0 }
 0x72d   : > { %v10486_v24 = vpack.c.bf16 %v3677_v26, %v3676_v63 }
 0x72e   : > { %v10488_v33 = vpack.c.bf16 %v3675_v37, %v3674_v19 }
 0x730   : > { %4240 = vmatmul.mubr.bf16.gmra.mrb[240].mxu1 %v10488_v33  ;;  %4433 = vmatmul.mubr.bf16.gmra.mrb[16].mxu0 %v10488_v33 }
 0x731   : > { %4249 = vmatprep.mubr.bf16.mxu1 %v9202_v56  ;;  %4442 = vmatprep.mubr.bf16.mxu0 %v9202_v56 }
 0x736   : > { %v8085_v23 = vpop.f32.mrb[220].mxu0 }
 0x737   : > { %v3644_v34 = vadd.f32 %v8085_v23, %v10318_v13  ;;  %v3635_v36 = vpop.f32.mrb[221].mxu0 }
 0x738   : > { %v3636_v12 = vadd.f32 %v10318_v13, %v3635_v36  ;;  %v8086_v9 = vpop.f32.mrb[222].mxu0  ;;  %4250 = vmatmul.mubr.bf16.gmra.mrb[244].mxu1 %v10486_v24  ;;  %4443 = vmatmul.mubr.bf16.gmra.mrb[20].mxu0 %v10486_v24 }
 0x739   : > { %v3647_v39 = vadd.f32 %v8086_v9, %v10318_v13  ;;  %v3638_v50 = vpop.f32.mrb[223].mxu0  ;;  %4259 = vmatprep.mubr.bf16.mxu1 %v9202_v56  ;;  %4452 = vmatprep.mubr.bf16.mxu0 %v9202_v56  ;;  %v3680_v27 = vmax.f32 %v3644_v34, 0.0 }
 0x73a   : > { %v3639_v42 = vadd.f32 %v10318_v13, %v3638_v50  ;;  %v3678_v52 = vmax.f32 %v3636_v12, 0.0  ;;  %v3764_v13 = vlaneseq }
 0x73b   : > { %v3681_v47 = vmax.f32 %v3647_v39, 0.0 }
 0x73c   : > { %v3679_v32 = vmax.f32 %v3639_v42, 0.0 }
 0x73d   : > { %v10502_v40 = vpack.c.bf16 %v3681_v47, %v3680_v27 }
 0x73e   : > { %v10504_v46 = vpack.c.bf16 %v3679_v32, %v3678_v52 }
 0x740   : > { %4260 = vmatmul.mubr.bf16.gmra.mrb[248].mxu1 %v10504_v46  ;;  %4453 = vmatmul.mubr.bf16.gmra.mrb[24].mxu0 %v10504_v46 }
 0x741   : > { %4269 = vmatprep.mubr.bf16.mxu1 %v9202_v56  ;;  %4462 = vmatprep.mubr.bf16.mxu0 %v9202_v56 }
 0x748   : > { %4270 = vmatmul.mubr.bf16.gmra.mrb[252].mxu1 %v10502_v40  ;;  %4463 = vmatmul.mubr.bf16.gmra.mrb[28].mxu0 %v10502_v40 }
 0x749   : > { %8103 = vmatprep.mubr.bf16.mxu0 %v10329_v15  ;;  %4505 = vmatprep.mubr.bf16.mxu1 %v9202_v56 }
 0x750   : > { %4506 = vmatmul.mubr.bf16.vlgmr.msra.gmra.mrb[0].mxu1 %v10329_v15  ;;  %8104 = vmatmul.mubr.bf16.vlgmr.msra.gmra.mrb[32].mxu0 %v10324_v14 }
 0x751   : > { %8107 = vmatprep.mubr.bf16.mxu0 %v10375_v61  ;;  %4515 = vmatprep.mubr.bf16.mxu1 %v9202_v56 }
 0x758   : > { %4516 = vmatmul.mubr.bf16.gmra.mrb[4].mxu1 %v10324_v14  ;;  %8108 = vmatmul.mubr.bf16.gmra.mrb[36].mxu0 %v10373_v35  ;;  %v10548_v14 = vshrl.u32 %v3764_v13, 7 }
 0x759   : > { %8111 = vmatprep.mubr.bf16.mxu0 %v10424_v10  ;;  %4525 = vmatprep.mubr.bf16.mxu1 %v9202_v56 }
 0x75a   : > { %11651 = vst [vmem:[#allocation2_spill] sm:$0xff] %v10548_v14  ;;  %v3766_v15 = vsub.s32 0, %v10548_v14 }
 0x760   : > { %4526 = vmatmul.mubr.bf16.gmra.mrb[8].mxu1 %v10375_v61  ;;  %8112 = vmatmul.mubr.bf16.gmra.mrb[40].mxu0 %v10422_v7  ;;  %v3762_v61 = vld [vmem:[%s11642_s16] sm:$0x7f] }
 0x761   : > { %8115 = vmatprep.mubr.bf16.mxu0 %v10440_v53  ;;  %4535 = vmatprep.mubr.bf16.mxu1 %v9202_v56 }
 0x768   : > { %4536 = vmatmul.mubr.bf16.gmra.mrb[12].mxu1 %v10373_v35  ;;  %8116 = vmatmul.mubr.bf16.gmra.mrb[44].mxu0 %v10438_v51  ;;  %v3774_v35 = vsub.s32 2, %v10548_v14 }
 0x769   : > { %8119 = vmatprep.mubr.bf16.mxu0 %v10456_v60  ;;  %4545 = vmatprep.mubr.bf16.mxu1 %v9202_v56 }
 0x770   : > { %4546 = vmatmul.mubr.bf16.gmra.mrb[16].mxu1 %v10424_v10  ;;  %8120 = vmatmul.mubr.bf16.gmra.mrb[48].mxu0 %v10454_v59  ;;  %v3778_v10 = vsub.s32 3, %v10548_v14 }
 0x771   : > { %8123 = vmatprep.mubr.bf16.mxu0 %v10472_v58  ;;  %4555 = vmatprep.mubr.bf16.mxu1 %v9202_v56 }
 0x772   : > { %v10565_v54 = vrot.slane %v3762_v61, %v3778_v10 }
 0x778   : > { %4556 = vmatmul.mubr.bf16.gmra.mrb[20].mxu1 %v10422_v7  ;;  %8124 = vmatmul.mubr.bf16.gmra.mrb[52].mxu0 %v10470_v18  ;;  %v3770_v7 = vsub.s32 1, %v10548_v14 }
 0x779   : > { %8127 = vmatprep.mubr.bf16.mxu0 %v10488_v33  ;;  %4565 = vmatprep.mubr.bf16.mxu1 %v9202_v56 }
 0x77a   : > { %v10563_v43 = vrot.slane %v3762_v61, %v3770_v7 }
 0x780   : > { %4566 = vmatmul.mubr.bf16.gmra.mrb[24].mxu1 %v10440_v53  ;;  %8128 = vmatmul.mubr.bf16.gmra.mrb[56].mxu0 %v10486_v24  ;;  %v10561_v53 = vrot.slane %v3762_v61, %v3774_v35 }
 0x781   : > { %8131 = vmatprep.mubr.bf16.mxu0 %v10504_v46  ;;  %4575 = vmatprep.mubr.bf16.mxu1 %v9202_v56 }
 0x788   : > { %4576 = vmatmul.mubr.bf16.gmra.mrb[28].mxu1 %v10438_v51  ;;  %8132 = vmatmul.mubr.bf16.gmra.mrb[60].mxu0 %v10502_v40  ;;  %v10559_v51 = vrot.slane %v3762_v61, %v3766_v15 }
 0x789   : > { %4585 = vmatprep.mubr.bf16.mxu1 %v9202_v56 }
 0x790   : > { %4586 = vmatmul.mubr.bf16.gmra.mrb[32].mxu1 %v10456_v60 }
 0x791   : > { %4595 = vmatprep.mubr.bf16.mxu1 %v9202_v56 }
 0x798   : > { %4596 = vmatmul.mubr.bf16.gmra.mrb[36].mxu1 %v10454_v59 }
 0x799   : > { %4605 = vmatprep.mubr.bf16.mxu1 %v9202_v56 }
 0x7a0   : > { %4606 = vmatmul.mubr.bf16.gmra.mrb[40].mxu1 %v10472_v58 }
 0x7a1   : > { %4615 = vmatprep.mubr.bf16.mxu1 %v9202_v56 }
 0x7a3   : > { %v4121_v4 = vpop.f32.mrb[192].mxu1  ;;  %v4314_v28 = vpop.f32.mrb[224].mxu0 }
 0x7a4   : > { %v4122_v8 = vadd.f32 %v4121_v4, %v10559_v51  ;;  %v4315_v49 = vadd.f32 %v4314_v28, %v10561_v53  ;;  %v4123_v41 = vpop.f32.mrb[193].mxu1  ;;  %v4316_v55 = vpop.f32.mrb[225].mxu0 }
 0x7a5   : > { %v4124_v57 = vadd.f32 %v4123_v41, %v10563_v43  ;;  %v4317_v5 = vadd.f32 %v4316_v55, %v10565_v54  ;;  %v4125_v59 = vpop.f32.mrb[194].mxu1  ;;  %v4318_v60 = vpop.f32.mrb[226].mxu0 }
 0x7a6   : > { %v4827_v3 = vsub.f32 0.0, %v4122_v8  ;;  %v4829_v16 = vsub.f32 0.0, %v4315_v49  ;;  %v4126_v31 = vadd.f32 %v4125_v59, %v10559_v51  ;;  %v4319_v29 = vadd.f32 %v4318_v60, %v10561_v53  ;;  %v4127_v45 = vpop.f32.mrb[195].mxu1  ;;  %v4320_v48 = vpop.f32.mrb[227].mxu0 }
 0x7a7   : > { %v4828_v38 = vsub.f32 0.0, %v4124_v57  ;;  %v4830_v1 = vsub.f32 0.0, %v4317_v5  ;;  %v4128_v44 = vadd.f32 %v4127_v45, %v10563_v43  ;;  %v4321_v6 = vadd.f32 %v4320_v48, %v10565_v54 }
 0x7a8   : > { %v5051_v25 = vmul.f32 1.442695, %v4827_v3  ;;  %v5055_v17 = vmul.f32 1.442695, %v4829_v16  ;;  %v4834_v58 = vsub.f32 0.0, %v4126_v31  ;;  %v4836_v11 = vsub.f32 0.0, %v4319_v29  ;;  %4616 = vmatmul.mubr.bf16.gmra.mrb[44].mxu1 %v10470_v18 }
 0x7a9   : > { %v5053_v62 = vmul.f32 1.442695, %v4828_v38  ;;  %v5057_v20 = vmul.f32 1.442695, %v4830_v1  ;;  %v4835_v2 = vsub.f32 0.0, %v4128_v44  ;;  %v4837_v21 = vsub.f32 0.0, %v4321_v6  ;;  %4625 = vmatprep.mubr.bf16.mxu1 %v9202_v56 }
 0x7aa   : > { %8296 = vpow2.f32 %v5051_v25  ;;  %v5065_v30 = vmul.f32 1.442695, %v4834_v58  ;;  %v5069_v22 = vmul.f32 1.442695, %v4836_v11 }
 0x7ab   : > { %8298 = vpow2.f32 %v5055_v17  ;;  %v4131_v0 = vpop.f32.mrb[196].mxu1  ;;  %v4324_v63 = vpop.f32.mrb[228].mxu0  ;;  %v5067_v26 = vmul.f32 1.442695, %v4835_v2  ;;  %v5071_v34 = vmul.f32 1.442695, %v4837_v21 }
 0x7ac   : > { %8300 = vpow2.f32 %v5053_v62  ;;  %v4132_v19 = vadd.f32 %v4131_v0, %v10559_v51  ;;  %v4325_v37 = vadd.f32 %v4324_v63, %v10561_v53  ;;  %v4133_v23 = vpop.f32.mrb[197].mxu1  ;;  %v4326_v18 = vpop.f32.mrb[229].mxu0 }
 0x7ad   : > { %8302 = vpow2.f32 %v5057_v20  ;;  %v4134_v36 = vadd.f32 %v4133_v23, %v10563_v43  ;;  %v4327_v12 = vadd.f32 %v4326_v18, %v10565_v54  ;;  %v4135_v9 = vpop.f32.mrb[198].mxu1  ;;  %v4328_v39 = vpop.f32.mrb[230].mxu0 }
 0x7ae   : > { %8304 = vpow2.f32 %v5065_v30  ;;  %v4841_v50 = vsub.f32 0.0, %v4132_v19  ;;  %v4843_v42 = vsub.f32 0.0, %v4325_v37  ;;  %v4136_v27 = vadd.f32 %v4135_v9, %v10559_v51  ;;  %v4137_v47 = vpop.f32.mrb[199].mxu1  ;;  %v4330_v52 = vpop.f32.mrb[231].mxu0 }
 0x7af   : > { %8306 = vpow2.f32 %v5069_v22  ;;  %v4842_v32 = vsub.f32 0.0, %v4134_v36  ;;  %v4844_v13 = vsub.f32 0.0, %v4327_v12  ;;  %v4329_v41 = vadd.f32 %v4328_v39, %v10561_v53 }
 0x7b0   : > { %8308 = vpow2.f32 %v5067_v26  ;;  %v5079_v15 = vmul.f32 1.442695, %v4841_v50  ;;  %v5083_v35 = vmul.f32 1.442695, %v4843_v42  ;;  %v4848_v61 = vsub.f32 0.0, %v4136_v27  ;;  %4626 = vmatmul.mubr.bf16.gmra.mrb[48].mxu1 %v10488_v33 }
 0x7b1   : > { %8310 = vpow2.f32 %v5071_v34  ;;  %v5081_v7 = vmul.f32 1.442695, %v4842_v32  ;;  %v5085_v10 = vmul.f32 1.442695, %v4844_v13  ;;  %4635 = vmatprep.mubr.bf16.mxu1 %v9202_v56  ;;  %v4138_v33 = vadd.f32 %v4137_v47, %v10563_v43 }
 0x7b2   : > { %8312 = vpow2.f32 %v5079_v15  ;;  %v5093_v4 = vmul.f32 1.442695, %v4848_v61  ;;  %v4850_v6 = vsub.f32 0.0, %v4329_v41  ;;  %v4331_v25 = vadd.f32 %v4330_v52, %v10565_v54 }
 0x7b3   : > { %8314 = vpow2.f32 %v5083_v35  ;;  %v4141_v28 = vpop.f32.mrb[200].mxu1  ;;  %v4334_v8 = vpop.f32.mrb[232].mxu0  ;;  %v4849_v11 = vsub.f32 0.0, %v4138_v33 }
 0x7b4   : > { %v8297_v49 = vpop.eup %8296  ;;  %8316 = vpow2.f32 %v5081_v7  ;;  %v4143_v55 = vpop.f32.mrb[201].mxu1  ;;  %v4142_v2 = vadd.f32 %v4141_v28, %v10559_v51  ;;  %v4335_v22 = vadd.f32 %v4334_v8, %v10561_v53  ;;  %v5097_v19 = vmul.f32 1.442695, %v4850_v6 }
 0x7b5   : > { %v4336_v57 = vpop.f32.mrb[233].mxu0  ;;  %v8299_v5 = vpop.eup %8298  ;;  %v5499_v59 = vadd.f32 1.0, %v8297_v49  ;;  %8318 = vpow2.f32 %v5085_v10  ;;  %v4851_v37 = vsub.f32 0.0, %v4331_v25  ;;  %v5095_v12 = vmul.f32 1.442695, %v4849_v11 }
 0x7b6   : > { %v4145_v60 = vpop.f32.mrb[202].mxu1  ;;  %v4338_v3 = vpop.f32.mrb[234].mxu0  ;;  %v5501_v31 = vadd.f32 1.0, %v8299_v5  ;;  %8320 = vpow2.f32 %v5093_v4  ;;  %v4144_v9 = vadd.f32 %v4143_v55, %v10563_v43  ;;  %v4855_v47 = vsub.f32 0.0, %v4142_v2 }
 0x7b7   : > { %v8301_v16 = vpop.eup %8300  ;;  %v10587_v29 = vpop.f32.mrb[203].mxu1  ;;  %8322 = vrcp.f32 %v5499_v59  ;;  %v4337_v52 = vadd.f32 %v4336_v57, %v10565_v54  ;;  %v4857_v61 = vsub.f32 0.0, %v4335_v22  ;;  %v4146_v7 = vadd.f32 %v4145_v60, %v10559_v51 }
 0x7b8   : > { %v8303_v45 = vpop.eup %8302  ;;  %v5500_v48 = vadd.f32 1.0, %v8301_v16  ;;  %v10589_v38 = vpop.f32.mrb[235].mxu0  ;;  %8324 = vrcp.f32 %v5501_v31  ;;  %4636 = vmatmul.mubr.bf16.gmra.mrb[52].mxu1 %v10486_v24  ;;  %v5099_v28 = vmul.f32 1.442695, %v4851_v37  ;;  %v4339_v8 = vadd.f32 %v4338_v3, %v10561_v53 }
 0x7b9   : > { %v8305_v1 = vpop.eup %8304  ;;  %v5502_v44 = vadd.f32 1.0, %v8303_v45  ;;  %4645 = vmatprep.mubr.bf16.mxu1 %v9202_v56  ;;  %v4856_v55 = vsub.f32 0.0, %v4144_v9  ;;  %v4148_v57 = vadd.f32 %v10587_v29, %v10563_v43  ;;  %v5107_v59 = vmul.f32 1.442695, %v4855_v47 }
 0x7ba   : > { %v8307_v17 = vpop.eup %8306  ;;  %8326 = vrcp.f32 %v5500_v48  ;;  %v5506_v58 = vadd.f32 1.0, %v8305_v1  ;;  %v4858_v33 = vsub.f32 0.0, %v4337_v52  ;;  %v4341_v60 = vadd.f32 %v10589_v38, %v10565_v54 }
 0x7bb   : > { %v8309_v62 = vpop.eup %8308  ;;  %8328 = vrcp.f32 %v5502_v44  ;;  %v5508_v20 = vadd.f32 1.0, %v8307_v17  ;;  %v4151_v0 = vpop.f32.mrb[204].mxu1  ;;  %v4862_v3 = vsub.f32 0.0, %v4146_v7  ;;  %v4864_v38 = vsub.f32 0.0, %v4339_v8 }
 0x7bc   : > { %v8311_v21 = vpop.eup %8310  ;;  %8330 = vrcp.f32 %v5506_v58  ;;  %v5507_v30 = vadd.f32 1.0, %v8309_v62  ;;  %v4344_v63 = vpop.f32.mrb[236].mxu0  ;;  %v4152_v31 = vadd.f32 %v4151_v0, %v10559_v51  ;;  %v5109_v58 = vmul.f32 1.442695, %v4856_v55 }
 0x7bd   : > { %v8313_v26 = vpop.eup %8312  ;;  %8332 = vrcp.f32 %v5508_v20  ;;  %v5509_v24 = vadd.f32 1.0, %v8311_v21  ;;  %v10596_v23 = vpop.f32.mrb[205].mxu1  ;;  %v4345_v1 = vadd.f32 %v4344_v63, %v10561_v53  ;;  %v4863_v11 = vsub.f32 0.0, %v4148_v57 }
 0x7be   : > { %v10598_v18 = vpop.f32.mrb[237].mxu0  ;;  %v8315_v34 = vpop.eup %8314  ;;  %8334 = vrcp.f32 %v5507_v30  ;;  %v5513_v36 = vadd.f32 1.0, %v8313_v26  ;;  %v5113_v21 = vmul.f32 1.442695, %v4858_v33  ;;  %v4865_v30 = vsub.f32 0.0, %v4341_v60 }
 0x7bf   : > { %v10601_v39 = vpop.f32.mrb[206].mxu1  ;;  %v10603_v50 = vpop.f32.mrb[238].mxu0  ;;  %8336 = vrcp.f32 %v5509_v24  ;;  %v5515_v27 = vadd.f32 1.0, %v8315_v34  ;;  %v5121_v63 = vmul.f32 1.442695, %v4862_v3  ;;  %v4869_v26 = vsub.f32 0.0, %v4152_v31 }
 0x7c0   : > { %v8317_v42 = vpop.eup %8316  ;;  %v10606_v32 = vpop.f32.mrb[207].mxu1  ;;  %8338 = vrcp.f32 %v5513_v36  ;;  %4646 = vmatmul.mubr.bf16.gmra.mrb[56].mxu1 %v10504_v46  ;;  %v5111_v46 = vmul.f32 1.442695, %v4857_v61  ;;  %v5125_v34 = vmul.f32 1.442695, %v4864_v38  ;;  %v4871_v36 = vsub.f32 0.0, %v4345_v1 }
 0x7c1   : > { %v10608_v13 = vpop.f32.mrb[239].mxu0  ;;  %v8319_v15 = vpop.eup %8318  ;;  %v5514_v35 = vadd.f32 1.0, %v8317_v42  ;;  %8340 = vrcp.f32 %v5515_v27  ;;  %4655 = vmatprep.mubr.bf16.mxu1 %v9202_v56  ;;  %v5123_v42 = vmul.f32 1.442695, %v4863_v11  ;;  %v5127_v47 = vmul.f32 1.442695, %v4865_v30 }
 0x7c2   : > { %v8321_v10 = vpop.eup %8320  ;;  %v5516_v4 = vadd.f32 1.0, %v8319_v15  ;;  %v5135_v15 = vmul.f32 1.442695, %v4869_v26 }
 0x7c3   : > { %v8323_v49 = vpop.eup %8322  ;;  %8342 = vrcp.f32 %v5514_v35  ;;  %v5520_v41 = vadd.f32 1.0, %v8321_v10  ;;  %v10625_v29 = vpop.f32.mrb[208].mxu1 }
 0x7c4   : > { %v8325_v5 = vpop.eup %8324  ;;  %8344 = vrcp.f32 %v5516_v4  ;;  %v10627_v56 = vpop.f32.mrb[240].mxu0 }
 0x7c5   : > { %v8327_v16 = vpop.eup %8326  ;;  %8346 = vrcp.f32 %v5520_v41  ;;  %v10630_v44 = vpop.f32.mrb[209].mxu1 }
 0x7c6   : > { %v8329_v45 = vpop.eup %8328  ;;  %v7203_v48 = vpack.c.bf16 %v8327_v16, %v8323_v49  ;;  %8348 = vpow2.f32 %v5097_v19  ;;  %v10632_v6 = vpop.f32.mrb[241].mxu0 }
 0x7c7   : > { %v8331_v25 = vpop.eup %8330  ;;  %v7204_v17 = vpack.c.bf16 %v8329_v45, %v8325_v5  ;;  %8350 = vpow2.f32 %v5095_v12  ;;  %v10634_v62 = vpop.f32.mrb[210].mxu1  ;;  %v4154_v5 = vadd.f32 %v10596_v23, %v10563_v43  ;;  %v4156_v23 = vadd.f32 %v10601_v39, %v10559_v51 }
 0x7c8   : > { %v10636_v20 = vpop.f32.mrb[242].mxu0  ;;  %v8333_v2 = vpop.eup %8332  ;;  %6651 = vst [vmem:[%s10622_s26] sm:$0xff] %v7203_v48  ;;  %8352 = vpow2.f32 %v5099_v28  ;;  %4656 = vmatmul.mubr.bf16.gmra.mrb[60].mxu1 %v10502_v40  ;;  %v5139_v40 = vmul.f32 1.442695, %v4871_v36  ;;  %v4158_v39 = vadd.f32 %v10606_v32, %v10563_v43 }
 0x7c9   : > { %v10639_v22 = vpop.f32.mrb[211].mxu1  ;;  %v8335_v0 = vpop.eup %8334  ;;  %6652 = vst [vmem:[%s10622_s26 + $0x8] sm:$0xff] %v7204_v17  ;;  %8354 = vpow2.f32 %v5107_v59 }
 0x7ca   : > { %v10642_v24 = vpop.f32.mrb[243].mxu0  ;;  %v8337_v19 = vpop.eup %8336  ;;  %v7207_v37 = vpack.c.bf16 %v8335_v0, %v8331_v25  ;;  %8356 = vpow2.f32 %v5111_v46  ;;  %v4347_v46 = vadd.f32 %v10598_v18, %v10565_v54  ;;  %v4870_v25 = vsub.f32 0.0, %v4154_v5 }
 0x7cb   : > { %v8339_v12 = vpop.eup %8338  ;;  %v7208_v9 = vpack.c.bf16 %v8337_v19, %v8333_v2  ;;  %8358 = vpow2.f32 %v5109_v58  ;;  %v10647_v35 = vpop.f32.mrb[212].mxu1  ;;  %v4349_v0 = vadd.f32 %v10603_v50, %v10561_v53  ;;  %v4351_v50 = vadd.f32 %v10608_v13, %v10565_v54 }
 0x7cc   : > { %v8341_v27 = vpop.eup %8340  ;;  %6656 = vst [vmem:[%s10622_s26 + $0x1c] sm:$0xff] %v7207_v37  ;;  %8360 = vpow2.f32 %v5113_v21  ;;  %v10649_v61 = vpop.f32.mrb[244].mxu0  ;;  %v4872_v11 = vsub.f32 0.0, %v4347_v46  ;;  %v4877_v5 = vsub.f32 0.0, %v4158_v39  ;;  %v4355_v46 = vadd.f32 %v10627_v56, %v10561_v53 }
 0x7cd   : > { %v8343_v52 = vpop.eup %8342  ;;  %6657 = vst [vmem:[%s10622_s26 + $0x24] sm:$0xff] %v7208_v9  ;;  %8362 = vpow2.f32 %v5121_v63  ;;  %v10651_v4 = vpop.f32.mrb[213].mxu1 }
 0x7ce   : > { %v8345_v7 = vpop.eup %8344  ;;  %v7211_v10 = vpack.c.bf16 %v8343_v52, %v8339_v12  ;;  %8364 = vpow2.f32 %v5125_v34  ;;  %v10653_v28 = vpop.f32.mrb[245].mxu0  ;;  %v4876_v34 = vsub.f32 0.0, %v4156_v23 }
 0x7cf   : > { %v10655_v8 = vpop.eup %8346  ;;  %v7212_v49 = vpack.c.bf16 %v8345_v7, %v8341_v27  ;;  %8366 = vpow2.f32 %v5123_v42  ;;  %v10657_v41 = vpop.f32.mrb[214].mxu1  ;;  %v5137_v27 = vmul.f32 1.442695, %v4870_v25  ;;  %v5141_v7 = vmul.f32 1.442695, %v4872_v11 }
 0x7d0   : > { %v10659_v55 = vpop.f32.mrb[246].mxu0  ;;  %v8349_v57 = vpop.eup %8348  ;;  %6660 = vst [vmem:[%s10622_s26 + $0x38] sm:$0xff] %v7211_v10  ;;  %8368 = vpow2.f32 %v5127_v47  ;;  %v4162_v10 = vadd.f32 %v10625_v29, %v10559_v51  ;;  %v5149_v13 = vmul.f32 1.442695, %v4876_v34  ;;  %v5151_v11 = vmul.f32 1.442695, %v4877_v5 }
 0x7d1   : > { %v10664_v59 = vpop.f32.mrb[215].mxu1  ;;  %v10666_v33 = vpop.f32.mrb[247].mxu0  ;;  %6661 = vst [vmem:[%s10622_s26 + $0x40] sm:$0xff] %v7212_v49  ;;  %v5522_v16 = vadd.f32 1.0, %v8349_v57  ;;  %8370 = vpow2.f32 %v5135_v15  ;;  %v4878_v57 = vsub.f32 0.0, %v4349_v0 }
 0x7d2   : > { %v8351_v60 = vpop.eup %8350  ;;  %8372 = vpow2.f32 %v5139_v40 }
 0x7d3   : > { %v8353_v3 = vpop.eup %8352  ;;  %v5521_v31 = vadd.f32 1.0, %v8351_v60  ;;  %8374 = vrcp.f32 %v5522_v16  ;;  %v10673_v2 = vpop.f32.mrb[216].mxu1  ;;  %v5153_v56 = vmul.f32 1.442695, %v4878_v57 }
 0x7d4   : > { %v8355_v45 = vpop.eup %8354  ;;  %v5523_v48 = vadd.f32 1.0, %v8353_v3  ;;  %v10675_v18 = vpop.f32.mrb[248].mxu0 }
 0x7d5   : > { %v8357_v38 = vpop.eup %8356  ;;  %8376 = vrcp.f32 %v5521_v31  ;;  %v5527_v1 = vadd.f32 1.0, %v8355_v45  ;;  %v10681_v63 = vpop.f32.mrb[217].mxu1  ;;  %v4879_v45 = vsub.f32 0.0, %v4351_v50  ;;  %v4168_v50 = vadd.f32 %v10639_v22, %v10563_v43 }
 0x7d6   : > { %v8359_v17 = vpop.eup %8358  ;;  %8378 = vrcp.f32 %v5523_v48  ;;  %v5529_v58 = vadd.f32 1.0, %v8357_v38  ;;  %v10683_v26 = vpop.f32.mrb[249].mxu0  ;;  %v4164_v48 = vadd.f32 %v10630_v44, %v10563_v43  ;;  %v4883_v38 = vsub.f32 0.0, %v4162_v10 }
 0x7d7   : > { %v8361_v21 = vpop.eup %8360  ;;  %8380 = vrcp.f32 %v5527_v1  ;;  %v5528_v30 = vadd.f32 1.0, %v8359_v17  ;;  %v10685_v36 = vpop.f32.mrb[218].mxu1  ;;  %v4357_v1 = vadd.f32 %v10632_v6, %v10565_v54  ;;  %v4885_v6 = vsub.f32 0.0, %v4355_v46 }
 0x7d8   : > { %v8363_v19 = vpop.eup %8362  ;;  %8382 = vrcp.f32 %v5529_v58  ;;  %v5530_v37 = vadd.f32 1.0, %v8361_v21  ;;  %v10687_v12 = vpop.f32.mrb[250].mxu0  ;;  %v4166_v21 = vadd.f32 %v10634_v62, %v10559_v51  ;;  %v4375_v14 = vadd.f32 %v10675_v18, %v10561_v53 }
 0x7d9   : > { %v8365_v9 = vpop.eup %8364  ;;  %8384 = vrcp.f32 %v5528_v30  ;;  %v5534_v42 = vadd.f32 1.0, %v8363_v19  ;;  %v10691_v32 = vpop.f32.mrb[219].mxu1  ;;  %v4359_v19 = vadd.f32 %v10636_v20, %v10561_v53  ;;  %v5155_v20 = vmul.f32 1.442695, %v4879_v45 }
 0x7da   : > { %v10693_v47 = vpop.f32.mrb[251].mxu0  ;;  %v8367_v52 = vpop.eup %8366  ;;  %8386 = vrcp.f32 %v5530_v37  ;;  %v5536_v15 = vadd.f32 1.0, %v8365_v9  ;;  %v4886_v10 = vsub.f32 0.0, %v4357_v1  ;;  %v4890_v57 = vsub.f32 0.0, %v4166_v21 }
 0x7db   : > { %v8369_v40 = vpop.eup %8368  ;;  %8388 = vrcp.f32 %v5534_v42  ;;  %v5535_v49 = vadd.f32 1.0, %v8367_v52  ;;  %v10703_v25 = vpop.f32.mrb[220].mxu1  ;;  %v4884_v42 = vsub.f32 0.0, %v4164_v48  ;;  %v5167_v22 = vmul.f32 1.442695, %v4885_v6 }
 0x7dc   : > { %v8371_v60 = vpop.eup %8370  ;;  %8390 = vrcp.f32 %v5536_v15  ;;  %v5537_v16 = vadd.f32 1.0, %v8369_v40  ;;  %v10705_v17 = vpop.f32.mrb[252].mxu0  ;;  %v5169_v45 = vmul.f32 1.442695, %v4886_v10  ;;  %v4377_v18 = vadd.f32 %v10683_v26, %v10565_v54 }
 0x7dd   : > { %v8373_v3 = vpop.eup %8372  ;;  %8392 = vrcp.f32 %v5535_v49  ;;  %v5541_v31 = vadd.f32 1.0, %v8371_v60  ;;  %v10709_v30 = vpop.f32.mrb[221].mxu1  ;;  %v5163_v49 = vmul.f32 1.442695, %v4883_v38  ;;  %v4892_v60 = vsub.f32 0.0, %v4359_v19 }
 0x7de   : > { %v8375_v29 = vpop.eup %8374  ;;  %8394 = vrcp.f32 %v5537_v16  ;;  %v5543_v23 = vadd.f32 1.0, %v8373_v3  ;;  %v10711_v44 = vpop.f32.mrb[253].mxu0  ;;  %v5165_v3 = vmul.f32 1.442695, %v4884_v42 }
 0x7df   : > { %v8377_v58 = vpop.eup %8376  ;;  %8396 = vrcp.f32 %v5541_v31  ;;  %v10716_v37 = vpop.f32.mrb[222].mxu1  ;;  %v4891_v31 = vsub.f32 0.0, %v4168_v50 }
 0x7e0   : > { %v8379_v0 = vpop.eup %8378  ;;  %v7215_v39 = vpack.c.bf16 %v8377_v58, %v10655_v8  ;;  %8398 = vrcp.f32 %v5543_v23  ;;  %v10718_v34 = vpop.f32.mrb[254].mxu0  ;;  %v5177_v23 = vmul.f32 1.442695, %v4890_v57 }
 0x7e1   : > { %v8381_v9 = vpop.eup %8380  ;;  %v7216_v62 = vpack.c.bf16 %v8379_v0, %v8375_v29  ;;  %8400 = vpow2.f32 %v5137_v27  ;;  %v10722_v52 = vpop.f32.mrb[223].mxu1  ;;  %v5179_v19 = vmul.f32 1.442695, %v4891_v31 }
 0x7e2   : > { %v10724_v8 = vpop.f32.mrb[255].mxu0  ;;  %v8383_v15 = vpop.eup %8382  ;;  %6664 = vst [vmem:[%s10622_s26 + $0x54] sm:$0xff] %v7215_v39  ;;  %8402 = vpow2.f32 %v5141_v7 }
 0x7e3   : > { %v8385_v40 = vpop.eup %8384  ;;  %6665 = vst [vmem:[%s10622_s26 + $0x5c] sm:$0xff] %v7216_v62  ;;  %8404 = vpow2.f32 %v5149_v13  ;;  %v10729_v48 = vpop.f32.mrb[224].mxu1 }
 0x7e4   : > { %v8387_v27 = vpop.eup %8386  ;;  %v7219_v5 = vpack.c.bf16 %v8385_v40, %v8381_v9  ;;  %8406 = vpow2.f32 %v5153_v56  ;;  %v10731_v13 = vpop.f32.mrb[0].mxu0  ;;  %v4172_v40 = vadd.f32 %v10647_v35, %v10559_v51 }
 0x7e5   : > { %v8389_v16 = vpop.eup %8388  ;;  %v7220_v46 = vpack.c.bf16 %v8387_v27, %v8383_v15  ;;  %8408 = vpow2.f32 %v5151_v11  ;;  %v10734_v38 = vpop.f32.mrb[225].mxu1  ;;  %v5181_v11 = vmul.f32 1.442695, %v4892_v60  ;;  %v4361_v15 = vadd.f32 %v10642_v24, %v10565_v54 }
 0x7e6   : > { %v8391_v7 = vpop.eup %8390  ;;  %6668 = vst [vmem:[%s10622_s26 + $0x70] sm:$0xff] %v7219_v5  ;;  %8410 = vpow2.f32 %v5155_v20  ;;  %v10736_v1 = vpop.f32.mrb[1].mxu0  ;;  %v4365_v27 = vadd.f32 %v10649_v61, %v10561_v53  ;;  %v4174_v60 = vadd.f32 %v10651_v4, %v10563_v43  ;;  %v4897_v61 = vsub.f32 0.0, %v4172_v40 }
 0x7e7   : > { %v8393_v29 = vpop.eup %8392  ;;  %6669 = vst [vmem:[%s10622_s26 + $0x78] sm:$0xff] %v7220_v46  ;;  %8412 = vpow2.f32 %v5163_v49  ;;  %v10738_v21 = vpop.f32.mrb[226].mxu1 }
 0x7e8   : > { %v8395_v58 = vpop.eup %8394  ;;  %v7223_v56 = vpack.c.bf16 %v8393_v29, %v8389_v16  ;;  %8414 = vpow2.f32 %v5167_v22  ;;  %v10740_v0 = vpop.f32.mrb[2].mxu0 }
 0x7e9   : > { %v10742_v39 = vpop.eup %8396  ;;  %v7224_v6 = vpack.c.bf16 %v8395_v58, %v8391_v7  ;;  %8416 = vpow2.f32 %v5165_v3  ;;  %v10744_v9 = vpop.f32.mrb[227].mxu1  ;;  %v4893_v3 = vsub.f32 0.0, %v4361_v15  ;;  %v4898_v15 = vsub.f32 0.0, %v4174_v60 }
 0x7ea   : > { %v10746_v62 = vpop.f32.mrb[3].mxu0  ;;  %v10748_v42 = vpop.eup %8398  ;;  %6672 = vst [vmem:[%s10622_s26 + $0x8c] sm:$0xff] %v7223_v56  ;;  %8418 = vpow2.f32 %v5169_v45  ;;  %v4899_v56 = vsub.f32 0.0, %v4365_v27 }
 0x7eb   : > { %v8401_v50 = vpop.eup %8400  ;;  %6673 = vst [vmem:[%s10622_s26 + $0x94] sm:$0xff] %v7224_v6  ;;  %8420 = vpow2.f32 %v5177_v23  ;;  %v10760_v16 = vpop.f32.mrb[228].mxu1 }
 0x7ec   : > { %v8403_v20 = vpop.eup %8402  ;;  %v5542_v10 = vadd.f32 1.0, %v8401_v50  ;;  %8422 = vpow2.f32 %v5181_v11  ;;  %v10762_v31 = vpop.f32.mrb[4].mxu0  ;;  %v5195_v60 = vmul.f32 1.442695, %v4899_v56  ;;  %v4371_v56 = vadd.f32 %v10666_v33, %v10565_v54 }
 0x7ed   : > { %v8405_v49 = vpop.eup %8404  ;;  %v5544_v57 = vadd.f32 1.0, %v8403_v20  ;;  %8424 = vpow2.f32 %v5179_v19  ;;  %v10764_v35 = vpop.f32.mrb[229].mxu1 }
 0x7ee   : > { %v8407_v5 = vpop.eup %8406  ;;  %8426 = vrcp.f32 %v5542_v10  ;;  %v5548_v22 = vadd.f32 1.0, %v8405_v49  ;;  %v10766_v29 = vpop.f32.mrb[5].mxu0  ;;  %v5183_v49 = vmul.f32 1.442695, %v4893_v3 }
 0x7ef   : > { %v8409_v24 = vpop.eup %8408  ;;  %8428 = vrcp.f32 %v5544_v57  ;;  %v5550_v46 = vadd.f32 1.0, %v8407_v5  ;;  %v10768_v23 = vpop.f32.mrb[230].mxu1  ;;  %v4367_v57 = vadd.f32 %v10653_v28, %v10565_v54  ;;  %v4178_v28 = vadd.f32 %v10664_v59, %v10563_v43 }
 0x7f0   : > { %v8411_v7 = vpop.eup %8410  ;;  %8430 = vrcp.f32 %v5548_v22  ;;  %v5549_v45 = vadd.f32 1.0, %v8409_v24  ;;  %v10770_v11 = vpop.f32.mrb[6].mxu0  ;;  %v5191_v22 = vmul.f32 1.442695, %v4897_v61  ;;  %v4176_v24 = vadd.f32 %v10657_v41, %v10559_v51 }
 0x7f1   : > { %v8413_v58 = vpop.eup %8412  ;;  %8432 = vrcp.f32 %v5550_v46  ;;  %v5551_v4 = vadd.f32 1.0, %v8411_v7  ;;  %v10772_v6 = vpop.f32.mrb[231].mxu1  ;;  %v4182_v59 = vadd.f32 %v10673_v2, %v10559_v51 }
 0x7f2   : > { %v8415_v19 = vpop.eup %8414  ;;  %8434 = vrcp.f32 %v5549_v45  ;;  %v5555_v50 = vadd.f32 1.0, %v8413_v58  ;;  %v10774_v20 = vpop.f32.mrb[7].mxu0  ;;  %v4369_v45 = vadd.f32 %v10659_v55, %v10561_v53 }
 0x7f3   : > { %v8417_v10 = vpop.eup %8416  ;;  %8436 = vrcp.f32 %v5551_v4  ;;  %v5557_v40 = vadd.f32 1.0, %v8415_v19  ;;  %v5193_v4 = vmul.f32 1.442695, %v4898_v15  ;;  %v10784_v19 = vpop.f32.mrb[232].mxu1 }
 0x7f4   : > { %v8419_v5 = vpop.eup %8418  ;;  %8438 = vrcp.f32 %v5555_v50  ;;  %v5556_v27 = vadd.f32 1.0, %v8417_v10  ;;  %v10786_v61 = vpop.f32.mrb[8].mxu0  ;;  %v4900_v10 = vsub.f32 0.0, %v4367_v57  ;;  %v4906_v33 = vsub.f32 0.0, %v4369_v45 }
 0x7f5   : > { %v8421_v46 = vpop.eup %8420  ;;  %8440 = vrcp.f32 %v5557_v40  ;;  %v5558_v7 = vadd.f32 1.0, %v8419_v5  ;;  %v10790_v40 = vpop.f32.mrb[233].mxu1  ;;  %v4907_v45 = vsub.f32 0.0, %v4371_v56 }
 0x7f6   : > { %v8423_v58 = vpop.eup %8422  ;;  %8442 = vrcp.f32 %v5556_v27  ;;  %v5562_v3 = vadd.f32 1.0, %v8421_v46  ;;  %v10792_v55 = vpop.f32.mrb[9].mxu0  ;;  %v4904_v27 = vsub.f32 0.0, %v4176_v24 }
 0x7f7   : > { %v8425_v50 = vpop.eup %8424  ;;  %8444 = vrcp.f32 %v5558_v7  ;;  %v5564_v41 = vadd.f32 1.0, %v8423_v58  ;;  %11652 = vst [vmem:[#allocation3_spill] sm:$0xff] %v10792_v55  ;;  %v10796_v46 = vpop.f32.mrb[234].mxu1 }
 0x7f8   : > { %v8427_v5 = vpop.eup %8426  ;;  %8446 = vrcp.f32 %v5562_v3  ;;  %v5563_v15 = vadd.f32 1.0, %v8425_v50  ;;  %11653 = vst [vmem:[#allocation4_spill] sm:$0xff] %v10796_v46  ;;  %v10798_v7 = vpop.f32.mrb[10].mxu0  ;;  %v4905_v46 = vsub.f32 0.0, %v4178_v28  ;;  %v5209_v28 = vmul.f32 1.442695, %v4906_v33 }
 0x7f9   : > { %11654 = vst [vmem:[#allocation5_spill] sm:$0xff] %v10798_v7  ;;  %v8429_v57 = vpop.eup %8428  ;;  %v7227_v58 = vpack.c.bf16 %v8427_v5, %v10742_v39  ;;  %8448 = vrcp.f32 %v5564_v41  ;;  %v10803_v3 = vpop.f32.mrb[235].mxu1  ;;  %v4184_v7 = vadd.f32 %v10681_v63, %v10563_v43  ;;  %v5197_v39 = vmul.f32 1.442695, %v4900_v10 }
 0x7fa   : > { %v10805_v24 = vpop.f32.mrb[11].mxu0  ;;  %v8431_v50 = vpop.eup %8430  ;;  %v7228_v2 = vpack.c.bf16 %v8429_v57, %v10748_v42  ;;  %8450 = vrcp.f32 %v5563_v15  ;;  %v5205_v5 = vmul.f32 1.442695, %v4904_v27  ;;  %v4913_v57 = vsub.f32 0.0, %v4375_v14 }
 0x7fb   : > { %11655 = vst [vmem:[#allocation6_spill] sm:$0xff] %v10805_v24  ;;  %v8433_v55 = vpop.eup %8432  ;;  %6676 = vst [vmem:[%s10622_s26 + $0xa8] sm:$0xff] %v7227_v58  ;;  %8452 = vpow2.f32 %v5183_v49  ;;  %v4911_v24 = vsub.f32 0.0, %v4182_v59  ;;  %v5207_v49 = vmul.f32 1.442695, %v4905_v46  ;;  %v4912_v10 = vsub.f32 0.0, %v4184_v7 }
 0x7fc   : > { %v8435_v41 = vpop.eup %8434  ;;  %6677 = vst [vmem:[%s10622_s26 + $0xb0] sm:$0xff] %v7228_v2  ;;  %8454 = vpow2.f32 %v5191_v22  ;;  %v10814_v56 = vpop.f32.mrb[236].mxu1  ;;  %v5211_v22 = vmul.f32 1.442695, %v4907_v45  ;;  %v4914_v27 = vsub.f32 0.0, %v4377_v18 }
 0x7fd   : > { %v8437_v42 = vpop.eup %8436  ;;  %v7231_v15 = vpack.c.bf16 %v8435_v41, %v8431_v50  ;;  %8456 = vpow2.f32 %v5195_v60  ;;  %v10816_v26 = vpop.f32.mrb[12].mxu0  ;;  %v5223_v50 = vmul.f32 1.442695, %v4913_v57  ;;  %v4186_v57 = vadd.f32 %v10685_v36, %v10559_v51 }
 0x7fe   : > { %v8439_v63 = vpop.eup %8438  ;;  %v7232_v58 = vpack.c.bf16 %v8437_v42, %v8433_v55  ;;  %8458 = vpow2.f32 %v5193_v4  ;;  %v10819_v59 = vpop.f32.mrb[237].mxu1  ;;  %v5219_v4 = vmul.f32 1.442695, %v4911_v24  ;;  %v5221_v42 = vmul.f32 1.442695, %v4912_v10 }
 0x7ff   : > { %v8441_v2 = vpop.eup %8440  ;;  %6680 = vst [vmem:[%s10622_s26 + $0xc4] sm:$0xff] %v7231_v15  ;;  %8460 = vpow2.f32 %v5197_v39  ;;  %v10821_v60 = vpop.f32.mrb[13].mxu0  ;;  %v5225_v24 = vmul.f32 1.442695, %v4914_v27 }
 0x800   : > { %v8443_v14 = vpop.eup %8442  ;;  %6681 = vst [vmem:[%s10622_s26 + $0xcc] sm:$0xff] %v7232_v58  ;;  %8462 = vpow2.f32 %v5205_v5  ;;  %v10824_v55 = vpop.f32.mrb[238].mxu1 }
 0x801   : > { %v10826_v46 = vpop.f32.mrb[14].mxu0  ;;  %v8445_v7 = vpop.eup %8444  ;;  %v7235_v33 = vpack.c.bf16 %v8443_v14, %v8439_v63  ;;  %8464 = vpow2.f32 %v5209_v28 }
 0x802   : > { %v10828_v39 = vpop.f32.mrb[239].mxu1  ;;  %v10830_v45 = vpop.f32.mrb[15].mxu0  ;;  %v7236_v41 = vpack.c.bf16 %v8445_v7, %v8441_v2  ;;  %8466 = vpow2.f32 %v5207_v49  ;;  %v4379_v49 = vadd.f32 %v10687_v12, %v10561_v53 }
 0x803   : > { %v8447_v18 = vpop.eup %8446  ;;  %6684 = vst [vmem:[%s10622_s26 + $0xe0] sm:$0xff] %v7235_v33  ;;  %8468 = vpow2.f32 %v5211_v22  ;;  %v10840_v10 = vpop.f32.mrb[240].mxu1 }
 0x804   : > { %v10832_v15 = vpop.eup %8448  ;;  %6685 = vst [vmem:[%s10622_s26 + $0xe8] sm:$0xff] %v7236_v41  ;;  %8470 = vpow2.f32 %v5219_v4  ;;  %v10842_v2 = vpop.f32.mrb[16].mxu0  ;;  %v4918_v41 = vsub.f32 0.0, %v4186_v57 }
 0x805   : > { %v8451_v5 = vpop.eup %8450  ;;  %8472 = vpow2.f32 %v5223_v50  ;;  %v10845_v4 = vpop.f32.mrb[241].mxu1 }
 0x806   : > { %v8453_v63 = vpop.eup %8452  ;;  %v7239_v28 = vpack.c.bf16 %v8451_v5, %v8447_v18  ;;  %8474 = vpow2.f32 %v5221_v42  ;;  %v10847_v36 = vpop.f32.mrb[17].mxu0  ;;  %v4188_v42 = vadd.f32 %v10691_v32, %v10563_v43  ;;  %v4192_v32 = vadd.f32 %v10703_v25, %v10559_v51 }
 0x807   : > { %v8455_v58 = vpop.eup %8454  ;;  %v5565_v14 = vadd.f32 1.0, %v8453_v63  ;;  %8476 = vpow2.f32 %v5225_v24  ;;  %11656 = vst [vmem:[#allocation7_spill] sm:$0xff] %v10847_v36  ;;  %v10849_v50 = vpop.f32.mrb[242].mxu1 }
 0x808   : > { %v8457_v22 = vpop.eup %8456  ;;  %6688 = vst [vmem:[%s10622_s26 + $0xfc] sm:$0xff] %v7239_v28  ;;  %v5569_v27 = vadd.f32 1.0, %v8455_v58  ;;  %11657 = vst [vmem:[#allocation8_spill] sm:$0xff] %v10849_v50  ;;  %v10853_v5 = vpop.f32.mrb[18].mxu0  ;;  %v4920_v58 = vsub.f32 0.0, %v4379_v49 }
 0x809   : > { %v8459_v7 = vpop.eup %8458  ;;  %8478 = vrcp.f32 %v5565_v14  ;;  %v5571_v33 = vadd.f32 1.0, %v8457_v22  ;;  %11658 = vst [vmem:[#allocation9_spill] sm:$0xff] %v10853_v5  ;;  %v10855_v63 = vpop.f32.mrb[243].mxu1 }
 0x80a   : > { %v8461_v18 = vpop.eup %8460  ;;  %8480 = vrcp.f32 %v5569_v27  ;;  %v5570_v12 = vadd.f32 1.0, %v8459_v7  ;;  %11659 = vst [vmem:[#allocation10_spill] sm:$0xff] %v10855_v63  ;;  %v10857_v14 = vpop.f32.mrb[19].mxu0  ;;  %v4381_v27 = vadd.f32 %v10693_v47, %v10565_v54  ;;  %v5237_v36 = vmul.f32 1.442695, %v4920_v58 }
 0x80b   : > { %v8463_v24 = vpop.eup %8462  ;;  %8482 = vrcp.f32 %v5571_v33  ;;  %v5572_v28 = vadd.f32 1.0, %v8461_v18  ;;  %11660 = vst [vmem:[#allocation11_spill] sm:$0xff] %v10857_v14  ;;  %v5233_v33 = vmul.f32 1.442695, %v4918_v41  ;;  %v4919_v18 = vsub.f32 0.0, %v4188_v42  ;;  %v10867_v47 = vpop.f32.mrb[20].mxu0 }
 0x80c   : > { %v8465_v22 = vpop.eup %8464  ;;  %8484 = vrcp.f32 %v5570_v12  ;;  %v5576_v50 = vadd.f32 1.0, %v8463_v24  ;;  %v4385_v12 = vadd.f32 %v10705_v17, %v10561_v53  ;;  %v10865_v24 = vpop.f32.mrb[244].mxu1  ;;  %11661 = vst [vmem:[#allocation12_spill] sm:$0xff] %v10867_v47  ;;  %v4921_v25 = vsub.f32 0.0, %v4381_v27 }
 0x80d   : > { %v8467_v57 = vpop.eup %8466  ;;  %8486 = vrcp.f32 %v5572_v28  ;;  %v5578_v7 = vadd.f32 1.0, %v8465_v22  ;;  %v10871_v41 = vpop.f32.mrb[245].mxu1  ;;  %v4387_v17 = vadd.f32 %v10711_v44, %v10565_v54 }
 0x80e   : > { %v8469_v5 = vpop.eup %8468  ;;  %8488 = vrcp.f32 %v5576_v50  ;;  %v5577_v63 = vadd.f32 1.0, %v8467_v57  ;;  %v4194_v50 = vadd.f32 %v10709_v30, %v10563_v43  ;;  %11662 = vst [vmem:[#allocation13_spill] sm:$0xff] %v10871_v41  ;;  %v10873_v42 = vpop.f32.mrb[21].mxu0  ;;  %v4925_v57 = vsub.f32 0.0, %v4192_v32 }
 0x80f   : > { %v8471_v49 = vpop.eup %8470  ;;  %8490 = vrcp.f32 %v5578_v7  ;;  %v5579_v14 = vadd.f32 1.0, %v8469_v5  ;;  %11663 = vst [vmem:[#allocation14_spill] sm:$0xff] %v10873_v42  ;;  %v10877_v7 = vpop.f32.mrb[246].mxu1  ;;  %v4196_v30 = vadd.f32 %v10716_v37, %v10559_v51  ;;  %v4927_v44 = vsub.f32 0.0, %v4385_v12 }
 0x810   : > { %v8473_v28 = vpop.eup %8472  ;;  %8492 = vrcp.f32 %v5577_v63  ;;  %v5583_v22 = vadd.f32 1.0, %v8471_v49  ;;  %v10879_v47 = vpop.f32.mrb[22].mxu0  ;;  %v5235_v49 = vmul.f32 1.442695, %v4919_v18  ;;  %v4926_v18 = vsub.f32 0.0, %v4194_v50 }
 0x811   : > { %v8475_v5 = vpop.eup %8474  ;;  %8494 = vrcp.f32 %v5579_v14  ;;  %v5585_v58 = vadd.f32 1.0, %v8473_v28  ;;  %11664 = vst [vmem:[#allocation15_spill] sm:$0xff] %v10879_v47  ;;  %v10883_v41 = vpop.f32.mrb[247].mxu1  ;;  %v4389_v28 = vadd.f32 %v10718_v34, %v10561_v53  ;;  %v4198_v37 = vadd.f32 %v10722_v52, %v10563_v43 }
 0x812   : > { %v8477_v63 = vpop.eup %8476  ;;  %8496 = vrcp.f32 %v5583_v22  ;;  %v5584_v27 = vadd.f32 1.0, %v8475_v5  ;;  %11665 = vst [vmem:[#allocation16_spill] sm:$0xff] %v10883_v41  ;;  %v10885_v42 = vpop.f32.mrb[23].mxu0  ;;  %v5239_v41 = vmul.f32 1.442695, %v4921_v25  ;;  %v4932_v34 = vsub.f32 0.0, %v4196_v30 }
 0x813   : > { %11666 = vst [vmem:[#allocation17_spill] sm:$0xff] %v10885_v42  ;;  %v8479_v14 = vpop.eup %8478  ;;  %8498 = vrcp.f32 %v5585_v58  ;;  %v5586_v32 = vadd.f32 1.0, %v8477_v63  ;;  %v4928_v42 = vsub.f32 0.0, %v4387_v17  ;;  %v4391_v58 = vadd.f32 %v10724_v8, %v10565_v54  ;;  %v10899_v25 = vpop.f32.mrb[24].mxu0 }
 0x814   : > { %v8481_v47 = vpop.eup %8480  ;;  %v7240_v22 = vpack.c.bf16 %v8479_v14, %v10832_v15  ;;  %8500 = vrcp.f32 %v5584_v27  ;;  %v5247_v12 = vmul.f32 1.442695, %v4925_v57  ;;  %v4202_v15 = vadd.f32 %v10729_v48, %v10559_v51 }
 0x815   : > { %v8483_v5 = vpop.eup %8482  ;;  %8502 = vrcp.f32 %v5586_v32  ;;  %v5251_v52 = vmul.f32 1.442695, %v4927_v44  ;;  %v4934_v14 = vsub.f32 0.0, %v4389_v28  ;;  %v10897_v32 = vpop.f32.mrb[248].mxu1  ;;  %v4933_v57 = vsub.f32 0.0, %v4198_v37 }
 0x816   : > { %v8485_v63 = vpop.eup %8484  ;;  %6689 = vst [vmem:[%s10622_s26 + $0x104] sm:$0xff] %v7240_v22  ;;  %8504 = vpow2.f32 %v5233_v33  ;;  %v5249_v33 = vmul.f32 1.442695, %v4926_v18  ;;  %v10901_v30 = vpop.f32.mrb[249].mxu1 }
 0x817   : > { %v8487_v50 = vpop.eup %8486  ;;  %v7243_v27 = vpack.c.bf16 %v8485_v63, %v8481_v47  ;;  %8506 = vpow2.f32 %v5237_v36  ;;  %v10903_v22 = vpop.f32.mrb[25].mxu0  ;;  %v5253_v36 = vmul.f32 1.442695, %v4928_v42  ;;  %v4935_v47 = vsub.f32 0.0, %v4391_v58 }
 0x818   : > { %v8489_v8 = vpop.eup %8488  ;;  %v7244_v17 = vpack.c.bf16 %v8487_v50, %v8483_v5  ;;  %8508 = vpow2.f32 %v5235_v49  ;;  %v10906_v44 = vpop.f32.mrb[250].mxu1  ;;  %v5261_v63 = vmul.f32 1.442695, %v4932_v34  ;;  %v4939_v5 = vsub.f32 0.0, %v4202_v15 }
 0x819   : > { %v8491_v48 = vpop.eup %8490  ;;  %6692 = vst [vmem:[%s10622_s26 + $0x118] sm:$0xff] %v7243_v27  ;;  %8510 = vpow2.f32 %v5239_v41  ;;  %11667 = vst [vmem:[#allocation18_spill] sm:$0xff] %v10906_v44  ;;  %v10909_v49 = vpop.f32.mrb[26].mxu0  ;;  %v5265_v27 = vmul.f32 1.442695, %v4934_v14 }
 0x81a   : > { %v8493_v28 = vpop.eup %8492  ;;  %6693 = vst [vmem:[%s10622_s26 + $0x120] sm:$0xff] %v7244_v17  ;;  %8512 = vpow2.f32 %v5247_v12  ;;  %11668 = vst [vmem:[#allocation19_spill] sm:$0xff] %v10909_v49  ;;  %v10911_v18 = vpop.f32.mrb[251].mxu1  ;;  %v5263_v44 = vmul.f32 1.442695, %v4933_v57  ;;  %v4395_v57 = vadd.f32 %v10731_v13, %v10561_v53 }
 0x81b   : > { %11669 = vst [vmem:[#allocation20_spill] sm:$0xff] %v10911_v18  ;;  %v8495_v37 = vpop.eup %8494  ;;  %v7247_v50 = vpack.c.bf16 %v8493_v28, %v8489_v8  ;;  %8514 = vpow2.f32 %v5251_v52  ;;  %v10913_v41 = vpop.f32.mrb[27].mxu0  ;;  %v5267_v12 = vmul.f32 1.442695, %v4935_v47  ;;  %v5275_v15 = vmul.f32 1.442695, %v4939_v5 }
 0x81c   : > { %v8497_v42 = vpop.eup %8496  ;;  %v7248_v58 = vpack.c.bf16 %v8495_v37, %v8491_v48  ;;  %8516 = vpow2.f32 %v5249_v33  ;;  %v10917_v52 = vpop.f32.mrb[252].mxu1 }
 0x81d   : > { %v8499_v17 = vpop.eup %8498  ;;  %6696 = vst [vmem:[%s10622_s26 + $0x134] sm:$0xff] %v7247_v50  ;;  %8518 = vpow2.f32 %v5253_v36  ;;  %v10919_v14 = vpop.f32.mrb[28].mxu0 }
 0x81e   : > { %v8501_v34 = vpop.eup %8500  ;;  %6697 = vst [vmem:[%s10622_s26 + $0x13c] sm:$0xff] %v7248_v58  ;;  %8520 = vpow2.f32 %v5261_v63  ;;  %v10923_v48 = vpop.f32.mrb[253].mxu1 }
 0x81f   : > { %v8503_v18 = vpop.eup %8502  ;;  %v7251_v49 = vpack.c.bf16 %v8501_v34, %v8497_v42  ;;  %8522 = vpow2.f32 %v5265_v27  ;;  %v10925_v36 = vpop.f32.mrb[29].mxu0 }
 0x820   : > { %v8505_v8 = vpop.eup %8504  ;;  %v7252_v33 = vpack.c.bf16 %v8503_v18, %v8499_v17  ;;  %8524 = vpow2.f32 %v5263_v44  ;;  %v10928_v63 = vpop.f32.mrb[254].mxu1  ;;  %v4204_v44 = vadd.f32 %v10734_v38, %v10563_v43  ;;  %v4941_v17 = vsub.f32 0.0, %v4395_v57 }
 0x821   : > { %v8507_v47 = vpop.eup %8506  ;;  %6700 = vst [vmem:[%s10622_s26 + $0x150] sm:$0xff] %v7251_v49  ;;  %v5590_v28 = vadd.f32 1.0, %v8505_v8  ;;  %8526 = vpow2.f32 %v5267_v12  ;;  %v10930_v5 = vpop.f32.mrb[30].mxu0  ;;  %v4397_v12 = vadd.f32 %v10736_v1, %v10565_v54  ;;  %v4206_v38 = vadd.f32 %v10738_v21, %v10559_v51 }
 0x822   : > { %v8509_v37 = vpop.eup %8508  ;;  %6701 = vst [vmem:[%s10622_s26 + $0x158] sm:$0xff] %v7252_v33  ;;  %v5592_v50 = vadd.f32 1.0, %v8507_v47  ;;  %8528 = vpow2.f32 %v5275_v15  ;;  %v10935_v13 = vpop.f32.mrb[255].mxu1  ;;  %v4940_v47 = vsub.f32 0.0, %v4204_v44 }
 0x823   : > { %v10937_v18 = vpop.f32.mrb[31].mxu0  ;;  %v8511_v27 = vpop.eup %8510  ;;  %8530 = vrcp.f32 %v5590_v28  ;;  %v5591_v49 = vadd.f32 1.0, %v8509_v37  ;;  %v4399_v37 = vadd.f32 %v10740_v0, %v10561_v53 }
 0x824   : > { %11670 = vst [vmem:[#allocation21_spill] sm:$0xff] %v10937_v18  ;;  %v8513_v42 = vpop.eup %8512  ;;  %8532 = vrcp.f32 %v5592_v50  ;;  %v5593_v58 = vadd.f32 1.0, %v8511_v27  ;;  %v10945_v57 = vpop.f32.mrb[0].mxu1 }
 0x825   : > { %v8515_v34 = vpop.eup %8514  ;;  %8534 = vrcp.f32 %v5591_v49  ;;  %v5597_v15 = vadd.f32 1.0, %v8513_v42  ;;  %11671 = vst [vmem:[#allocation22_spill] sm:$0xff] %v10945_v57  ;;  %v10947_v50 = vpop.f32.mrb[32].mxu0  ;;  %v5279_v49 = vmul.f32 1.442695, %v4941_v17  ;;  %v4942_v42 = vsub.f32 0.0, %v4397_v12 }
 0x826   : > { %v8517_v8 = vpop.eup %8516  ;;  %8536 = vrcp.f32 %v5593_v58  ;;  %v5599_v33 = vadd.f32 1.0, %v8515_v34  ;;  %11672 = vst [vmem:[#allocation23_spill] sm:$0xff] %v10947_v50  ;;  %v10949_v21 = vpop.f32.mrb[1].mxu1  ;;  %v4946_v34 = vsub.f32 0.0, %v4206_v38  ;;  %v5277_v57 = vmul.f32 1.442695, %v4940_v47 }
 0x827   : > { %v8519_v18 = vpop.eup %8518  ;;  %8538 = vrcp.f32 %v5597_v15  ;;  %v5598_v28 = vadd.f32 1.0, %v8517_v8  ;;  %11673 = vst [vmem:[#allocation24_spill] sm:$0xff] %v10949_v21  ;;  %v4208_v15 = vadd.f32 %v10744_v9, %v10563_v43  ;;  %v4401_v50 = vadd.f32 %v10746_v62, %v10565_v54 }
 0x828   : > { %v8521_v1 = vpop.eup %8520  ;;  %8540 = vrcp.f32 %v5599_v33  ;;  %v5600_v27 = vadd.f32 1.0, %v8519_v18  ;;  %v4948_v17 = vsub.f32 0.0, %v4399_v37  ;;  %v4212_v12 = vadd.f32 %v10760_v16, %v10559_v51  ;;  %v10963_v37 = vpop.f32.mrb[2].mxu1 }
 0x829   : > { %v8523_v58 = vpop.eup %8522  ;;  %8542 = vrcp.f32 %v5598_v28  ;;  %v5604_v44 = vadd.f32 1.0, %v8521_v1  ;;  %v10957_v28 = vpop.f32.mrb[33].mxu0  ;;  %v5281_v9 = vmul.f32 1.442695, %v4942_v42  ;;  %v4947_v62 = vsub.f32 0.0, %v4208_v15  ;;  %11675 = vst [vmem:[#allocation26_spill] sm:$0xff] %v10963_v37 }
 0x82a   : > { %v8525_v8 = vpop.eup %8524  ;;  %8544 = vrcp.f32 %v5600_v27  ;;  %v5606_v0 = vadd.f32 1.0, %v8523_v58  ;;  %11674 = vst [vmem:[#allocation25_spill] sm:$0xff] %v10957_v28  ;;  %v4405_v27 = vadd.f32 %v10762_v31, %v10561_v53  ;;  %v5289_v28 = vmul.f32 1.442695, %v4946_v34 }
 0x82b   : > { %v8527_v33 = vpop.eup %8526  ;;  %8546 = vrcp.f32 %v5604_v44  ;;  %v5605_v18 = vadd.f32 1.0, %v8525_v8  ;;  %v4214_v44 = vadd.f32 %v10764_v35, %v10563_v43  ;;  %v10965_v8 = vpop.f32.mrb[34].mxu0  ;;  %v4407_v42 = vadd.f32 %v10766_v29, %v10565_v54 }
 0x82c   : > { %v8529_v38 = vpop.eup %8528  ;;  %8548 = vrcp.f32 %v5606_v0  ;;  %v5607_v1 = vadd.f32 1.0, %v8527_v33  ;;  %11676 = vst [vmem:[#allocation27_spill] sm:$0xff] %v10965_v8  ;;  %v4949_v0 = vsub.f32 0.0, %v4401_v50  ;;  %v5293_v31 = vmul.f32 1.442695, %v4948_v17  ;;  %v10971_v35 = vpop.f32.mrb[3].mxu1 }
 0x82d   : > { %v8531_v47 = vpop.eup %8530  ;;  %8550 = vrcp.f32 %v5605_v18  ;;  %v5611_v58 = vadd.f32 1.0, %v8529_v38  ;;  %v4953_v18 = vsub.f32 0.0, %v4212_v12  ;;  %v4216_v15 = vadd.f32 %v10768_v23, %v10559_v51  ;;  %11677 = vst [vmem:[#allocation28_spill] sm:$0xff] %v10971_v35  ;;  %v10973_v38 = vpop.f32.mrb[35].mxu0 }
 0x82e   : > { %v8533_v16 = vpop.eup %8532  ;;  %8552 = vrcp.f32 %v5607_v1  ;;  %v4955_v50 = vsub.f32 0.0, %v4405_v27  ;;  %v4409_v29 = vadd.f32 %v10770_v11, %v10561_v53  ;;  %v5291_v17 = vmul.f32 1.442695, %v4947_v62 }
 0x82f   : > { %v8535_v33 = vpop.eup %8534  ;;  %8554 = vrcp.f32 %v5611_v58  ;;  %v4954_v12 = vsub.f32 0.0, %v4214_v44  ;;  %v5295_v23 = vmul.f32 1.442695, %v4949_v0  ;;  %v4956_v35 = vsub.f32 0.0, %v4407_v42 }
 0x830   : > { %v8537_v8 = vpop.eup %8536  ;;  %v7255_v1 = vpack.c.bf16 %v8535_v33, %v8531_v47  ;;  %8556 = vpow2.f32 %v5279_v49  ;;  %v5303_v47 = vmul.f32 1.442695, %v4953_v18  ;;  %v4960_v49 = vsub.f32 0.0, %v4216_v15 }
 0x831   : > { %v8539_v34 = vpop.eup %8538  ;;  %v7256_v58 = vpack.c.bf16 %v8537_v8, %v8533_v16  ;;  %8558 = vpow2.f32 %v5277_v57  ;;  %v5307_v11 = vmul.f32 1.442695, %v4955_v50  ;;  %v4962_v8 = vsub.f32 0.0, %v4409_v29  ;;  %v10979_v16 = vpop.f32.mrb[4].mxu1 }
 0x832   : > { %v8541_v21 = vpop.eup %8540  ;;  %6704 = vst [vmem:[%s10622_s26 + $0x16c] sm:$0xff] %v7255_v1  ;;  %8560 = vpow2.f32 %v5281_v9  ;;  %v5305_v44 = vmul.f32 1.442695, %v4954_v12  ;;  %v10981_v9 = vpop.f32.mrb[36].mxu0 }
 0x833   : > { %v8543_v37 = vpop.eup %8542  ;;  %6705 = vst [vmem:[%s10622_s26 + $0x174] sm:$0xff] %v7256_v58  ;;  %8562 = vpow2.f32 %v5289_v28  ;;  %v5309_v28 = vmul.f32 1.442695, %v4956_v35  ;;  %v10984_v42 = vpop.f32.mrb[5].mxu1  ;;  %v5321_v29 = vmul.f32 1.442695, %v4962_v8 }
 0x834   : > { %v8545_v27 = vpop.eup %8544  ;;  %v7259_v33 = vpack.c.bf16 %v8543_v37, %v8539_v34  ;;  %8564 = vpow2.f32 %v5293_v31  ;;  %v10986_v18 = vpop.f32.mrb[37].mxu0  ;;  %v5317_v31 = vmul.f32 1.442695, %v4960_v49 }
 0x835   : > { %v8547_v57 = vpop.eup %8546  ;;  %v7260_v62 = vpack.c.bf16 %v8545_v27, %v8541_v21  ;;  %8566 = vpow2.f32 %v5291_v17  ;;  %v10989_v21 = vpop.f32.mrb[6].mxu1  ;;  %v4411_v27 = vadd.f32 %v10774_v20, %v10565_v54  ;;  %v4415_v20 = vadd.f32 %v10786_v61, %v10561_v53 }
 0x836   : > { %v8549_v0 = vpop.eup %8548  ;;  %6708 = vst [vmem:[%s10622_s26 + $0x188] sm:$0xff] %v7259_v33  ;;  %8568 = vpow2.f32 %v5295_v23  ;;  %v10991_v15 = vpop.f32.mrb[38].mxu0  ;;  %v4218_v23 = vadd.f32 %v10772_v6, %v10563_v43 }
 0x837   : > { %v8551_v37 = vpop.eup %8550  ;;  %6709 = vst [vmem:[%s10622_s26 + $0x190] sm:$0xff] %v7260_v62  ;;  %8570 = vpow2.f32 %v5303_v47  ;;  %v10993_v34 = vpop.f32.mrb[7].mxu1  ;;  %v4222_v62 = vadd.f32 %v10784_v19, %v10559_v51 }
 0x838   : > { %v8553_v1 = vpop.eup %8552  ;;  %v7263_v50 = vpack.c.bf16 %v8551_v37, %v8547_v57  ;;  %8572 = vpow2.f32 %v5307_v11  ;;  %v10995_v35 = vpop.f32.mrb[39].mxu0  ;;  %v4961_v6 = vsub.f32 0.0, %v4218_v23 }
 0x839   : > { %v10997_v58 = vpop.eup %8554  ;;  %v7264_v17 = vpack.c.bf16 %v8553_v1, %v8549_v0  ;;  %8574 = vpow2.f32 %v5305_v44 }
 0x83a   : > { %v8557_v12 = vpop.eup %8556  ;;  %6712 = vst [vmem:[%s10622_s26 + $0x1a4] sm:$0xff] %v7263_v50  ;;  %8576 = vpow2.f32 %v5309_v28 }
 0x83b   : > { %v8559_v47 = vpop.eup %8558  ;;  %6713 = vst [vmem:[%s10622_s26 + $0x1ac] sm:$0xff] %v7264_v17  ;;  %v5613_v49 = vadd.f32 1.0, %v8557_v12  ;;  %8578 = vpow2.f32 %v5317_v31  ;;  %v4963_v31 = vsub.f32 0.0, %v4411_v27  ;;  %v4967_v12 = vsub.f32 0.0, %v4222_v62 }
 0x83c   : > { %v8561_v33 = vpop.eup %8560  ;;  %v5612_v11 = vadd.f32 1.0, %v8559_v47  ;;  %8580 = vpow2.f32 %v5321_v29  ;;  %v4224_v29 = vadd.f32 %v10790_v40, %v10563_v43 }
 0x83d   : > { %v8563_v8 = vpop.eup %8562  ;;  %8582 = vrcp.f32 %v5613_v49  ;;  %v5614_v57 = vadd.f32 1.0, %v8561_v33  ;;  %v5319_v49 = vmul.f32 1.442695, %v4961_v6  ;;  %v11678_v33 = vld [vmem:[#allocation3_spill] sm:$0xff]  ;;  %v11680_v6 = vld [vmem:[#allocation5_spill] sm:$0xff] }
 0x83e   : > { %v8565_v44 = vpop.eup %8564  ;;  %8584 = vrcp.f32 %v5612_v11  ;;  %v5618_v0 = vadd.f32 1.0, %v8563_v8  ;;  %v4417_v27 = vadd.f32 %v11678_v33, %v10565_v54  ;;  %v5323_v8 = vmul.f32 1.442695, %v4963_v31 }
 0x83f   : > { %v8567_v28 = vpop.eup %8566  ;;  %8586 = vrcp.f32 %v5614_v57  ;;  %v5620_v37 = vadd.f32 1.0, %v8565_v44  ;;  %v4969_v57 = vsub.f32 0.0, %v4415_v20  ;;  %v4968_v40 = vsub.f32 0.0, %v4224_v29 }
 0x840   : > { %v8569_v1 = vpop.eup %8568  ;;  %8588 = vrcp.f32 %v5618_v0  ;;  %v5619_v50 = vadd.f32 1.0, %v8567_v28  ;;  %v11679_v28 = vld [vmem:[#allocation4_spill] sm:$0xff]  ;;  %v4228_v31 = vadd.f32 %v10803_v3, %v10563_v43 }
 0x841   : > { %v8571_v17 = vpop.eup %8570  ;;  %8590 = vrcp.f32 %v5620_v37  ;;  %v5621_v19 = vadd.f32 1.0, %v8569_v1  ;;  %v4226_v37 = vadd.f32 %v11679_v28, %v10559_v51 }
 0x842   : > { %v8573_v47 = vpop.eup %8572  ;;  %8592 = vrcp.f32 %v5619_v50  ;;  %v5625_v23 = vadd.f32 1.0, %v8571_v17  ;;  %v5331_v50 = vmul.f32 1.442695, %v4967_v12  ;;  %v4419_v17 = vadd.f32 %v11680_v6, %v10561_v53 }
 0x843   : > { %v8575_v11 = vpop.eup %8574  ;;  %8594 = vrcp.f32 %v5621_v19  ;;  %v5627_v61 = vadd.f32 1.0, %v8573_v47  ;;  %v4970_v47 = vsub.f32 0.0, %v4417_v27  ;;  %v5333_v12 = vmul.f32 1.442695, %v4968_v40 }
 0x844   : > { %v8577_v44 = vpop.eup %8576  ;;  %8596 = vrcp.f32 %v5625_v23  ;;  %v5626_v0 = vadd.f32 1.0, %v8575_v11  ;;  %v5335_v23 = vmul.f32 1.442695, %v4969_v57  ;;  %v11681_v11 = vld [vmem:[#allocation6_spill] sm:$0xff]  ;;  %v4976_v3 = vsub.f32 0.0, %v4419_v17 }
 0x845   : > { %v8579_v62 = vpop.eup %8578  ;;  %8598 = vrcp.f32 %v5627_v61  ;;  %v5628_v1 = vadd.f32 1.0, %v8577_v44  ;;  %v4421_v28 = vadd.f32 %v11681_v11, %v10565_v54  ;;  %v4974_v44 = vsub.f32 0.0, %v4226_v37  ;;  %v11028_v37 = vpop.f32.mrb[8].mxu1 }
 0x846   : > { %v8581_v33 = vpop.eup %8580  ;;  %8600 = vrcp.f32 %v5626_v0  ;;  %v5632_v19 = vadd.f32 1.0, %v8579_v62  ;;  %v4232_v0 = vadd.f32 %v10814_v56, %v10559_v51  ;;  %v4234_v40 = vadd.f32 %v10819_v59, %v10563_v43 }
 0x847   : > { %v8583_v20 = vpop.eup %8582  ;;  %8602 = vrcp.f32 %v5628_v1  ;;  %v5634_v29 = vadd.f32 1.0, %v8581_v33  ;;  %v4425_v1 = vadd.f32 %v10816_v26, %v10561_v53  ;;  %v4975_v33 = vsub.f32 0.0, %v4228_v31 }
 0x848   : > { %v8585_v61 = vpop.eup %8584  ;;  %8604 = vrcp.f32 %v5632_v19  ;;  %v11030_v19 = vpop.f32.mrb[40].mxu0  ;;  %v4977_v17 = vsub.f32 0.0, %v4421_v28  ;;  %v4981_v31 = vsub.f32 0.0, %v4232_v0 }
 0x849   : > { %v8587_v62 = vpop.eup %8586  ;;  %v7267_v27 = vpack.c.bf16 %v8585_v61, %v10997_v58  ;;  %8606 = vrcp.f32 %v5634_v29  ;;  %v5337_v58 = vmul.f32 1.442695, %v4970_v47  ;;  %v11033_v29 = vpop.f32.mrb[9].mxu1  ;;  %v4983_v47 = vsub.f32 0.0, %v4425_v1 }
 0x84a   : > { %v8589_v57 = vpop.eup %8588  ;;  %v7268_v6 = vpack.c.bf16 %v8587_v62, %v8583_v20  ;;  %8608 = vpow2.f32 %v5319_v49  ;;  %v11035_v26 = vpop.f32.mrb[41].mxu0  ;;  %v5345_v49 = vmul.f32 1.442695, %v4974_v44  ;;  %v4982_v44 = vsub.f32 0.0, %v4234_v40 }
 0x84b   : > { %v8591_v56 = vpop.eup %8590  ;;  %6716 = vst [vmem:[%s10622_s26 + $0x1c0] sm:$0xff] %v7267_v27  ;;  %8610 = vpow2.f32 %v5323_v8  ;;  %11682 = vst [vmem:[#allocation3_spill] sm:$0xff] %v11035_v26  ;;  %v11038_v59 = vpop.f32.mrb[10].mxu1  ;;  %v5349_v8 = vmul.f32 1.442695, %v4976_v3 }
 0x84c   : > { %v8593_v11 = vpop.eup %8592  ;;  %6717 = vst [vmem:[%s10622_s26 + $0x1c8] sm:$0xff] %v7268_v6  ;;  %8612 = vpow2.f32 %v5331_v50  ;;  %11683 = vst [vmem:[#allocation4_spill] sm:$0xff] %v11038_v59  ;;  %v11040_v20 = vpop.f32.mrb[42].mxu0  ;;  %v5347_v50 = vmul.f32 1.442695, %v4975_v33 }
 0x84d   : > { %11684 = vst [vmem:[#allocation5_spill] sm:$0xff] %v11040_v20  ;;  %v8595_v61 = vpop.eup %8594  ;;  %v7271_v62 = vpack.c.bf16 %v8593_v11, %v8589_v57  ;;  %8614 = vpow2.f32 %v5335_v23  ;;  %v11042_v28 = vpop.f32.mrb[11].mxu1  ;;  %v5351_v59 = vmul.f32 1.442695, %v4977_v17  ;;  %v5359_v23 = vmul.f32 1.442695, %v4981_v31 }
 0x84e   : > { %v11044_v27 = vpop.f32.mrb[43].mxu0  ;;  %v8597_v26 = vpop.eup %8596  ;;  %v7272_v6 = vpack.c.bf16 %v8595_v61, %v8591_v56  ;;  %8616 = vpow2.f32 %v5333_v12  ;;  %v5363_v57 = vmul.f32 1.442695, %v4983_v47  ;;  %v5361_v12 = vmul.f32 1.442695, %v4982_v44 }
 0x84f   : > { %v8599_v0 = vpop.eup %8598  ;;  %6720 = vst [vmem:[%s10622_s26 + $0x1dc] sm:$0xff] %v7271_v62  ;;  %8618 = vpow2.f32 %v5337_v58  ;;  %v11050_v33 = vpop.f32.mrb[12].mxu1  ;;  %v4427_v31 = vadd.f32 %v10821_v60, %v10565_v54  ;;  %v4238_v60 = vadd.f32 %v10828_v39, %v10563_v43 }
 0x850   : > { %v8601_v20 = vpop.eup %8600  ;;  %6721 = vst [vmem:[%s10622_s26 + $0x1e4] sm:$0xff] %v7272_v6  ;;  %8620 = vpow2.f32 %v5345_v49  ;;  %v11052_v40 = vpop.f32.mrb[44].mxu0  ;;  %v4429_v6 = vadd.f32 %v10826_v46, %v10561_v53 }
 0x851   : > { %v8603_v3 = vpop.eup %8602  ;;  %v7275_v1 = vpack.c.bf16 %v8601_v20, %v8597_v26  ;;  %8622 = vpow2.f32 %v5349_v8  ;;  %v11057_v17 = vpop.f32.mrb[13].mxu1  ;;  %v4236_v8 = vadd.f32 %v10824_v55, %v10559_v51 }
 0x852   : > { %v11048_v11 = vpop.eup %8604  ;;  %v7276_v56 = vpack.c.bf16 %v8603_v3, %v8599_v0  ;;  %8624 = vpow2.f32 %v5347_v50  ;;  %v11059_v49 = vpop.f32.mrb[45].mxu0  ;;  %v4984_v3 = vsub.f32 0.0, %v4427_v31 }
 0x853   : > { %v11054_v58 = vpop.eup %8606  ;;  %6724 = vst [vmem:[%s10622_s26 + $0x1f8] sm:$0xff] %v7275_v1  ;;  %8626 = vpow2.f32 %v5351_v59  ;;  %v11064_v20 = vpop.f32.mrb[14].mxu1  ;;  %v4988_v55 = vsub.f32 0.0, %v4236_v8  ;;  %v4242_v8 = vadd.f32 %v10840_v10, %v10559_v51 }
 0x854   : > { %v8609_v26 = vpop.eup %8608  ;;  %6725 = vst [vmem:[%s10622_s26 + $0x200] sm:$0xff] %v7276_v56  ;;  %8628 = vpow2.f32 %v5359_v23  ;;  %11685 = vst [vmem:[#allocation6_spill] sm:$0xff] %v11064_v20  ;;  %v5365_v39 = vmul.f32 1.442695, %v4984_v3 }
 0x855   : > { %v8611_v61 = vpop.eup %8610  ;;  %v5633_v62 = vadd.f32 1.0, %v8609_v26  ;;  %8630 = vpow2.f32 %v5363_v57  ;;  %v4990_v26 = vsub.f32 0.0, %v4429_v6 }
 0x856   : > { %v8613_v47 = vpop.eup %8612  ;;  %v5635_v59 = vadd.f32 1.0, %v8611_v61  ;;  %8632 = vpow2.f32 %v5361_v12 }
 0x857   : > { %v8615_v50 = vpop.eup %8614  ;;  %8634 = vrcp.f32 %v5633_v62  ;;  %v5639_v44 = vadd.f32 1.0, %v8613_v47  ;;  %v4989_v62 = vsub.f32 0.0, %v4238_v60  ;;  %v4435_v60 = vadd.f32 %v10842_v2, %v10561_v53 }
 0x858   : > { %v8617_v0 = vpop.eup %8616  ;;  %8636 = vrcp.f32 %v5635_v59  ;;  %v5641_v23 = vadd.f32 1.0, %v8615_v50  ;;  %v4431_v59 = vadd.f32 %v10830_v45, %v10565_v54  ;;  %v4244_v45 = vadd.f32 %v10845_v4, %v10563_v43 }
 0x859   : > { %v8619_v1 = vpop.eup %8618  ;;  %8638 = vrcp.f32 %v5639_v44  ;;  %v5640_v57 = vadd.f32 1.0, %v8617_v0  ;;  %v5373_v44 = vmul.f32 1.442695, %v4988_v55  ;;  %v4995_v2 = vsub.f32 0.0, %v4242_v8 }
 0x85a   : > { %v8621_v56 = vpop.eup %8620  ;;  %8640 = vrcp.f32 %v5641_v23  ;;  %v5642_v12 = vadd.f32 1.0, %v8619_v1  ;;  %v5377_v23 = vmul.f32 1.442695, %v4990_v26  ;;  %v4991_v10 = vsub.f32 0.0, %v4431_v59 }
 0x85b   : > { %v8623_v61 = vpop.eup %8622  ;;  %8642 = vrcp.f32 %v5640_v57  ;;  %v5646_v46 = vadd.f32 1.0, %v8621_v56  ;;  %v5375_v57 = vmul.f32 1.442695, %v4989_v62  ;;  %v11080_v56 = vpop.f32.mrb[46].mxu0  ;;  %v4997_v59 = vsub.f32 0.0, %v4435_v60 }
 0x85c   : > { %v8625_v47 = vpop.eup %8624  ;;  %8644 = vrcp.f32 %v5642_v12  ;;  %v5648_v20 = vadd.f32 1.0, %v8623_v61  ;;  %11686 = vst [vmem:[#allocation29_spill] sm:$0xff] %v11080_v56  ;;  %v11088_v4 = vpop.f32.mrb[47].mxu0  ;;  %v4996_v8 = vsub.f32 0.0, %v4244_v45 }
 0x85d   : > { %v8627_v31 = vpop.eup %8626  ;;  %8646 = vrcp.f32 %v5646_v46  ;;  %v5647_v50 = vadd.f32 1.0, %v8625_v47  ;;  %v11688_v47 = vld [vmem:[#allocation8_spill] sm:$0xff]  ;;  %v5391_v45 = vmul.f32 1.442695, %v4997_v59 }
 0x85e   : > { %v8629_v0 = vpop.eup %8628  ;;  %8648 = vrcp.f32 %v5648_v20  ;;  %v5649_v6 = vadd.f32 1.0, %v8627_v31  ;;  %v11687_v20 = vld [vmem:[#allocation7_spill] sm:$0xff]  ;;  %v4246_v62 = vadd.f32 %v11688_v47, %v10559_v51  ;;  %v11086_v31 = vpop.f32.mrb[15].mxu1  ;;  %11690 = vst [vmem:[#allocation8_spill] sm:$0xff] %v11088_v4  ;;  %v5379_v4 = vmul.f32 1.442695, %v4991_v10 }
 0x85f   : > { %v8631_v1 = vpop.eup %8630  ;;  %8650 = vrcp.f32 %v5647_v50  ;;  %v5653_v3 = vadd.f32 1.0, %v8629_v0  ;;  %v4437_v61 = vadd.f32 %v11687_v20, %v10565_v54  ;;  %11689 = vst [vmem:[#allocation7_spill] sm:$0xff] %v11086_v31  ;;  %v11692_v20 = vld [vmem:[#allocation10_spill] sm:$0xff] }
 0x860   : > { %v8633_v55 = vpop.eup %8632  ;;  %8652 = vrcp.f32 %v5649_v6  ;;  %v5655_v12 = vadd.f32 1.0, %v8631_v1  ;;  %v11691_v6 = vld [vmem:[#allocation9_spill] sm:$0xff]  ;;  %v4248_v47 = vadd.f32 %v11692_v20, %v10563_v43 }
 0x861   : > { %v8635_v26 = vpop.eup %8634  ;;  %8654 = vrcp.f32 %v5653_v3  ;;  %v5654_v46 = vadd.f32 1.0, %v8633_v55  ;;  %v4439_v1 = vadd.f32 %v11691_v6, %v10561_v53  ;;  %v4998_v56 = vsub.f32 0.0, %v4437_v61  ;;  %v11100_v61 = vpop.f32.mrb[16].mxu1 }
 0x862   : > { %v8637_v50 = vpop.eup %8636  ;;  %v7279_v0 = vpack.c.bf16 %v8635_v26, %v11048_v11  ;;  %8656 = vrcp.f32 %v5655_v12  ;;  %v11693_v11 = vld [vmem:[#allocation11_spill] sm:$0xff]  ;;  %v5387_v26 = vmul.f32 1.442695, %v4995_v2  ;;  %v5002_v6 = vsub.f32 0.0, %v4246_v62  ;;  %v11105_v62 = vpop.f32.mrb[17].mxu1 }
 0x863   : > { %v8639_v3 = vpop.eup %8638  ;;  %v7280_v55 = vpack.c.bf16 %v8637_v50, %v11054_v58  ;;  %8658 = vrcp.f32 %v5654_v46  ;;  %v4441_v12 = vadd.f32 %v11693_v11, %v10565_v54  ;;  %v5004_v50 = vsub.f32 0.0, %v4439_v1  ;;  %v11102_v11 = vpop.f32.mrb[48].mxu0 }
 0x864   : > { %v8641_v31 = vpop.eup %8640  ;;  %6728 = vst [vmem:[%s10622_s26 + $0x214] sm:$0xff] %v7279_v0  ;;  %8660 = vpow2.f32 %v5365_v39  ;;  %v5389_v39 = vmul.f32 1.442695, %v4996_v8  ;;  %v5003_v10 = vsub.f32 0.0, %v4248_v47 }
 0x865   : > { %v8643_v60 = vpop.eup %8642  ;;  %6729 = vst [vmem:[%s10622_s26 + $0x21c] sm:$0xff] %v7280_v55  ;;  %8662 = vpow2.f32 %v5373_v44  ;;  %v5393_v44 = vmul.f32 1.442695, %v4998_v56  ;;  %v5005_v2 = vsub.f32 0.0, %v4441_v12 }
 0x866   : > { %v8645_v58 = vpop.eup %8644  ;;  %v7283_v46 = vpack.c.bf16 %v8643_v60, %v8639_v3  ;;  %8664 = vpow2.f32 %v5377_v23  ;;  %v11107_v23 = vpop.f32.mrb[49].mxu0 }
 0x867   : > { %v8647_v20 = vpop.eup %8646  ;;  %v7284_v0 = vpack.c.bf16 %v8645_v58, %v8641_v31  ;;  %8666 = vpow2.f32 %v5375_v57  ;;  %v5401_v57 = vmul.f32 1.442695, %v5002_v6  ;;  %v11110_v31 = vpop.f32.mrb[18].mxu1  ;;  %v5403_v58 = vmul.f32 1.442695, %v5003_v10 }
 0x868   : > { %v8649_v55 = vpop.eup %8648  ;;  %6732 = vst [vmem:[%s10622_s26 + $0x230] sm:$0xff] %v7283_v46  ;;  %8668 = vpow2.f32 %v5379_v4  ;;  %v11112_v1 = vpop.f32.mrb[50].mxu0  ;;  %v5405_v4 = vmul.f32 1.442695, %v5004_v50  ;;  %v4252_v50 = vadd.f32 %v10865_v24, %v10559_v51 }
 0x869   : > { %v8651_v59 = vpop.eup %8650  ;;  %6733 = vst [vmem:[%s10622_s26 + $0x238] sm:$0xff] %v7284_v0  ;;  %8670 = vpow2.f32 %v5387_v26  ;;  %11694 = vst [vmem:[#allocation9_spill] sm:$0xff] %v11112_v1  ;;  %v11114_v56 = vpop.f32.mrb[19].mxu1  ;;  %v5407_v26 = vmul.f32 1.442695, %v5005_v2 }
 0x86a   : > { %v8653_v3 = vpop.eup %8652  ;;  %v7287_v8 = vpack.c.bf16 %v8651_v59, %v8647_v20  ;;  %8672 = vpow2.f32 %v5391_v45  ;;  %11695 = vst [vmem:[#allocation10_spill] sm:$0xff] %v11114_v56  ;;  %v11116_v47 = vpop.f32.mrb[51].mxu0 }
 0x86b   : > { %11696 = vst [vmem:[#allocation11_spill] sm:$0xff] %v11116_v47  ;;  %v8655_v12 = vpop.eup %8654  ;;  %v7288_v60 = vpack.c.bf16 %v8653_v3, %v8649_v55  ;;  %8674 = vpow2.f32 %v5389_v39  ;;  %v11697_v39 = vld [vmem:[#allocation12_spill] sm:$0xff]  ;;  %v11126_v55 = vpop.f32.mrb[20].mxu1 }
 0x86c   : > { %v11118_v46 = vpop.eup %8656  ;;  %6736 = vst [vmem:[%s10622_s26 + $0x24c] sm:$0xff] %v7287_v8  ;;  %8676 = vpow2.f32 %v5393_v44  ;;  %v4445_v10 = vadd.f32 %v11697_v39, %v10561_v53  ;;  %11698 = vst [vmem:[#allocation12_spill] sm:$0xff] %v11126_v55  ;;  %v11128_v44 = vpop.f32.mrb[52].mxu0 }
 0x86d   : > { %v8659_v6 = vpop.eup %8658  ;;  %6737 = vst [vmem:[%s10622_s26 + $0x254] sm:$0xff] %v7288_v60  ;;  %8678 = vpow2.f32 %v5401_v57  ;;  %11699 = vst [vmem:[#allocation30_spill] sm:$0xff] %v11128_v44  ;;  %v11700_v57 = vld [vmem:[#allocation13_spill] sm:$0xff] }
 0x86e   : > { %v8661_v20 = vpop.eup %8660  ;;  %v7291_v45 = vpack.c.bf16 %v8659_v6, %v8655_v12  ;;  %8680 = vpow2.f32 %v5405_v4  ;;  %v4254_v8 = vadd.f32 %v11700_v57, %v10563_v43  ;;  %v5011_v39 = vsub.f32 0.0, %v4445_v10  ;;  %v11701_v57 = vld [vmem:[#allocation14_spill] sm:$0xff] }
 0x86f   : > { %v8663_v0 = vpop.eup %8662  ;;  %v5656_v59 = vadd.f32 1.0, %v8661_v20  ;;  %8682 = vpow2.f32 %v5403_v58  ;;  %v5009_v58 = vsub.f32 0.0, %v4252_v50  ;;  %v4447_v47 = vadd.f32 %v11701_v57, %v10565_v54 }
 0x870   : > { %v8665_v2 = vpop.eup %8664  ;;  %6740 = vst [vmem:[%s10622_s26 + $0x268] sm:$0xff] %v7291_v45  ;;  %v5660_v3 = vadd.f32 1.0, %v8663_v0  ;;  %8684 = vpow2.f32 %v5407_v26  ;;  %v5010_v45 = vsub.f32 0.0, %v4254_v8  ;;  %v4256_v50 = vadd.f32 %v10877_v7, %v10559_v51  ;;  %v11704_v7 = vld [vmem:[#allocation17_spill] sm:$0xff] }
 0x871   : > { %v8667_v4 = vpop.eup %8666  ;;  %8686 = vrcp.f32 %v5656_v59  ;;  %v5662_v24 = vadd.f32 1.0, %v8665_v2  ;;  %v4451_v56 = vadd.f32 %v11704_v7, %v10565_v54 }
 0x872   : > { %v8669_v12 = vpop.eup %8668  ;;  %8688 = vrcp.f32 %v5660_v3  ;;  %v5661_v60 = vadd.f32 1.0, %v8667_v4  ;;  %v5415_v3 = vmul.f32 1.442695, %v5009_v58 }
 0x873   : > { %v8671_v6 = vpop.eup %8670  ;;  %8690 = vrcp.f32 %v5662_v24  ;;  %v5663_v20 = vadd.f32 1.0, %v8669_v12  ;;  %v5419_v24 = vmul.f32 1.442695, %v5011_v39  ;;  %v11702_v12 = vld [vmem:[#allocation15_spill] sm:$0xff] }
 0x874   : > { %v8673_v55 = vpop.eup %8672  ;;  %8692 = vrcp.f32 %v5661_v60  ;;  %v5667_v44 = vadd.f32 1.0, %v8671_v6  ;;  %v4449_v8 = vadd.f32 %v11702_v12, %v10561_v53  ;;  %v5417_v6 = vmul.f32 1.442695, %v5010_v45  ;;  %v11147_v45 = vpop.f32.mrb[53].mxu0 }
 0x875   : > { %v8675_v0 = vpop.eup %8674  ;;  %8694 = vrcp.f32 %v5663_v20  ;;  %v5669_v26 = vadd.f32 1.0, %v8673_v55  ;;  %v11703_v20 = vld [vmem:[#allocation16_spill] sm:$0xff]  ;;  %v4262_v12 = vadd.f32 %v10897_v32, %v10559_v51  ;;  %11706 = vst [vmem:[#allocation14_spill] sm:$0xff] %v11147_v45  ;;  %v4264_v32 = vadd.f32 %v10901_v30, %v10563_v43  ;;  %v11156_v7 = vpop.f32.mrb[54].mxu0 }
 0x876   : > { %v8677_v59 = vpop.eup %8676  ;;  %8696 = vrcp.f32 %v5667_v44  ;;  %v5668_v2 = vadd.f32 1.0, %v8675_v0  ;;  %v4258_v57 = vadd.f32 %v11703_v20, %v10563_v43  ;;  %v5012_v0 = vsub.f32 0.0, %v4447_v47  ;;  %11708 = vst [vmem:[#allocation16_spill] sm:$0xff] %v11156_v7 }
 0x877   : > { %v8679_v4 = vpop.eup %8678  ;;  %8698 = vrcp.f32 %v5669_v26  ;;  %v5670_v10 = vadd.f32 1.0, %v8677_v59  ;;  %v5016_v59 = vsub.f32 0.0, %v4256_v50  ;;  %v4455_v47 = vadd.f32 %v10899_v25, %v10561_v53 }
 0x878   : > { %v8681_v60 = vpop.eup %8680  ;;  %8700 = vrcp.f32 %v5668_v2  ;;  %v5674_v55 = vadd.f32 1.0, %v8679_v4  ;;  %v11145_v2 = vpop.f32.mrb[21].mxu1  ;;  %v5017_v50 = vsub.f32 0.0, %v4258_v57  ;;  %v5023_v57 = vsub.f32 0.0, %v4262_v12 }
 0x879   : > { %v8683_v44 = vpop.eup %8682  ;;  %8702 = vrcp.f32 %v5670_v10  ;;  %v5676_v58 = vadd.f32 1.0, %v8681_v60  ;;  %11705 = vst [vmem:[#allocation13_spill] sm:$0xff] %v11145_v2  ;;  %v5018_v10 = vsub.f32 0.0, %v4449_v8  ;;  %v4457_v8 = vadd.f32 %v10903_v22, %v10565_v54 }
 0x87a   : > { %v8685_v26 = vpop.eup %8684  ;;  %8704 = vrcp.f32 %v5674_v55  ;;  %v5675_v39 = vadd.f32 1.0, %v8683_v44  ;;  %v11154_v44 = vpop.f32.mrb[22].mxu1 }
 0x87b   : > { %v8687_v4 = vpop.eup %8686  ;;  %8706 = vrcp.f32 %v5676_v58  ;;  %v5677_v20 = vadd.f32 1.0, %v8685_v26  ;;  %11707 = vst [vmem:[#allocation15_spill] sm:$0xff] %v11154_v44  ;;  %v5421_v58 = vmul.f32 1.442695, %v5012_v0  ;;  %v5019_v26 = vsub.f32 0.0, %v4451_v56  ;;  %v11165_v44 = vpop.f32.mrb[55].mxu0 }
 0x87c   : > { %v8689_v60 = vpop.eup %8688  ;;  %v7292_v55 = vpack.c.bf16 %v8687_v4, %v11118_v46  ;;  %8708 = vrcp.f32 %v5675_v39  ;;  %v5429_v46 = vmul.f32 1.442695, %v5016_v59  ;;  %v11709_v39 = vld [vmem:[#allocation18_spill] sm:$0xff]  ;;  %v11163_v4 = vpop.f32.mrb[23].mxu1  ;;  %v5433_v56 = vmul.f32 1.442695, %v5018_v10 }
 0x87d   : > { %v8691_v45 = vpop.eup %8690  ;;  %8710 = vrcp.f32 %v5677_v20  ;;  %v4266_v30 = vadd.f32 %v11709_v39, %v10559_v51  ;;  %11710 = vst [vmem:[#allocation17_spill] sm:$0xff] %v11163_v4  ;;  %11711 = vst [vmem:[#allocation18_spill] sm:$0xff] %v11165_v44  ;;  %v5025_v20 = vsub.f32 0.0, %v4455_v47  ;;  %v5024_v59 = vsub.f32 0.0, %v4264_v32  ;;  %v11171_v32 = vpop.f32.mrb[56].mxu0 }
 0x87e   : > { %v8693_v25 = vpop.eup %8692  ;;  %6741 = vst [vmem:[%s10622_s26 + $0x270] sm:$0xff] %v7292_v55  ;;  %8712 = vpow2.f32 %v5415_v3  ;;  %v5431_v3 = vmul.f32 1.442695, %v5017_v50  ;;  %v5435_v12 = vmul.f32 1.442695, %v5019_v26  ;;  %v5026_v39 = vsub.f32 0.0, %v4457_v8 }
 0x87f   : > { %v8695_v7 = vpop.eup %8694  ;;  %v7295_v0 = vpack.c.bf16 %v8693_v25, %v8689_v60  ;;  %8714 = vpow2.f32 %v5419_v24  ;;  %v5443_v44 = vmul.f32 1.442695, %v5023_v57  ;;  %v5030_v4 = vsub.f32 0.0, %v4266_v30  ;;  %v11169_v50 = vpop.f32.mrb[24].mxu1  ;;  %v11712_v25 = vld [vmem:[#allocation19_spill] sm:$0xff] }
 0x880   : > { %v8697_v22 = vpop.eup %8696  ;;  %v7296_v2 = vpack.c.bf16 %v8695_v7, %v8691_v45  ;;  %8716 = vpow2.f32 %v5417_v6  ;;  %v5447_v10 = vmul.f32 1.442695, %v5025_v20  ;;  %v5445_v47 = vmul.f32 1.442695, %v5024_v59  ;;  %v11176_v26 = vpop.f32.mrb[57].mxu0  ;;  %v11713_v20 = vld [vmem:[#allocation20_spill] sm:$0xff] }
 0x881   : > { %v8699_v55 = vpop.eup %8698  ;;  %6744 = vst [vmem:[%s10622_s26 + $0x284] sm:$0xff] %v7295_v0  ;;  %8718 = vpow2.f32 %v5421_v58  ;;  %v11174_v58 = vpop.f32.mrb[25].mxu1  ;;  %v5457_v8 = vmul.f32 1.442695, %v5030_v4 }
 0x882   : > { %v8701_v1 = vpop.eup %8700  ;;  %6745 = vst [vmem:[%s10622_s26 + $0x28c] sm:$0xff] %v7296_v2  ;;  %8720 = vpow2.f32 %v5429_v46  ;;  %v5449_v2 = vmul.f32 1.442695, %v5026_v39  ;;  %v4459_v46 = vadd.f32 %v11712_v25, %v10561_v53  ;;  %v11181_v57 = vpop.f32.mrb[26].mxu1 }
 0x883   : > { %v8703_v60 = vpop.eup %8702  ;;  %v7299_v24 = vpack.c.bf16 %v8701_v1, %v8697_v22  ;;  %8722 = vpow2.f32 %v5433_v56  ;;  %v11183_v30 = vpop.f32.mrb[58].mxu0  ;;  %v4268_v22 = vadd.f32 %v11713_v20, %v10563_v43 }
 0x884   : > { %v8705_v45 = vpop.eup %8704  ;;  %v7300_v6 = vpack.c.bf16 %v8703_v60, %v8699_v55  ;;  %8724 = vpow2.f32 %v5431_v3  ;;  %v11187_v3 = vpop.f32.mrb[27].mxu1 }
 0x885   : > { %v8707_v7 = vpop.eup %8706  ;;  %6748 = vst [vmem:[%s10622_s26 + $0x2a0] sm:$0xff] %v7299_v24  ;;  %8726 = vpow2.f32 %v5435_v12  ;;  %v5032_v24 = vsub.f32 0.0, %v4459_v46 }
 0x886   : > { %v8709_v1 = vpop.eup %8708  ;;  %6749 = vst [vmem:[%s10622_s26 + $0x2a8] sm:$0xff] %v7300_v6  ;;  %8728 = vpow2.f32 %v5443_v44  ;;  %v4461_v44 = vadd.f32 %v10913_v41, %v10565_v54  ;;  %v5031_v6 = vsub.f32 0.0, %v4268_v22 }
 0x887   : > { %v8711_v0 = vpop.eup %8710  ;;  %v7303_v56 = vpack.c.bf16 %v8709_v1, %v8705_v45  ;;  %8730 = vpow2.f32 %v5447_v10  ;;  %v5461_v20 = vmul.f32 1.442695, %v5032_v24  ;;  %v4274_v24 = vadd.f32 %v10923_v48, %v10563_v43 }
 0x888   : > { %v8713_v59 = vpop.eup %8712  ;;  %v7304_v55 = vpack.c.bf16 %v8711_v0, %v8707_v7  ;;  %8732 = vpow2.f32 %v5445_v47  ;;  %v5033_v47 = vsub.f32 0.0, %v4461_v44  ;;  %v4272_v0 = vadd.f32 %v10917_v52, %v10559_v51 }
 0x889   : > { %v8715_v4 = vpop.eup %8714  ;;  %6752 = vst [vmem:[%s10622_s26 + $0x2bc] sm:$0xff] %v7303_v56  ;;  %v5681_v12 = vadd.f32 1.0, %v8713_v59  ;;  %8734 = vpow2.f32 %v5449_v2  ;;  %v5459_v59 = vmul.f32 1.442695, %v5031_v6  ;;  %v4467_v6 = vadd.f32 %v10925_v36, %v10565_v54 }
 0x88a   : > { %v8717_v39 = vpop.eup %8716  ;;  %6753 = vst [vmem:[%s10622_s26 + $0x2c4] sm:$0xff] %v7304_v55  ;;  %v5683_v60 = vadd.f32 1.0, %v8715_v4  ;;  %8736 = vpow2.f32 %v5457_v8  ;;  %v4465_v8 = vadd.f32 %v10919_v14, %v10561_v53  ;;  %v11714_v55 = vld [vmem:[#allocation2_spill] sm:$0xff]  ;;  %v4469_v36 = vadd.f32 %v10930_v5, %v10561_v53 }
 0x88b   : > { %v8719_v10 = vpop.eup %8718  ;;  %8738 = vrcp.f32 %v5681_v12  ;;  %v5682_v45 = vadd.f32 1.0, %v8717_v39  ;;  %v3782_v4 = vsub.s32 4, %v11714_v55  ;;  %v5463_v39 = vmul.f32 1.442695, %v5033_v47 }
 0x88c   : > { %v8721_v1 = vpop.eup %8720  ;;  %8740 = vrcp.f32 %v5683_v60  ;;  %v5684_v7 = vadd.f32 1.0, %v8719_v10  ;;  %v3790_v60 = vsub.s32 6, %v11714_v55  ;;  %v4276_v47 = vadd.f32 %v10928_v63, %v10559_v51 }
 0x88d   : > { %v8723_v25 = vpop.eup %8722  ;;  %8742 = vrcp.f32 %v5682_v45  ;;  %v5688_v41 = vadd.f32 1.0, %v8721_v1  ;;  %v5037_v45 = vsub.f32 0.0, %v4272_v0  ;;  %v11208_v0 = vld [vmem:[%s11642_s16] sm:$0x7f] }
 0x88e   : > { %v8725_v2 = vpop.eup %8724  ;;  %8744 = vrcp.f32 %v5684_v7  ;;  %v5690_v56 = vadd.f32 1.0, %v8723_v25  ;;  %v5039_v7 = vsub.f32 0.0, %v4465_v8  ;;  %v11211_v48 = vrot.slane %v11208_v0, %v3782_v4 }
 0x88f   : > { %v8727_v46 = vpop.eup %8726  ;;  %8746 = vrcp.f32 %v5688_v41  ;;  %v5689_v22 = vadd.f32 1.0, %v8725_v2  ;;  %v11213_v2 = vpop.f32.mrb[59].mxu0  ;;  %v5044_v5 = vsub.f32 0.0, %v4276_v47 }
 0x890   : > { %v8729_v44 = vpop.eup %8728  ;;  %8748 = vrcp.f32 %v5690_v56  ;;  %v5691_v12 = vadd.f32 1.0, %v8727_v46  ;;  %v11218_v46 = vrot.slane %v11208_v0, %v3790_v60  ;;  %v5475_v53 = vmul.f32 1.442695, %v5039_v7  ;;  %v11716_v60 = vld [vmem:[#allocation22_spill] sm:$0xff]  ;;  %v11230_v7 = vpop.f32.mrb[60].mxu0 }
 0x891   : > { %v8731_v52 = vpop.eup %8730  ;;  %8750 = vrcp.f32 %v5689_v22  ;;  %v5695_v10 = vadd.f32 1.0, %v8729_v44  ;;  %v5038_v22 = vsub.f32 0.0, %v4274_v24  ;;  %v4278_v44 = vadd.f32 %v10935_v13, %v10563_v43  ;;  %v11717_v43 = vld [vmem:[#allocation23_spill] sm:$0xff] }
 0x892   : > { %v8733_v14 = vpop.eup %8732  ;;  %8752 = vrcp.f32 %v5691_v12  ;;  %v5697_v1 = vadd.f32 1.0, %v8731_v52  ;;  %v5471_v12 = vmul.f32 1.442695, %v5037_v45  ;;  %v5040_v52 = vsub.f32 0.0, %v4467_v6 }
 0x893   : > { %v8735_v25 = vpop.eup %8734  ;;  %8754 = vrcp.f32 %v5695_v10  ;;  %v5696_v41 = vadd.f32 1.0, %v8733_v14  ;;  %v11715_v10 = vld [vmem:[#allocation21_spill] sm:$0xff]  ;;  %v4709_v13 = vadd.f32 %v11717_v43, %v11218_v46 }
 0x894   : > { %v8737_v56 = vpop.eup %8736  ;;  %8756 = vrcp.f32 %v5697_v1  ;;  %v5698_v8 = vadd.f32 1.0, %v8735_v25  ;;  %v4471_v14 = vadd.f32 %v11715_v10, %v10565_v54  ;;  %v4508_v25 = vadd.f32 %v11716_v60, %v11211_v48 }
 0x895   : > { %v8739_v51 = vpop.eup %8738  ;;  %8758 = vrcp.f32 %v5696_v41  ;;  %v5702_v63 = vadd.f32 1.0, %v8737_v56  ;;  %v5046_v56 = vsub.f32 0.0, %v4469_v36  ;;  %v5473_v54 = vmul.f32 1.442695, %v5038_v22  ;;  %v11235_v36 = vpop.f32.mrb[61].mxu0 }
 0x896   : > { %v8741_v4 = vpop.eup %8740  ;;  %8760 = vrcp.f32 %v5698_v8  ;;  %v5045_v8 = vsub.f32 0.0, %v4278_v44  ;;  %v5477_v10 = vmul.f32 1.442695, %v5040_v52  ;;  %v3786_v22 = vsub.s32 5, %v11714_v55  ;;  %v11241_v60 = vpop.f32.mrb[62].mxu0 }
 0x897   : > { %v8743_v1 = vpop.eup %8742  ;;  %8762 = vrcp.f32 %v5702_v63  ;;  %v11228_v63 = vpop.f32.mrb[28].mxu1  ;;  %11718 = vst [vmem:[#allocation19_spill] sm:$0xff] %v11241_v60  ;;  %v5489_v52 = vmul.f32 1.442695, %v5046_v56 }
 0x898   : > { %v8745_v41 = vpop.eup %8744  ;;  %v7307_v24 = vpack.c.bf16 %v8743_v1, %v8739_v51  ;;  %8764 = vpow2.f32 %v5461_v20  ;;  %v5047_v51 = vsub.f32 0.0, %v4471_v14  ;;  %v11233_v20 = vpop.f32.mrb[29].mxu1  ;;  %v4847_v14 = vsub.f32 0.0, %v4709_v13 }
 0x899   : > { %v8747_v45 = vpop.eup %8746  ;;  %v7308_v6 = vpack.c.bf16 %v8745_v41, %v8741_v4  ;;  %8766 = vpow2.f32 %v5459_v59  ;;  %v5485_v4 = vmul.f32 1.442695, %v5044_v5  ;;  %v4831_v59 = vsub.f32 0.0, %v4508_v25  ;;  %v11239_v44 = vpop.f32.mrb[30].mxu1 }
 0x89a   : > { %v8749_v47 = vpop.eup %8748  ;;  %6756 = vst [vmem:[%s10622_s26 + $0x2d8] sm:$0xff] %v7307_v24  ;;  %8768 = vpow2.f32 %v5463_v39  ;;  %v11243_v24 = vpop.f32.mrb[31].mxu1  ;;  %v5487_v25 = vmul.f32 1.442695, %v5045_v8  ;;  %v5491_v55 = vmul.f32 1.442695, %v5047_v51 }
 0x89b   : > { %v8751_v1 = vpop.eup %8750  ;;  %6757 = vst [vmem:[%s10622_s26 + $0x2e0] sm:$0xff] %v7308_v6  ;;  %8770 = vpow2.f32 %v5471_v12  ;;  %v11245_v43 = vpop.f32.mrb[63].mxu0  ;;  %v11720_v51 = vld [vmem:[#allocation26_spill] sm:$0xff] }
 0x89c   : > { %v8753_v41 = vpop.eup %8752  ;;  %v7311_v39 = vpack.c.bf16 %v8751_v1, %v8747_v45  ;;  %8772 = vpow2.f32 %v5475_v53  ;;  %v5059_v45 = vmul.f32 1.442695, %v4831_v59  ;;  %v11250_v53 = vrot.slane %v11208_v0, %v3786_v22  ;;  %v11254_v8 = vpop.f32.mrb[32].mxu1 }
 0x89d   : > { %v8755_v12 = vpop.eup %8754  ;;  %v7312_v5 = vpack.c.bf16 %v8753_v41, %v8749_v47  ;;  %8774 = vpow2.f32 %v5473_v54  ;;  %v5091_v1 = vmul.f32 1.442695, %v4847_v14  ;;  %11719 = vst [vmem:[#allocation20_spill] sm:$0xff] %v11254_v8  ;;  %v11259_v59 = vpop.f32.mrb[33].mxu1 }
 0x89e   : > { %v8757_v6 = vpop.eup %8756  ;;  %6760 = vst [vmem:[%s10622_s26 + $0x2f4] sm:$0xff] %v7311_v39  ;;  %8776 = vpow2.f32 %v5477_v10  ;;  %11721 = vst [vmem:[#allocation2_spill] sm:$0xff] %v11259_v59  ;;  %v11264_v39 = vpop.f32.mrb[34].mxu1 }
 0x89f   : > { %v8759_v60 = vpop.eup %8758  ;;  %6761 = vst [vmem:[%s10622_s26 + $0x2fc] sm:$0xff] %v7312_v5  ;;  %8778 = vpow2.f32 %v5485_v4  ;;  %v4512_v4 = vadd.f32 %v11720_v51, %v11211_v48  ;;  %11723 = vst [vmem:[#allocation21_spill] sm:$0xff] %v11264_v39 }
 0x8a0   : > { %v8761_v56 = vpop.eup %8760  ;;  %v7315_v13 = vpack.c.bf16 %v8759_v60, %v8755_v12  ;;  %8780 = vpow2.f32 %v5489_v52  ;;  %v11722_v60 = vld [vmem:[#allocation24_spill] sm:$0xff]  ;;  %v11266_v12 = vpop.f32.mrb[35].mxu1 }
 0x8a1   : > { %v11252_v47 = vpop.eup %8762  ;;  %v7316_v54 = vpack.c.bf16 %v8761_v56, %v8757_v6  ;;  %8782 = vpow2.f32 %v5487_v25  ;;  %v4510_v41 = vadd.f32 %v11722_v60, %v11250_v53  ;;  %11724 = vst [vmem:[#allocation22_spill] sm:$0xff] %v11266_v12  ;;  %v11725_v6 = vld [vmem:[#allocation25_spill] sm:$0xff] }
 0x8a2   : > { %v8765_v10 = vpop.eup %8764  ;;  %6764 = vst [vmem:[%s10622_s26 + $0x310] sm:$0xff] %v7315_v13  ;;  %8784 = vpow2.f32 %v5491_v55  ;;  %v4701_v55 = vadd.f32 %v11725_v6, %v11218_v46 }
 0x8a3   : > { %v8767_v0 = vpop.eup %8766  ;;  %6765 = vst [vmem:[%s10622_s26 + $0x318] sm:$0xff] %v7316_v54  ;;  %v5704_v22 = vadd.f32 1.0, %v8765_v10  ;;  %8786 = vpow2.f32 %v5059_v45  ;;  %v4838_v45 = vsub.f32 0.0, %v4512_v4  ;;  %v11726_v54 = vld [vmem:[#allocation27_spill] sm:$0xff] }
 0x8a4   : > { %v8769_v52 = vpop.eup %8768  ;;  %v5703_v14 = vadd.f32 1.0, %v8767_v0  ;;  %8788 = vpow2.f32 %v5091_v1  ;;  %v4712_v10 = vadd.f32 %v11726_v54, %v11218_v46  ;;  %v4832_v0 = vsub.f32 0.0, %v4510_v41 }
 0x8a5   : > { %v8771_v5 = vpop.eup %8770  ;;  %8790 = vrcp.f32 %v5704_v22  ;;  %v5705_v25 = vadd.f32 1.0, %v8769_v52  ;;  %v11727_v22 = vld [vmem:[#allocation28_spill] sm:$0xff]  ;;  %v4833_v59 = vsub.f32 0.0, %v4701_v55  ;;  %v4704_v41 = vadd.f32 %v10973_v38, %v11218_v46 }
 0x8a6   : > { %v8773_v56 = vpop.eup %8772  ;;  %8792 = vrcp.f32 %v5703_v14  ;;  %v5709_v13 = vadd.f32 1.0, %v8771_v5  ;;  %v4514_v52 = vadd.f32 %v11727_v22, %v11250_v53  ;;  %v5073_v5 = vmul.f32 1.442695, %v4838_v45 }
 0x8a7   : > { %v8775_v51 = vpop.eup %8774  ;;  %8794 = vrcp.f32 %v5705_v25  ;;  %v5711_v60 = vadd.f32 1.0, %v8773_v56  ;;  %v4854_v8 = vsub.f32 0.0, %v4712_v10  ;;  %v5061_v56 = vmul.f32 1.442695, %v4832_v0 }
 0x8a8   : > { %v8777_v1 = vpop.eup %8776  ;;  %8796 = vrcp.f32 %v5709_v13  ;;  %v5710_v12 = vadd.f32 1.0, %v8775_v51  ;;  %v4839_v22 = vsub.f32 0.0, %v4514_v52  ;;  %v4725_v45 = vadd.f32 %v10981_v9, %v11218_v46 }
 0x8a9   : > { %v8779_v39 = vpop.eup %8778  ;;  %8798 = vrcp.f32 %v5711_v60  ;;  %v5712_v6 = vadd.f32 1.0, %v8777_v1  ;;  %v4518_v60 = vadd.f32 %v10979_v16, %v11211_v48  ;;  %v5105_v1 = vmul.f32 1.442695, %v4854_v8 }
 0x8aa   : > { %v8781_v14 = vpop.eup %8780  ;;  %8800 = vrcp.f32 %v5710_v12  ;;  %v5716_v4 = vadd.f32 1.0, %v8779_v39  ;;  %v5063_v39 = vmul.f32 1.442695, %v4833_v59  ;;  %v4520_v38 = vadd.f32 %v10984_v42, %v11250_v53 }
 0x8ab   : > { %v8783_v54 = vpop.eup %8782  ;;  %8802 = vrcp.f32 %v5712_v6  ;;  %v5718_v25 = vadd.f32 1.0, %v8781_v14  ;;  %v4840_v14 = vsub.f32 0.0, %v4704_v41  ;;  %v4717_v16 = vadd.f32 %v10986_v18, %v11218_v46 }
 0x8ac   : > { %v8785_v13 = vpop.eup %8784  ;;  %8804 = vrcp.f32 %v5716_v4  ;;  %v5717_v51 = vadd.f32 1.0, %v8783_v54  ;;  %v5075_v59 = vmul.f32 1.442695, %v4839_v22  ;;  %v4845_v54 = vsub.f32 0.0, %v4518_v60  ;;  %v11291_v60 = vpop.f32.mrb[36].mxu1 }
 0x8ad   : > { %v8787_v55 = vpop.eup %8786  ;;  %8806 = vrcp.f32 %v5718_v25  ;;  %v5719_v12 = vadd.f32 1.0, %v8785_v13  ;;  %v4522_v9 = vadd.f32 %v10989_v21, %v11211_v48  ;;  %v4875_v42 = vsub.f32 0.0, %v4725_v45 }
 0x8ae   : > { %v8789_v10 = vpop.eup %8788  ;;  %8808 = vrcp.f32 %v5717_v51  ;;  %v5503_v0 = vadd.f32 1.0, %v8787_v55  ;;  %v4728_v41 = vadd.f32 %v10991_v15, %v11218_v46  ;;  %v4846_v18 = vsub.f32 0.0, %v4520_v38 }
 0x8af   : > { %v8791_v6 = vpop.eup %8790  ;;  %8810 = vrcp.f32 %v5719_v12  ;;  %v5519_v52 = vadd.f32 1.0, %v8789_v10  ;;  %v4524_v22 = vadd.f32 %v10993_v34, %v11250_v53  ;;  %v5077_v21 = vmul.f32 1.442695, %v4840_v14  ;;  %v11294_v12 = vpop.f32.mrb[37].mxu1 }
 0x8b0   : > { %v8793_v4 = vpop.eup %8792  ;;  %8812 = vrcp.f32 %v5503_v0  ;;  %v5087_v15 = vmul.f32 1.442695, %v4845_v54  ;;  %v4852_v10 = vsub.f32 0.0, %v4522_v9  ;;  %v5147_v38 = vmul.f32 1.442695, %v4875_v42 }
 0x8b1   : > { %v8795_v25 = vpop.eup %8794  ;;  %v7319_v8 = vpack.c.bf16 %v8793_v4, %v11252_v47  ;;  %8814 = vrcp.f32 %v5519_v52  ;;  %v4861_v47 = vsub.f32 0.0, %v4717_v16  ;;  %v5089_v16 = vmul.f32 1.442695, %v4846_v18 }
 0x8b2   : > { %v8797_v13 = vpop.eup %8796  ;;  %v7320_v51 = vpack.c.bf16 %v8795_v25, %v8791_v6  ;;  %8816 = vpow2.f32 %v5061_v56  ;;  %v11297_v56 = vpop.f32.mrb[38].mxu1  ;;  %v4882_v6 = vsub.f32 0.0, %v4728_v41  ;;  %v4853_v4 = vsub.f32 0.0, %v4524_v22 }
 0x8b3   : > { %v8799_v55 = vpop.eup %8798  ;;  %6768 = vst [vmem:[%s10622_s26 + $0x32c] sm:$0xff] %v7319_v8  ;;  %8818 = vpow2.f32 %v5063_v39  ;;  %v11299_v52 = vpop.f32.mrb[39].mxu1  ;;  %v5101_v9 = vmul.f32 1.442695, %v4852_v10 }
 0x8b4   : > { %v8801_v45 = vpop.eup %8800  ;;  %6769 = vst [vmem:[%s10622_s26 + $0x334] sm:$0xff] %v7320_v51  ;;  %8820 = vpow2.f32 %v5073_v5  ;;  %v5119_v5 = vmul.f32 1.442695, %v4861_v47  ;;  %v5161_v42 = vmul.f32 1.442695, %v4882_v6  ;;  %v11305_v51 = vpop.f32.mrb[40].mxu1  ;;  %v4720_v47 = vadd.f32 %v10995_v35, %v11218_v46 }
 0x8b5   : > { %v8803_v0 = vpop.eup %8802  ;;  %v7323_v34 = vpack.c.bf16 %v8801_v45, %v8797_v13  ;;  %8822 = vpow2.f32 %v5105_v1  ;;  %v11308_v22 = vpop.f32.mrb[41].mxu1 }
 0x8b6   : > { %v8805_v39 = vpop.eup %8804  ;;  %v7324_v14 = vpack.c.bf16 %v8803_v0, %v8799_v55  ;;  %8824 = vpow2.f32 %v5075_v59  ;;  %v5103_v59 = vmul.f32 1.442695, %v4853_v4  ;;  %v11313_v45 = vpop.f32.mrb[42].mxu1  ;;  %v4528_v0 = vadd.f32 %v11028_v37, %v11211_v48 }
 0x8b7   : > { %v8807_v25 = vpop.eup %8806  ;;  %6772 = vst [vmem:[%s10622_s26 + $0x348] sm:$0xff] %v7323_v34  ;;  %8826 = vpow2.f32 %v5077_v21  ;;  %v11317_v34 = vpop.f32.mrb[43].mxu1  ;;  %v4530_v37 = vadd.f32 %v11033_v29, %v11250_v53 }
 0x8b8   : > { %v8809_v54 = vpop.eup %8808  ;;  %6773 = vst [vmem:[%s10622_s26 + $0x350] sm:$0xff] %v7324_v14  ;;  %8828 = vpow2.f32 %v5087_v15 }
 0x8b9   : > { %v8811_v1 = vpop.eup %8810  ;;  %v7327_v8 = vpack.c.bf16 %v8809_v54, %v8805_v39  ;;  %8830 = vpow2.f32 %v5147_v38  ;;  %v4741_v39 = vadd.f32 %v11030_v19, %v11218_v46 }
 0x8ba   : > { %v11303_v41 = vpop.eup %8812  ;;  %v7328_v13 = vpack.c.bf16 %v8811_v1, %v8807_v25  ;;  %8832 = vpow2.f32 %v5089_v16  ;;  %v4868_v25 = vsub.f32 0.0, %v4720_v47 }
 0x8bb   : > { %v8815_v18 = vpop.eup %8814  ;;  %6776 = vst [vmem:[%s10622_s26 + $0x364] sm:$0xff] %v7327_v8  ;;  %8834 = vpow2.f32 %v5119_v5 }
 0x8bc   : > { %v8817_v55 = vpop.eup %8816  ;;  %6777 = vst [vmem:[%s10622_s26 + $0x36c] sm:$0xff] %v7328_v13  ;;  %v7214_v21 = vpack.c.bf16 %v8815_v18, %v8815_v18  ;;  %8836 = vpow2.f32 %v5101_v9  ;;  %v4859_v9 = vsub.f32 0.0, %v4528_v0  ;;  %v11325_v13 = vpop.f32.mrb[44].mxu1  ;;  %v11728_v18 = vld [vmem:[#allocation3_spill] sm:$0xff] }
 0x8bd   : > { %v8819_v15 = vpop.eup %8818  ;;  %v5504_v10 = vadd.f32 1.0, %v8817_v55  ;;  %8838 = vpow2.f32 %v5161_v42  ;;  %v4903_v42 = vsub.f32 0.0, %v4741_v39  ;;  %v4733_v55 = vadd.f32 %v11728_v18, %v11218_v46 }
 0x8be   : > { %v8821_v38 = vpop.eup %8820  ;;  %6663 = vst.msk [vmem:[%s10622_s26 + $0x50] sm:$0xf] %vm6654_vm7, %v7214_v21  ;;  %v5505_v6 = vadd.f32 1.0, %v8819_v15  ;;  %8840 = vpow2.f32 %v5103_v59  ;;  %v11329_v21 = vpop.f32.mrb[45].mxu1  ;;  %v5133_v15 = vmul.f32 1.442695, %v4868_v25 }
 0x8bf   : > { %v8823_v14 = vpop.eup %8822  ;;  %8842 = vrcp.f32 %v5504_v10  ;;  %v5510_v35 = vadd.f32 1.0, %v8821_v38  ;;  %v4860_v10 = vsub.f32 0.0, %v4530_v37  ;;  %v11331_v0 = vpop.f32.mrb[46].mxu1  ;;  %v5115_v39 = vmul.f32 1.442695, %v4859_v9 }
 0x8c0   : > { %v8825_v16 = vpop.eup %8824  ;;  %8844 = vrcp.f32 %v5505_v6  ;;  %v5526_v4 = vadd.f32 1.0, %v8823_v14  ;;  %v11729_v14 = vld [vmem:[#allocation4_spill] sm:$0xff] }
 0x8c1   : > { %v8827_v5 = vpop.eup %8826  ;;  %8846 = vrcp.f32 %v5510_v35  ;;  %v5511_v54 = vadd.f32 1.0, %v8825_v16  ;;  %v4532_v35 = vadd.f32 %v11729_v14, %v11211_v48  ;;  %v11335_v16 = vpop.f32.mrb[47].mxu1  ;;  %v4736_v14 = vadd.f32 %v11044_v27, %v11218_v46 }
 0x8c2   : > { %v8829_v1 = vpop.eup %8828  ;;  %8848 = vrcp.f32 %v5526_v4  ;;  %v5512_v8 = vadd.f32 1.0, %v8827_v5 }
 0x8c3   : > { %v8831_v19 = vpop.eup %8830  ;;  %8850 = vrcp.f32 %v5511_v54  ;;  %v5517_v59 = vadd.f32 1.0, %v8829_v1  ;;  %v5203_v54 = vmul.f32 1.442695, %v4903_v42  ;;  %v11730_v1 = vld [vmem:[#allocation5_spill] sm:$0xff] }
 0x8c4   : > { %v8833_v47 = vpop.eup %8832  ;;  %8852 = vrcp.f32 %v5512_v8  ;;  %v5547_v29 = vadd.f32 1.0, %v8831_v19  ;;  %v4744_v8 = vadd.f32 %v11730_v1, %v11218_v46  ;;  %v4889_v19 = vsub.f32 0.0, %v4733_v55 }
 0x8c5   : > { %v8835_v38 = vpop.eup %8834  ;;  %8854 = vrcp.f32 %v5517_v59  ;;  %v5518_v6 = vadd.f32 1.0, %v8833_v47  ;;  %v4534_v59 = vadd.f32 %v11042_v28, %v11250_v53  ;;  %v5117_v47 = vmul.f32 1.442695, %v4860_v10  ;;  %v11348_v10 = vpop.f32.mrb[48].mxu1 }
 0x8c6   : > { %v8837_v4 = vpop.eup %8836  ;;  %8856 = vrcp.f32 %v5547_v29  ;;  %v5533_v5 = vadd.f32 1.0, %v8835_v38  ;;  %v4866_v38 = vsub.f32 0.0, %v4532_v35  ;;  %v4910_v28 = vsub.f32 0.0, %v4744_v8 }
 0x8c7   : > { %v8839_v25 = vpop.eup %8838  ;;  %8858 = vrcp.f32 %v5518_v6  ;;  %v5524_v37 = vadd.f32 1.0, %v8837_v4  ;;  %v4538_v6 = vadd.f32 %v11050_v33, %v11211_v48  ;;  %v4540_v35 = vadd.f32 %v11057_v17, %v11250_v53 }
 0x8c8   : > { %v8841_v9 = vpop.eup %8840  ;;  %8860 = vrcp.f32 %v5533_v5  ;;  %v5554_v18 = vadd.f32 1.0, %v8839_v25  ;;  %v4757_v5 = vadd.f32 %v11052_v40, %v11218_v46  ;;  %v4867_v25 = vsub.f32 0.0, %v4534_v59 }
 0x8c9   : > { %v8843_v29 = vpop.eup %8842  ;;  %8862 = vrcp.f32 %v5524_v37  ;;  %v5525_v42 = vadd.f32 1.0, %v8841_v9  ;;  %v11352_v37 = vpop.f32.mrb[49].mxu1  ;;  %v4896_v8 = vsub.f32 0.0, %v4736_v14  ;;  %v4749_v40 = vadd.f32 %v11059_v49, %v11218_v46 }
 0x8ca   : > { %v8845_v4 = vpop.eup %8844  ;;  %v7205_v55 = vpack.c.bf16 %v8843_v29, %v11303_v41  ;;  %8864 = vrcp.f32 %v5554_v18  ;;  %v5175_v41 = vmul.f32 1.442695, %v4889_v19  ;;  %v11357_v9 = vpop.f32.mrb[50].mxu1  ;;  %v5129_v17 = vmul.f32 1.442695, %v4866_v38 }
 0x8cb   : > { %v8847_v27 = vpop.eup %8846  ;;  %v7206_v1 = vpack.c.bf16 %v8845_v4, %v8845_v4  ;;  %8866 = vrcp.f32 %v5525_v42  ;;  %11731 = vst [vmem:[#allocation23_spill] sm:$0xff] %v11357_v9  ;;  %v4873_v29 = vsub.f32 0.0, %v4538_v6  ;;  %v11361_v42 = vpop.f32.mrb[51].mxu1  ;;  %v5217_v19 = vmul.f32 1.442695, %v4910_v28 }
 0x8cc   : > { %v8849_v33 = vpop.eup %8848  ;;  %6653 = vst [vmem:[%s10622_s26 + $0x10] sm:$0xff] %v7205_v55  ;;  %8868 = vpow2.f32 %v5133_v15  ;;  %v4931_v14 = vsub.f32 0.0, %v4757_v5  ;;  %v5131_v9 = vmul.f32 1.442695, %v4867_v25  ;;  %v4917_v38 = vsub.f32 0.0, %v4749_v40  ;;  %v11368_v25 = vpop.f32.mrb[52].mxu1 }
 0x8cd   : > { %v8851_v18 = vpop.eup %8850  ;;  %6655 = vst.msk [vmem:[%s10622_s26 + $0x18] sm:$0xf] %vm6654_vm7, %v7206_v1  ;;  %v7218_v59 = vpack.c.bf16 %v8849_v33, %v8849_v33  ;;  %8870 = vpow2.f32 %v5115_v39  ;;  %v4874_v1 = vsub.f32 0.0, %v4540_v35  ;;  %v5189_v39 = vmul.f32 1.442695, %v4896_v8  ;;  %v11372_v40 = vpop.f32.mrb[53].mxu1 }
 0x8ce   : > { %v8853_v4 = vpop.eup %8852  ;;  %v7209_v15 = vpack.c.bf16 %v8851_v18, %v8847_v27  ;;  %8872 = vpow2.f32 %v5203_v54  ;;  %v5143_v28 = vmul.f32 1.442695, %v4873_v29 }
 0x8cf   : > { %v8855_v55 = vpop.eup %8854  ;;  %6667 = vst.msk [vmem:[%s10622_s26 + $0x6c] sm:$0xf] %vm6654_vm7, %v7218_v59  ;;  %v7210_v49 = vpack.c.bf16 %v8853_v4, %v8853_v4  ;;  %8874 = vpow2.f32 %v5117_v47  ;;  %v5259_v47 = vmul.f32 1.442695, %v4931_v14  ;;  %v5145_v8 = vmul.f32 1.442695, %v4874_v1 }
 0x8d0   : > { %v8857_v33 = vpop.eup %8856  ;;  %6658 = vst [vmem:[%s10622_s26 + $0x2c] sm:$0xff] %v7209_v15  ;;  %8876 = vpow2.f32 %v5175_v41  ;;  %v5231_v59 = vmul.f32 1.442695, %v4917_v38  ;;  %v11732_v14 = vld [vmem:[#allocation6_spill] sm:$0xff] }
 0x8d1   : > { %v8859_v6 = vpop.eup %8858  ;;  %6659 = vst.msk [vmem:[%s10622_s26 + $0x34] sm:$0xf] %vm6654_vm7, %v7210_v49  ;;  %v7230_v54 = vpack.c.bf16 %v8857_v33, %v8857_v33  ;;  %8878 = vpow2.f32 %v5129_v17  ;;  %v11375_v17 = vpop.f32.mrb[54].mxu1  ;;  %v11733_v33 = vld [vmem:[#allocation29_spill] sm:$0xff] }
 0x8d2   : > { %v8861_v5 = vpop.eup %8860  ;;  %v7213_v27 = vpack.c.bf16 %v8859_v6, %v8855_v55  ;;  %8880 = vpow2.f32 %v5217_v19  ;;  %v11379_v15 = vpop.f32.mrb[55].mxu1  ;;  %v4542_v55 = vadd.f32 %v11732_v14, %v11211_v48 }
 0x8d3   : > { %v8863_v35 = vpop.eup %8862  ;;  %6679 = vst.msk [vmem:[%s10622_s26 + $0xc0] sm:$0xf] %vm6654_vm7, %v7230_v54  ;;  %v7222_v41 = vpack.c.bf16 %v8861_v5, %v8861_v5  ;;  %8882 = vpow2.f32 %v5131_v9  ;;  %v11734_v54 = vld [vmem:[#allocation7_spill] sm:$0xff] }
 0x8d4   : > { %v8865_v18 = vpop.eup %8864  ;;  %6662 = vst [vmem:[%s10622_s26 + $0x48] sm:$0xff] %v7213_v27  ;;  %8884 = vpow2.f32 %v5189_v39  ;;  %v4760_v39 = vadd.f32 %v11733_v33, %v11218_v46 }
 0x8d5   : > { %v8867_v29 = vpop.eup %8866  ;;  %6671 = vst.msk [vmem:[%s10622_s26 + $0x88] sm:$0xf] %vm6654_vm7, %v7222_v41  ;;  %v7234_v4 = vpack.c.bf16 %v8865_v18, %v8865_v18  ;;  %8886 = vpow2.f32 %v5143_v28  ;;  %v4544_v28 = vadd.f32 %v11734_v54, %v11250_v53  ;;  %v4880_v41 = vsub.f32 0.0, %v4542_v55  ;;  %v11735_v18 = vld [vmem:[#allocation8_spill] sm:$0xff] }
 0x8d6   : > { %v8869_v19 = vpop.eup %8868  ;;  %v7217_v9 = vpack.c.bf16 %v8867_v29, %v8863_v35  ;;  %8888 = vpow2.f32 %v5259_v47  ;;  %v11392_v29 = vpop.f32.mrb[56].mxu1 }
 0x8d7   : > { %v8871_v49 = vpop.eup %8870  ;;  %6683 = vst.msk [vmem:[%s10622_s26 + $0xdc] sm:$0xf] %vm6654_vm7, %v7234_v4  ;;  %v5540_v1 = vadd.f32 1.0, %v8869_v19  ;;  %8890 = vpow2.f32 %v5145_v8  ;;  %v4752_v8 = vadd.f32 %v11735_v18, %v11218_v46  ;;  %11736 = vst [vmem:[#allocation26_spill] sm:$0xff] %v11392_v29 }
 0x8d8   : > { %v8873_v38 = vpop.eup %8872  ;;  %6666 = vst [vmem:[%s10622_s26 + $0x64] sm:$0xff] %v7217_v9  ;;  %v5531_v6 = vadd.f32 1.0, %v8871_v49  ;;  %8892 = vpow2.f32 %v5231_v59  ;;  %v4938_v9 = vsub.f32 0.0, %v4760_v39  ;;  %v11394_v59 = vpop.f32.mrb[57].mxu1  ;;  %v5157_v39 = vmul.f32 1.442695, %v4880_v41 }
 0x8d9   : > { %v8875_v5 = vpop.eup %8874  ;;  %8894 = vrcp.f32 %v5540_v1  ;;  %v5575_v27 = vadd.f32 1.0, %v8873_v38  ;;  %11737 = vst [vmem:[#allocation24_spill] sm:$0xff] %v11394_v59  ;;  %v4881_v1 = vsub.f32 0.0, %v4544_v28  ;;  %v11396_v33 = vpop.f32.mrb[58].mxu1  ;;  %v4773_v28 = vadd.f32 %v11102_v11, %v11218_v46 }
 0x8da   : > { %v8877_v47 = vpop.eup %8876  ;;  %8896 = vrcp.f32 %v5531_v6  ;;  %v5532_v35 = vadd.f32 1.0, %v8875_v5  ;;  %11738 = vst [vmem:[#allocation25_spill] sm:$0xff] %v11396_v33  ;;  %v4548_v6 = vadd.f32 %v11100_v61, %v11211_v48  ;;  %v11400_v54 = vpop.f32.mrb[59].mxu1  ;;  %v4550_v61 = vadd.f32 %v11105_v62, %v11250_v53 }
 0x8db   : > { %v8879_v4 = vpop.eup %8878  ;;  %8898 = vrcp.f32 %v5575_v27  ;;  %v5561_v19 = vadd.f32 1.0, %v8877_v47  ;;  %11739 = vst [vmem:[#allocation27_spill] sm:$0xff] %v11400_v54  ;;  %v4924_v47 = vsub.f32 0.0, %v4752_v8  ;;  %v4765_v41 = vadd.f32 %v11107_v23, %v11218_v46 }
 0x8dc   : > { %v8881_v14 = vpop.eup %8880  ;;  %8900 = vrcp.f32 %v5532_v35  ;;  %v5538_v49 = vadd.f32 1.0, %v8879_v4  ;;  %v5273_v4 = vmul.f32 1.442695, %v4938_v9  ;;  %v4552_v11 = vadd.f32 %v11110_v31, %v11211_v48 }
 0x8dd   : > { %v8883_v38 = vpop.eup %8882  ;;  %8902 = vrcp.f32 %v5561_v19  ;;  %v5582_v55 = vadd.f32 1.0, %v8881_v14  ;;  %v5159_v14 = vmul.f32 1.442695, %v4881_v1  ;;  %v4959_v62 = vsub.f32 0.0, %v4773_v28 }
 0x8de   : > { %v8885_v5 = vpop.eup %8884  ;;  %8904 = vrcp.f32 %v5538_v49  ;;  %v5539_v27 = vadd.f32 1.0, %v8883_v38  ;;  %v4887_v38 = vsub.f32 0.0, %v4548_v6  ;;  %v4945_v28 = vsub.f32 0.0, %v4765_v41 }
 0x8df   : > { %v8887_v18 = vpop.eup %8886  ;;  %8906 = vrcp.f32 %v5582_v55  ;;  %v5568_v35 = vadd.f32 1.0, %v8885_v5  ;;  %v5245_v55 = vmul.f32 1.442695, %v4924_v47  ;;  %v11410_v5 = vpop.f32.mrb[60].mxu1  ;;  %v11743_v47 = vld [vmem:[#allocation10_spill] sm:$0xff] }
 0x8e0   : > { %v8889_v33 = vpop.eup %8888  ;;  %8908 = vrcp.f32 %v5539_v27  ;;  %v5545_v19 = vadd.f32 1.0, %v8887_v18  ;;  %11740 = vst [vmem:[#allocation28_spill] sm:$0xff] %v11410_v5  ;;  %v11741_v18 = vld [vmem:[#allocation9_spill] sm:$0xff]  ;;  %v11414_v6 = vpop.f32.mrb[61].mxu1 }
 0x8e1   : > { %v8891_v54 = vpop.eup %8890  ;;  %8910 = vrcp.f32 %v5568_v35  ;;  %v5603_v49 = vadd.f32 1.0, %v8889_v33  ;;  %v4776_v33 = vadd.f32 %v11741_v18, %v11218_v46  ;;  %11742 = vst [vmem:[#allocation3_spill] sm:$0xff] %v11414_v6  ;;  %v11418_v31 = vpop.f32.mrb[62].mxu1 }
 0x8e2   : > { %v8893_v8 = vpop.eup %8892  ;;  %8912 = vrcp.f32 %v5545_v19  ;;  %v5546_v9 = vadd.f32 1.0, %v8891_v54  ;;  %v4888_v54 = vsub.f32 0.0, %v4550_v61  ;;  %v4554_v19 = vadd.f32 %v11743_v47, %v11250_v53  ;;  %11744 = vst [vmem:[#allocation4_spill] sm:$0xff] %v11418_v31  ;;  %v11422_v18 = vpop.f32.mrb[63].mxu1 }
 0x8e3   : > { %v8895_v1 = vpop.eup %8894  ;;  %8914 = vrcp.f32 %v5603_v49  ;;  %v5589_v27 = vadd.f32 1.0, %v8893_v8  ;;  %v5171_v49 = vmul.f32 1.442695, %v4887_v38  ;;  %v11745_v8 = vld [vmem:[#allocation11_spill] sm:$0xff]  ;;  %11746 = vst [vmem:[#allocation5_spill] sm:$0xff] %v11422_v18  ;;  %v4894_v61 = vsub.f32 0.0, %v4552_v11 }
 0x8e4   : > { %v8897_v23 = vpop.eup %8896  ;;  %v7226_v35 = vpack.c.bf16 %v8895_v1, %v8895_v1  ;;  %8916 = vrcp.f32 %v5546_v9  ;;  %v4768_v59 = vadd.f32 %v11745_v8, %v11218_v46  ;;  %v11747_v1 = vld [vmem:[#allocation12_spill] sm:$0xff]  ;;  %v5315_v38 = vmul.f32 1.442695, %v4959_v62 }
 0x8e5   : > { %v8899_v5 = vpop.eup %8898  ;;  %8918 = vrcp.f32 %v5589_v27  ;;  %v4558_v47 = vadd.f32 %v11747_v1, %v11211_v48  ;;  %v4966_v41 = vsub.f32 0.0, %v4776_v33  ;;  %v5173_v18 = vmul.f32 1.442695, %v4888_v54 }
 0x8e6   : > { %v8901_v6 = vpop.eup %8900  ;;  %6675 = vst.msk [vmem:[%s10622_s26 + $0xa4] sm:$0xf] %vm6654_vm7, %v7226_v35  ;;  %v7246_v9 = vpack.c.bf16 %v8899_v5, %v8899_v5  ;;  %8920 = vpow2.f32 %v5157_v39  ;;  %v4895_v35 = vsub.f32 0.0, %v4554_v19  ;;  %v5287_v39 = vmul.f32 1.442695, %v4945_v28 }
 0x8e7   : > { %v8903_v31 = vpop.eup %8902  ;;  %v7221_v27 = vpack.c.bf16 %v8901_v6, %v8897_v23  ;;  %8922 = vpow2.f32 %v5273_v4  ;;  %v4952_v11 = vsub.f32 0.0, %v4768_v59  ;;  %v5185_v62 = vmul.f32 1.442695, %v4894_v61 }
 0x8e8   : > { %v8905_v29 = vpop.eup %8904  ;;  %6695 = vst.msk [vmem:[%s10622_s26 + $0x130] sm:$0xf] %vm6654_vm7, %v7246_v9  ;;  %v7238_v8 = vpack.c.bf16 %v8903_v31, %v8903_v31  ;;  %8924 = vpow2.f32 %v5159_v14  ;;  %v4901_v33 = vsub.f32 0.0, %v4558_v47  ;;  %v5329_v14 = vmul.f32 1.442695, %v4966_v41 }
 0x8e9   : > { %v8907_v5 = vpop.eup %8906  ;;  %6670 = vst [vmem:[%s10622_s26 + $0x80] sm:$0xff] %v7221_v27  ;;  %8926 = vpow2.f32 %v5245_v55  ;;  %v5187_v59 = vmul.f32 1.442695, %v4895_v35  ;;  %v5301_v31 = vmul.f32 1.442695, %v4952_v11  ;;  %v11748_v27 = vld [vmem:[#allocation30_spill] sm:$0xff] }
 0x8ea   : > { %v8909_v1 = vpop.eup %8908  ;;  %6687 = vst.msk [vmem:[%s10622_s26 + $0xf8] sm:$0xf] %vm6654_vm7, %v7238_v8  ;;  %v7250_v4 = vpack.c.bf16 %v8907_v5, %v8907_v5  ;;  %8928 = vpow2.f32 %v5171_v49  ;;  %v11749_v35 = vld [vmem:[#allocation13_spill] sm:$0xff] }
 0x8eb   : > { %v8911_v6 = vpop.eup %8910  ;;  %v7225_v23 = vpack.c.bf16 %v8909_v1, %v8905_v29  ;;  %8930 = vpow2.f32 %v5315_v38  ;;  %v5199_v29 = vmul.f32 1.442695, %v4901_v33  ;;  %v4789_v38 = vadd.f32 %v11748_v27, %v11218_v46 }
 0x8ec   : > { %v8913_v54 = vpop.eup %8912  ;;  %6699 = vst.msk [vmem:[%s10622_s26 + $0x14c] sm:$0xf] %vm6654_vm7, %v7250_v4  ;;  %v7242_v19 = vpack.c.bf16 %v8911_v6, %v8911_v6  ;;  %8932 = vpow2.f32 %v5173_v18  ;;  %v4560_v5 = vadd.f32 %v11749_v35, %v11250_v53 }
 0x8ed   : > { %v8915_v55 = vpop.eup %8914  ;;  %6674 = vst [vmem:[%s10622_s26 + $0x9c] sm:$0xff] %v7225_v23  ;;  %8934 = vpow2.f32 %v5287_v39 }
 0x8ee   : > { %v8917_v49 = vpop.eup %8916  ;;  %6691 = vst.msk [vmem:[%s10622_s26 + $0x114] sm:$0xf] %vm6654_vm7, %v7242_v19  ;;  %v7262_v28 = vpack.c.bf16 %v8915_v55, %v8915_v55  ;;  %8936 = vpow2.f32 %v5185_v62  ;;  %v11750_v62 = vld [vmem:[#allocation14_spill] sm:$0xff] }
 0x8ef   : > { %v8919_v9 = vpop.eup %8918  ;;  %v7229_v61 = vpack.c.bf16 %v8917_v49, %v8913_v54  ;;  %8938 = vpow2.f32 %v5329_v14  ;;  %v4781_v33 = vadd.f32 %v11750_v62, %v11218_v46  ;;  %v4987_v14 = vsub.f32 0.0, %v4789_v38  ;;  %v11751_v54 = vld [vmem:[#allocation15_spill] sm:$0xff] }
 0x8f0   : > { %v8921_v47 = vpop.eup %8920  ;;  %6711 = vst.msk [vmem:[%s10622_s26 + $0x1a0] sm:$0xf] %vm6654_vm7, %v7262_v28  ;;  %v7254_v18 = vpack.c.bf16 %v8919_v9, %v8919_v9  ;;  %8940 = vpow2.f32 %v5187_v59  ;;  %v4562_v19 = vadd.f32 %v11751_v54, %v11211_v48 }
 0x8f1   : > { %v8923_v41 = vpop.eup %8922  ;;  %6678 = vst [vmem:[%s10622_s26 + $0xb8] sm:$0xff] %v7229_v61  ;;  %v5552_v8 = vadd.f32 1.0, %v8921_v47  ;;  %8942 = vpow2.f32 %v5301_v31  ;;  %v4902_v31 = vsub.f32 0.0, %v4560_v5  ;;  %v11753_v5 = vld [vmem:[#allocation17_spill] sm:$0xff] }
 0x8f2   : > { %v8925_v39 = vpop.eup %8924  ;;  %6703 = vst.msk [vmem:[%s10622_s26 + $0x168] sm:$0xf] %vm6654_vm7, %v7254_v18  ;;  %v5610_v11 = vadd.f32 1.0, %v8923_v41  ;;  %8944 = vpow2.f32 %v5199_v29  ;;  %v11752_v29 = vld [vmem:[#allocation16_spill] sm:$0xff]  ;;  %v4973_v18 = vsub.f32 0.0, %v4781_v33 }
 0x8f3   : > { %v8927_v1 = vpop.eup %8926  ;;  %8946 = vrcp.f32 %v5552_v8  ;;  %v5553_v4 = vadd.f32 1.0, %v8925_v39  ;;  %v4792_v9 = vadd.f32 %v11752_v29, %v11218_v46  ;;  %v5371_v41 = vmul.f32 1.442695, %v4987_v14 }
 0x8f4   : > { %v8929_v6 = vpop.eup %8928  ;;  %8948 = vrcp.f32 %v5610_v11  ;;  %v5596_v23 = vadd.f32 1.0, %v8927_v1  ;;  %v4908_v8 = vsub.f32 0.0, %v4562_v19  ;;  %v5201_v11 = vmul.f32 1.442695, %v4902_v31 }
 0x8f5   : > { %v8931_v59 = vpop.eup %8930  ;;  %8950 = vrcp.f32 %v5553_v4  ;;  %v5559_v55 = vadd.f32 1.0, %v8929_v6  ;;  %v4564_v1 = vadd.f32 %v11753_v5, %v11250_v53  ;;  %v4994_v6 = vsub.f32 0.0, %v4792_v9 }
 0x8f6   : > { %v8933_v49 = vpop.eup %8932  ;;  %8952 = vrcp.f32 %v5596_v23  ;;  %v5631_v28 = vadd.f32 1.0, %v8931_v59  ;;  %v11754_v23 = vld [vmem:[#allocation18_spill] sm:$0xff]  ;;  %v4568_v14 = vadd.f32 %v11169_v50, %v11211_v48  ;;  %v4797_v50 = vadd.f32 %v11176_v26, %v11218_v46 }
 0x8f7   : > { %v8935_v61 = vpop.eup %8934  ;;  %8954 = vrcp.f32 %v5559_v55  ;;  %v5560_v47 = vadd.f32 1.0, %v8933_v49  ;;  %v4784_v54 = vadd.f32 %v11754_v23, %v11218_v46  ;;  %v5343_v55 = vmul.f32 1.442695, %v4973_v18 }
 0x8f8   : > { %v8937_v27 = vpop.eup %8936  ;;  %8956 = vrcp.f32 %v5631_v28  ;;  %v5617_v38 = vadd.f32 1.0, %v8935_v61  ;;  %v5213_v49 = vmul.f32 1.442695, %v4908_v8  ;;  %v4805_v28 = vadd.f32 %v11171_v32, %v11218_v46 }
 0x8f9   : > { %v8939_v35 = vpop.eup %8938  ;;  %8958 = vrcp.f32 %v5560_v47  ;;  %v5566_v39 = vadd.f32 1.0, %v8937_v27  ;;  %v4909_v61 = vsub.f32 0.0, %v4564_v1  ;;  %v4570_v47 = vadd.f32 %v11174_v58, %v11250_v53 }
 0x8fa   : > { %v8941_v4 = vpop.eup %8940  ;;  %8960 = vrcp.f32 %v5617_v38  ;;  %v5638_v62 = vadd.f32 1.0, %v8939_v35  ;;  %v5385_v18 = vmul.f32 1.442695, %v4994_v6  ;;  %v4980_v38 = vsub.f32 0.0, %v4784_v54 }
 0x8fb   : > { %v8943_v33 = vpop.eup %8942  ;;  %8962 = vrcp.f32 %v5566_v39  ;;  %v5567_v59 = vadd.f32 1.0, %v8941_v4  ;;  %v4915_v32 = vsub.f32 0.0, %v4568_v14  ;;  %v4572_v39 = vadd.f32 %v11181_v57, %v11211_v48 }
 0x8fc   : > { %v8945_v19 = vpop.eup %8944  ;;  %8964 = vrcp.f32 %v5638_v62  ;;  %v5624_v31 = vadd.f32 1.0, %v8943_v33  ;;  %v5015_v58 = vsub.f32 0.0, %v4805_v28  ;;  %v4808_v4 = vadd.f32 %v11183_v30, %v11218_v46 }
 0x8fd   : > { %v8947_v29 = vpop.eup %8946  ;;  %8966 = vrcp.f32 %v5567_v59  ;;  %v5573_v9 = vadd.f32 1.0, %v8945_v19  ;;  %v5215_v6 = vmul.f32 1.442695, %v4909_v61  ;;  %v4916_v23 = vsub.f32 0.0, %v4570_v47 }
 0x8fe   : > { %v8949_v27 = vpop.eup %8948  ;;  %8968 = vrcp.f32 %v5624_v31  ;;  %v5357_v57 = vmul.f32 1.442695, %v4980_v38  ;;  %v5001_v33 = vsub.f32 0.0, %v4797_v50  ;;  %v5227_v30 = vmul.f32 1.442695, %v4915_v32 }
 0x8ff   : > { %v8951_v35 = vpop.eup %8950  ;;  %v7266_v8 = vpack.c.bf16 %v8949_v27, %v8949_v27  ;;  %8970 = vrcp.f32 %v5573_v9  ;;  %v4922_v14 = vsub.f32 0.0, %v4572_v39  ;;  %v5022_v28 = vsub.f32 0.0, %v4808_v4 }
 0x900   : > { %v8953_v5 = vpop.eup %8952  ;;  %v7233_v1 = vpack.c.bf16 %v8951_v35, %v8947_v29  ;;  %8972 = vpow2.f32 %v5371_v41  ;;  %v5229_v9 = vmul.f32 1.442695, %v4916_v23  ;;  %v4800_v4 = vadd.f32 %v11213_v2, %v11218_v46 }
 0x901   : > { %v8955_v62 = vpop.eup %8954  ;;  %6715 = vst.msk [vmem:[%s10622_s26 + $0x1bc] sm:$0xf] %vm6654_vm7, %v7266_v8  ;;  %v7258_v26 = vpack.c.bf16 %v8953_v5, %v8953_v5  ;;  %8974 = vpow2.f32 %v5201_v11  ;;  %v5427_v11 = vmul.f32 1.442695, %v5015_v58  ;;  %v5441_v35 = vmul.f32 1.442695, %v5022_v28 }
 0x902   : > { %v8957_v54 = vpop.eup %8956  ;;  %6682 = vst [vmem:[%s10622_s26 + $0xd4] sm:$0xff] %v7233_v1  ;;  %8976 = vpow2.f32 %v5343_v55  ;;  %v4574_v5 = vadd.f32 %v11187_v3, %v11250_v53  ;;  %v5008_v2 = vsub.f32 0.0, %v4800_v4 }
 0x903   : > { %v8959_v59 = vpop.eup %8958  ;;  %6707 = vst.msk [vmem:[%s10622_s26 + $0x184] sm:$0xf] %vm6654_vm7, %v7258_v26  ;;  %v7278_v41 = vpack.c.bf16 %v8957_v54, %v8957_v54  ;;  %8978 = vpow2.f32 %v5213_v49  ;;  %v5399_v49 = vmul.f32 1.442695, %v5001_v33 }
 0x904   : > { %v8961_v19 = vpop.eup %8960  ;;  %v7237_v31 = vpack.c.bf16 %v8959_v59, %v8955_v62  ;;  %8980 = vpow2.f32 %v5385_v18  ;;  %v5241_v18 = vmul.f32 1.442695, %v4922_v14  ;;  %v4923_v33 = vsub.f32 0.0, %v4574_v5  ;;  %v11755_v5 = vld [vmem:[#allocation19_spill] sm:$0xff] }
 0x905   : > { %v8963_v29 = vpop.eup %8962  ;;  %6727 = vst.msk [vmem:[%s10622_s26 + $0x210] sm:$0xf] %vm6654_vm7, %v7278_v41  ;;  %v7270_v55 = vpack.c.bf16 %v8961_v19, %v8961_v19  ;;  %8982 = vpow2.f32 %v5215_v6  ;;  %v4578_v6 = vadd.f32 %v11228_v63, %v11211_v48  ;;  %v4821_v59 = vadd.f32 %v11230_v7, %v11218_v46 }
 0x906   : > { %v8965_v61 = vpop.eup %8964  ;;  %6686 = vst [vmem:[%s10622_s26 + $0xf0] sm:$0xff] %v7237_v31  ;;  %8984 = vpow2.f32 %v5357_v57  ;;  %v4580_v63 = vadd.f32 %v11233_v20, %v11250_v53 }
 0x907   : > { %v8967_v47 = vpop.eup %8966  ;;  %6719 = vst.msk [vmem:[%s10622_s26 + $0x1d8] sm:$0xf] %vm6654_vm7, %v7270_v55  ;;  %v7282_v27 = vpack.c.bf16 %v8965_v61, %v8965_v61  ;;  %8986 = vpow2.f32 %v5227_v30  ;;  %v4929_v31 = vsub.f32 0.0, %v4578_v6  ;;  %v5043_v61 = vsub.f32 0.0, %v4821_v59  ;;  %v11756_v59 = vld [vmem:[#allocation20_spill] sm:$0xff] }
 0x908   : > { %v8969_v38 = vpop.eup %8968  ;;  %v7241_v50 = vpack.c.bf16 %v8967_v47, %v8963_v29  ;;  %8988 = vpow2.f32 %v5427_v11  ;;  %v4813_v29 = vadd.f32 %v11235_v36, %v11218_v46 }
 0x909   : > { %v11479_v8 = vpop.eup %8970  ;;  %6731 = vst.msk [vmem:[%s10622_s26 + $0x22c] sm:$0xf] %vm6654_vm7, %v7282_v27  ;;  %v7274_v32 = vpack.c.bf16 %v8969_v38, %v8969_v38  ;;  %8990 = vpow2.f32 %v5229_v9  ;;  %v5243_v9 = vmul.f32 1.442695, %v4923_v33  ;;  %v5413_v27 = vmul.f32 1.442695, %v5008_v2 }
 0x90a   : > { %v8973_v39 = vpop.eup %8972  ;;  %6690 = vst [vmem:[%s10622_s26 + $0x10c] sm:$0xff] %v7241_v50  ;;  %8992 = vpow2.f32 %v5399_v49  ;;  %v5255_v50 = vmul.f32 1.442695, %v4929_v31 }
 0x90b   : > { %v8975_v1 = vpop.eup %8974  ;;  %6723 = vst.msk [vmem:[%s10622_s26 + $0x1f4] sm:$0xf] %vm6654_vm7, %v7274_v32  ;;  %v5659_v58 = vadd.f32 1.0, %v8973_v39  ;;  %8994 = vpow2.f32 %v5241_v18  ;;  %v4582_v18 = vadd.f32 %v11239_v44, %v11211_v48  ;;  %v5029_v39 = vsub.f32 0.0, %v4813_v29 }
 0x90c   : > { %v8977_v62 = vpop.eup %8976  ;;  %v5574_v26 = vadd.f32 1.0, %v8975_v1  ;;  %8996 = vpow2.f32 %v5441_v35  ;;  %v4930_v35 = vsub.f32 0.0, %v4580_v63  ;;  %v4824_v1 = vadd.f32 %v11755_v5, %v11218_v46  ;;  %v11758_v63 = vld [vmem:[#allocation21_spill] sm:$0xff] }
 0x90d   : > { %v8979_v23 = vpop.eup %8978  ;;  %8998 = vrcp.f32 %v5659_v58  ;;  %v5645_v54 = vadd.f32 1.0, %v8977_v62  ;;  %v5483_v62 = vmul.f32 1.442695, %v5043_v61 }
 0x90e   : > { %v8981_v57 = vpop.eup %8980  ;;  %9000 = vrcp.f32 %v5574_v26  ;;  %v5580_v3 = vadd.f32 1.0, %v8979_v23  ;;  %v4584_v26 = vadd.f32 %v11243_v24, %v11250_v53  ;;  %v4936_v23 = vsub.f32 0.0, %v4582_v18 }
 0x90f   : > { %v8983_v41 = vpop.eup %8982  ;;  %9002 = vrcp.f32 %v5645_v54  ;;  %v5666_v30 = vadd.f32 1.0, %v8981_v57  ;;  %v4816_v54 = vadd.f32 %v11245_v43, %v11218_v46  ;;  %v5257_v33 = vmul.f32 1.442695, %v4930_v35 }
 0x910   : > { %v8985_v14 = vpop.eup %8984  ;;  %9004 = vrcp.f32 %v5580_v3  ;;  %v5581_v19 = vadd.f32 1.0, %v8983_v41  ;;  %v4588_v41 = vadd.f32 %v11756_v59, %v11211_v48  ;;  %v5050_v24 = vsub.f32 0.0, %v4824_v1 }
 0x911   : > { %v8987_v11 = vpop.eup %8986  ;;  %9006 = vrcp.f32 %v5666_v30  ;;  %v5652_v28 = vadd.f32 1.0, %v8985_v14  ;;  %v11757_v14 = vld [vmem:[#allocation2_spill] sm:$0xff]  ;;  %v4937_v43 = vsub.f32 0.0, %v4584_v26  ;;  %v5036_v29 = vsub.f32 0.0, %v4816_v54 }
 0x912   : > { %v8989_v55 = vpop.eup %8988  ;;  %9008 = vrcp.f32 %v5581_v19  ;;  %v5587_v7 = vadd.f32 1.0, %v8987_v11  ;;  %v4590_v19 = vadd.f32 %v11757_v14, %v11250_v53  ;;  %v4592_v11 = vadd.f32 %v11758_v63, %v11211_v48 }
 0x913   : > { %v8991_v49 = vpop.eup %8990  ;;  %9010 = vrcp.f32 %v5652_v28  ;;  %v5687_v47 = vadd.f32 1.0, %v8989_v55  ;;  %v5269_v61 = vmul.f32 1.442695, %v4936_v23  ;;  %v5497_v18 = vmul.f32 1.442695, %v5050_v24 }
 0x914   : > { %v8993_v38 = vpop.eup %8992  ;;  %9012 = vrcp.f32 %v5587_v7  ;;  %v5588_v20 = vadd.f32 1.0, %v8991_v49  ;;  %v4943_v49 = vsub.f32 0.0, %v4588_v41  ;;  %v5271_v35 = vmul.f32 1.442695, %v4937_v43 }
 0x915   : > { %v8995_v32 = vpop.eup %8994  ;;  %9014 = vrcp.f32 %v5687_v47  ;;  %v5673_v36 = vadd.f32 1.0, %v8993_v38  ;;  %v4944_v38 = vsub.f32 0.0, %v4590_v19  ;;  %v4600_v14 = vadd.f32 %v11294_v12, %v11250_v53 }
 0x916   : > { %v8997_v58 = vpop.eup %8996  ;;  %9016 = vrcp.f32 %v5588_v20  ;;  %v5594_v4 = vadd.f32 1.0, %v8995_v32  ;;  %v4950_v32 = vsub.f32 0.0, %v4592_v11  ;;  %v5283_v1 = vmul.f32 1.442695, %v4943_v49 }
 0x917   : > { %v8999_v44 = vpop.eup %8998  ;;  %9018 = vrcp.f32 %v5673_v36  ;;  %v5694_v6 = vadd.f32 1.0, %v8997_v58  ;;  %v4602_v11 = vadd.f32 %v11297_v56, %v11211_v48  ;;  %v4604_v49 = vadd.f32 %v11299_v52, %v11250_v53 }
 0x918   : > { %v9001_v57 = vpop.eup %9000  ;;  %v7294_v3 = vpack.c.bf16 %v8999_v44, %v8999_v44  ;;  %9020 = vrcp.f32 %v5594_v4 }
 0x919   : > { %v9003_v30 = vpop.eup %9002  ;;  %v7245_v2 = vpack.c.bf16 %v9001_v57, %v11479_v8  ;;  %9022 = vrcp.f32 %v5694_v6  ;;  %v5455_v8 = vmul.f32 1.442695, %v5029_v39  ;;  %v5297_v6 = vmul.f32 1.442695, %v4950_v32 }
 0x91a   : > { %v9005_v31 = vpop.eup %9004  ;;  %6743 = vst.msk [vmem:[%s10622_s26 + $0x280] sm:$0xf] %vm6654_vm7, %v7294_v3  ;;  %v7286_v46 = vpack.c.bf16 %v9003_v30, %v9003_v30  ;;  %9024 = vpow2.f32 %v5243_v9  ;;  %v11759_v3 = vld [vmem:[#allocation22_spill] sm:$0xff]  ;;  %v4598_v30 = vadd.f32 %v11291_v60, %v11211_v48 }
 0x91b   : > { %v9007_v28 = vpop.eup %9006  ;;  %6694 = vst [vmem:[%s10622_s26 + $0x128] sm:$0xff] %v7245_v2  ;;  %9026 = vpow2.f32 %v5413_v27 }
 0x91c   : > { %v9009_v55 = vpop.eup %9008  ;;  %6735 = vst.msk [vmem:[%s10622_s26 + $0x248] sm:$0xf] %vm6654_vm7, %v7286_v46  ;;  %v7298_v7 = vpack.c.bf16 %v9007_v28, %v9007_v28  ;;  %9028 = vpow2.f32 %v5255_v50  ;;  %v5469_v50 = vmul.f32 1.442695, %v5036_v29 }
 0x91d   : > { %v9011_v47 = vpop.eup %9010  ;;  %v7249_v9 = vpack.c.bf16 %v9009_v55, %v9005_v31  ;;  %9030 = vpow2.f32 %v5483_v62  ;;  %v5285_v62 = vmul.f32 1.442695, %v4944_v38  ;;  %v4964_v38 = vsub.f32 0.0, %v4602_v11 }
 0x91e   : > { %v9013_v20 = vpop.eup %9012  ;;  %6747 = vst.msk [vmem:[%s10622_s26 + $0x29c] sm:$0xf] %vm6654_vm7, %v7298_v7  ;;  %v7290_v27 = vpack.c.bf16 %v9011_v47, %v9011_v47  ;;  %9032 = vpow2.f32 %v5257_v33  ;;  %v4594_v33 = vadd.f32 %v11759_v3, %v11250_v53  ;;  %v4958_v7 = vsub.f32 0.0, %v4600_v14 }
 0x91f   : > { %v9015_v36 = vpop.eup %9014  ;;  %6698 = vst [vmem:[%s10622_s26 + $0x144] sm:$0xff] %v7249_v9  ;;  %9034 = vpow2.f32 %v5455_v8  ;;  %v4957_v8 = vsub.f32 0.0, %v4598_v30  ;;  %v4622_v30 = vadd.f32 %v11331_v0, %v11211_v48 }
 0x920   : > { %v9017_v39 = vpop.eup %9016  ;;  %6739 = vst.msk [vmem:[%s10622_s26 + $0x264] sm:$0xf] %vm6654_vm7, %v7290_v27  ;;  %v7310_v5 = vpack.c.bf16 %v9015_v36, %v9015_v36  ;;  %9036 = vpow2.f32 %v5269_v61  ;;  %v4951_v63 = vsub.f32 0.0, %v4594_v33  ;;  %v4620_v33 = vadd.f32 %v11329_v21, %v11250_v53 }
 0x921   : > { %v9019_v58 = vpop.eup %9018  ;;  %v7253_v4 = vpack.c.bf16 %v9017_v39, %v9013_v20  ;;  %9038 = vpow2.f32 %v5497_v18  ;;  %v5311_v27 = vmul.f32 1.442695, %v4957_v8  ;;  %v4610_v39 = vadd.f32 %v11308_v22, %v11250_v53 }
 0x922   : > { %v11523_v26 = vpop.eup %9020  ;;  %6759 = vst.msk [vmem:[%s10622_s26 + $0x2f0] sm:$0xf] %vm6654_vm7, %v7310_v5  ;;  %v7302_v44 = vpack.c.bf16 %v9019_v58, %v9019_v58  ;;  %9040 = vpow2.f32 %v5271_v35  ;;  %v5299_v18 = vmul.f32 1.442695, %v4951_v63  ;;  %v4608_v35 = vadd.f32 %v11305_v51, %v11211_v48 }
 0x923   : > { %v9023_v23 = vpop.eup %9022  ;;  %6702 = vst [vmem:[%s10622_s26 + $0x160] sm:$0xff] %v7253_v4  ;;  %9042 = vpow2.f32 %v5469_v50  ;;  %v5313_v50 = vmul.f32 1.442695, %v4958_v7  ;;  %v4612_v58 = vadd.f32 %v11313_v45, %v11211_v48  ;;  %v4614_v51 = vadd.f32 %v11317_v34, %v11250_v53 }
 0x924   : > { %v9025_v54 = vpop.eup %9024  ;;  %6751 = vst.msk [vmem:[%s10622_s26 + $0x2b8] sm:$0xf] %vm6654_vm7, %v7302_v44  ;;  %v7314_v57 = vpack.c.bf16 %v9023_v23, %v9023_v23  ;;  %9044 = vpow2.f32 %v5283_v1  ;;  %v4965_v1 = vsub.f32 0.0, %v4604_v49  ;;  %v5325_v44 = vmul.f32 1.442695, %v4964_v38 }
 0x925   : > { %v9027_v59 = vpop.eup %9026  ;;  %v5595_v41 = vadd.f32 1.0, %v9025_v54  ;;  %9046 = vpow2.f32 %v5285_v62  ;;  %v4971_v54 = vsub.f32 0.0, %v4608_v35  ;;  %v4618_v22 = vadd.f32 %v11325_v13, %v11211_v48 }
 0x926   : > { %v9029_v2 = vpop.eup %9028  ;;  %6763 = vst.msk [vmem:[%s10622_s26 + $0x30c] sm:$0xf] %vm6654_vm7, %v7314_v57  ;;  %v5680_v24 = vadd.f32 1.0, %v9027_v59  ;;  %9048 = vpow2.f32 %v5297_v6  ;;  %v4972_v45 = vsub.f32 0.0, %v4610_v39  ;;  %v4978_v34 = vsub.f32 0.0, %v4612_v58 }
 0x927   : > { %v9031_v19 = vpop.eup %9030  ;;  %9050 = vrcp.f32 %v5595_v41  ;;  %v5601_v31 = vadd.f32 1.0, %v9029_v2  ;;  %v5327_v13 = vmul.f32 1.442695, %v4965_v1  ;;  %v4986_v63 = vsub.f32 0.0, %v4620_v33 }
 0x928   : > { %v9033_v46 = vpop.eup %9032  ;;  %9052 = vrcp.f32 %v5680_v24  ;;  %v5715_v43 = vadd.f32 1.0, %v9031_v19  ;;  %v4979_v24 = vsub.f32 0.0, %v4614_v51  ;;  %v5339_v19 = vmul.f32 1.442695, %v4971_v54 }
 0x929   : > { %v9035_v28 = vpop.eup %9034  ;;  %9054 = vrcp.f32 %v5601_v31  ;;  %v5602_v60 = vadd.f32 1.0, %v9033_v46  ;;  %v4985_v31 = vsub.f32 0.0, %v4618_v22  ;;  %v5341_v0 = vmul.f32 1.442695, %v4972_v45 }
 0x92a   : > { %v9037_v29 = vpop.eup %9036  ;;  %9056 = vrcp.f32 %v5715_v43  ;;  %v5701_v55 = vadd.f32 1.0, %v9035_v28  ;;  %v4634_v54 = vadd.f32 %v11361_v42, %v11250_v53 }
 0x92b   : > { %v9039_v61 = vpop.eup %9038  ;;  %9058 = vrcp.f32 %v5602_v60  ;;  %v5608_v12 = vadd.f32 1.0, %v9037_v29  ;;  %v4992_v60 = vsub.f32 0.0, %v4622_v30  ;;  %v5355_v29 = vmul.f32 1.442695, %v4979_v24 }
 0x92c   : > { %v9041_v47 = vpop.eup %9040  ;;  %9060 = vrcp.f32 %v5701_v55  ;;  %v5722_v9 = vadd.f32 1.0, %v9039_v61  ;;  %v5007_v24 = vsub.f32 0.0, %v4634_v54 }
 0x92d   : > { %v9043_v56 = vpop.eup %9042  ;;  %9062 = vrcp.f32 %v5608_v12  ;;  %v5609_v20 = vadd.f32 1.0, %v9041_v47  ;;  %v5367_v12 = vmul.f32 1.442695, %v4985_v31 }
 0x92e   : > { %v9045_v32 = vpop.eup %9044  ;;  %9064 = vrcp.f32 %v5722_v9  ;;  %v5708_v36 = vadd.f32 1.0, %v9043_v56  ;;  %v5369_v9 = vmul.f32 1.442695, %v4986_v63  ;;  %v5381_v56 = vmul.f32 1.442695, %v4992_v60 }
 0x92f   : > { %v9047_v52 = vpop.eup %9046  ;;  %9066 = vrcp.f32 %v5609_v20  ;;  %v5615_v5 = vadd.f32 1.0, %v9045_v32  ;;  %v5411_v60 = vmul.f32 1.442695, %v5007_v24 }
 0x930   : > { %v9049_v4 = vpop.eup %9048  ;;  %9068 = vrcp.f32 %v5708_v36  ;;  %v5616_v62 = vadd.f32 1.0, %v9047_v52 }
 0x931   : > { %v9051_v6 = vpop.eup %9050  ;;  %9070 = vrcp.f32 %v5615_v5  ;;  %v5622_v23 = vadd.f32 1.0, %v9049_v4  ;;  %v4630_v5 = vadd.f32 %v11352_v37, %v11250_v53  ;;  %v11760_v4 = vld [vmem:[#allocation23_spill] sm:$0xff] }
 0x932   : > { %v9053_v57 = vpop.eup %9052  ;;  %v7257_v3 = vpack.c.bf16 %v9051_v6, %v11523_v26  ;;  %9072 = vrcp.f32 %v5616_v62  ;;  %v4624_v26 = vadd.f32 %v11335_v16, %v11250_v53  ;;  %v5353_v16 = vmul.f32 1.442695, %v4978_v34 }
 0x933   : > { %v9055_v59 = vpop.eup %9054  ;;  %v7306_v41 = vpack.c.bf16 %v9053_v57, %v9053_v57  ;;  %9074 = vrcp.f32 %v5622_v23  ;;  %v4632_v62 = vadd.f32 %v11760_v4, %v11211_v48  ;;  %v5000_v37 = vsub.f32 0.0, %v4630_v5 }
 0x934   : > { %v9057_v2 = vpop.eup %9056  ;;  %6706 = vst [vmem:[%s10622_s26 + $0x17c] sm:$0xff] %v7257_v3  ;;  %9076 = vpow2.f32 %v5299_v18  ;;  %v4993_v55 = vsub.f32 0.0, %v4624_v26  ;;  %v4638_v34 = vadd.f32 %v11368_v25, %v11211_v48 }
 0x935   : > { %v9059_v14 = vpop.eup %9058  ;;  %6755 = vst.msk [vmem:[%s10622_s26 + $0x2d4] sm:$0xf] %vm6654_vm7, %v7306_v41  ;;  %v7326_v21 = vpack.c.bf16 %v9057_v2, %v9057_v2  ;;  %9078 = vpow2.f32 %v5311_v27  ;;  %v5006_v33 = vsub.f32 0.0, %v4632_v62 }
 0x936   : > { %v9061_v46 = vpop.eup %9060  ;;  %v7261_v43 = vpack.c.bf16 %v9059_v14, %v9055_v59  ;;  %9080 = vpow2.f32 %v5313_v50  ;;  %v5383_v27 = vmul.f32 1.442695, %v4993_v55  ;;  %v4628_v50 = vadd.f32 %v11348_v10, %v11211_v48 }
 0x937   : > { %v9063_v11 = vpop.eup %9062  ;;  %6775 = vst.msk [vmem:[%s10622_s26 + $0x360] sm:$0xf] %vm6654_vm7, %v7326_v21  ;;  %v7318_v28 = vpack.c.bf16 %v9061_v46, %v9061_v46  ;;  %9082 = vpow2.f32 %v5325_v44  ;;  %v5397_v14 = vmul.f32 1.442695, %v5000_v37  ;;  %v4640_v21 = vadd.f32 %v11372_v40, %v11250_v53  ;;  %v11761_v40 = vld [vmem:[#allocation26_spill] sm:$0xff] }
 0x938   : > { %v9065_v8 = vpop.eup %9064  ;;  %6710 = vst [vmem:[%s10622_s26 + $0x198] sm:$0xff] %v7261_v43  ;;  %9084 = vpow2.f32 %v5327_v13  ;;  %v4999_v10 = vsub.f32 0.0, %v4628_v50  ;;  %v5409_v46 = vmul.f32 1.442695, %v5006_v33  ;;  %v4642_v43 = vadd.f32 %v11375_v17, %v11211_v48  ;;  %v11762_v17 = vld [vmem:[#allocation24_spill] sm:$0xff] }
 0x939   : > { %v9067_v7 = vpop.eup %9066  ;;  %6767 = vst.msk [vmem:[%s10622_s26 + $0x328] sm:$0xf] %vm6654_vm7, %v7318_v28  ;;  %v7330_v61 = vpack.c.bf16 %v9065_v8, %v9065_v8  ;;  %9086 = vpow2.f32 %v5339_v19  ;;  %v5013_v63 = vsub.f32 0.0, %v4638_v34  ;;  %v4648_v8 = vadd.f32 %v11761_v40, %v11211_v48 }
 0x93a   : > { %v9069_v49 = vpop.eup %9068  ;;  %v7265_v47 = vpack.c.bf16 %v9067_v7, %v9063_v11  ;;  %9088 = vpow2.f32 %v5341_v0  ;;  %v5395_v13 = vmul.f32 1.442695, %v4999_v10  ;;  %v4644_v11 = vadd.f32 %v11379_v15, %v11250_v53 }
 0x93b   : > { %v9071_v18 = vpop.eup %9070  ;;  %6779 = vst.msk [vmem:[%s10622_s26 + $0x37c] sm:$0xf] %vm6654_vm7, %v7330_v61  ;;  %v7322_v38 = vpack.c.bf16 %v9069_v49, %v9069_v49  ;;  %9090 = vpow2.f32 %v5353_v16  ;;  %v5014_v7 = vsub.f32 0.0, %v4640_v21  ;;  %v4650_v61 = vadd.f32 %v11762_v17, %v11250_v53 }
 0x93c   : > { %v9073_v20 = vpop.eup %9072  ;;  %6714 = vst [vmem:[%s10622_s26 + $0x1b4] sm:$0xff] %v7265_v47  ;;  %9092 = vpow2.f32 %v5355_v29  ;;  %v5020_v15 = vsub.f32 0.0, %v4642_v43  ;;  %v11763_v47 = vld [vmem:[#allocation25_spill] sm:$0xff]  ;;  %v5027_v50 = vsub.f32 0.0, %v4648_v8 }
 0x93d   : > { %v11570_v35 = vpop.eup %9074  ;;  %6771 = vst.msk [vmem:[%s10622_s26 + $0x344] sm:$0xf] %vm6654_vm7, %v7322_v38  ;;  %v7269_v32 = vpack.c.bf16 %v9073_v20, %v9071_v18  ;;  %9094 = vpow2.f32 %v5367_v12  ;;  %v5423_v38 = vmul.f32 1.442695, %v5013_v63  ;;  %v11764_v20 = vld [vmem:[#allocation27_spill] sm:$0xff] }
 0x93e   : > { %v9077_v36 = vpop.eup %9076  ;;  %9096 = vpow2.f32 %v5369_v9  ;;  %v4652_v9 = vadd.f32 %v11763_v47, %v11211_v48  ;;  %v5425_v5 = vmul.f32 1.442695, %v5014_v7  ;;  %v5437_v62 = vmul.f32 1.442695, %v5020_v15  ;;  %v11766_v63 = vld [vmem:[#allocation3_spill] sm:$0xff] }
 0x93f   : > { %v9079_v39 = vpop.eup %9078  ;;  %6718 = vst [vmem:[%s10622_s26 + $0x1d0] sm:$0xff] %v7269_v32  ;;  %v5623_v52 = vadd.f32 1.0, %v9077_v36  ;;  %9098 = vpow2.f32 %v5381_v56  ;;  %v5021_v56 = vsub.f32 0.0, %v4644_v11  ;;  %v4660_v11 = vadd.f32 %v11766_v63, %v11250_v53 }
 0x940   : > { %v9081_v1 = vpop.eup %9080  ;;  %v5629_v58 = vadd.f32 1.0, %v9079_v39  ;;  %9100 = vpow2.f32 %v5383_v27  ;;  %v4654_v27 = vadd.f32 %v11764_v20, %v11250_v53 }
 0x941   : > { %v9083_v44 = vpop.eup %9082  ;;  %9102 = vrcp.f32 %v5623_v52  ;;  %v5630_v51 = vadd.f32 1.0, %v9081_v1  ;;  %v5028_v1 = vsub.f32 0.0, %v4650_v61  ;;  %v5042_v15 = vsub.f32 0.0, %v4660_v11 }
 0x942   : > { %v9085_v6 = vpop.eup %9084  ;;  %9104 = vrcp.f32 %v5629_v58  ;;  %v5636_v23 = vadd.f32 1.0, %v9083_v44  ;;  %v5034_v44 = vsub.f32 0.0, %v4652_v9 }
 0x943   : > { %v9087_v22 = vpop.eup %9086  ;;  %9106 = vrcp.f32 %v5630_v51  ;;  %v5637_v57 = vadd.f32 1.0, %v9085_v6  ;;  %v5439_v6 = vmul.f32 1.442695, %v5021_v56 }
 0x944   : > { %v9089_v3 = vpop.eup %9088  ;;  %9108 = vrcp.f32 %v5636_v23  ;;  %v5643_v45 = vadd.f32 1.0, %v9087_v22  ;;  %v5035_v23 = vsub.f32 0.0, %v4654_v27  ;;  %v5451_v22 = vmul.f32 1.442695, %v5027_v50 }
 0x945   : > { %v9091_v59 = vpop.eup %9090  ;;  %9110 = vrcp.f32 %v5637_v57  ;;  %v5644_v41 = vadd.f32 1.0, %v9089_v3  ;;  %v5453_v3 = vmul.f32 1.442695, %v5028_v1 }
 0x946   : > { %v9093_v30 = vpop.eup %9092  ;;  %9112 = vrcp.f32 %v5643_v45  ;;  %v5650_v2 = vadd.f32 1.0, %v9091_v59  ;;  %v5465_v59 = vmul.f32 1.442695, %v5034_v44  ;;  %v5467_v34 = vmul.f32 1.442695, %v5035_v23 }
 0x947   : > { %v9095_v42 = vpop.eup %9094  ;;  %9114 = vrcp.f32 %v5644_v41  ;;  %v5651_v26 = vadd.f32 1.0, %v9093_v30 }
 0x948   : > { %v9097_v19 = vpop.eup %9096  ;;  %9116 = vrcp.f32 %v5650_v2  ;;  %v5657_v31 = vadd.f32 1.0, %v9095_v42 }
 0x949   : > { %v9099_v25 = vpop.eup %9098  ;;  %9118 = vrcp.f32 %v5651_v26  ;;  %v5658_v0 = vadd.f32 1.0, %v9097_v19 }
 0x94a   : > { %v9101_v28 = vpop.eup %9100  ;;  %9120 = vrcp.f32 %v5657_v31  ;;  %v5664_v16 = vadd.f32 1.0, %v9099_v25 }
 0x94b   : > { %v9103_v29 = vpop.eup %9102  ;;  %9122 = vrcp.f32 %v5658_v0  ;;  %v5665_v55 = vadd.f32 1.0, %v9101_v28 }
 0x94c   : > { %v9105_v12 = vpop.eup %9104  ;;  %v7273_v49 = vpack.c.bf16 %v9103_v29, %v11570_v35  ;;  %9124 = vrcp.f32 %v5664_v16  ;;  %v11765_v35 = vld [vmem:[#allocation28_spill] sm:$0xff] }
 0x94d   : > { %v9107_v18 = vpop.eup %9106  ;;  %9126 = vrcp.f32 %v5665_v55  ;;  %v4658_v39 = vadd.f32 %v11765_v35, %v11211_v48  ;;  %v11768_v55 = vld [vmem:[#allocation5_spill] sm:$0xff] }
 0x94e   : > { %v9109_v32 = vpop.eup %9108  ;;  %6722 = vst [vmem:[%s10622_s26 + $0x1ec] sm:$0xff] %v7273_v49  ;;  %v7277_v36 = vpack.c.bf16 %v9107_v18, %v9105_v12  ;;  %9128 = vpow2.f32 %v5395_v13  ;;  %v4664_v7 = vadd.f32 %v11768_v55, %v11250_v53 }
 0x94f   : > { %v9111_v52 = vpop.eup %9110  ;;  %9130 = vpow2.f32 %v5397_v14  ;;  %v5041_v57 = vsub.f32 0.0, %v4658_v39 }
 0x950   : > { %v9113_v58 = vpop.eup %9112  ;;  %6726 = vst [vmem:[%s10622_s26 + $0x208] sm:$0xff] %v7277_v36  ;;  %v7281_v4 = vpack.c.bf16 %v9111_v52, %v9109_v32  ;;  %9132 = vpow2.f32 %v5409_v46  ;;  %v5049_v56 = vsub.f32 0.0, %v4664_v7  ;;  %v5481_v36 = vmul.f32 1.442695, %v5042_v15 }
 0x951   : > { %v9115_v51 = vpop.eup %9114  ;;  %9134 = vpow2.f32 %v5411_v60  ;;  %v5479_v13 = vmul.f32 1.442695, %v5041_v57  ;;  %v11767_v60 = vld [vmem:[#allocation4_spill] sm:$0xff] }
 0x952   : > { %v9117_v10 = vpop.eup %9116  ;;  %6730 = vst [vmem:[%s10622_s26 + $0x224] sm:$0xff] %v7281_v4  ;;  %v7285_v54 = vpack.c.bf16 %v9115_v51, %v9113_v58  ;;  %9136 = vpow2.f32 %v5423_v38  ;;  %v4662_v40 = vadd.f32 %v11767_v60, %v11211_v48  ;;  %v5495_v52 = vmul.f32 1.442695, %v5049_v56 }
 0x953   : > { %v9119_v37 = vpop.eup %9118  ;;  %9138 = vpow2.f32 %v5425_v5 }
 0x954   : > { %v9121_v45 = vpop.eup %9120  ;;  %6734 = vst [vmem:[%s10622_s26 + $0x240] sm:$0xff] %v7285_v54  ;;  %v7289_v33 = vpack.c.bf16 %v9119_v37, %v9117_v10  ;;  %9140 = vpow2.f32 %v5437_v62  ;;  %v5048_v18 = vsub.f32 0.0, %v4662_v40 }
 0x955   : > { %v9123_v41 = vpop.eup %9122  ;;  %9142 = vpow2.f32 %v5439_v6 }
 0x956   : > { %v9125_v30 = vpop.eup %9124  ;;  %6738 = vst [vmem:[%s10622_s26 + $0x25c] sm:$0xff] %v7289_v33  ;;  %v7293_v2 = vpack.c.bf16 %v9123_v41, %v9121_v45  ;;  %9144 = vpow2.f32 %v5451_v22  ;;  %v5493_v35 = vmul.f32 1.442695, %v5048_v18 }
 0x957   : > { %v9127_v24 = vpop.eup %9126  ;;  %9146 = vpow2.f32 %v5453_v3 }
 0x958   : > { %v9129_v42 = vpop.eup %9128  ;;  %6742 = vst [vmem:[%s10622_s26 + $0x278] sm:$0xff] %v7293_v2  ;;  %v7297_v26 = vpack.c.bf16 %v9127_v24, %v9125_v30  ;;  %9148 = vpow2.f32 %v5465_v59 }
 0x959   : > { %v9131_v14 = vpop.eup %9130  ;;  %v5671_v21 = vadd.f32 1.0, %v9129_v42  ;;  %9150 = vpow2.f32 %v5467_v34 }
 0x95a   : > { %v9133_v19 = vpop.eup %9132  ;;  %6746 = vst [vmem:[%s10622_s26 + $0x294] sm:$0xff] %v7297_v26  ;;  %v5672_v31 = vadd.f32 1.0, %v9131_v14  ;;  %9152 = vpow2.f32 %v5479_v13 }
 0x95b   : > { %v9135_v46 = vpop.eup %9134  ;;  %9154 = vrcp.f32 %v5671_v21  ;;  %v5678_v43 = vadd.f32 1.0, %v9133_v19 }
 0x95c   : > { %v9137_v25 = vpop.eup %9136  ;;  %9156 = vrcp.f32 %v5672_v31  ;;  %v5679_v0 = vadd.f32 1.0, %v9135_v46 }
 0x95d   : > { %v9139_v28 = vpop.eup %9138  ;;  %9158 = vrcp.f32 %v5678_v43  ;;  %v5685_v16 = vadd.f32 1.0, %v9137_v25 }
 0x95e   : > { %v9141_v8 = vpop.eup %9140  ;;  %9160 = vrcp.f32 %v5679_v0  ;;  %v5686_v29 = vadd.f32 1.0, %v9139_v28 }
 0x95f   : > { %v9143_v17 = vpop.eup %9142  ;;  %9162 = vrcp.f32 %v5685_v16  ;;  %v5692_v61 = vadd.f32 1.0, %v9141_v8 }
 0x960   : > { %v9145_v12 = vpop.eup %9144  ;;  %9164 = vrcp.f32 %v5686_v29  ;;  %v5693_v49 = vadd.f32 1.0, %v9143_v17 }
 0x961   : > { %v9147_v47 = vpop.eup %9146  ;;  %9166 = vrcp.f32 %v5692_v61  ;;  %v5699_v9 = vadd.f32 1.0, %v9145_v12 }
 0x962   : > { %v9149_v38 = vpop.eup %9148  ;;  %9168 = vrcp.f32 %v5693_v49  ;;  %v5700_v48 = vadd.f32 1.0, %v9147_v47 }
 0x963   : > { %v9151_v20 = vpop.eup %9150  ;;  %9170 = vrcp.f32 %v5699_v9  ;;  %v5706_v27 = vadd.f32 1.0, %v9149_v38 }
 0x964   : > { %v9153_v53 = vpop.eup %9152  ;;  %9172 = vrcp.f32 %v5700_v48  ;;  %v5707_v32 = vadd.f32 1.0, %v9151_v20 }
 0x965   : > { %v9155_v50 = vpop.eup %9154  ;;  %9174 = vrcp.f32 %v5706_v27  ;;  %v5713_v3 = vadd.f32 1.0, %v9153_v53 }
 0x966   : > { %v9157_v39 = vpop.eup %9156  ;;  %9176 = vrcp.f32 %v5707_v32 }
 0x967   : > { %v9159_v5 = vpop.eup %9158  ;;  %v7301_v1 = vpack.c.bf16 %v9157_v39, %v9155_v50  ;;  %9178 = vpow2.f32 %v5481_v36 }
 0x968   : > { %v9161_v58 = vpop.eup %9160  ;;  %9180 = vpow2.f32 %v5493_v35 }
 0x969   : > { %v9163_v4 = vpop.eup %9162  ;;  %6750 = vst [vmem:[%s10622_s26 + $0x2b0] sm:$0xff] %v7301_v1  ;;  %v7305_v62 = vpack.c.bf16 %v9161_v58, %v9159_v5  ;;  %9182 = vpow2.f32 %v5495_v52 }
 0x96a   : > { %v9165_v44 = vpop.eup %9164  ;;  %9184 = vrcp.f32 %v5713_v3 }
 0x96b   : > { %v9167_v51 = vpop.eup %9166  ;;  %6754 = vst [vmem:[%s10622_s26 + $0x2cc] sm:$0xff] %v7305_v62  ;;  %v7309_v6 = vpack.c.bf16 %v9165_v44, %v9163_v4 }
 0x96c   : > { %v9169_v23 = vpop.eup %9168 }
 0x96d   : > { %v9171_v10 = vpop.eup %9170  ;;  %6758 = vst [vmem:[%s10622_s26 + $0x2e8] sm:$0xff] %v7309_v6  ;;  %v7313_v54 = vpack.c.bf16 %v9169_v23, %v9167_v51 }
 0x96e   : > { %v9173_v22 = vpop.eup %9172 }
 0x96f   : > { %v9175_v57 = vpop.eup %9174  ;;  %6762 = vst [vmem:[%s10622_s26 + $0x304] sm:$0xff] %v7313_v54  ;;  %v7317_v37 = vpack.c.bf16 %v9173_v22, %v9171_v10 }
 0x970   : > { %v9177_v45 = vpop.eup %9176 }
 0x971   : > { %6766 = vst [vmem:[%s10622_s26 + $0x320] sm:$0xff] %v7317_v37  ;;  %v7321_v33 = vpack.c.bf16 %v9177_v45, %v9175_v57  ;;  %v9179_v59 = vpop.eup %9178 }
 0x972   : > { %v9181_v41 = vpop.eup %9180  ;;  %v5714_v34 = vadd.f32 1.0, %v9179_v59 }
 0x973   : > { %6770 = vst [vmem:[%s10622_s26 + $0x33c] sm:$0xff] %v7321_v33  ;;  %v9183_v30 = vpop.eup %9182  ;;  %v5720_v2 = vadd.f32 1.0, %v9181_v41 }
 0x974   : > { %9186 = vrcp.f32 %v5714_v34  ;;  %v5721_v13 = vadd.f32 1.0, %v9183_v30  ;;  %v9185_v24 = vpop.eup %9184 }
 0x975   : > { %9188 = vrcp.f32 %v5720_v2 }
 0x976   : > { %9190 = vrcp.f32 %v5721_v13 }
 0x97e   : > { %v9187_v42 = vpop.eup %9186 }
 0x97f   : > { %v9189_v26 = vpop.eup %9188  ;;  %v7325_v14 = vpack.c.bf16 %v9187_v42, %v9185_v24 }
 0x980   : > { %v9191_v21 = vpop.eup %9190 }
 0x981   : > { %6774 = vst [vmem:[%s10622_s26 + $0x358] sm:$0xff] %v7325_v14  ;;  %v7329_v19 = vpack.c.bf16 %v9191_v21, %v9189_v26 }
 0x983   : > { %6778 = vst [vmem:[%s10622_s26 + $0x374] sm:$0xff] %v7329_v19 }
 0x984 PF: > { %s27_s24 = sadd.s32 1, %s9199_s24  }
 0x985   : > { %p24_p4 = scmp.ge.s32.totalorder %s27_s24, 6  }
 0x987   :  { %26 = sbr.rel (!%p24_p4) target bundleno = 3 (0x3), region = 118 }

</bundles_post_ra>
